<compile_context>
chip_gen: v5e
topology: v5e:2x2
jax: 0.10.0
libtpu: 0.0.40
codegen_flags: <defaults>
</compile_context>

<pallas_src>
import functools

import jax
import jax.numpy as jnp
from jax.experimental import pallas as pl
from jax.experimental.pallas import tpu as pltpu

# Keep the XLA reference at full matmul precision so the check stays tight.
jax.config.update("jax_default_matmul_precision", "highest")


# -----------------------------------------------------------------------------
# Fused ESA kernel: one image per grid step, everything resident in VMEM.
# Layout: "s2d phase-major" -- token q = i*Wq + j, channel (2a+b)*C + c holds
# x[c, 2i+a, 2j+b].
# -----------------------------------------------------------------------------
def _esa_kernel(xsd_ref, w1_ref, b1_ref, w2_ref, b2_ref, w3_ref, b3_ref,
                w4_ref, b4_ref, wup_ref, bup_ref, w5_ref, b5_ref,
                out_ref, o1ph_scr, o2ph_scr, o3p_scr, im_scr,
                *, Hq, Wq, C, Cm):
    Q = Hq * Wq
    f32 = jnp.float32
    dot = functools.partial(jnp.dot, preferred_element_type=f32,
                            precision=jax.lax.Precision.HIGHEST)
    KK = [(ky, kx) for ky in range(3) for kx in range(3)]

    xsd = xsd_ref[0].astype(f32)                         # (Q, 4*C) phase-major

    # ---- conv_1 (1x1) on all four spatial phases at once (block-diag W1) ----
    o1sd = dot(xsd, w1_ref[...]) + b1_ref[...]           # (Q, 4*Cm)

    # Scatter o1 into a zero-padded per-phase scratch: the zero border IS
    # conv_2's padding, and stride-2 access below becomes static slices.
    o1ph_scr[...] = jnp.zeros(o1ph_scr.shape, f32)
    for a in range(2):
        for b in range(2):
            p = 2 * a + b
            o1ph_scr[p, 1:Hq + 1, 1:Wq + 1, :] = (
                o1sd[:, p * Cm:(p + 1) * Cm].reshape(Hq, Wq, Cm))

    def tap(scr, a, b, ky, kx):
        # Tap (ky,kx) of a pad-1 3x3 conv evaluated at positions (2i+a, 2j+b),
        # read from a zero-padded phase scratch.  Fully static slice.
        ua, ub = a + ky - 1, b + kx - 1
        return scr[2 * (ua % 2) + (ub % 2),
                   1 + ua // 2:1 + ua // 2 + Hq,
                   1 + ub // 2:1 + ub // 2 + Wq, :]

    # ---- conv_2 (3x3, s1, p1): all 4 output phases, im2col K = 9*Cm ---------
    for a in range(2):
        for b in range(2):
            p = 2 * a + b
            for t, (ky, kx) in enumerate(KK):
                im_scr[p * Q:(p + 1) * Q, t * Cm:(t + 1) * Cm] = (
                    tap(o1ph_scr, a, b, ky, kx).reshape(Q, Cm))
    o2all = dot(im_scr[0:4 * Q, 0:9 * Cm], w2_ref[...]) + b2_ref[...]  # (4Q,Cm)

    # Scatter o2 phases into a zero-padded per-phase scratch for conv_3.
    o2ph_scr[...] = jnp.zeros(o2ph_scr.shape, f32)
    for p in range(4):
        o2ph_scr[p, 1:Hq + 1, 1:Wq + 1, :] = (
            o2all[p * Q:(p + 1) * Q, :].reshape(Hq, Wq, Cm))

    # ---- conv_3 (3x3, s2, p1): half-res output, im2col K = 9*Cm -------------
    for t, (ky, kx) in enumerate(KK):
        im_scr[0:Q, t * Cm:(t + 1) * Cm] = (
            tap(o2ph_scr, 0, 0, ky, kx).reshape(Q, Cm))
    o3 = dot(im_scr[0:Q, 0:9 * Cm], w3_ref[...]) + b3_ref[...]         # (Q, C)

    # Zero-padded scratch -> conv_4's padding (border zero by construction).
    o3p_scr[...] = jnp.zeros(o3p_scr.shape, f32)
    o3p_scr[1:Hq + 1, 1:Wq + 1, :] = o3.reshape(Hq, Wq, C)

    # ---- conv_4 (3x3, s1, p1) at half res, im2col K = 9*C -------------------
    for t, (ky, kx) in enumerate(KK):
        im_scr[0:Q, t * C:(t + 1) * C] = (
            o3p_scr[ky:ky + Hq, kx:kx + Wq, :].reshape(Q, C))
    o4 = dot(im_scr[0:Q, 0:9 * C], w4_ref[...]) + b4_ref[...]          # (Q, C)

    # ---- deconv 2x2 s2 (one dense dot into phase-major channels) + o1 -------
    o5 = dot(o4, wup_ref[...]) + bup_ref[...] + o1sd                   # (Q,4Cm)

    # ---- conv_5 (1x1 per phase via block-diag) + sigmoid + input residual ---
    o6 = dot(o5, w5_ref[...]) + b5_ref[...]                            # (Q,4C)
    sig = pl.reciprocal(1.0 + jnp.exp(-o6), approx=True)               # EUP
    out_ref[0] = (sig + xsd).astype(out_ref.dtype)


# -----------------------------------------------------------------------------
# Wrapper: one s2d relayout in, one back out; everything else inside the kernel.
# -----------------------------------------------------------------------------
def esa_forward(x, params):
    """Pallas ESA forward. x: (N, C, H, W) (NCHW, like the torch module)."""
    N, C, H, W = x.shape
    Cm = C // 2
    Hq, Wq = H // 2, W // 2
    Q = Hq * Wq
    dt = x.dtype

    # Input: NCHW -> space-to-depth, phase-major channels (single XLA copy).
    # xsd[n, i*Wq+j, (2a+b)*C + c] = x[n, c, 2i+a, 2j+b]
    xsd = x.reshape(N, C, Hq, 2, Wq, 2)
    xsd = jnp.transpose(xsd, (0, 2, 4, 3, 5, 1)).reshape(N, Q, 4 * C)

    # Repack torch-layout weights into matmul layout (tiny, traced once).
    eye4 = jnp.eye(4, dtype=jnp.float32)
    w1m = params["w1"].reshape(Cm, C).T                       # (C, Cm)
    w1bd = jnp.kron(eye4, w1m)                                # (4C, 4Cm)
    b1bd = jnp.tile(params["b1"], 4).reshape(1, 4 * Cm)
    w2k = jnp.transpose(params["w2"], (2, 3, 1, 0)).reshape(9 * Cm, Cm)
    b2k = params["b2"].reshape(1, Cm)
    w3k = jnp.transpose(params["w3"], (2, 3, 1, 0)).reshape(9 * Cm, C)
    b3k = params["b3"].reshape(1, C)
    w4k = jnp.transpose(params["w4"], (2, 3, 1, 0)).reshape(9 * C, C)
    b4k = params["b4"].reshape(1, C)
    # ConvTranspose2d weight (Cin, Cout, 2, 2) -> (Cin, 4*Cout), phase p=2a+b.
    wupk = jnp.transpose(params["wup"], (0, 2, 3, 1)).reshape(C, 4 * Cm)
    bupk = jnp.tile(params["bup"], 4).reshape(1, 4 * Cm)
    # conv_5 (1x1) as block-diagonal so it acts independently per phase.
    w5m = params["w5"].reshape(C, Cm).T                       # (Cm, C)
    w5bd = jnp.kron(eye4, w5m)                                # (4Cm, 4C)
    b5k = jnp.tile(params["b5"], 4).reshape(1, 4 * C)

    flops = 2 * N * Q * (4 * C * 4 * Cm + 4 * 9 * Cm * Cm + 9 * Cm * C
                         + 9 * C * C + C * 4 * Cm + 4 * Cm * 4 * C)
    bytes_acc = 4 * (xsd.size + N * Q * 4 * C + w1bd.size + w2k.size
                     + w3k.size + w4k.size + wupk.size + w5bd.size)

    rep = lambda n: (0, 0)   # weights: same block every grid step

    out = pl.pallas_call(
        functools.partial(_esa_kernel, Hq=Hq, Wq=Wq, C=C, Cm=Cm),
        grid=(N,),
        in_specs=[
            pl.BlockSpec((1, Q, 4 * C), lambda n: (n, 0, 0)),   # xsd
            pl.BlockSpec((4 * C, 4 * Cm), rep),                 # w1 (block-diag)
            pl.BlockSpec((1, 4 * Cm), rep),                     # b1
            pl.BlockSpec((9 * Cm, Cm), rep),                    # w2 (im2col)
            pl.BlockSpec((1, Cm), rep),                         # b2
            pl.BlockSpec((9 * Cm, C), rep),                     # w3 (im2col)
            pl.BlockSpec((1, C), rep),                          # b3
            pl.BlockSpec((9 * C, C), rep),                      # w4 (im2col)
            pl.BlockSpec((1, C), rep),                          # b4
            pl.BlockSpec((C, 4 * Cm), rep),                     # deconv
            pl.BlockSpec((1, 4 * Cm), rep),                     # deconv bias
            pl.BlockSpec((4 * Cm, 4 * C), rep),                 # w5 (block-diag)
            pl.BlockSpec((1, 4 * C), rep),                      # b5
        ],
        out_specs=pl.BlockSpec((1, Q, 4 * C), lambda n: (n, 0, 0)),
        out_shape=jax.ShapeDtypeStruct((N, Q, 4 * C), dt),
        scratch_shapes=[
            pltpu.VMEM((4, Hq + 2, Wq + 2, Cm), jnp.float32),   # padded o1 phases
            pltpu.VMEM((4, Hq + 2, Wq + 2, Cm), jnp.float32),   # padded o2 phases
            pltpu.VMEM((Hq + 2, Wq + 2, C), jnp.float32),       # padded o3
            pltpu.VMEM((4 * Q, 9 * C), jnp.float32),            # im2col buffer
        ],
        compiler_params=pltpu.CompilerParams(
            dimension_semantics=("parallel",)),   # N>=2 keeps both v7x TCs busy
        cost_estimate=pl.CostEstimate(flops=flops,
                                      transcendentals=2 * N * Q * 4 * C,
                                      bytes_accessed=bytes_acc),
    )(xsd, w1bd, b1bd, w2k, b2k, w3k, b3k, w4k, b4k, wupk, bupk, w5bd, b5k)

    # Output: s2d phase-major -> NCHW (single XLA copy; the reshape is free).
    out = out.reshape(N, Hq, Wq, 2, 2, C)
    out = jnp.transpose(out, (0, 5, 1, 3, 2, 4)).reshape(N, C, H, W)
    return out


# ------------------------- pure-JAX reference (torch semantics) --------------
def _conv2d_ref(x, w, b, stride, pad):
    out = jax.lax.conv_general_dilated(
        x, w, window_strides=(stride, stride),
        padding=((pad, pad), (pad, pad)),
        dimension_numbers=("NCHW", "OIHW", "NCHW"),
        precision=jax.lax.Precision.HIGHEST)
    return out + b[None, :, None, None]


def _deconv2x2_ref(x, w, b):
    n, _, hq, wq = x.shape
    co = w.shape[1]
    up = jnp.einsum("nihw,iokl->nohkwl", x, w,
                    precision=jax.lax.Precision.HIGHEST)
    return up.reshape(n, co, 2 * hq, 2 * wq) + b[None, :, None, None]


def esa_reference(x, p):
    o1 = _conv2d_ref(x, p["w1"], p["b1"], 1, 0)
    o2 = _conv2d_ref(o1, p["w2"], p["b2"], 1, 1)
    o3 = _conv2d_ref(o2, p["w3"], p["b3"], 2, 1)
    o4 = _conv2d_ref(o3, p["w4"], p["b4"], 1, 1)
    o5 = _deconv2x2_ref(o4, p["wup"], p["bup"]) + o1
    o6 = jax.nn.sigmoid(_conv2d_ref(o5, p["w5"], p["b5"], 1, 0))
    return o6 + x


if __name__ == "__main__":
    N, C, H, W = 2, 32, 16, 16        # size = 32 channels, 16x16 feature map
    Cm = C // 2

    key = jax.random.PRNGKey(0)
    ks = jax.random.split(key, 13)

    def rnd(k, shape, scale):
        return jax.random.normal(k, shape, dtype=jnp.float32) * scale

    params = {
        "w1": rnd(ks[0], (Cm, C, 1, 1), C ** -0.5),
        "b1": rnd(ks[1], (Cm,), 0.1),
        "w2": rnd(ks[2], (Cm, Cm, 3, 3), (9 * Cm) ** -0.5),
        "b2": rnd(ks[3], (Cm,), 0.1),
        "w3": rnd(ks[4], (C, Cm, 3, 3), (9 * Cm) ** -0.5),
        "b3": rnd(ks[5], (C,), 0.1),
        "w4": rnd(ks[6], (C, C, 3, 3), (9 * C) ** -0.5),
        "b4": rnd(ks[7], (C,), 0.1),
        "wup": rnd(ks[8], (C, Cm, 2, 2), C ** -0.5),   # ConvTranspose2d (in,out,kh,kw)
        "bup": rnd(ks[9], (Cm,), 0.1),
        "w5": rnd(ks[10], (C, Cm, 1, 1), Cm ** -0.5),
        "b5": rnd(ks[11], (C,), 0.1),
    }
    x = jax.random.normal(ks[12], (N, C, H, W), dtype=jnp.float32)

    out = jax.jit(esa_forward)(x, params)
    out = jax.block_until_ready(out)

    ref = esa_reference(x, params)
    assert out.shape == (N, C, H, W)
    max_err = float(jnp.max(jnp.abs(out - ref)))
    assert max_err < 5e-3, max_err

    print("KERNEL_OK")
</pallas_src>

<mosaic_0001>
module attributes {stable_mosaic.version = 11 : i64} {
  func.func @_esa_kernel(%arg0: i32, %arg1: memref<1x64x128xf32, #tpu.memory_space<vmem>>, %arg2: memref<128x64xf32, #tpu.memory_space<vmem>>, %arg3: memref<1x64xf32, #tpu.memory_space<vmem>>, %arg4: memref<144x16xf32, #tpu.memory_space<vmem>>, %arg5: memref<1x16xf32, #tpu.memory_space<vmem>>, %arg6: memref<144x32xf32, #tpu.memory_space<vmem>>, %arg7: memref<1x32xf32, #tpu.memory_space<vmem>>, %arg8: memref<288x32xf32, #tpu.memory_space<vmem>>, %arg9: memref<1x32xf32, #tpu.memory_space<vmem>>, %arg10: memref<32x64xf32, #tpu.memory_space<vmem>>, %arg11: memref<1x64xf32, #tpu.memory_space<vmem>>, %arg12: memref<64x128xf32, #tpu.memory_space<vmem>>, %arg13: memref<1x128xf32, #tpu.memory_space<vmem>>, %arg14: memref<1x64x128xf32, #tpu.memory_space<vmem>>, %arg15: memref<4x10x10x16xf32, #tpu.memory_space<vmem>>, %arg16: memref<4x10x10x16xf32, #tpu.memory_space<vmem>>, %arg17: memref<10x10x32xf32, #tpu.memory_space<vmem>>, %arg18: memref<256x288xf32, #tpu.memory_space<vmem>>) attributes {dimension_semantics = [#tpu.dimension_semantics<parallel>], iteration_bounds = array<i64: 2>, scalar_prefetch = 0 : i64, scratch_operands = 4 : i64, tpu.core_type = #tpu.core_type<tc>, window_params = [{transform_indices = @transform_0, window_bounds = array<i64: 1, 64, 128>}, {pipeline_mode = #tpu.pipeline_mode<synchronous>, transform_indices = @transform_1, window_bounds = array<i64: 128, 64>}, {pipeline_mode = #tpu.pipeline_mode<synchronous>, transform_indices = @transform_2, window_bounds = array<i64: 1, 64>}, {pipeline_mode = #tpu.pipeline_mode<synchronous>, transform_indices = @transform_3, window_bounds = array<i64: 144, 16>}, {pipeline_mode = #tpu.pipeline_mode<synchronous>, transform_indices = @transform_4, window_bounds = array<i64: 1, 16>}, {pipeline_mode = #tpu.pipeline_mode<synchronous>, transform_indices = @transform_5, window_bounds = array<i64: 144, 32>}, {pipeline_mode = #tpu.pipeline_mode<synchronous>, transform_indices = @transform_6, window_bounds = array<i64: 1, 32>}, {pipeline_mode = #tpu.pipeline_mode<synchronous>, transform_indices = @transform_7, window_bounds = array<i64: 288, 32>}, {pipeline_mode = #tpu.pipeline_mode<synchronous>, transform_indices = @transform_8, window_bounds = array<i64: 1, 32>}, {pipeline_mode = #tpu.pipeline_mode<synchronous>, transform_indices = @transform_9, window_bounds = array<i64: 32, 64>}, {pipeline_mode = #tpu.pipeline_mode<synchronous>, transform_indices = @transform_10, window_bounds = array<i64: 1, 64>}, {pipeline_mode = #tpu.pipeline_mode<synchronous>, transform_indices = @transform_11, window_bounds = array<i64: 64, 128>}, {pipeline_mode = #tpu.pipeline_mode<synchronous>, transform_indices = @transform_12, window_bounds = array<i64: 1, 128>}, {transform_indices = @transform_13, window_bounds = array<i64: 1, 64, 128>}]} {
    %c0 = arith.constant 0 : index
    %c0_0 = arith.constant 0 : index
    %c0_1 = arith.constant 0 : index
    %0 = vector.load %arg1[%c0, %c0_0, %c0_1] : memref<1x64x128xf32, #tpu.memory_space<vmem>>, vector<1x64x128xf32>
    %1 = vector.shape_cast %0 : vector<1x64x128xf32> to vector<64x128xf32>
    %c0_2 = arith.constant 0 : index
    %c0_3 = arith.constant 0 : index
    %2 = vector.load %arg2[%c0_2, %c0_3] : memref<128x64xf32, #tpu.memory_space<vmem>>, vector<128x64xf32>
    %cst = arith.constant dense<0.000000e+00> : vector<64x64xf32>
    %3 = tpu.matmul %1, %2, %cst {dimension_numbers = #tpu.dot_dimension_numbers<[1], [0], [0], [1], [0, 0, 1, 1], [], []>, precision = #tpu.contract_precision<fp32>} : vector<64x128xf32>, vector<128x64xf32>, vector<64x64xf32> -> vector<64x64xf32>
    %c0_4 = arith.constant 0 : index
    %c0_5 = arith.constant 0 : index
    %4 = vector.load %arg3[%c0_4, %c0_5] : memref<1x64xf32, #tpu.memory_space<vmem>>, vector<1x64xf32>
    %5 = vector.broadcast %4 : vector<1x64xf32> to vector<64x64xf32>
    %6 = arith.addf %3, %5 : vector<64x64xf32>
    %cst_6 = arith.constant 0.000000e+00 : f32
    %7 = vector.broadcast %cst_6 : f32 to vector<4x10x10x16xf32>
    %c0_7 = arith.constant 0 : index
    %c0_8 = arith.constant 0 : index
    %c0_9 = arith.constant 0 : index
    %c0_10 = arith.constant 0 : index
    %8 = vector.load %arg15[%c0_7, %c0_8, %c0_9, %c0_10] : memref<4x10x10x16xf32, #tpu.memory_space<vmem>>, vector<4x10x10x16xf32>
    tpu.vector_store %arg15[%c0_7, %c0_8, %c0_9, %c0_10], %7 {strides = array<i32>} : memref<4x10x10x16xf32, #tpu.memory_space<vmem>>, vector<4x10x10x16xf32>,
    %9 = vector.extract_strided_slice %6 {offsets = [0, 0], sizes = [64, 16], strides = [1, 1]} : vector<64x64xf32> to vector<64x16xf32>
    %10 = vector.shape_cast %9 : vector<64x16xf32> to vector<8x8x16xf32>
    %c0_11 = arith.constant 0 : index
    %c1 = arith.constant 1 : index
    %c1_12 = arith.constant 1 : index
    %c0_13 = arith.constant 0 : index
    %11 = vector.load %arg15[%c0_11, %c1, %c1_12, %c0_13] : memref<4x10x10x16xf32, #tpu.memory_space<vmem>>, vector<1x8x8x16xf32>
    %12 = vector.shape_cast %11 : vector<1x8x8x16xf32> to vector<8x8x16xf32>
    %13 = vector.shape_cast %10 : vector<8x8x16xf32> to vector<1x8x8x16xf32>
    tpu.vector_store %arg15[%c0_11, %c1, %c1_12, %c0_13], %13 {strides = array<i32>} : memref<4x10x10x16xf32, #tpu.memory_space<vmem>>, vector<1x8x8x16xf32>,
    %14 = vector.extract_strided_slice %6 {offsets = [0, 16], sizes = [64, 16], strides = [1, 1]} : vector<64x64xf32> to vector<64x16xf32>
    %15 = vector.shape_cast %14 : vector<64x16xf32> to vector<8x8x16xf32>
    %c1_14 = arith.constant 1 : index
    %c1_15 = arith.constant 1 : index
    %c1_16 = arith.constant 1 : index
    %c0_17 = arith.constant 0 : index
    %16 = vector.load %arg15[%c1_14, %c1_15, %c1_16, %c0_17] : memref<4x10x10x16xf32, #tpu.memory_space<vmem>>, vector<1x8x8x16xf32>
    %17 = vector.shape_cast %16 : vector<1x8x8x16xf32> to vector<8x8x16xf32>
    %18 = vector.shape_cast %15 : vector<8x8x16xf32> to vector<1x8x8x16xf32>
    tpu.vector_store %arg15[%c1_14, %c1_15, %c1_16, %c0_17], %18 {strides = array<i32>} : memref<4x10x10x16xf32, #tpu.memory_space<vmem>>, vector<1x8x8x16xf32>,
    %19 = vector.extract_strided_slice %6 {offsets = [0, 32], sizes = [64, 16], strides = [1, 1]} : vector<64x64xf32> to vector<64x16xf32>
    %20 = vector.shape_cast %19 : vector<64x16xf32> to vector<8x8x16xf32>
    %c2 = arith.constant 2 : index
    %c1_18 = arith.constant 1 : index
    %c1_19 = arith.constant 1 : index
    %c0_20 = arith.constant 0 : index
    %21 = vector.load %arg15[%c2, %c1_18, %c1_19, %c0_20] : memref<4x10x10x16xf32, #tpu.memory_space<vmem>>, vector<1x8x8x16xf32>
    %22 = vector.shape_cast %21 : vector<1x8x8x16xf32> to vector<8x8x16xf32>
    %23 = vector.shape_cast %20 : vector<8x8x16xf32> to vector<1x8x8x16xf32>
    tpu.vector_store %arg15[%c2, %c1_18, %c1_19, %c0_20], %23 {strides = array<i32>} : memref<4x10x10x16xf32, #tpu.memory_space<vmem>>, vector<1x8x8x16xf32>,
    %24 = vector.extract_strided_slice %6 {offsets = [0, 48], sizes = [64, 16], strides = [1, 1]} : vector<64x64xf32> to vector<64x16xf32>
    %25 = vector.shape_cast %24 : vector<64x16xf32> to vector<8x8x16xf32>
    %c3 = arith.constant 3 : index
    %c1_21 = arith.constant 1 : index
    %c1_22 = arith.constant 1 : index
    %c0_23 = arith.constant 0 : index
    %26 = vector.load %arg15[%c3, %c1_21, %c1_22, %c0_23] : memref<4x10x10x16xf32, #tpu.memory_space<vmem>>, vector<1x8x8x16xf32>
    %27 = vector.shape_cast %26 : vector<1x8x8x16xf32> to vector<8x8x16xf32>
    %28 = vector.shape_cast %25 : vector<8x8x16xf32> to vector<1x8x8x16xf32>
    tpu.vector_store %arg15[%c3, %c1_21, %c1_22, %c0_23], %28 {strides = array<i32>} : memref<4x10x10x16xf32, #tpu.memory_space<vmem>>, vector<1x8x8x16xf32>,
    %c3_24 = arith.constant 3 : index
    %c0_25 = arith.constant 0 : index
    %c0_26 = arith.constant 0 : index
    %c0_27 = arith.constant 0 : index
    %29 = vector.load %arg15[%c3_24, %c0_25, %c0_26, %c0_27] : memref<4x10x10x16xf32, #tpu.memory_space<vmem>>, vector<1x8x8x16xf32>
    %30 = vector.shape_cast %29 : vector<1x8x8x16xf32> to vector<8x8x16xf32>
    %31 = vector.shape_cast %30 : vector<8x8x16xf32> to vector<64x16xf32>
    %c0_28 = arith.constant 0 : index
    %c0_29 = arith.constant 0 : index
    %32 = vector.load %arg18[%c0_28, %c0_29] : memref<256x288xf32, #tpu.memory_space<vmem>>, vector<64x16xf32>
    tpu.vector_store %arg18[%c0_28, %c0_29], %31 {strides = array<i32>} : memref<256x288xf32, #tpu.memory_space<vmem>>, vector<64x16xf32>,
    %c2_30 = arith.constant 2 : index
    %c0_31 = arith.constant 0 : index
    %c1_32 = arith.constant 1 : index
    %c0_33 = arith.constant 0 : index
    %33 = vector.load %arg15[%c2_30, %c0_31, %c1_32, %c0_33] : memref<4x10x10x16xf32, #tpu.memory_space<vmem>>, vector<1x8x8x16xf32>
    %34 = vector.shape_cast %33 : vector<1x8x8x16xf32> to vector<8x8x16xf32>
    %35 = vector.shape_cast %34 : vector<8x8x16xf32> to vector<64x16xf32>
    %c0_34 = arith.constant 0 : index
    %c16 = arith.constant 16 : index
    %36 = vector.load %arg18[%c0_34, %c16] : memref<256x288xf32, #tpu.memory_space<vmem>>, vector<64x16xf32>
    tpu.vector_store %arg18[%c0_34, %c16], %35 {strides = array<i32>} : memref<256x288xf32, #tpu.memory_space<vmem>>, vector<64x16xf32>,
    %c3_35 = arith.constant 3 : index
    %c0_36 = arith.constant 0 : index
    %c1_37 = arith.constant 1 : index
    %c0_38 = arith.constant 0 : index
    %37 = vector.load %arg15[%c3_35, %c0_36, %c1_37, %c0_38] : memref<4x10x10x16xf32, #tpu.memory_space<vmem>>, vector<1x8x8x16xf32>
    %38 = vector.shape_cast %37 : vector<1x8x8x16xf32> to vector<8x8x16xf32>
    %39 = vector.shape_cast %38 : vector<8x8x16xf32> to vector<64x16xf32>
    %c0_39 = arith.constant 0 : index
    %c32 = arith.constant 32 : index
    %40 = vector.load %arg18[%c0_39, %c32] : memref<256x288xf32, #tpu.memory_space<vmem>>, vector<64x16xf32>
    tpu.vector_store %arg18[%c0_39, %c32], %39 {strides = array<i32>} : memref<256x288xf32, #tpu.memory_space<vmem>>, vector<64x16xf32>,
    %c1_40 = arith.constant 1 : index
    %c1_41 = arith.constant 1 : index
    %c0_42 = arith.constant 0 : index
    %c0_43 = arith.constant 0 : index
    %41 = vector.load %arg15[%c1_40, %c1_41, %c0_42, %c0_43] : memref<4x10x10x16xf32, #tpu.memory_space<vmem>>, vector<1x8x8x16xf32>
    %42 = vector.shape_cast %41 : vector<1x8x8x16xf32> to vector<8x8x16xf32>
    %43 = vector.shape_cast %42 : vector<8x8x16xf32> to vector<64x16xf32>
    %c0_44 = arith.constant 0 : index
    %c48 = arith.constant 48 : index
    %44 = vector.load %arg18[%c0_44, %c48] : memref<256x288xf32, #tpu.memory_space<vmem>>, vector<64x16xf32>
    tpu.vector_store %arg18[%c0_44, %c48], %43 {strides = array<i32>} : memref<256x288xf32, #tpu.memory_space<vmem>>, vector<64x16xf32>,
    %c0_45 = arith.constant 0 : index
    %c1_46 = arith.constant 1 : index
    %c1_47 = arith.constant 1 : index
    %c0_48 = arith.constant 0 : index
    %45 = vector.load %arg15[%c0_45, %c1_46, %c1_47, %c0_48] : memref<4x10x10x16xf32, #tpu.memory_space<vmem>>, vector<1x8x8x16xf32>
    %46 = vector.shape_cast %45 : vector<1x8x8x16xf32> to vector<8x8x16xf32>
    %47 = vector.shape_cast %46 : vector<8x8x16xf32> to vector<64x16xf32>
    %c0_49 = arith.constant 0 : index
    %c64 = arith.constant 64 : index
    %48 = vector.load %arg18[%c0_49, %c64] : memref<256x288xf32, #tpu.memory_space<vmem>>, vector<64x16xf32>
    tpu.vector_store %arg18[%c0_49, %c64], %47 {strides = array<i32>} : memref<256x288xf32, #tpu.memory_space<vmem>>, vector<64x16xf32>,
    %c1_50 = arith.constant 1 : index
    %c1_51 = arith.constant 1 : index
    %c1_52 = arith.constant 1 : index
    %c0_53 = arith.constant 0 : index
    %49 = vector.load %arg15[%c1_50, %c1_51, %c1_52, %c0_53] : memref<4x10x10x16xf32, #tpu.memory_space<vmem>>, vector<1x8x8x16xf32>
    %50 = vector.shape_cast %49 : vector<1x8x8x16xf32> to vector<8x8x16xf32>
    %51 = vector.shape_cast %50 : vector<8x8x16xf32> to vector<64x16xf32>
    %c0_54 = arith.constant 0 : index
    %c80 = arith.constant 80 : index
    %52 = vector.load %arg18[%c0_54, %c80] : memref<256x288xf32, #tpu.memory_space<vmem>>, vector<64x16xf32>
    tpu.vector_store %arg18[%c0_54, %c80], %51 {strides = array<i32>} : memref<256x288xf32, #tpu.memory_space<vmem>>, vector<64x16xf32>,
    %c3_55 = arith.constant 3 : index
    %c1_56 = arith.constant 1 : index
    %c0_57 = arith.constant 0 : index
    %c0_58 = arith.constant 0 : index
    %53 = vector.load %arg15[%c3_55, %c1_56, %c0_57, %c0_58] : memref<4x10x10x16xf32, #tpu.memory_space<vmem>>, vector<1x8x8x16xf32>
    %54 = vector.shape_cast %53 : vector<1x8x8x16xf32> to vector<8x8x16xf32>
    %55 = vector.shape_cast %54 : vector<8x8x16xf32> to vector<64x16xf32>
    %c0_59 = arith.constant 0 : index
    %c96 = arith.constant 96 : index
    %56 = vector.load %arg18[%c0_59, %c96] : memref<256x288xf32, #tpu.memory_space<vmem>>, vector<64x16xf32>
    tpu.vector_store %arg18[%c0_59, %c96], %55 {strides = array<i32>} : memref<256x288xf32, #tpu.memory_space<vmem>>, vector<64x16xf32>,
    %c2_60 = arith.constant 2 : index
    %c1_61 = arith.constant 1 : index
    %c1_62 = arith.constant 1 : index
    %c0_63 = arith.constant 0 : index
    %57 = vector.load %arg15[%c2_60, %c1_61, %c1_62, %c0_63] : memref<4x10x10x16xf32, #tpu.memory_space<vmem>>, vector<1x8x8x16xf32>
    %58 = vector.shape_cast %57 : vector<1x8x8x16xf32> to vector<8x8x16xf32>
    %59 = vector.shape_cast %58 : vector<8x8x16xf32> to vector<64x16xf32>
    %c0_64 = arith.constant 0 : index
    %c112 = arith.constant 112 : index
    %60 = vector.load %arg18[%c0_64, %c112] : memref<256x288xf32, #tpu.memory_space<vmem>>, vector<64x16xf32>
    tpu.vector_store %arg18[%c0_64, %c112], %59 {strides = array<i32>} : memref<256x288xf32, #tpu.memory_space<vmem>>, vector<64x16xf32>,
    %c3_65 = arith.constant 3 : index
    %c1_66 = arith.constant 1 : index
    %c1_67 = arith.constant 1 : index
    %c0_68 = arith.constant 0 : index
    %61 = vector.load %arg15[%c3_65, %c1_66, %c1_67, %c0_68] : memref<4x10x10x16xf32, #tpu.memory_space<vmem>>, vector<1x8x8x16xf32>
    %62 = vector.shape_cast %61 : vector<1x8x8x16xf32> to vector<8x8x16xf32>
    %63 = vector.shape_cast %62 : vector<8x8x16xf32> to vector<64x16xf32>
    %c0_69 = arith.constant 0 : index
    %c128 = arith.constant 128 : index
    %64 = vector.load %arg18[%c0_69, %c128] : memref<256x288xf32, #tpu.memory_space<vmem>>, vector<64x16xf32>
    tpu.vector_store %arg18[%c0_69, %c128], %63 {strides = array<i32>} : memref<256x288xf32, #tpu.memory_space<vmem>>, vector<64x16xf32>,
    %c2_70 = arith.constant 2 : index
    %c0_71 = arith.constant 0 : index
    %c1_72 = arith.constant 1 : index
    %c0_73 = arith.constant 0 : index
    %65 = vector.load %arg15[%c2_70, %c0_71, %c1_72, %c0_73] : memref<4x10x10x16xf32, #tpu.memory_space<vmem>>, vector<1x8x8x16xf32>
    %66 = vector.shape_cast %65 : vector<1x8x8x16xf32> to vector<8x8x16xf32>
    %67 = vector.shape_cast %66 : vector<8x8x16xf32> to vector<64x16xf32>
    %c64_74 = arith.constant 64 : index
    %c0_75 = arith.constant 0 : index
    %68 = vector.load %arg18[%c64_74, %c0_75] : memref<256x288xf32, #tpu.memory_space<vmem>>, vector<64x16xf32>
    tpu.vector_store %arg18[%c64_74, %c0_75], %67 {strides = array<i32>} : memref<256x288xf32, #tpu.memory_space<vmem>>, vector<64x16xf32>,
    %c3_76 = arith.constant 3 : index
    %c0_77 = arith.constant 0 : index
    %c1_78 = arith.constant 1 : index
    %c0_79 = arith.constant 0 : index
    %69 = vector.load %arg15[%c3_76, %c0_77, %c1_78, %c0_79] : memref<4x10x10x16xf32, #tpu.memory_space<vmem>>, vector<1x8x8x16xf32>
    %70 = vector.shape_cast %69 : vector<1x8x8x16xf32> to vector<8x8x16xf32>
    %71 = vector.shape_cast %70 : vector<8x8x16xf32> to vector<64x16xf32>
    %c64_80 = arith.constant 64 : index
    %c16_81 = arith.constant 16 : index
    %72 = vector.load %arg18[%c64_80, %c16_81] : memref<256x288xf32, #tpu.memory_space<vmem>>, vector<64x16xf32>
    tpu.vector_store %arg18[%c64_80, %c16_81], %71 {strides = array<i32>} : memref<256x288xf32, #tpu.memory_space<vmem>>, vector<64x16xf32>,
    %c2_82 = arith.constant 2 : index
    %c0_83 = arith.constant 0 : index
    %c2_84 = arith.constant 2 : index
    %c0_85 = arith.constant 0 : index
    %73 = vector.load %arg15[%c2_82, %c0_83, %c2_84, %c0_85] : memref<4x10x10x16xf32, #tpu.memory_space<vmem>>, vector<1x8x8x16xf32>
    %74 = vector.shape_cast %73 : vector<1x8x8x16xf32> to vector<8x8x16xf32>
    %75 = vector.shape_cast %74 : vector<8x8x16xf32> to vector<64x16xf32>
    %c64_86 = arith.constant 64 : index
    %c32_87 = arith.constant 32 : index
    %76 = vector.load %arg18[%c64_86, %c32_87] : memref<256x288xf32, #tpu.memory_space<vmem>>, vector<64x16xf32>
    tpu.vector_store %arg18[%c64_86, %c32_87], %75 {strides = array<i32>} : memref<256x288xf32, #tpu.memory_space<vmem>>, vector<64x16xf32>,
    %c0_88 = arith.constant 0 : index
    %c1_89 = arith.constant 1 : index
    %c1_90 = arith.constant 1 : index
    %c0_91 = arith.constant 0 : index
    %77 = vector.load %arg15[%c0_88, %c1_89, %c1_90, %c0_91] : memref<4x10x10x16xf32, #tpu.memory_space<vmem>>, vector<1x8x8x16xf32>
    %78 = vector.shape_cast %77 : vector<1x8x8x16xf32> to vector<8x8x16xf32>
    %79 = vector.shape_cast %78 : vector<8x8x16xf32> to vector<64x16xf32>
    %c64_92 = arith.constant 64 : index
    %c48_93 = arith.constant 48 : index
    %80 = vector.load %arg18[%c64_92, %c48_93] : memref<256x288xf32, #tpu.memory_space<vmem>>, vector<64x16xf32>
    tpu.vector_store %arg18[%c64_92, %c48_93], %79 {strides = array<i32>} : memref<256x288xf32, #tpu.memory_space<vmem>>, vector<64x16xf32>,
    %c1_94 = arith.constant 1 : index
    %c1_95 = arith.constant 1 : index
    %c1_96 = arith.constant 1 : index
    %c0_97 = arith.constant 0 : index
    %81 = vector.load %arg15[%c1_94, %c1_95, %c1_96, %c0_97] : memref<4x10x10x16xf32, #tpu.memory_space<vmem>>, vector<1x8x8x16xf32>
    %82 = vector.shape_cast %81 : vector<1x8x8x16xf32> to vector<8x8x16xf32>
    %83 = vector.shape_cast %82 : vector<8x8x16xf32> to vector<64x16xf32>
    %c64_98 = arith.constant 64 : index
    %c64_99 = arith.constant 64 : index
    %84 = vector.load %arg18[%c64_98, %c64_99] : memref<256x288xf32, #tpu.memory_space<vmem>>, vector<64x16xf32>
    tpu.vector_store %arg18[%c64_98, %c64_99], %83 {strides = array<i32>} : memref<256x288xf32, #tpu.memory_space<vmem>>, vector<64x16xf32>,
    %c0_100 = arith.constant 0 : index
    %c1_101 = arith.constant 1 : index
    %c2_102 = arith.constant 2 : index
    %c0_103 = arith.constant 0 : index
    %85 = vector.load %arg15[%c0_100, %c1_101, %c2_102, %c0_103] : memref<4x10x10x16xf32, #tpu.memory_space<vmem>>, vector<1x8x8x16xf32>
    %86 = vector.shape_cast %85 : vector<1x8x8x16xf32> to vector<8x8x16xf32>
    %87 = vector.shape_cast %86 : vector<8x8x16xf32> to vector<64x16xf32>
    %c64_104 = arith.constant 64 : index
    %c80_105 = arith.constant 80 : index
    %88 = vector.load %arg18[%c64_104, %c80_105] : memref<256x288xf32, #tpu.memory_space<vmem>>, vector<64x16xf32>
    tpu.vector_store %arg18[%c64_104, %c80_105], %87 {strides = array<i32>} : memref<256x288xf32, #tpu.memory_space<vmem>>, vector<64x16xf32>,
    %c2_106 = arith.constant 2 : index
    %c1_107 = arith.constant 1 : index
    %c1_108 = arith.constant 1 : index
    %c0_109 = arith.constant 0 : index
    %89 = vector.load %arg15[%c2_106, %c1_107, %c1_108, %c0_109] : memref<4x10x10x16xf32, #tpu.memory_space<vmem>>, vector<1x8x8x16xf32>
    %90 = vector.shape_cast %89 : vector<1x8x8x16xf32> to vector<8x8x16xf32>
    %91 = vector.shape_cast %90 : vector<8x8x16xf32> to vector<64x16xf32>
    %c64_110 = arith.constant 64 : index
    %c96_111 = arith.constant 96 : index
    %92 = vector.load %arg18[%c64_110, %c96_111] : memref<256x288xf32, #tpu.memory_space<vmem>>, vector<64x16xf32>
    tpu.vector_store %arg18[%c64_110, %c96_111], %91 {strides = array<i32>} : memref<256x288xf32, #tpu.memory_space<vmem>>, vector<64x16xf32>,
    %c3_112 = arith.constant 3 : index
    %c1_113 = arith.constant 1 : index
    %c1_114 = arith.constant 1 : index
    %c0_115 = arith.constant 0 : index
    %93 = vector.load %arg15[%c3_112, %c1_113, %c1_114, %c0_115] : memref<4x10x10x16xf32, #tpu.memory_space<vmem>>, vector<1x8x8x16xf32>
    %94 = vector.shape_cast %93 : vector<1x8x8x16xf32> to vector<8x8x16xf32>
    %95 = vector.shape_cast %94 : vector<8x8x16xf32> to vector<64x16xf32>
    %c64_116 = arith.constant 64 : index
    %c112_117 = arith.constant 112 : index
    %96 = vector.load %arg18[%c64_116, %c112_117] : memref<256x288xf32, #tpu.memory_space<vmem>>, vector<64x16xf32>
    tpu.vector_store %arg18[%c64_116, %c112_117], %95 {strides = array<i32>} : memref<256x288xf32, #tpu.memory_space<vmem>>, vector<64x16xf32>,
    %c2_118 = arith.constant 2 : index
    %c1_119 = arith.constant 1 : index
    %c2_120 = arith.constant 2 : index
    %c0_121 = arith.constant 0 : index
    %97 = vector.load %arg15[%c2_118, %c1_119, %c2_120, %c0_121] : memref<4x10x10x16xf32, #tpu.memory_space<vmem>>, vector<1x8x8x16xf32>
    %98 = vector.shape_cast %97 : vector<1x8x8x16xf32> to vector<8x8x16xf32>
    %99 = vector.shape_cast %98 : vector<8x8x16xf32> to vector<64x16xf32>
    %c64_122 = arith.constant 64 : index
    %c128_123 = arith.constant 128 : index
    %100 = vector.load %arg18[%c64_122, %c128_123] : memref<256x288xf32, #tpu.memory_space<vmem>>, vector<64x16xf32>
    tpu.vector_store %arg18[%c64_122, %c128_123], %99 {strides = array<i32>} : memref<256x288xf32, #tpu.memory_space<vmem>>, vector<64x16xf32>,
    %c1_124 = arith.constant 1 : index
    %c1_125 = arith.constant 1 : index
    %c0_126 = arith.constant 0 : index
    %c0_127 = arith.constant 0 : index
    %101 = vector.load %arg15[%c1_124, %c1_125, %c0_126, %c0_127] : memref<4x10x10x16xf32, #tpu.memory_space<vmem>>, vector<1x8x8x16xf32>
    %102 = vector.shape_cast %101 : vector<1x8x8x16xf32> to vector<8x8x16xf32>
    %103 = vector.shape_cast %102 : vector<8x8x16xf32> to vector<64x16xf32>
    %c128_128 = arith.constant 128 : index
    %c0_129 = arith.constant 0 : index
    %104 = vector.load %arg18[%c128_128, %c0_129] : memref<256x288xf32, #tpu.memory_space<vmem>>, vector<64x16xf32>
    tpu.vector_store %arg18[%c128_128, %c0_129], %103 {strides = array<i32>} : memref<256x288xf32, #tpu.memory_space<vmem>>, vector<64x16xf32>,
    %c0_130 = arith.constant 0 : index
    %c1_131 = arith.constant 1 : index
    %c1_132 = arith.constant 1 : index
    %c0_133 = arith.constant 0 : index
    %105 = vector.load %arg15[%c0_130, %c1_131, %c1_132, %c0_133] : memref<4x10x10x16xf32, #tpu.memory_space<vmem>>, vector<1x8x8x16xf32>
    %106 = vector.shape_cast %105 : vector<1x8x8x16xf32> to vector<8x8x16xf32>
    %107 = vector.shape_cast %106 : vector<8x8x16xf32> to vector<64x16xf32>
    %c128_134 = arith.constant 128 : index
    %c16_135 = arith.constant 16 : index
    %108 = vector.load %arg18[%c128_134, %c16_135] : memref<256x288xf32, #tpu.memory_space<vmem>>, vector<64x16xf32>
    tpu.vector_store %arg18[%c128_134, %c16_135], %107 {strides = array<i32>} : memref<256x288xf32, #tpu.memory_space<vmem>>, vector<64x16xf32>,
    %c1_136 = arith.constant 1 : index
    %c1_137 = arith.constant 1 : index
    %c1_138 = arith.constant 1 : index
    %c0_139 = arith.constant 0 : index
    %109 = vector.load %arg15[%c1_136, %c1_137, %c1_138, %c0_139] : memref<4x10x10x16xf32, #tpu.memory_space<vmem>>, vector<1x8x8x16xf32>
    %110 = vector.shape_cast %109 : vector<1x8x8x16xf32> to vector<8x8x16xf32>
    %111 = vector.shape_cast %110 : vector<8x8x16xf32> to vector<64x16xf32>
    %c128_140 = arith.constant 128 : index
    %c32_141 = arith.constant 32 : index
    %112 = vector.load %arg18[%c128_140, %c32_141] : memref<256x288xf32, #tpu.memory_space<vmem>>, vector<64x16xf32>
    tpu.vector_store %arg18[%c128_140, %c32_141], %111 {strides = array<i32>} : memref<256x288xf32, #tpu.memory_space<vmem>>, vector<64x16xf32>,
    %c3_142 = arith.constant 3 : index
    %c1_143 = arith.constant 1 : index
    %c0_144 = arith.constant 0 : index
    %c0_145 = arith.constant 0 : index
    %113 = vector.load %arg15[%c3_142, %c1_143, %c0_144, %c0_145] : memref<4x10x10x16xf32, #tpu.memory_space<vmem>>, vector<1x8x8x16xf32>
    %114 = vector.shape_cast %113 : vector<1x8x8x16xf32> to vector<8x8x16xf32>
    %115 = vector.shape_cast %114 : vector<8x8x16xf32> to vector<64x16xf32>
    %c128_146 = arith.constant 128 : index
    %c48_147 = arith.constant 48 : index
    %116 = vector.load %arg18[%c128_146, %c48_147] : memref<256x288xf32, #tpu.memory_space<vmem>>, vector<64x16xf32>
    tpu.vector_store %arg18[%c128_146, %c48_147], %115 {strides = array<i32>} : memref<256x288xf32, #tpu.memory_space<vmem>>, vector<64x16xf32>,
    %c2_148 = arith.constant 2 : index
    %c1_149 = arith.constant 1 : index
    %c1_150 = arith.constant 1 : index
    %c0_151 = arith.constant 0 : index
    %117 = vector.load %arg15[%c2_148, %c1_149, %c1_150, %c0_151] : memref<4x10x10x16xf32, #tpu.memory_space<vmem>>, vector<1x8x8x16xf32>
    %118 = vector.shape_cast %117 : vector<1x8x8x16xf32> to vector<8x8x16xf32>
    %119 = vector.shape_cast %118 : vector<8x8x16xf32> to vector<64x16xf32>
    %c128_152 = arith.constant 128 : index
    %c64_153 = arith.constant 64 : index
    %120 = vector.load %arg18[%c128_152, %c64_153] : memref<256x288xf32, #tpu.memory_space<vmem>>, vector<64x16xf32>
    tpu.vector_store %arg18[%c128_152, %c64_153], %119 {strides = array<i32>} : memref<256x288xf32, #tpu.memory_space<vmem>>, vector<64x16xf32>,
    %c3_154 = arith.constant 3 : index
    %c1_155 = arith.constant 1 : index
    %c1_156 = arith.constant 1 : index
    %c0_157 = arith.constant 0 : index
    %121 = vector.load %arg15[%c3_154, %c1_155, %c1_156, %c0_157] : memref<4x10x10x16xf32, #tpu.memory_space<vmem>>, vector<1x8x8x16xf32>
    %122 = vector.shape_cast %121 : vector<1x8x8x16xf32> to vector<8x8x16xf32>
    %123 = vector.shape_cast %122 : vector<8x8x16xf32> to vector<64x16xf32>
    %c128_158 = arith.constant 128 : index
    %c80_159 = arith.constant 80 : index
    %124 = vector.load %arg18[%c128_158, %c80_159] : memref<256x288xf32, #tpu.memory_space<vmem>>, vector<64x16xf32>
    tpu.vector_store %arg18[%c128_158, %c80_159], %123 {strides = array<i32>} : memref<256x288xf32, #tpu.memory_space<vmem>>, vector<64x16xf32>,
    %c1_160 = arith.constant 1 : index
    %c2_161 = arith.constant 2 : index
    %c0_162 = arith.constant 0 : index
    %c0_163 = arith.constant 0 : index
    %125 = vector.load %arg15[%c1_160, %c2_161, %c0_162, %c0_163] : memref<4x10x10x16xf32, #tpu.memory_space<vmem>>, vector<1x8x8x16xf32>
    %126 = vector.shape_cast %125 : vector<1x8x8x16xf32> to vector<8x8x16xf32>
    %127 = vector.shape_cast %126 : vector<8x8x16xf32> to vector<64x16xf32>
    %c128_164 = arith.constant 128 : index
    %c96_165 = arith.constant 96 : index
    %128 = vector.load %arg18[%c128_164, %c96_165] : memref<256x288xf32, #tpu.memory_space<vmem>>, vector<64x16xf32>
    tpu.vector_store %arg18[%c128_164, %c96_165], %127 {strides = array<i32>} : memref<256x288xf32, #tpu.memory_space<vmem>>, vector<64x16xf32>,
    %c0_166 = arith.constant 0 : index
    %c2_167 = arith.constant 2 : index
    %c1_168 = arith.constant 1 : index
    %c0_169 = arith.constant 0 : index
    %129 = vector.load %arg15[%c0_166, %c2_167, %c1_168, %c0_169] : memref<4x10x10x16xf32, #tpu.memory_space<vmem>>, vector<1x8x8x16xf32>
    %130 = vector.shape_cast %129 : vector<1x8x8x16xf32> to vector<8x8x16xf32>
    %131 = vector.shape_cast %130 : vector<8x8x16xf32> to vector<64x16xf32>
    %c128_170 = arith.constant 128 : index
    %c112_171 = arith.constant 112 : index
    %132 = vector.load %arg18[%c128_170, %c112_171] : memref<256x288xf32, #tpu.memory_space<vmem>>, vector<64x16xf32>
    tpu.vector_store %arg18[%c128_170, %c112_171], %131 {strides = array<i32>} : memref<256x288xf32, #tpu.memory_space<vmem>>, vector<64x16xf32>,
    %c1_172 = arith.constant 1 : index
    %c2_173 = arith.constant 2 : index
    %c1_174 = arith.constant 1 : index
    %c0_175 = arith.constant 0 : index
    %133 = vector.load %arg15[%c1_172, %c2_173, %c1_174, %c0_175] : memref<4x10x10x16xf32, #tpu.memory_space<vmem>>, vector<1x8x8x16xf32>
    %134 = vector.shape_cast %133 : vector<1x8x8x16xf32> to vector<8x8x16xf32>
    %135 = vector.shape_cast %134 : vector<8x8x16xf32> to vector<64x16xf32>
    %c128_176 = arith.constant 128 : index
    %c128_177 = arith.constant 128 : index
    %136 = vector.load %arg18[%c128_176, %c128_177] : memref<256x288xf32, #tpu.memory_space<vmem>>, vector<64x16xf32>
    tpu.vector_store %arg18[%c128_176, %c128_177], %135 {strides = array<i32>} : memref<256x288xf32, #tpu.memory_space<vmem>>, vector<64x16xf32>,
    %c0_178 = arith.constant 0 : index
    %c1_179 = arith.constant 1 : index
    %c1_180 = arith.constant 1 : index
    %c0_181 = arith.constant 0 : index
    %137 = vector.load %arg15[%c0_178, %c1_179, %c1_180, %c0_181] : memref<4x10x10x16xf32, #tpu.memory_space<vmem>>, vector<1x8x8x16xf32>
    %138 = vector.shape_cast %137 : vector<1x8x8x16xf32> to vector<8x8x16xf32>
    %139 = vector.shape_cast %138 : vector<8x8x16xf32> to vector<64x16xf32>
    %c192 = arith.constant 192 : index
    %c0_182 = arith.constant 0 : index
    %140 = vector.load %arg18[%c192, %c0_182] : memref<256x288xf32, #tpu.memory_space<vmem>>, vector<64x16xf32>
    tpu.vector_store %arg18[%c192, %c0_182], %139 {strides = array<i32>} : memref<256x288xf32, #tpu.memory_space<vmem>>, vector<64x16xf32>,
    %c1_183 = arith.constant 1 : index
    %c1_184 = arith.constant 1 : index
    %c1_185 = arith.constant 1 : index
    %c0_186 = arith.constant 0 : index
    %141 = vector.load %arg15[%c1_183, %c1_184, %c1_185, %c0_186] : memref<4x10x10x16xf32, #tpu.memory_space<vmem>>, vector<1x8x8x16xf32>
    %142 = vector.shape_cast %141 : vector<1x8x8x16xf32> to vector<8x8x16xf32>
    %143 = vector.shape_cast %142 : vector<8x8x16xf32> to vector<64x16xf32>
    %c192_187 = arith.constant 192 : index
    %c16_188 = arith.constant 16 : index
    %144 = vector.load %arg18[%c192_187, %c16_188] : memref<256x288xf32, #tpu.memory_space<vmem>>, vector<64x16xf32>
    tpu.vector_store %arg18[%c192_187, %c16_188], %143 {strides = array<i32>} : memref<256x288xf32, #tpu.memory_space<vmem>>, vector<64x16xf32>,
    %c0_189 = arith.constant 0 : index
    %c1_190 = arith.constant 1 : index
    %c2_191 = arith.constant 2 : index
    %c0_192 = arith.constant 0 : index
    %145 = vector.load %arg15[%c0_189, %c1_190, %c2_191, %c0_192] : memref<4x10x10x16xf32, #tpu.memory_space<vmem>>, vector<1x8x8x16xf32>
    %146 = vector.shape_cast %145 : vector<1x8x8x16xf32> to vector<8x8x16xf32>
    %147 = vector.shape_cast %146 : vector<8x8x16xf32> to vector<64x16xf32>
    %c192_193 = arith.constant 192 : index
    %c32_194 = arith.constant 32 : index
    %148 = vector.load %arg18[%c192_193, %c32_194] : memref<256x288xf32, #tpu.memory_space<vmem>>, vector<64x16xf32>
    tpu.vector_store %arg18[%c192_193, %c32_194], %147 {strides = array<i32>} : memref<256x288xf32, #tpu.memory_space<vmem>>, vector<64x16xf32>,
    %c2_195 = arith.constant 2 : index
    %c1_196 = arith.constant 1 : index
    %c1_197 = arith.constant 1 : index
    %c0_198 = arith.constant 0 : index
    %149 = vector.load %arg15[%c2_195, %c1_196, %c1_197, %c0_198] : memref<4x10x10x16xf32, #tpu.memory_space<vmem>>, vector<1x8x8x16xf32>
    %150 = vector.shape_cast %149 : vector<1x8x8x16xf32> to vector<8x8x16xf32>
    %151 = vector.shape_cast %150 : vector<8x8x16xf32> to vector<64x16xf32>
    %c192_199 = arith.constant 192 : index
    %c48_200 = arith.constant 48 : index
    %152 = vector.load %arg18[%c192_199, %c48_200] : memref<256x288xf32, #tpu.memory_space<vmem>>, vector<64x16xf32>
    tpu.vector_store %arg18[%c192_199, %c48_200], %151 {strides = array<i32>} : memref<256x288xf32, #tpu.memory_space<vmem>>, vector<64x16xf32>,
    %c3_201 = arith.constant 3 : index
    %c1_202 = arith.constant 1 : index
    %c1_203 = arith.constant 1 : index
    %c0_204 = arith.constant 0 : index
    %153 = vector.load %arg15[%c3_201, %c1_202, %c1_203, %c0_204] : memref<4x10x10x16xf32, #tpu.memory_space<vmem>>, vector<1x8x8x16xf32>
    %154 = vector.shape_cast %153 : vector<1x8x8x16xf32> to vector<8x8x16xf32>
    %155 = vector.shape_cast %154 : vector<8x8x16xf32> to vector<64x16xf32>
    %c192_205 = arith.constant 192 : index
    %c64_206 = arith.constant 64 : index
    %156 = vector.load %arg18[%c192_205, %c64_206] : memref<256x288xf32, #tpu.memory_space<vmem>>, vector<64x16xf32>
    tpu.vector_store %arg18[%c192_205, %c64_206], %155 {strides = array<i32>} : memref<256x288xf32, #tpu.memory_space<vmem>>, vector<64x16xf32>,
    %c2_207 = arith.constant 2 : index
    %c1_208 = arith.constant 1 : index
    %c2_209 = arith.constant 2 : index
    %c0_210 = arith.constant 0 : index
    %157 = vector.load %arg15[%c2_207, %c1_208, %c2_209, %c0_210] : memref<4x10x10x16xf32, #tpu.memory_space<vmem>>, vector<1x8x8x16xf32>
    %158 = vector.shape_cast %157 : vector<1x8x8x16xf32> to vector<8x8x16xf32>
    %159 = vector.shape_cast %158 : vector<8x8x16xf32> to vector<64x16xf32>
    %c192_211 = arith.constant 192 : index
    %c80_212 = arith.constant 80 : index
    %160 = vector.load %arg18[%c192_211, %c80_212] : memref<256x288xf32, #tpu.memory_space<vmem>>, vector<64x16xf32>
    tpu.vector_store %arg18[%c192_211, %c80_212], %159 {strides = array<i32>} : memref<256x288xf32, #tpu.memory_space<vmem>>, vector<64x16xf32>,
    %c0_213 = arith.constant 0 : index
    %c2_214 = arith.constant 2 : index
    %c1_215 = arith.constant 1 : index
    %c0_216 = arith.constant 0 : index
    %161 = vector.load %arg15[%c0_213, %c2_214, %c1_215, %c0_216] : memref<4x10x10x16xf32, #tpu.memory_space<vmem>>, vector<1x8x8x16xf32>
    %162 = vector.shape_cast %161 : vector<1x8x8x16xf32> to vector<8x8x16xf32>
    %163 = vector.shape_cast %162 : vector<8x8x16xf32> to vector<64x16xf32>
    %c192_217 = arith.constant 192 : index
    %c96_218 = arith.constant 96 : index
    %164 = vector.load %arg18[%c192_217, %c96_218] : memref<256x288xf32, #tpu.memory_space<vmem>>, vector<64x16xf32>
    tpu.vector_store %arg18[%c192_217, %c96_218], %163 {strides = array<i32>} : memref<256x288xf32, #tpu.memory_space<vmem>>, vector<64x16xf32>,
    %c1_219 = arith.constant 1 : index
    %c2_220 = arith.constant 2 : index
    %c1_221 = arith.constant 1 : index
    %c0_222 = arith.constant 0 : index
    %165 = vector.load %arg15[%c1_219, %c2_220, %c1_221, %c0_222] : memref<4x10x10x16xf32, #tpu.memory_space<vmem>>, vector<1x8x8x16xf32>
    %166 = vector.shape_cast %165 : vector<1x8x8x16xf32> to vector<8x8x16xf32>
    %167 = vector.shape_cast %166 : vector<8x8x16xf32> to vector<64x16xf32>
    %c192_223 = arith.constant 192 : index
    %c112_224 = arith.constant 112 : index
    %168 = vector.load %arg18[%c192_223, %c112_224] : memref<256x288xf32, #tpu.memory_space<vmem>>, vector<64x16xf32>
    tpu.vector_store %arg18[%c192_223, %c112_224], %167 {strides = array<i32>} : memref<256x288xf32, #tpu.memory_space<vmem>>, vector<64x16xf32>,
    %c0_225 = arith.constant 0 : index
    %c2_226 = arith.constant 2 : index
    %c2_227 = arith.constant 2 : index
    %c0_228 = arith.constant 0 : index
    %169 = vector.load %arg15[%c0_225, %c2_226, %c2_227, %c0_228] : memref<4x10x10x16xf32, #tpu.memory_space<vmem>>, vector<1x8x8x16xf32>
    %170 = vector.shape_cast %169 : vector<1x8x8x16xf32> to vector<8x8x16xf32>
    %171 = vector.shape_cast %170 : vector<8x8x16xf32> to vector<64x16xf32>
    %c192_229 = arith.constant 192 : index
    %c128_230 = arith.constant 128 : index
    %172 = vector.load %arg18[%c192_229, %c128_230] : memref<256x288xf32, #tpu.memory_space<vmem>>, vector<64x16xf32>
    tpu.vector_store %arg18[%c192_229, %c128_230], %171 {strides = array<i32>} : memref<256x288xf32, #tpu.memory_space<vmem>>, vector<64x16xf32>,
    %c0_231 = arith.constant 0 : index
    %c0_232 = arith.constant 0 : index
    %173 = vector.load %arg18[%c0_231, %c0_232] : memref<256x288xf32, #tpu.memory_space<vmem>>, vector<256x144xf32>
    %c0_233 = arith.constant 0 : index
    %c0_234 = arith.constant 0 : index
    %174 = vector.load %arg4[%c0_233, %c0_234] : memref<144x16xf32, #tpu.memory_space<vmem>>, vector<144x16xf32>
    %cst_235 = arith.constant dense<0.000000e+00> : vector<256x16xf32>
    %175 = tpu.matmul %173, %174, %cst_235 {dimension_numbers = #tpu.dot_dimension_numbers<[1], [0], [0], [1], [0, 0, 1, 1], [], []>, precision = #tpu.contract_precision<fp32>} : vector<256x144xf32>, vector<144x16xf32>, vector<256x16xf32> -> vector<256x16xf32>
    %c0_236 = arith.constant 0 : index
    %c0_237 = arith.constant 0 : index
    %176 = vector.load %arg5[%c0_236, %c0_237] : memref<1x16xf32, #tpu.memory_space<vmem>>, vector<1x16xf32>
    %177 = vector.broadcast %176 : vector<1x16xf32> to vector<256x16xf32>
    %178 = arith.addf %175, %177 : vector<256x16xf32>
    %cst_238 = arith.constant 0.000000e+00 : f32
    %179 = vector.broadcast %cst_238 : f32 to vector<4x10x10x16xf32>
    %c0_239 = arith.constant 0 : index
    %c0_240 = arith.constant 0 : index
    %c0_241 = arith.constant 0 : index
    %c0_242 = arith.constant 0 : index
    %180 = vector.load %arg16[%c0_239, %c0_240, %c0_241, %c0_242] : memref<4x10x10x16xf32, #tpu.memory_space<vmem>>, vector<4x10x10x16xf32>
    tpu.vector_store %arg16[%c0_239, %c0_240, %c0_241, %c0_242], %179 {strides = array<i32>} : memref<4x10x10x16xf32, #tpu.memory_space<vmem>>, vector<4x10x10x16xf32>,
    %181 = vector.extract_strided_slice %178 {offsets = [0, 0], sizes = [64, 16], strides = [1, 1]} : vector<256x16xf32> to vector<64x16xf32>
    %182 = vector.shape_cast %181 : vector<64x16xf32> to vector<8x8x16xf32>
    %c0_243 = arith.constant 0 : index
    %c1_244 = arith.constant 1 : index
    %c1_245 = arith.constant 1 : index
    %c0_246 = arith.constant 0 : index
    %183 = vector.load %arg16[%c0_243, %c1_244, %c1_245, %c0_246] : memref<4x10x10x16xf32, #tpu.memory_space<vmem>>, vector<1x8x8x16xf32>
    %184 = vector.shape_cast %183 : vector<1x8x8x16xf32> to vector<8x8x16xf32>
    %185 = vector.shape_cast %182 : vector<8x8x16xf32> to vector<1x8x8x16xf32>
    tpu.vector_store %arg16[%c0_243, %c1_244, %c1_245, %c0_246], %185 {strides = array<i32>} : memref<4x10x10x16xf32, #tpu.memory_space<vmem>>, vector<1x8x8x16xf32>,
    %186 = vector.extract_strided_slice %178 {offsets = [64, 0], sizes = [64, 16], strides = [1, 1]} : vector<256x16xf32> to vector<64x16xf32>
    %187 = vector.shape_cast %186 : vector<64x16xf32> to vector<8x8x16xf32>
    %c1_247 = arith.constant 1 : index
    %c1_248 = arith.constant 1 : index
    %c1_249 = arith.constant 1 : index
    %c0_250 = arith.constant 0 : index
    %188 = vector.load %arg16[%c1_247, %c1_248, %c1_249, %c0_250] : memref<4x10x10x16xf32, #tpu.memory_space<vmem>>, vector<1x8x8x16xf32>
    %189 = vector.shape_cast %188 : vector<1x8x8x16xf32> to vector<8x8x16xf32>
    %190 = vector.shape_cast %187 : vector<8x8x16xf32> to vector<1x8x8x16xf32>
    tpu.vector_store %arg16[%c1_247, %c1_248, %c1_249, %c0_250], %190 {strides = array<i32>} : memref<4x10x10x16xf32, #tpu.memory_space<vmem>>, vector<1x8x8x16xf32>,
    %191 = vector.extract_strided_slice %178 {offsets = [128, 0], sizes = [64, 16], strides = [1, 1]} : vector<256x16xf32> to vector<64x16xf32>
    %192 = vector.shape_cast %191 : vector<64x16xf32> to vector<8x8x16xf32>
    %c2_251 = arith.constant 2 : index
    %c1_252 = arith.constant 1 : index
    %c1_253 = arith.constant 1 : index
    %c0_254 = arith.constant 0 : index
    %193 = vector.load %arg16[%c2_251, %c1_252, %c1_253, %c0_254] : memref<4x10x10x16xf32, #tpu.memory_space<vmem>>, vector<1x8x8x16xf32>
    %194 = vector.shape_cast %193 : vector<1x8x8x16xf32> to vector<8x8x16xf32>
    %195 = vector.shape_cast %192 : vector<8x8x16xf32> to vector<1x8x8x16xf32>
    tpu.vector_store %arg16[%c2_251, %c1_252, %c1_253, %c0_254], %195 {strides = array<i32>} : memref<4x10x10x16xf32, #tpu.memory_space<vmem>>, vector<1x8x8x16xf32>,
    %196 = vector.extract_strided_slice %178 {offsets = [192, 0], sizes = [64, 16], strides = [1, 1]} : vector<256x16xf32> to vector<64x16xf32>
    %197 = vector.shape_cast %196 : vector<64x16xf32> to vector<8x8x16xf32>
    %c3_255 = arith.constant 3 : index
    %c1_256 = arith.constant 1 : index
    %c1_257 = arith.constant 1 : index
    %c0_258 = arith.constant 0 : index
    %198 = vector.load %arg16[%c3_255, %c1_256, %c1_257, %c0_258] : memref<4x10x10x16xf32, #tpu.memory_space<vmem>>, vector<1x8x8x16xf32>
    %199 = vector.shape_cast %198 : vector<1x8x8x16xf32> to vector<8x8x16xf32>
    %200 = vector.shape_cast %197 : vector<8x8x16xf32> to vector<1x8x8x16xf32>
    tpu.vector_store %arg16[%c3_255, %c1_256, %c1_257, %c0_258], %200 {strides = array<i32>} : memref<4x10x10x16xf32, #tpu.memory_space<vmem>>, vector<1x8x8x16xf32>,
    %c3_259 = arith.constant 3 : index
    %c0_260 = arith.constant 0 : index
    %c0_261 = arith.constant 0 : index
    %c0_262 = arith.constant 0 : index
    %201 = vector.load %arg16[%c3_259, %c0_260, %c0_261, %c0_262] : memref<4x10x10x16xf32, #tpu.memory_space<vmem>>, vector<1x8x8x16xf32>
    %202 = vector.shape_cast %201 : vector<1x8x8x16xf32> to vector<8x8x16xf32>
    %203 = vector.shape_cast %202 : vector<8x8x16xf32> to vector<64x16xf32>
    %c0_263 = arith.constant 0 : index
    %c0_264 = arith.constant 0 : index
    %204 = vector.load %arg18[%c0_263, %c0_264] : memref<256x288xf32, #tpu.memory_space<vmem>>, vector<64x16xf32>
    tpu.vector_store %arg18[%c0_263, %c0_264], %203 {strides = array<i32>} : memref<256x288xf32, #tpu.memory_space<vmem>>, vector<64x16xf32>,
    %c2_265 = arith.constant 2 : index
    %c0_266 = arith.constant 0 : index
    %c1_267 = arith.constant 1 : index
    %c0_268 = arith.constant 0 : index
    %205 = vector.load %arg16[%c2_265, %c0_266, %c1_267, %c0_268] : memref<4x10x10x16xf32, #tpu.memory_space<vmem>>, vector<1x8x8x16xf32>
    %206 = vector.shape_cast %205 : vector<1x8x8x16xf32> to vector<8x8x16xf32>
    %207 = vector.shape_cast %206 : vector<8x8x16xf32> to vector<64x16xf32>
    %c0_269 = arith.constant 0 : index
    %c16_270 = arith.constant 16 : index
    %208 = vector.load %arg18[%c0_269, %c16_270] : memref<256x288xf32, #tpu.memory_space<vmem>>, vector<64x16xf32>
    tpu.vector_store %arg18[%c0_269, %c16_270], %207 {strides = array<i32>} : memref<256x288xf32, #tpu.memory_space<vmem>>, vector<64x16xf32>,
    %c3_271 = arith.constant 3 : index
    %c0_272 = arith.constant 0 : index
    %c1_273 = arith.constant 1 : index
    %c0_274 = arith.constant 0 : index
    %209 = vector.load %arg16[%c3_271, %c0_272, %c1_273, %c0_274] : memref<4x10x10x16xf32, #tpu.memory_space<vmem>>, vector<1x8x8x16xf32>
    %210 = vector.shape_cast %209 : vector<1x8x8x16xf32> to vector<8x8x16xf32>
    %211 = vector.shape_cast %210 : vector<8x8x16xf32> to vector<64x16xf32>
    %c0_275 = arith.constant 0 : index
    %c32_276 = arith.constant 32 : index
    %212 = vector.load %arg18[%c0_275, %c32_276] : memref<256x288xf32, #tpu.memory_space<vmem>>, vector<64x16xf32>
    tpu.vector_store %arg18[%c0_275, %c32_276], %211 {strides = array<i32>} : memref<256x288xf32, #tpu.memory_space<vmem>>, vector<64x16xf32>,
    %c1_277 = arith.constant 1 : index
    %c1_278 = arith.constant 1 : index
    %c0_279 = arith.constant 0 : index
    %c0_280 = arith.constant 0 : index
    %213 = vector.load %arg16[%c1_277, %c1_278, %c0_279, %c0_280] : memref<4x10x10x16xf32, #tpu.memory_space<vmem>>, vector<1x8x8x16xf32>
    %214 = vector.shape_cast %213 : vector<1x8x8x16xf32> to vector<8x8x16xf32>
    %215 = vector.shape_cast %214 : vector<8x8x16xf32> to vector<64x16xf32>
    %c0_281 = arith.constant 0 : index
    %c48_282 = arith.constant 48 : index
    %216 = vector.load %arg18[%c0_281, %c48_282] : memref<256x288xf32, #tpu.memory_space<vmem>>, vector<64x16xf32>
    tpu.vector_store %arg18[%c0_281, %c48_282], %215 {strides = array<i32>} : memref<256x288xf32, #tpu.memory_space<vmem>>, vector<64x16xf32>,
    %c0_283 = arith.constant 0 : index
    %c1_284 = arith.constant 1 : index
    %c1_285 = arith.constant 1 : index
    %c0_286 = arith.constant 0 : index
    %217 = vector.load %arg16[%c0_283, %c1_284, %c1_285, %c0_286] : memref<4x10x10x16xf32, #tpu.memory_space<vmem>>, vector<1x8x8x16xf32>
    %218 = vector.shape_cast %217 : vector<1x8x8x16xf32> to vector<8x8x16xf32>
    %219 = vector.shape_cast %218 : vector<8x8x16xf32> to vector<64x16xf32>
    %c0_287 = arith.constant 0 : index
    %c64_288 = arith.constant 64 : index
    %220 = vector.load %arg18[%c0_287, %c64_288] : memref<256x288xf32, #tpu.memory_space<vmem>>, vector<64x16xf32>
    tpu.vector_store %arg18[%c0_287, %c64_288], %219 {strides = array<i32>} : memref<256x288xf32, #tpu.memory_space<vmem>>, vector<64x16xf32>,
    %c1_289 = arith.constant 1 : index
    %c1_290 = arith.constant 1 : index
    %c1_291 = arith.constant 1 : index
    %c0_292 = arith.constant 0 : index
    %221 = vector.load %arg16[%c1_289, %c1_290, %c1_291, %c0_292] : memref<4x10x10x16xf32, #tpu.memory_space<vmem>>, vector<1x8x8x16xf32>
    %222 = vector.shape_cast %221 : vector<1x8x8x16xf32> to vector<8x8x16xf32>
    %223 = vector.shape_cast %222 : vector<8x8x16xf32> to vector<64x16xf32>
    %c0_293 = arith.constant 0 : index
    %c80_294 = arith.constant 80 : index
    %224 = vector.load %arg18[%c0_293, %c80_294] : memref<256x288xf32, #tpu.memory_space<vmem>>, vector<64x16xf32>
    tpu.vector_store %arg18[%c0_293, %c80_294], %223 {strides = array<i32>} : memref<256x288xf32, #tpu.memory_space<vmem>>, vector<64x16xf32>,
    %c3_295 = arith.constant 3 : index
    %c1_296 = arith.constant 1 : index
    %c0_297 = arith.constant 0 : index
    %c0_298 = arith.constant 0 : index
    %225 = vector.load %arg16[%c3_295, %c1_296, %c0_297, %c0_298] : memref<4x10x10x16xf32, #tpu.memory_space<vmem>>, vector<1x8x8x16xf32>
    %226 = vector.shape_cast %225 : vector<1x8x8x16xf32> to vector<8x8x16xf32>
    %227 = vector.shape_cast %226 : vector<8x8x16xf32> to vector<64x16xf32>
    %c0_299 = arith.constant 0 : index
    %c96_300 = arith.constant 96 : index
    %228 = vector.load %arg18[%c0_299, %c96_300] : memref<256x288xf32, #tpu.memory_space<vmem>>, vector<64x16xf32>
    tpu.vector_store %arg18[%c0_299, %c96_300], %227 {strides = array<i32>} : memref<256x288xf32, #tpu.memory_space<vmem>>, vector<64x16xf32>,
    %c2_301 = arith.constant 2 : index
    %c1_302 = arith.constant 1 : index
    %c1_303 = arith.constant 1 : index
    %c0_304 = arith.constant 0 : index
    %229 = vector.load %arg16[%c2_301, %c1_302, %c1_303, %c0_304] : memref<4x10x10x16xf32, #tpu.memory_space<vmem>>, vector<1x8x8x16xf32>
    %230 = vector.shape_cast %229 : vector<1x8x8x16xf32> to vector<8x8x16xf32>
    %231 = vector.shape_cast %230 : vector<8x8x16xf32> to vector<64x16xf32>
    %c0_305 = arith.constant 0 : index
    %c112_306 = arith.constant 112 : index
    %232 = vector.load %arg18[%c0_305, %c112_306] : memref<256x288xf32, #tpu.memory_space<vmem>>, vector<64x16xf32>
    tpu.vector_store %arg18[%c0_305, %c112_306], %231 {strides = array<i32>} : memref<256x288xf32, #tpu.memory_space<vmem>>, vector<64x16xf32>,
    %c3_307 = arith.constant 3 : index
    %c1_308 = arith.constant 1 : index
    %c1_309 = arith.constant 1 : index
    %c0_310 = arith.constant 0 : index
    %233 = vector.load %arg16[%c3_307, %c1_308, %c1_309, %c0_310] : memref<4x10x10x16xf32, #tpu.memory_space<vmem>>, vector<1x8x8x16xf32>
    %234 = vector.shape_cast %233 : vector<1x8x8x16xf32> to vector<8x8x16xf32>
    %235 = vector.shape_cast %234 : vector<8x8x16xf32> to vector<64x16xf32>
    %c0_311 = arith.constant 0 : index
    %c128_312 = arith.constant 128 : index
    %236 = vector.load %arg18[%c0_311, %c128_312] : memref<256x288xf32, #tpu.memory_space<vmem>>, vector<64x16xf32>
    tpu.vector_store %arg18[%c0_311, %c128_312], %235 {strides = array<i32>} : memref<256x288xf32, #tpu.memory_space<vmem>>, vector<64x16xf32>,
    %c0_313 = arith.constant 0 : index
    %c0_314 = arith.constant 0 : index
    %237 = vector.load %arg18[%c0_313, %c0_314] : memref<256x288xf32, #tpu.memory_space<vmem>>, vector<64x144xf32>
    %c0_315 = arith.constant 0 : index
    %c0_316 = arith.constant 0 : index
    %238 = vector.load %arg6[%c0_315, %c0_316] : memref<144x32xf32, #tpu.memory_space<vmem>>, vector<144x32xf32>
    %cst_317 = arith.constant dense<0.000000e+00> : vector<64x32xf32>
    %239 = tpu.matmul %237, %238, %cst_317 {dimension_numbers = #tpu.dot_dimension_numbers<[1], [0], [0], [1], [0, 0, 1, 1], [], []>, precision = #tpu.contract_precision<fp32>} : vector<64x144xf32>, vector<144x32xf32>, vector<64x32xf32> -> vector<64x32xf32>
    %c0_318 = arith.constant 0 : index
    %c0_319 = arith.constant 0 : index
    %240 = vector.load %arg7[%c0_318, %c0_319] : memref<1x32xf32, #tpu.memory_space<vmem>>, vector<1x32xf32>
    %241 = vector.broadcast %240 : vector<1x32xf32> to vector<64x32xf32>
    %242 = arith.addf %239, %241 : vector<64x32xf32>
    %cst_320 = arith.constant 0.000000e+00 : f32
    %243 = vector.broadcast %cst_320 : f32 to vector<10x10x32xf32>
    %c0_321 = arith.constant 0 : index
    %c0_322 = arith.constant 0 : index
    %c0_323 = arith.constant 0 : index
    %244 = vector.load %arg17[%c0_321, %c0_322, %c0_323] : memref<10x10x32xf32, #tpu.memory_space<vmem>>, vector<10x10x32xf32>
    tpu.vector_store %arg17[%c0_321, %c0_322, %c0_323], %243 {strides = array<i32>} : memref<10x10x32xf32, #tpu.memory_space<vmem>>, vector<10x10x32xf32>,
    %245 = vector.shape_cast %242 : vector<64x32xf32> to vector<8x8x32xf32>
    %c1_324 = arith.constant 1 : index
    %c1_325 = arith.constant 1 : index
    %c0_326 = arith.constant 0 : index
    %246 = vector.load %arg17[%c1_324, %c1_325, %c0_326] : memref<10x10x32xf32, #tpu.memory_space<vmem>>, vector<8x8x32xf32>
    tpu.vector_store %arg17[%c1_324, %c1_325, %c0_326], %245 {strides = array<i32>} : memref<10x10x32xf32, #tpu.memory_space<vmem>>, vector<8x8x32xf32>,
    %c0_327 = arith.constant 0 : index
    %c0_328 = arith.constant 0 : index
    %c0_329 = arith.constant 0 : index
    %247 = vector.load %arg17[%c0_327, %c0_328, %c0_329] : memref<10x10x32xf32, #tpu.memory_space<vmem>>, vector<8x8x32xf32>
    %248 = vector.shape_cast %247 : vector<8x8x32xf32> to vector<64x32xf32>
    %c0_330 = arith.constant 0 : index
    %c0_331 = arith.constant 0 : index
    %249 = vector.load %arg18[%c0_330, %c0_331] : memref<256x288xf32, #tpu.memory_space<vmem>>, vector<64x32xf32>
    tpu.vector_store %arg18[%c0_330, %c0_331], %248 {strides = array<i32>} : memref<256x288xf32, #tpu.memory_space<vmem>>, vector<64x32xf32>,
    %c0_332 = arith.constant 0 : index
    %c1_333 = arith.constant 1 : index
    %c0_334 = arith.constant 0 : index
    %250 = vector.load %arg17[%c0_332, %c1_333, %c0_334] : memref<10x10x32xf32, #tpu.memory_space<vmem>>, vector<8x8x32xf32>
    %251 = vector.shape_cast %250 : vector<8x8x32xf32> to vector<64x32xf32>
    %c0_335 = arith.constant 0 : index
    %c32_336 = arith.constant 32 : index
    %252 = vector.load %arg18[%c0_335, %c32_336] : memref<256x288xf32, #tpu.memory_space<vmem>>, vector<64x32xf32>
    tpu.vector_store %arg18[%c0_335, %c32_336], %251 {strides = array<i32>} : memref<256x288xf32, #tpu.memory_space<vmem>>, vector<64x32xf32>,
    %c0_337 = arith.constant 0 : index
    %c2_338 = arith.constant 2 : index
    %c0_339 = arith.constant 0 : index
    %253 = vector.load %arg17[%c0_337, %c2_338, %c0_339] : memref<10x10x32xf32, #tpu.memory_space<vmem>>, vector<8x8x32xf32>
    %254 = vector.shape_cast %253 : vector<8x8x32xf32> to vector<64x32xf32>
    %c0_340 = arith.constant 0 : index
    %c64_341 = arith.constant 64 : index
    %255 = vector.load %arg18[%c0_340, %c64_341] : memref<256x288xf32, #tpu.memory_space<vmem>>, vector<64x32xf32>
    tpu.vector_store %arg18[%c0_340, %c64_341], %254 {strides = array<i32>} : memref<256x288xf32, #tpu.memory_space<vmem>>, vector<64x32xf32>,
    %c1_342 = arith.constant 1 : index
    %c0_343 = arith.constant 0 : index
    %c0_344 = arith.constant 0 : index
    %256 = vector.load %arg17[%c1_342, %c0_343, %c0_344] : memref<10x10x32xf32, #tpu.memory_space<vmem>>, vector<8x8x32xf32>
    %257 = vector.shape_cast %256 : vector<8x8x32xf32> to vector<64x32xf32>
    %c0_345 = arith.constant 0 : index
    %c96_346 = arith.constant 96 : index
    %258 = vector.load %arg18[%c0_345, %c96_346] : memref<256x288xf32, #tpu.memory_space<vmem>>, vector<64x32xf32>
    tpu.vector_store %arg18[%c0_345, %c96_346], %257 {strides = array<i32>} : memref<256x288xf32, #tpu.memory_space<vmem>>, vector<64x32xf32>,
    %c1_347 = arith.constant 1 : index
    %c1_348 = arith.constant 1 : index
    %c0_349 = arith.constant 0 : index
    %259 = vector.load %arg17[%c1_347, %c1_348, %c0_349] : memref<10x10x32xf32, #tpu.memory_space<vmem>>, vector<8x8x32xf32>
    %260 = vector.shape_cast %259 : vector<8x8x32xf32> to vector<64x32xf32>
    %c0_350 = arith.constant 0 : index
    %c128_351 = arith.constant 128 : index
    %261 = vector.load %arg18[%c0_350, %c128_351] : memref<256x288xf32, #tpu.memory_space<vmem>>, vector<64x32xf32>
    tpu.vector_store %arg18[%c0_350, %c128_351], %260 {strides = array<i32>} : memref<256x288xf32, #tpu.memory_space<vmem>>, vector<64x32xf32>,
    %c1_352 = arith.constant 1 : index
    %c2_353 = arith.constant 2 : index
    %c0_354 = arith.constant 0 : index
    %262 = vector.load %arg17[%c1_352, %c2_353, %c0_354] : memref<10x10x32xf32, #tpu.memory_space<vmem>>, vector<8x8x32xf32>
    %263 = vector.shape_cast %262 : vector<8x8x32xf32> to vector<64x32xf32>
    %c0_355 = arith.constant 0 : index
    %c160 = arith.constant 160 : index
    %264 = vector.load %arg18[%c0_355, %c160] : memref<256x288xf32, #tpu.memory_space<vmem>>, vector<64x32xf32>
    tpu.vector_store %arg18[%c0_355, %c160], %263 {strides = array<i32>} : memref<256x288xf32, #tpu.memory_space<vmem>>, vector<64x32xf32>,
    %c2_356 = arith.constant 2 : index
    %c0_357 = arith.constant 0 : index
    %c0_358 = arith.constant 0 : index
    %265 = vector.load %arg17[%c2_356, %c0_357, %c0_358] : memref<10x10x32xf32, #tpu.memory_space<vmem>>, vector<8x8x32xf32>
    %266 = vector.shape_cast %265 : vector<8x8x32xf32> to vector<64x32xf32>
    %c0_359 = arith.constant 0 : index
    %c192_360 = arith.constant 192 : index
    %267 = vector.load %arg18[%c0_359, %c192_360] : memref<256x288xf32, #tpu.memory_space<vmem>>, vector<64x32xf32>
    tpu.vector_store %arg18[%c0_359, %c192_360], %266 {strides = array<i32>} : memref<256x288xf32, #tpu.memory_space<vmem>>, vector<64x32xf32>,
    %c2_361 = arith.constant 2 : index
    %c1_362 = arith.constant 1 : index
    %c0_363 = arith.constant 0 : index
    %268 = vector.load %arg17[%c2_361, %c1_362, %c0_363] : memref<10x10x32xf32, #tpu.memory_space<vmem>>, vector<8x8x32xf32>
    %269 = vector.shape_cast %268 : vector<8x8x32xf32> to vector<64x32xf32>
    %c0_364 = arith.constant 0 : index
    %c224 = arith.constant 224 : index
    %270 = vector.load %arg18[%c0_364, %c224] : memref<256x288xf32, #tpu.memory_space<vmem>>, vector<64x32xf32>
    tpu.vector_store %arg18[%c0_364, %c224], %269 {strides = array<i32>} : memref<256x288xf32, #tpu.memory_space<vmem>>, vector<64x32xf32>,
    %c2_365 = arith.constant 2 : index
    %c2_366 = arith.constant 2 : index
    %c0_367 = arith.constant 0 : index
    %271 = vector.load %arg17[%c2_365, %c2_366, %c0_367] : memref<10x10x32xf32, #tpu.memory_space<vmem>>, vector<8x8x32xf32>
    %272 = vector.shape_cast %271 : vector<8x8x32xf32> to vector<64x32xf32>
    %c0_368 = arith.constant 0 : index
    %c256 = arith.constant 256 : index
    %273 = vector.load %arg18[%c0_368, %c256] : memref<256x288xf32, #tpu.memory_space<vmem>>, vector<64x32xf32>
    tpu.vector_store %arg18[%c0_368, %c256], %272 {strides = array<i32>} : memref<256x288xf32, #tpu.memory_space<vmem>>, vector<64x32xf32>,
    %c0_369 = arith.constant 0 : index
    %c0_370 = arith.constant 0 : index
    %274 = vector.load %arg18[%c0_369, %c0_370] : memref<256x288xf32, #tpu.memory_space<vmem>>, vector<64x288xf32>
    %c0_371 = arith.constant 0 : index
    %c0_372 = arith.constant 0 : index
    %275 = vector.load %arg8[%c0_371, %c0_372] : memref<288x32xf32, #tpu.memory_space<vmem>>, vector<288x32xf32>
    %cst_373 = arith.constant dense<0.000000e+00> : vector<64x32xf32>
    %276 = tpu.matmul %274, %275, %cst_373 {dimension_numbers = #tpu.dot_dimension_numbers<[1], [0], [0], [1], [0, 0, 1, 1], [], []>, precision = #tpu.contract_precision<fp32>} : vector<64x288xf32>, vector<288x32xf32>, vector<64x32xf32> -> vector<64x32xf32>
    %c0_374 = arith.constant 0 : index
    %c0_375 = arith.constant 0 : index
    %277 = vector.load %arg9[%c0_374, %c0_375] : memref<1x32xf32, #tpu.memory_space<vmem>>, vector<1x32xf32>
    %278 = vector.broadcast %277 : vector<1x32xf32> to vector<64x32xf32>
    %279 = arith.addf %276, %278 : vector<64x32xf32>
    %c0_376 = arith.constant 0 : index
    %c0_377 = arith.constant 0 : index
    %280 = vector.load %arg10[%c0_376, %c0_377] : memref<32x64xf32, #tpu.memory_space<vmem>>, vector<32x64xf32>
    %cst_378 = arith.constant dense<0.000000e+00> : vector<64x64xf32>
    %281 = tpu.matmul %279, %280, %cst_378 {dimension_numbers = #tpu.dot_dimension_numbers<[1], [0], [0], [1], [0, 0, 1, 1], [], []>, precision = #tpu.contract_precision<fp32>} : vector<64x32xf32>, vector<32x64xf32>, vector<64x64xf32> -> vector<64x64xf32>
    %c0_379 = arith.constant 0 : index
    %c0_380 = arith.constant 0 : index
    %282 = vector.load %arg11[%c0_379, %c0_380] : memref<1x64xf32, #tpu.memory_space<vmem>>, vector<1x64xf32>
    %283 = vector.broadcast %282 : vector<1x64xf32> to vector<64x64xf32>
    %284 = arith.addf %281, %283 : vector<64x64xf32>
    %285 = arith.addf %284, %6 : vector<64x64xf32>
    %c0_381 = arith.constant 0 : index
    %c0_382 = arith.constant 0 : index
    %286 = vector.load %arg12[%c0_381, %c0_382] : memref<64x128xf32, #tpu.memory_space<vmem>>, vector<64x128xf32>
    %cst_383 = arith.constant dense<0.000000e+00> : vector<64x128xf32>
    %287 = tpu.matmul %285, %286, %cst_383 {dimension_numbers = #tpu.dot_dimension_numbers<[1], [0], [0], [1], [0, 0, 1, 1], [], []>, precision = #tpu.contract_precision<fp32>} : vector<64x64xf32>, vector<64x128xf32>, vector<64x128xf32> -> vector<64x128xf32>
    %c0_384 = arith.constant 0 : index
    %c0_385 = arith.constant 0 : index
    %288 = vector.load %arg13[%c0_384, %c0_385] : memref<1x128xf32, #tpu.memory_space<vmem>>, vector<1x128xf32>
    %289 = vector.broadcast %288 : vector<1x128xf32> to vector<64x128xf32>
    %290 = arith.addf %287, %289 : vector<64x128xf32>
    %cst_386 = arith.constant 0.000000e+00 : f32
    %291 = vector.broadcast %cst_386 : f32 to vector<64x128xf32>
    %292 = arith.subf %291, %290 : vector<64x128xf32>
    %293 = math.exp %292 : vector<64x128xf32>
    %cst_387 = arith.constant 1.000000e+00 : f32
    %294 = vector.broadcast %cst_387 : f32 to vector<64x128xf32>
    %295 = arith.addf %294, %293 : vector<64x128xf32>
    %296 = tpu.reciprocal %295 {approx = true} : vector<64x128xf32> -> vector<64x128xf32>
    %297 = arith.addf %296, %1 : vector<64x128xf32>
    %c0_388 = arith.constant 0 : index
    %c0_389 = arith.constant 0 : index
    %c0_390 = arith.constant 0 : index
    %298 = vector.load %arg14[%c0_388, %c0_389, %c0_390] : memref<1x64x128xf32, #tpu.memory_space<vmem>>, vector<1x64x128xf32>
    %299 = vector.shape_cast %298 : vector<1x64x128xf32> to vector<64x128xf32>
    %300 = vector.shape_cast %297 : vector<64x128xf32> to vector<1x64x128xf32>
    tpu.vector_store %arg14[%c0_388, %c0_389, %c0_390], %300 {strides = array<i32>} : memref<1x64x128xf32, #tpu.memory_space<vmem>>, vector<1x64x128xf32>,
    return
  }
  func.func @transform_0(%arg0: i32) -> (i32, i32, i32) {
    %c0_i32 = arith.constant 0 : i32
    %c0_i32_0 = arith.constant 0 : i32
    %c0_i32_1 = arith.constant 0 : i32
    return %arg0, %c0_i32, %c0_i32_0 : i32, i32, i32
  }
  func.func @transform_1(%arg0: i32) -> (i32, i32) {
    %c0_i32 = arith.constant 0 : i32
    %c0_i32_0 = arith.constant 0 : i32
    %c0_i32_1 = arith.constant 0 : i32
    return %c0_i32, %c0_i32_0 : i32, i32
  }
  func.func @transform_2(%arg0: i32) -> (i32, i32) {
    %c0_i32 = arith.constant 0 : i32
    %c0_i32_0 = arith.constant 0 : i32
    %c0_i32_1 = arith.constant 0 : i32
    return %c0_i32, %c0_i32_0 : i32, i32
  }
  func.func @transform_3(%arg0: i32) -> (i32, i32) {
    %c0_i32 = arith.constant 0 : i32
    %c0_i32_0 = arith.constant 0 : i32
    %c0_i32_1 = arith.constant 0 : i32
    return %c0_i32, %c0_i32_0 : i32, i32
  }
  func.func @transform_4(%arg0: i32) -> (i32, i32) {
    %c0_i32 = arith.constant 0 : i32
    %c0_i32_0 = arith.constant 0 : i32
    %c0_i32_1 = arith.constant 0 : i32
    return %c0_i32, %c0_i32_0 : i32, i32
  }
  func.func @transform_5(%arg0: i32) -> (i32, i32) {
    %c0_i32 = arith.constant 0 : i32
    %c0_i32_0 = arith.constant 0 : i32
    %c0_i32_1 = arith.constant 0 : i32
    return %c0_i32, %c0_i32_0 : i32, i32
  }
  func.func @transform_6(%arg0: i32) -> (i32, i32) {
    %c0_i32 = arith.constant 0 : i32
    %c0_i32_0 = arith.constant 0 : i32
    %c0_i32_1 = arith.constant 0 : i32
    return %c0_i32, %c0_i32_0 : i32, i32
  }
  func.func @transform_7(%arg0: i32) -> (i32, i32) {
    %c0_i32 = arith.constant 0 : i32
    %c0_i32_0 = arith.constant 0 : i32
    %c0_i32_1 = arith.constant 0 : i32
    return %c0_i32, %c0_i32_0 : i32, i32
  }
  func.func @transform_8(%arg0: i32) -> (i32, i32) {
    %c0_i32 = arith.constant 0 : i32
    %c0_i32_0 = arith.constant 0 : i32
    %c0_i32_1 = arith.constant 0 : i32
    return %c0_i32, %c0_i32_0 : i32, i32
  }
  func.func @transform_9(%arg0: i32) -> (i32, i32) {
    %c0_i32 = arith.constant 0 : i32
    %c0_i32_0 = arith.constant 0 : i32
    %c0_i32_1 = arith.constant 0 : i32
    return %c0_i32, %c0_i32_0 : i32, i32
  }
  func.func @transform_10(%arg0: i32) -> (i32, i32) {
    %c0_i32 = arith.constant 0 : i32
    %c0_i32_0 = arith.constant 0 : i32
    %c0_i32_1 = arith.constant 0 : i32
    return %c0_i32, %c0_i32_0 : i32, i32
  }
  func.func @transform_11(%arg0: i32) -> (i32, i32) {
    %c0_i32 = arith.constant 0 : i32
    %c0_i32_0 = arith.constant 0 : i32
    %c0_i32_1 = arith.constant 0 : i32
    return %c0_i32, %c0_i32_0 : i32, i32
  }
  func.func @transform_12(%arg0: i32) -> (i32, i32) {
    %c0_i32 = arith.constant 0 : i32
    %c0_i32_0 = arith.constant 0 : i32
    %c0_i32_1 = arith.constant 0 : i32
    return %c0_i32, %c0_i32_0 : i32, i32
  }
  func.func @transform_13(%arg0: i32) -> (i32, i32, i32) {
    %c0_i32 = arith.constant 0 : i32
    %c0_i32_0 = arith.constant 0 : i32
    %c0_i32_1 = arith.constant 0 : i32
    return %arg0, %c0_i32, %c0_i32_0 : i32, i32, i32
  }
}

</mosaic_0001>

<bundles_post_ra>
// kernel: tile.18
= control target key start
LH: loop header
LB: loop body
LE: loop exit
PB: predicated region body
PF: predicated region fallthrough
CT: control target
= control target key end

     0   :  { %s22_s0 = inlined_call_operand.vmem [shape: f32[16], index: 0, kind: input, shape index: {}]   ;;  %s23_s1 = inlined_call_operand.vmem [shape: f32[4,16], index: 1, kind: output, shape index: {}]  }
   0x1   :  { %v4_v0 = vld [vmem:[%s22_s0] ss:$0 sm:$0xff] }
   0x2   :  { %5 = vst [vmem:[%s23_s1] sm:$0xf] %v4_v0 }

// kernel: tile.19
= control target key start
LH: loop header
LB: loop body
LE: loop exit
PB: predicated region body
PF: predicated region fallthrough
CT: control target
= control target key end

     0   :  { %s37_s8 = smov 16   ;;  %s38_s9 = smov 32   ;;  %vm7_vm0 = vcmask 130048   ;;  %vm13_vm1 = vcmask 523648   ;;  %vm19_vm2 = vcmask 392448   ;;  %vm25_vm3 = vcmask 261248   ;;  %s55_s0 = inlined_call_operand.vmem [shape: f32[4,16], index: 0, kind: input, shape index: {}]   ;;  %s56_s1 = inlined_call_operand.vmem [shape: f32[1,64], index: 1, kind: output, shape index: {}]  }
   0x1   :  { %v4_v0 = vld [vmem:[%s55_s0] sm:$0xf]  ;;  %s36_s0 = smov 48  }
   0x2   :  { %5 = vst [vmem:[#allocation1] sm:$0xf] %v4_v0 }
   0x9   :  { %v10_v1 = vld [vmem:[#allocation1 + $0x3] sm:$0x1]   ;;  %v22_v2 = vld [vmem:[#allocation1 + $0x1] sm:$0x1]   ;;  %v16_v3 = vld [vmem:[#allocation1 + $0x2] sm:$0x1]  }
   0xa   :  { %11 = vrot.lane.b32.xlu0 %v10_v1, %s36_s0  ;;  %23 = vrot.lane.b32.xlu1 %v22_v2, %s37_s8  ;;  %v6_v4 = vld [vmem:[#allocation1] sm:$0x1]  }
   0xb   :  { %8 = vst.msk [vmem:[#allocation0] sm:$0x1] %vm7_vm0, %v6_v4  }
  0x12   :  { %17 = vrot.lane.b32.xlu0 %v16_v3, %s38_s9 }
  0x7c   :  { %v12_v5 = vpop.permute.xlu0 %11   ;;  %v24_v6 = vpop.permute.xlu1 %23  }
  0x7d   :  { %14 = vst.msk [vmem:[#allocation0] sm:$0x1] %vm13_vm1, %v12_v5  }
  0x84   :  { %v18_v7 = vpop.permute.xlu0 %17  }
  0x85   :  { %20 = vst.msk [vmem:[#allocation0] sm:$0x1] %vm19_vm2, %v18_v7  }
  0x86   :  { %26 = vst.msk [vmem:[#allocation0] sm:$0x1] %vm25_vm3, %v24_v6  }
  0x8d   :  { %v29_v8 = vld [vmem:[#allocation0] sm:$0x1] }
  0x8e   :  { %32 = vst [vmem:[%s56_s1] sm:$0x1] %v29_v8 }

// kernel: tile.28
= control target key start
LH: loop header
LB: loop body
LE: loop exit
PB: predicated region body
PF: predicated region fallthrough
CT: control target
= control target key end

     0   :  { %s22_s0 = inlined_call_operand.vmem [shape: f32[32], index: 0, kind: input, shape index: {}]   ;;  %s23_s1 = inlined_call_operand.vmem [shape: f32[4,32], index: 1, kind: output, shape index: {}]  }
   0x1   :  { %v4_v0 = vld [vmem:[%s22_s0] ss:$0 sm:$0xff] }
   0x2   :  { %5 = vst [vmem:[%s23_s1] sm:$0xf] %v4_v0 }

// kernel: tile.29
= control target key start
LH: loop header
LB: loop body
LE: loop exit
PB: predicated region body
PF: predicated region fallthrough
CT: control target
= control target key end

     0   :  { %s37_s8 = smov 32   ;;  %s38_s9 = smov 64   ;;  %vm7_vm0 = vcmask 261120   ;;  %vm13_vm1 = vcmask 1048320   ;;  %vm19_vm2 = vcmask 785920   ;;  %vm25_vm3 = vcmask 523520   ;;  %s55_s0 = inlined_call_operand.vmem [shape: f32[4,32], index: 0, kind: input, shape index: {}]   ;;  %s56_s1 = inlined_call_operand.vmem [shape: f32[1,128], index: 1, kind: output, shape index: {}]  }
   0x1   :  { %v4_v0 = vld [vmem:[%s55_s0] sm:$0xf]  ;;  %s36_s0 = smov 96  }
   0x2   :  { %5 = vst [vmem:[#allocation1] sm:$0xf] %v4_v0 }
   0x9   :  { %v10_v1 = vld [vmem:[#allocation1 + $0x3] sm:$0x1]   ;;  %v22_v2 = vld [vmem:[#allocation1 + $0x1] sm:$0x1]   ;;  %v16_v3 = vld [vmem:[#allocation1 + $0x2] sm:$0x1]  }
   0xa   :  { %11 = vrot.lane.b32.xlu0 %v10_v1, %s36_s0  ;;  %23 = vrot.lane.b32.xlu1 %v22_v2, %s37_s8  ;;  %v6_v4 = vld [vmem:[#allocation1] sm:$0x1]  }
   0xb   :  { %8 = vst.msk [vmem:[#allocation0] sm:$0x1] %vm7_vm0, %v6_v4  }
  0x12   :  { %17 = vrot.lane.b32.xlu0 %v16_v3, %s38_s9 }
  0x7c   :  { %v12_v5 = vpop.permute.xlu0 %11   ;;  %v24_v6 = vpop.permute.xlu1 %23  }
  0x7d   :  { %14 = vst.msk [vmem:[#allocation0] sm:$0x1] %vm13_vm1, %v12_v5  }
  0x84   :  { %v18_v7 = vpop.permute.xlu0 %17  }
  0x85   :  { %20 = vst.msk [vmem:[#allocation0] sm:$0x1] %vm19_vm2, %v18_v7  }
  0x86   :  { %26 = vst.msk [vmem:[#allocation0] sm:$0x1] %vm25_vm3, %v24_v6  }
  0x8d   :  { %v29_v8 = vld [vmem:[#allocation0] sm:$0x1] }
  0x8e   :  { %32 = vst [vmem:[%s56_s1] sm:$0x1] %v29_v8 }

// kernel: esa_forward.1
= control target key start
LH: loop header
LB: loop body
LE: loop exit
PB: predicated region body
PF: predicated region fallthrough
CT: control target
= control target key end

     0   :  { %s9977_s25 = smov 0   ;;  %s15895_s0 = inlined_call_operand.vmem [shape: f32[2,64,128], index: 0, kind: input, shape index: {}]   ;;  %s15896_s1 = inlined_call_operand.vmem [shape: f32[128,64], index: 1, kind: input, shape index: {}]   ;;  %s15897_s2 = inlined_call_operand.vmem [shape: f32[1,64], index: 2, kind: input, shape index: {}]   ;;  %s15898_s3 = inlined_call_operand.vmem [shape: f32[144,16], index: 3, kind: input, shape index: {}]   ;;  %s15899_s4 = inlined_call_operand.vmem [shape: f32[1,16], index: 4, kind: input, shape index: {}]   ;;  %s15900_s5 = inlined_call_operand.vmem [shape: f32[144,32], index: 5, kind: input, shape index: {}]   ;;  %s15901_s6 = inlined_call_operand.vmem [shape: f32[1,32], index: 6, kind: input, shape index: {}]   ;;  %s15902_s7 = inlined_call_operand.vmem [shape: f32[288,32], index: 7, kind: input, shape index: {}]   ;;  %s15903_s8 = inlined_call_operand.vmem [shape: f32[1,32], index: 8, kind: input, shape index: {}]   ;;  %s15904_s9 = inlined_call_operand.vmem [shape: f32[32,64], index: 9, kind: input, shape index: {}]   ;;  %s15905_s10 = inlined_call_operand.vmem [shape: f32[1,64], index: 10, kind: input, shape index: {}]   ;;  %s15906_s11 = inlined_call_operand.vmem [shape: f32[64,128], index: 11, kind: input, shape index: {}]   ;;  %s15907_s12 = inlined_call_operand.vmem [shape: f32[1,128], index: 12, kind: input, shape index: {}]   ;;  %s15908_s13 = inlined_call_operand.vmem [shape: f32[2,64,128], index: 13, kind: output, shape index: {}]  }
   0x1 LB: > { %s9815_s26 = sadd.s32 4294967295, %s9897_s25   ;;  %p9819_p0 = scmp.ge.s32.totalorder %s9897_s25, 1  ;;  %s9897_s25 = sphi %s9977_s25, %s23_s25  }
   0x2   : > { %p387_p1 = scmp.lt.s32.totalorder %s9897_s25, 3 }
   0x4   : > { %p388_p2 = pnand %p9819_p0, %p387_p1 }
   0x6   : > { %391 = sbr.rel (%p388_p2) target bundleno = 3091 (0xc13), region = 72 }
   0xb   : > { %v464_v0 = vld [vmem:[%s15896_s1 + $0x78] sm:$0xff]  ;;  %v463_v1 = vld [vmem:[%s15896_s1 + $0x70] sm:$0xff]  ;;  %v462_v2 = vld [vmem:[%s15896_s1 + $0x68] sm:$0xff]  ;;  %p9996_p3 = scmp.lt.s32.totalorder %s9815_s26, 1  ;;  %vm1027_vm0 = vcmask 130048   ;;  %vm1029_vm1 = vcmask 123904  }
   0xc   : > { %v10000_v3 = vand.u32 4294901760, %v464_v0  ;;  %v10002_v4 = vand.u32 4294901760, %v463_v1  ;;  %v10004_v5 = vand.u32 4294901760, %v462_v2  ;;  %v461_v6 = vld [vmem:[%s15896_s1 + $0x60] sm:$0xff]  ;;  %v460_v7 = vld [vmem:[%s15896_s1 + $0x58] sm:$0xff]  ;;  %v459_v8 = vld [vmem:[%s15896_s1 + $0x50] sm:$0xff] }
   0xd   : > { %v10015_v9 = vand.u32 4294901760, %v461_v6  ;;  %v10017_v10 = vand.u32 4294901760, %v460_v7  ;;  %v10019_v11 = vand.u32 4294901760, %v459_v8  ;;  %v458_v12 = vld [vmem:[%s15896_s1 + $0x48] sm:$0xff]  ;;  %v457_v13 = vld [vmem:[%s15896_s1 + $0x40] sm:$0xff]  ;;  %v456_v18 = vld [vmem:[%s15896_s1 + $0x38] sm:$0xff] }
   0xe   : > { %470 = vmatpush.msra.mxu0 %v10000_v3  ;;  %v10029_v14 = vsub.f32 %v464_v0, %v10000_v3  ;;  %v10032_v15 = vsub.f32 %v463_v1, %v10002_v4  ;;  %785 = vmatpush.msra.mxu3 %v10000_v3  ;;  %v10036_v16 = vsub.f32 %v462_v2, %v10004_v5  ;;  %v10038_v17 = vand.u32 4294901760, %v458_v12  ;;  %s16578_s26 = smov (!%p9996_p3, %s9815_s26), 1  ;;  %v455_v29 = vld [vmem:[%s15896_s1 + $0x30] sm:$0xff]  ;;  %v454_v34 = vld [vmem:[%s15896_s1 + $0x28] sm:$0xff]  ;;  %v453_v43 = vld [vmem:[%s15896_s1 + $0x20] sm:$0xff]  ;;  %s9900_s17 = smov 16  }
   0xf   : > { %v10044_v19 = vsub.f32 %v461_v6, %v10015_v9  ;;  %v10047_v20 = vsub.f32 %v460_v7, %v10017_v10  ;;  %v10049_v21 = vand.u32 4294901760, %v457_v13  ;;  %v10052_v22 = vsub.f32 %v459_v8, %v10019_v11  ;;  %s9826_s18 = sshll.u32 %s16578_s26, 6  ;;  %v452_v49 = vld [vmem:[%s15896_s1 + $0x18] sm:$0xff]  ;;  %v451_v55 = vld [vmem:[%s15896_s1 + $0x10] sm:$0xff]  ;;  %v450_v62 = vld [vmem:[%s15896_s1 + $0x8] sm:$0xff]  ;;  %s9901_s21 = smov 32  }
  0x10   : > { %472 = vmatpush.msra.mxu0 %v10002_v4  ;;  %697 = vmatpush.msra.mxu2 %v10029_v14  ;;  %v568_v23 = vand.u32 4294901760, %v10029_v14  ;;  %v574_v24 = vand.u32 4294901760, %v10032_v15  ;;  %v580_v25 = vand.u32 4294901760, %v10036_v16  ;;  %v10067_v27 = vand.u32 4294901760, %v456_v18  ;;  %s10122_s23 = scalar_lea.vmem %s15895_s0, %s9826_s18  ;;  %v449_v8 = vld [vmem:[%s15896_s1] sm:$0xff]  ;;  %s9902_s22 = smov 112  }
  0x11   : > { %787 = vmatpush.msra.mxu3 %v10002_v4  ;;  %v586_v26 = vand.u32 4294901760, %v10044_v19  ;;  %v10070_v28 = vsub.f32 %v458_v12, %v10038_v17  ;;  %v592_v33 = vand.u32 4294901760, %v10047_v20  ;;  %v598_v35 = vand.u32 4294901760, %v10052_v22  ;;  %v441_v56 = vld [vmem:[%s10122_s23] sm:$0xff]  ;;  %s9903_s24 = smov 80   ;;  %s9904_s27 = smov 96  }
  0x12   : > { %474 = vmatpush.msra.mxu0 %v10004_v5  ;;  %700 = vmatpush.msra.mxu2 %v10032_v15  ;;  %v569_v30 = vsub.f32 %v10029_v14, %v568_v23  ;;  %v575_v31 = vsub.f32 %v10032_v15, %v574_v24  ;;  %v581_v32 = vsub.f32 %v10036_v16, %v580_v25  ;;  %v10101_v40 = vand.u32 4294901760, %v455_v29  ;;  %v445_v14 = vld [vmem:[%s10122_s23 + $0x20] sm:$0xff]  ;;  %s9905_s28 = smov 64   ;;  %s9906_s29 = smov 48  }
  0x13   : > { %789 = vmatpush.msra.mxu3 %v10004_v5  ;;  %v10093_v36 = vsub.f32 %v457_v13, %v10049_v21  ;;  %v587_v39 = vsub.f32 %v10044_v19, %v586_v26  ;;  %v604_v41 = vand.u32 4294901760, %v10070_v28  ;;  %v10106_v42 = vsub.f32 %v456_v18, %v10067_v27 }
  0x14   : > { %476 = vmatpush.msra.mxu0 %v10015_v9  ;;  %v570_v37 = vand.u32 4294901760, %v569_v30  ;;  %703 = vmatpush.msra.mxu2 %v10036_v16  ;;  %v576_v38 = vand.u32 4294901760, %v575_v31  ;;  %v582_v44 = vand.u32 4294901760, %v581_v32  ;;  %v593_v45 = vsub.f32 %v10047_v20, %v592_v33  ;;  %v442_v30 = vld [vmem:[%s10122_s23 + $0x8] sm:$0xff] }
  0x15   : > { %791 = vmatpush.msra.mxu3 %v10015_v9  ;;  %v10115_v46 = vand.u32 4294901760, %v454_v34  ;;  %v599_v47 = vsub.f32 %v10052_v22, %v598_v35  ;;  %v610_v48 = vand.u32 4294901760, %v10093_v36  ;;  %v588_v50 = vand.u32 4294901760, %v587_v39  ;;  %v446_v16 = vld [vmem:[%s10122_s23 + $0x28] sm:$0xff] }
  0x16   : > { %478 = vmatpush.msra.mxu0 %v10017_v10  ;;  %571 = vmatpush.msra.mxu1 %v570_v37  ;;  %v10134_v51 = vand.u32 4294901760, %v453_v43  ;;  %v10137_v52 = vsub.f32 %v455_v29, %v10101_v40  ;;  %v605_v53 = vsub.f32 %v10070_v28, %v604_v41  ;;  %v616_v54 = vand.u32 4294901760, %v10106_v42 }
  0x17   : > { %706 = vmatpush.msra.mxu2 %v10044_v19  ;;  %793 = vmatpush.msra.mxu3 %v10017_v10  ;;  %v594_v57 = vand.u32 4294901760, %v593_v45  ;;  %v10150_v58 = vand.u32 4294901760, %v452_v49  ;;  %v10153_v59 = vsub.f32 %v454_v34, %v10115_v46  ;;  %v600_v60 = vand.u32 4294901760, %v599_v47 }
  0x18   : > { %480 = vmatpush.msra.mxu0 %v10019_v11  ;;  %577 = vmatpush.msra.mxu1 %v576_v38  ;;  %v611_v61 = vsub.f32 %v10093_v36, %v610_v48  ;;  %v10164_v63 = vand.u32 4294901760, %v451_v55  ;;  %v622_v0 = vand.u32 4294901760, %v10137_v52  ;;  %v10168_v1 = vsub.f32 %v453_v43, %v10134_v51 }
  0x19   : > { %709 = vmatpush.msra.mxu2 %v10047_v20  ;;  %795 = vmatpush.msra.mxu3 %v10019_v11  ;;  %v10170_v2 = vand.u32 4294901760, %v441_v56  ;;  %v606_v6 = vand.u32 4294901760, %v605_v53  ;;  %v617_v7 = vsub.f32 %v10106_v42, %v616_v54  ;;  %v10181_v12 = vand.u32 4294901760, %v450_v62  ;;  %v447_v20 = vld [vmem:[%s10122_s23 + $0x30] sm:$0xff] }
  0x1a   : > { %482 = vmatpush.msra.mxu0 %v10038_v17  ;;  %583 = vmatpush.msra.mxu1 %v582_v44  ;;  %v628_v13 = vand.u32 4294901760, %v10153_v59  ;;  %v10185_v18 = vsub.f32 %v452_v49, %v10150_v58  ;;  %v612_v31 = vand.u32 4294901760, %v611_v61  ;;  %v623_v32 = vsub.f32 %v10137_v52, %v622_v0 }
  0x1b   : > { %712 = vmatpush.msra.mxu2 %v10052_v22  ;;  %797 = vmatpush.msra.mxu3 %v10038_v17  ;;  %v10188_v29 = vsub.f32 %v441_v56, %v10170_v2  ;;  %v10197_v34 = vand.u32 4294901760, %v449_v8  ;;  %v634_v37 = vand.u32 4294901760, %v10168_v1  ;;  %v10201_v38 = vsub.f32 %v451_v55, %v10164_v63 }
  0x1c   : > { %484 = vmatpush.msra.mxu0 %v10049_v21  ;;  %589 = vmatpush.msra.mxu1 %v588_v50  ;;  %v10206_v43 = vand.u32 4294901760, %v442_v30  ;;  %v618_v44 = vand.u32 4294901760, %v617_v7  ;;  %v629_v45 = vsub.f32 %v10153_v59, %v628_v13  ;;  %v15911_v47 = vand.u32 4294901760, %v10185_v18  ;;  %v443_v7 = vld [vmem:[%s10122_s23 + $0x10] sm:$0xff] }
  0x1d   : > { %715 = vmatpush.msra.mxu2 %v10070_v28  ;;  %799 = vmatpush.msra.mxu3 %v10049_v21  ;;  %v503_v39 = vand.u32 4294901760, %v10188_v29  ;;  %v10214_v49 = vsub.f32 %v450_v62, %v10181_v12  ;;  %v624_v50 = vand.u32 4294901760, %v623_v32  ;;  %v635_v53 = vsub.f32 %v10168_v1, %v634_v37  ;;  %v448_v28 = vld [vmem:[%s10122_s23 + $0x38] sm:$0xff] }
  0x1e   : > { %486 = vmatpush.msra.mxu0 %v10067_v27  ;;  %595 = vmatpush.msra.mxu1 %v594_v57  ;;  %v15909_v55 = vand.u32 4294901760, %v10201_v38  ;;  %v10224_v56 = vsub.f32 %v449_v8, %v10197_v34  ;;  %v630_v61 = vand.u32 4294901760, %v629_v45  ;;  %v641_v62 = vsub.f32 %v10185_v18, %v15911_v47  ;;  %v444_v47 = vld [vmem:[%s10122_s23 + $0x18] sm:$0xff] }
  0x1f   : > { %718 = vmatpush.msra.mxu2 %v10093_v36  ;;  %801 = vmatpush.msra.mxu3 %v10067_v27  ;;  %v504_v57 = vsub.f32 %v10188_v29, %v503_v39  ;;  %v636_v8 = vand.u32 4294901760, %v635_v53  ;;  %v10245_v45 = vand.u32 4294901760, %v443_v7  ;;  %v10293_v19 = vand.u32 4294901760, %v446_v16 }
  0x20   : > { %488 = vmatpush.msra.mxu0 %v10101_v40  ;;  %601 = vmatpush.msra.mxu1 %v600_v60  ;;  %v510_v60 = vsub.f32 %v442_v30, %v10206_v43  ;;  %v647_v30 = vsub.f32 %v10201_v38, %v15909_v55  ;;  %v549_v22 = vand.u32 4294901760, %v447_v20  ;;  %v557_v36 = vand.u32 4294901760, %v448_v28 }
  0x21   : > { %721 = vmatpush.msra.mxu2 %v10106_v42  ;;  %803 = vmatpush.msra.mxu3 %v10101_v40  ;;  %v505_v32 = vand.u32 4294901760, %v504_v57  ;;  %vm1283_vm2 = vcmask 261248   ;;  %vm1332_vm3 = vcmask 392448   ;;  %vm1381_vm4 = vcmask 523648  }
  0x22   : > { %490 = vmatpush.msra.mxu0 %v10115_v46  ;;  %607 = vmatpush.msra.mxu1 %v606_v6  ;;  %v15910_v6 = vand.u32 4294901760, %v10214_v49  ;;  %v648_v57 = vand.u32 4294901760, %v647_v30  ;;  %vm1430_vm5 = vcmask 654848   ;;  %vm1479_vm6 = vcmask 786048  }
  0x23   : > { %724 = vmatpush.msra.mxu2 %v10137_v52  ;;  %805 = vmatpush.msra.mxu3 %v10115_v46  ;;  %vm1528_vm7 = vcmask 917248   ;;  %vm1577_vm8 = vcmask 1048448   ;;  %vm6794_vm9 = vcmask 261120   ;;  %vm6796_vm10 = vcmask 254976  }
  0x24   : > { %492 = vmatpush.msra.mxu0 %v10134_v51  ;;  %613 = vmatpush.msra.mxu1 %v612_v31  ;;  %v15912_v31 = vand.u32 4294901760, %v10224_v56  ;;  %v653_v53 = vsub.f32 %v10214_v49, %v15910_v6  ;;  %vm6881_vm11 = vcmask 523520   ;;  %vm6930_vm12 = vcmask 785920  }
  0x25   : > { %727 = vmatpush.msra.mxu2 %v10153_v59  ;;  %807 = vmatpush.msra.mxu3 %v10134_v51  ;;  %vm6979_vm13 = vcmask 1048320   ;;  %vm9225_vm14 = vcmask 523264  }
  0x26   : > { %494 = vmatpush.msra.mxu0 %v10150_v58  ;;  %619 = vmatpush.msra.mxu1 %v618_v44  ;;  %v511_v44 = vand.u32 4294901760, %v510_v60  ;;  %v659_v55 = vsub.f32 %v10224_v56, %v15912_v31  ;;  %v654_v6 = vand.u32 4294901760, %v653_v53  ;;  %v10265_v31 = vand.u32 4294901760, %v444_v47 }
  0x27   : > { %730 = vmatpush.msra.mxu2 %v10168_v1  ;;  %809 = vmatpush.msra.mxu3 %v10150_v58 }
  0x28   : > { %496 = vmatpush.msra.mxu0 %v10164_v63  ;;  %625 = vmatpush.msra.mxu1 %v624_v50  ;;  %v642_v50 = vand.u32 4294901760, %v641_v62  ;;  %v518_v62 = vsub.f32 %v443_v7, %v10245_v45  ;;  %v526_v7 = vsub.f32 %v444_v47, %v10265_v31 }
  0x29   : > { %733 = vmatpush.msra.mxu2 %v10185_v18  ;;  %811 = vmatpush.msra.mxu3 %v10164_v63 }
  0x2a   : > { %498 = vmatpush.msra.mxu0 %v10181_v12  ;;  %631 = vmatpush.msra.mxu1 %v630_v61  ;;  %v512_v61 = vsub.f32 %v510_v60, %v511_v44 }
  0x2b   : > { %736 = vmatpush.msra.mxu2 %v10201_v38  ;;  %813 = vmatpush.msra.mxu3 %v10181_v12 }
  0x2c   : > { %500 = vmatpush.msra.mxu0 %v10197_v34  ;;  %637 = vmatpush.msra.mxu1 %v636_v8  ;;  %v660_v8 = vand.u32 4294901760, %v659_v55  ;;  %v513_v30 = vand.u32 4294901760, %v512_v61  ;;  %v10431_v55 = vld [vmem:[%s15897_s2] ss:$0 sm:$0xff] }
  0x2d   : > { %506 = vmatmul.f32.vlgmr.msra.gmra.mxu0 %v505_v32  ;;  %739 = vmatpush.msra.mxu2 %v10214_v49  ;;  %v519_v32 = vand.u32 4294901760, %v518_v62 }
  0x2e   : > { %643 = vmatpush.msra.mxu1 %v642_v50  ;;  %815 = vmatpush.msra.mxu3 %v10197_v34 }
  0x2f   : > { %742 = vmatpush.msra.mxu2 %v10224_v56  ;;  %819 = vmatmul.f32.vlgmr.msra.gmra.mxu3 %v503_v39  ;;  %v520_v39 = vsub.f32 %v518_v62, %v519_v32 }
  0x30   : > { %649 = vmatpush.msra.mxu1 %v648_v57  ;;  %745 = vmatmul.f32.vlgmr.msra.gmra.mxu2 %v10188_v29 }
  0x31   : > { %868 = vmatpush.msrb.mxu0 %v568_v23  ;;  %v521_v15 = vand.u32 4294901760, %v520_v39  ;;  %v527_v23 = vand.u32 4294901760, %v526_v7 }
  0x32   : > { %655 = vmatpush.msra.mxu1 %v654_v6 }
  0x33   : > { %872 = vmatpush.msrb.mxu0 %v574_v24  ;;  %v10278_v24 = vand.u32 4294901760, %v445_v14 }
  0x34   : > { %661 = vmatpush.msra.mxu1 %v660_v8 }
  0x35   : > { %514 = vmatmul.f32.gmra.mxu0 %v513_v30  ;;  %663 = vmatmul.f32.vlgmr.msra.gmra.mxu1 %v10170_v2 }
  0x36   : > { %963 = vmatpush.msrb.mxu1 %v10000_v3  ;;  %876 = vmatpush.msrb.mxu0 %v580_v25  ;;  %v528_v3 = vsub.f32 %v526_v7, %v527_v23 }
  0x37   : > { %825 = vmatmul.f32.gmra.mxu3 %v511_v44 }
  0x38   : > { %750 = vmatmul.f32.gmra.mxu2 %v510_v60  ;;  %965 = vmatpush.msrb.mxu1 %v10002_v4  ;;  %v534_v4 = vsub.f32 %v445_v14, %v10278_v24 }
  0x39   : > { %880 = vmatpush.msrb.mxu0 %v586_v26  ;;  %v550_v26 = vsub.f32 %v447_v20, %v549_v22 }
  0x3a   : > { %967 = vmatpush.msrb.mxu1 %v10004_v5  ;;  %v529_v5 = vand.u32 4294901760, %v528_v3 }
  0x3b   : > { %884 = vmatpush.msrb.mxu0 %v592_v33 }
  0x3c   : > { %969 = vmatpush.msrb.mxu1 %v10015_v9  ;;  %v535_v9 = vand.u32 4294901760, %v534_v4 }
  0x3d   : > { %522 = vmatmul.f32.gmra.mxu0 %v521_v15  ;;  %667 = vmatmul.f32.gmra.mxu1 %v10206_v43 }
  0x3e   : > { %971 = vmatpush.msrb.mxu1 %v10017_v10  ;;  %888 = vmatpush.msrb.mxu0 %v598_v35  ;;  %v536_v10 = vsub.f32 %v534_v4, %v535_v9  ;;  %v551_v35 = vand.u32 4294901760, %v550_v26 }
  0x3f   : > { %831 = vmatmul.f32.gmra.mxu3 %v519_v32 }
  0x40   : > { %755 = vmatmul.f32.gmra.mxu2 %v518_v62  ;;  %973 = vmatpush.msrb.mxu1 %v10019_v11  ;;  %v542_v11 = vsub.f32 %v446_v16, %v10293_v19  ;;  %v552_v42 = vsub.f32 %v550_v26, %v551_v35 }
  0x41   : > { %892 = vmatpush.msrb.mxu0 %v604_v41  ;;  %v16094_v41 = vand.u32 4294901760, %v10214_v49 }
  0x42   : > { %975 = vmatpush.msrb.mxu1 %v10038_v17  ;;  %v537_v17 = vand.u32 4294901760, %v536_v10 }
  0x43   : > { %896 = vmatpush.msrb.mxu0 %v610_v48  ;;  %v16095_v48 = vand.u32 4294901760, %v10224_v56 }
  0x44   : > { %977 = vmatpush.msrb.mxu1 %v10049_v21  ;;  %v543_v21 = vand.u32 4294901760, %v542_v11 }
  0x45   : > { %530 = vmatmul.f32.gmra.mxu0 %v529_v5  ;;  %671 = vmatmul.f32.gmra.mxu1 %v10245_v45 }
  0x46   : > { %900 = vmatpush.msrb.mxu0 %v616_v54  ;;  %979 = vmatpush.msrb.mxu1 %v10067_v27  ;;  %v544_v25 = vsub.f32 %v542_v11, %v543_v21  ;;  %v16092_v27 = vand.u32 4294901760, %v10185_v18 }
  0x47   : > { %837 = vmatmul.f32.gmra.mxu3 %v527_v23 }
  0x48   : > { %760 = vmatmul.f32.gmra.mxu2 %v526_v7  ;;  %904 = vmatpush.msrb.mxu0 %v622_v0  ;;  %v545_v33 = vand.u32 4294901760, %v544_v25 }
  0x49   : > { %981 = vmatpush.msrb.mxu1 %v10101_v40  ;;  %v16093_v40 = vand.u32 4294901760, %v10201_v38 }
  0x4a   : > { %908 = vmatpush.msrb.mxu0 %v628_v13 }
  0x4b   : > { %983 = vmatpush.msrb.mxu1 %v10115_v46  ;;  %v558_v46 = vsub.f32 %v448_v28, %v557_v36 }
  0x4c   : > { %912 = vmatpush.msrb.mxu0 %v634_v37 }
  0x4d   : > { %538 = vmatmul.f32.gmra.mxu0 %v537_v17  ;;  %675 = vmatmul.f32.gmra.mxu1 %v10265_v31  ;;  %v559_v52 = vand.u32 4294901760, %v558_v46 }
  0x4e   : > { %985 = vmatpush.msrb.mxu1 %v10134_v51  ;;  %916 = vmatpush.msrb.mxu0 %v16092_v27  ;;  %v553_v51 = vand.u32 4294901760, %v552_v42 }
  0x4f   : > { %843 = vmatmul.f32.gmra.mxu3 %v535_v9  ;;  %v560_v54 = vsub.f32 %v558_v46, %v559_v52 }
  0x50   : > { %765 = vmatmul.f32.gmra.mxu2 %v534_v4  ;;  %987 = vmatpush.msrb.mxu1 %v10150_v58 }
  0x51   : > { %920 = vmatpush.msrb.mxu0 %v16093_v40  ;;  %v561_v58 = vand.u32 4294901760, %v560_v54 }
  0x52   : > { %989 = vmatpush.msrb.mxu1 %v10164_v63 }
  0x53   : > { %924 = vmatpush.msrb.mxu0 %v16094_v41 }
  0x54   : > { %991 = vmatpush.msrb.mxu1 %v10181_v12  ;;  %v15913_v12 = vmov 0.0  }
  0x55   : > { %546 = vmatmul.f32.gmra.mxu0 %v545_v33  ;;  %679 = vmatmul.f32.gmra.mxu1 %v10278_v24  ;;  %1069 = vst.msk [vmem:[#allocation2 + $0x140] sm:$0xff] %vm1027_vm0, %v15913_v12 }
  0x56   : > { %928 = vmatpush.msrb.mxu0 %v16095_v48  ;;  %993 = vmatpush.msrb.mxu1 %v10197_v34  ;;  %1070 = vst.msk [vmem:[#allocation2 + $0x148] sm:$0x3] %vm1029_vm1, %v15913_v12 }
  0x57   : > { %849 = vmatmul.f32.gmra.mxu3 %v543_v21  ;;  %1031 = vst.msk [vmem:[#allocation2 + $0x10] sm:$0xff] %vm1027_vm0, %v15913_v12 }
  0x58   : > { %770 = vmatmul.f32.gmra.mxu2 %v542_v11  ;;  %1032 = vst.msk [vmem:[#allocation2 + $0x18] sm:$0x3] %vm1029_vm1, %v15913_v12 }
  0x59   : > { %1033 = vst.msk [vmem:[#allocation2 + $0x20] sm:$0xff] %vm1027_vm0, %v15913_v12 }
  0x5a   : > { %1034 = vst.msk [vmem:[#allocation2 + $0x28] sm:$0x3] %vm1029_vm1, %v15913_v12 }
  0x5b   : > { %1035 = vst.msk [vmem:[#allocation2 + $0x30] sm:$0xff] %vm1027_vm0, %v15913_v12 }
  0x5c   : > { %1036 = vst.msk [vmem:[#allocation2 + $0x38] sm:$0x3] %vm1029_vm1, %v15913_v12 }
  0x5d   : > { %554 = vmatmul.f32.gmra.mxu0 %v553_v51  ;;  %683 = vmatmul.f32.gmra.mxu1 %v10293_v19  ;;  %v10364_v29 = vld [vmem:[#allocation2 + $0x141] sm:$0xff]  ;;  %1037 = vst.msk [vmem:[#allocation2 + $0x40] sm:$0xff] %vm1027_vm0, %v15913_v12 }
  0x5e   : > { %1259 = vrot.lane.b32.xlu0 %v10364_v29, %s9900_s17  ;;  %1038 = vst.msk [vmem:[#allocation2 + $0x48] sm:$0x3] %vm1029_vm1, %v15913_v12  ;;  %v1666_v56 = vld [vmem:[#allocation2 + $0x142] sm:$0xff] }
  0x5f   : > { %855 = vmatmul.f32.gmra.mxu3 %v551_v35  ;;  %1039 = vst.msk [vmem:[#allocation2 + $0x50] sm:$0xff] %vm1027_vm0, %v15913_v12 }
  0x60   : > { %775 = vmatmul.f32.gmra.mxu2 %v550_v26  ;;  %1040 = vst.msk [vmem:[#allocation2 + $0x58] sm:$0x3] %vm1029_vm1, %v15913_v12 }
  0x61   : > { %1041 = vst.msk [vmem:[#allocation2 + $0x60] sm:$0xff] %vm1027_vm0, %v15913_v12 }
  0x62   : > { %1042 = vst.msk [vmem:[#allocation2 + $0x68] sm:$0x3] %vm1029_vm1, %v15913_v12 }
  0x63   : > { %1043 = vst.msk [vmem:[#allocation2 + $0x70] sm:$0xff] %vm1027_vm0, %v15913_v12 }
  0x64   : > { %1044 = vst.msk [vmem:[#allocation2 + $0x78] sm:$0x3] %vm1029_vm1, %v15913_v12 }
  0x65   : > { %562 = vmatmul.f32.gmra.mxu0 %v561_v58  ;;  %687 = vmatmul.f32.gmra.mxu1 %v549_v22  ;;  %1045 = vst.msk [vmem:[#allocation2 + $0x80] sm:$0xff] %vm1027_vm0, %v15913_v12 }
  0x66   : > { %1046 = vst.msk [vmem:[#allocation2 + $0x88] sm:$0x3] %vm1029_vm1, %v15913_v12  ;;  %1682 = vrot.lane.b32.xlu0 %v1666_v56, %s9901_s21 }
  0x67   : > { %861 = vmatmul.f32.gmra.mxu3 %v559_v52  ;;  %1047 = vst.msk [vmem:[#allocation2 + $0x90] sm:$0xff] %vm1027_vm0, %v15913_v12 }
  0x68   : > { %780 = vmatmul.f32.gmra.mxu2 %v558_v46  ;;  %1048 = vst.msk [vmem:[#allocation2 + $0x98] sm:$0x3] %vm1029_vm1, %v15913_v12 }
  0x69   : > { %1051 = vst.msk [vmem:[#allocation2 + $0xb0] sm:$0xff] %vm1027_vm0, %v15913_v12 }
  0x6a   : > { %1052 = vst.msk [vmem:[#allocation2 + $0xb8] sm:$0x3] %vm1029_vm1, %v15913_v12 }
  0x6b   : > { %1053 = vst.msk [vmem:[#allocation2 + $0xc0] sm:$0xff] %vm1027_vm0, %v15913_v12 }
  0x6c   : > { %1054 = vst.msk [vmem:[#allocation2 + $0xc8] sm:$0x3] %vm1029_vm1, %v15913_v12 }
  0x6d   : > { %691 = vmatmul.f32.gmra.mxu1 %v557_v36  ;;  %930 = vmatmul.f32.vlgmr.msrb.gmra.mxu0 %v10170_v2  ;;  %1055 = vst.msk [vmem:[#allocation2 + $0xd0] sm:$0xff] %vm1027_vm0, %v15913_v12 }
  0x6e   : > { %1056 = vst.msk [vmem:[#allocation2 + $0xd8] sm:$0x3] %vm1029_vm1, %v15913_v12 }
  0x6f   : > { %1057 = vst.msk [vmem:[#allocation2 + $0xe0] sm:$0xff] %vm1027_vm0, %v15913_v12 }
  0x70   : > { %1058 = vst.msk [vmem:[#allocation2 + $0xe8] sm:$0x3] %vm1029_vm1, %v15913_v12 }
  0x71   : > { %1059 = vst.msk [vmem:[#allocation2 + $0xf0] sm:$0xff] %vm1027_vm0, %v15913_v12 }
  0x72   : > { %1060 = vst.msk [vmem:[#allocation2 + $0xf8] sm:$0x3] %vm1029_vm1, %v15913_v12 }
  0x73   : > { %1061 = vst.msk [vmem:[#allocation2 + $0x100] sm:$0xff] %vm1027_vm0, %v15913_v12 }
  0x74   : > { %1062 = vst.msk [vmem:[#allocation2 + $0x108] sm:$0x3] %vm1029_vm1, %v15913_v12 }
  0x75   : > { %934 = vmatmul.f32.gmra.mxu0 %v10206_v43  ;;  %995 = vmatmul.f32.vlgmr.msrb.gmra.mxu1 %v10170_v2  ;;  %1063 = vst.msk [vmem:[#allocation2 + $0x110] sm:$0xff] %vm1027_vm0, %v15913_v12 }
  0x76   : > { %1064 = vst.msk [vmem:[#allocation2 + $0x118] sm:$0x3] %vm1029_vm1, %v15913_v12 }
  0x77   : > { %1065 = vst.msk [vmem:[#allocation2 + $0x120] sm:$0xff] %vm1027_vm0, %v15913_v12 }
  0x78   : > { %1066 = vst.msk [vmem:[#allocation2 + $0x128] sm:$0x3] %vm1029_vm1, %v15913_v12 }
  0x79   : > { %1067 = vst.msk [vmem:[#allocation2 + $0x130] sm:$0xff] %vm1027_vm0, %v15913_v12 }
  0x7a   : > { %1068 = vst.msk [vmem:[#allocation2 + $0x138] sm:$0x3] %vm1029_vm1, %v15913_v12 }
  0x7b   : > { %1071 = vst.msk [vmem:[#allocation2 + $0x150] sm:$0xff] %vm1027_vm0, %v15913_v12 }
  0x7c   : > { %1072 = vst.msk [vmem:[#allocation2 + $0x158] sm:$0x3] %vm1029_vm1, %v15913_v12 }
  0x7d   : > { %938 = vmatmul.f32.gmra.mxu0 %v10245_v45  ;;  %999 = vmatmul.f32.gmra.mxu1 %v10206_v43  ;;  %1073 = vst.msk [vmem:[#allocation2 + $0x160] sm:$0xff] %vm1027_vm0, %v15913_v12 }
  0x7e   : > { %1074 = vst.msk [vmem:[#allocation2 + $0x168] sm:$0x3] %vm1029_vm1, %v15913_v12 }
  0x7f   : > { %1075 = vst.msk [vmem:[#allocation2 + $0x170] sm:$0xff] %vm1027_vm0, %v15913_v12 }
  0x80   : > { %1076 = vst.msk [vmem:[#allocation2 + $0x178] sm:$0x3] %vm1029_vm1, %v15913_v12 }
  0x81   : > { %1077 = vst.msk [vmem:[#allocation2 + $0x180] sm:$0xff] %vm1027_vm0, %v15913_v12 }
  0x82   : > { %1078 = vst.msk [vmem:[#allocation2 + $0x188] sm:$0x3] %vm1029_vm1, %v15913_v12 }
  0x83   : > { %1079 = vst.msk [vmem:[#allocation2 + $0x190] sm:$0xff] %vm1027_vm0, %v15913_v12 }
  0x84   : > { %1080 = vst.msk [vmem:[#allocation2 + $0x198] sm:$0x3] %vm1029_vm1, %v15913_v12 }
  0x85   : > { %942 = vmatmul.f32.gmra.mxu0 %v10265_v31  ;;  %1003 = vmatmul.f32.gmra.mxu1 %v10245_v45  ;;  %1081 = vst.msk [vmem:[#allocation2 + $0x1a0] sm:$0xff] %vm1027_vm0, %v15913_v12 }
  0x86   : > { %1082 = vst.msk [vmem:[#allocation2 + $0x1a8] sm:$0x3] %vm1029_vm1, %v15913_v12 }
  0x87   : > { %1083 = vst.msk [vmem:[#allocation2 + $0x1b0] sm:$0xff] %vm1027_vm0, %v15913_v12 }
  0x88   : > { %1084 = vst.msk [vmem:[#allocation2 + $0x1b8] sm:$0x3] %vm1029_vm1, %v15913_v12 }
  0x89   : > { %1085 = vst.msk [vmem:[#allocation2 + $0x1c0] sm:$0xff] %vm1027_vm0, %v15913_v12 }
  0x8a   : > { %1086 = vst.msk [vmem:[#allocation2 + $0x1c8] sm:$0x3] %vm1029_vm1, %v15913_v12 }
  0x8b   : > { %1089 = vst.msk [vmem:[#allocation2 + $0x1e0] sm:$0xff] %vm1027_vm0, %v15913_v12 }
  0x8c   : > { %1090 = vst.msk [vmem:[#allocation2 + $0x1e8] sm:$0x3] %vm1029_vm1, %v15913_v12 }
  0x8d   : > { %946 = vmatmul.f32.gmra.mxu0 %v10278_v24  ;;  %1007 = vmatmul.f32.gmra.mxu1 %v10265_v31  ;;  %1091 = vst.msk [vmem:[#allocation2 + $0x1f0] sm:$0xff] %vm1027_vm0, %v15913_v12 }
  0x8e   : > { %1092 = vst.msk [vmem:[#allocation2 + $0x1f8] sm:$0x3] %vm1029_vm1, %v15913_v12 }
  0x8f   : > { %1093 = vst.msk [vmem:[#allocation2 + $0x200] sm:$0xff] %vm1027_vm0, %v15913_v12 }
  0x90   : > { %1094 = vst.msk [vmem:[#allocation2 + $0x208] sm:$0x3] %vm1029_vm1, %v15913_v12 }
  0x91   : > { %1095 = vst.msk [vmem:[#allocation2 + $0x210] sm:$0xff] %vm1027_vm0, %v15913_v12 }
  0x92   : > { %1096 = vst.msk [vmem:[#allocation2 + $0x218] sm:$0x3] %vm1029_vm1, %v15913_v12 }
  0x93   : > { %1097 = vst.msk [vmem:[#allocation2 + $0x220] sm:$0xff] %vm1027_vm0, %v15913_v12  ;;  %v1292_v39 = vld [vmem:[#allocation2 + $0x1e1] sm:$0xff] }
  0x94   : > { %1098 = vst.msk [vmem:[#allocation2 + $0x228] sm:$0x3] %vm1029_vm1, %v15913_v12  ;;  %1308 = vrot.lane.b32.xlu1 %v1292_v39, %s9901_s21  ;;  %1634 = vrot.lane.b32.xlu2 %v1292_v39, %s9900_s17 }
  0x95   : > { %950 = vmatmul.f32.gmra.mxu0 %v10293_v19  ;;  %1011 = vmatmul.f32.gmra.mxu1 %v10278_v24  ;;  %1099 = vst.msk [vmem:[#allocation2 + $0x230] sm:$0xff] %vm1027_vm0, %v15913_v12 }
  0x96   : > { %1100 = vst.msk [vmem:[#allocation2 + $0x238] sm:$0x3] %vm1029_vm1, %v15913_v12 }
  0x97   : > { %1101 = vst.msk [vmem:[#allocation2 + $0x240] sm:$0xff] %vm1027_vm0, %v15913_v12 }
  0x98   : > { %1102 = vst.msk [vmem:[#allocation2 + $0x248] sm:$0x3] %vm1029_vm1, %v15913_v12 }
  0x99   : > { %1103 = vst.msk [vmem:[#allocation2 + $0x250] sm:$0xff] %vm1027_vm0, %v15913_v12 }
  0x9a   : > { %1104 = vst.msk [vmem:[#allocation2 + $0x258] sm:$0x3] %vm1029_vm1, %v15913_v12 }
  0x9b   : > { %1105 = vst.msk [vmem:[#allocation2 + $0x260] sm:$0xff] %vm1027_vm0, %v15913_v12 }
  0x9c   : > { %1106 = vst.msk [vmem:[#allocation2 + $0x268] sm:$0x3] %vm1029_vm1, %v15913_v12 }
  0x9d   : > { %954 = vmatmul.f32.gmra.mxu0 %v549_v22  ;;  %1015 = vmatmul.f32.gmra.mxu1 %v10293_v19  ;;  %5314 = vst.msk [vmem:[#allocation3 + $0x10] sm:$0xff] %vm1027_vm0, %v15913_v12 }
  0x9e   : > { %5315 = vst.msk [vmem:[#allocation3 + $0x18] sm:$0x3] %vm1029_vm1, %v15913_v12 }
  0x9f   : > { %5316 = vst.msk [vmem:[#allocation3 + $0x20] sm:$0xff] %vm1027_vm0, %v15913_v12 }
  0xa0   : > { %5317 = vst.msk [vmem:[#allocation3 + $0x28] sm:$0x3] %vm1029_vm1, %v15913_v12 }
  0xa1   : > { %5318 = vst.msk [vmem:[#allocation3 + $0x30] sm:$0xff] %vm1027_vm0, %v15913_v12 }
  0xa2   : > { %5319 = vst.msk [vmem:[#allocation3 + $0x38] sm:$0x3] %vm1029_vm1, %v15913_v12 }
  0xa3   : > { %5320 = vst.msk [vmem:[#allocation3 + $0x40] sm:$0xff] %vm1027_vm0, %v15913_v12 }
  0xa4   : > { %5321 = vst.msk [vmem:[#allocation3 + $0x48] sm:$0x3] %vm1029_vm1, %v15913_v12 }
  0xa5   : > { %958 = vmatmul.f32.gmra.mxu0 %v557_v36  ;;  %1019 = vmatmul.f32.gmra.mxu1 %v549_v22  ;;  %5322 = vst.msk [vmem:[#allocation3 + $0x50] sm:$0xff] %vm1027_vm0, %v15913_v12 }
  0xa6   : > { %5323 = vst.msk [vmem:[#allocation3 + $0x58] sm:$0x3] %vm1029_vm1, %v15913_v12 }
  0xa7   : > { %5324 = vst.msk [vmem:[#allocation3 + $0x60] sm:$0xff] %vm1027_vm0, %v15913_v12 }
  0xa8   : > { %5325 = vst.msk [vmem:[#allocation3 + $0x68] sm:$0x3] %vm1029_vm1, %v15913_v12 }
  0xa9   : > { %5326 = vst.msk [vmem:[#allocation3 + $0x70] sm:$0xff] %vm1027_vm0, %v15913_v12 }
  0xaa   : > { %v507_v59 = vpop.f32.mrf.mxu0  ;;  %5327 = vst.msk [vmem:[#allocation3 + $0x78] sm:$0x3] %vm1029_vm1, %v15913_v12 }
  0xab   : > { %v508_v6 = vadd.f32 %v10431_v55, %v507_v59  ;;  %5328 = vst.msk [vmem:[#allocation3 + $0x80] sm:$0xff] %vm1027_vm0, %v15913_v12 }
  0xac   : > { %5329 = vst.msk [vmem:[#allocation3 + $0x88] sm:$0x3] %vm1029_vm1, %v15913_v12 }
  0xad   : > { %1023 = vmatmul.f32.gmra.mxu1 %v557_v36  ;;  %5334 = vst.msk [vmem:[#allocation3 + $0xb0] sm:$0xff] %vm1027_vm0, %v15913_v12 }
  0xae   : > { %5335 = vst.msk [vmem:[#allocation3 + $0xb8] sm:$0x3] %vm1029_vm1, %v15913_v12 }
  0xaf   : > { %5336 = vst.msk [vmem:[#allocation3 + $0xc0] sm:$0xff] %vm1027_vm0, %v15913_v12 }
  0xb0   : > { %5337 = vst.msk [vmem:[#allocation3 + $0xc8] sm:$0x3] %vm1029_vm1, %v15913_v12 }
  0xb1   : > { %5338 = vst.msk [vmem:[#allocation3 + $0xd0] sm:$0xff] %vm1027_vm0, %v15913_v12 }
  0xb2   : > { %v10342_v63 = vpop.f32.mrf.mxu0  ;;  %v664_v0 = vpop.f32.mrf.mxu1  ;;  %5339 = vst.msk [vmem:[#allocation3 + $0xd8] sm:$0x3] %vm1029_vm1, %v15913_v12 }
  0xb3   : > { %v665_v44 = vadd.f32 %v664_v0, %v508_v6  ;;  %v746_v45 = vpop.f32.mrf.mxu2  ;;  %v820_v57 = vpop.f32.mrf.mxu3  ;;  %5340 = vst.msk [vmem:[#allocation3 + $0xe0] sm:$0xff] %vm1027_vm0, %v15913_v12  ;;  %v516_v15 = vadd.f32 %v10431_v55, %v10342_v63 }
  0xb4   : > { %5341 = vst.msk [vmem:[#allocation3 + $0xe8] sm:$0x3] %vm1029_vm1, %v15913_v12 }
  0xb5   : > { %v747_v53 = vadd.f32 %v746_v45, %v665_v44  ;;  %5342 = vst.msk [vmem:[#allocation3 + $0xf0] sm:$0xff] %vm1027_vm0, %v15913_v12 }
  0xb6   : > { %5343 = vst.msk [vmem:[#allocation3 + $0xf8] sm:$0x3] %vm1029_vm1, %v15913_v12 }
  0xb7   : > { %v821_v62 = vadd.f32 %v820_v57, %v747_v53  ;;  %5344 = vst.msk [vmem:[#allocation3 + $0x100] sm:$0xff] %vm1027_vm0, %v15913_v12 }
  0xb8   : > { %5345 = vst.msk [vmem:[#allocation3 + $0x108] sm:$0x3] %vm1029_vm1, %v15913_v12 }
  0xb9   : > { %5346 = vst.msk [vmem:[#allocation3 + $0x110] sm:$0xff] %vm1027_vm0, %v15913_v12 }
  0xba   : > { %v10344_v1 = vpop.f32.mrf.mxu0  ;;  %v10346_v2 = vpop.f32.mrf.mxu1  ;;  %5347 = vst.msk [vmem:[#allocation3 + $0x118] sm:$0x3] %vm1029_vm1, %v15913_v12 }
  0xbb   : > { %v751_v7 = vpop.f32.mrf.mxu2  ;;  %v826_v14 = vpop.f32.mrf.mxu3  ;;  %5348 = vst.msk [vmem:[#allocation3 + $0x120] sm:$0xff] %vm1027_vm0, %v15913_v12  ;;  %v669_v24 = vadd.f32 %v10346_v2, %v516_v15  ;;  %v524_v20 = vadd.f32 %v10431_v55, %v10344_v1 }
  0xbc   : > { %5349 = vst.msk [vmem:[#allocation3 + $0x128] sm:$0x3] %vm1029_vm1, %v15913_v12 }
  0xbd   : > { %5352 = vst.msk [vmem:[#allocation3 + $0x140] sm:$0xff] %vm1027_vm0, %v15913_v12  ;;  %v752_v16 = vadd.f32 %v751_v7, %v669_v24 }
  0xbe   : > { %5353 = vst.msk [vmem:[#allocation3 + $0x148] sm:$0x3] %vm1029_vm1, %v15913_v12 }
  0xbf   : > { %5354 = vst.msk [vmem:[#allocation3 + $0x150] sm:$0xff] %vm1027_vm0, %v15913_v12  ;;  %v827_v5 = vadd.f32 %v826_v14, %v752_v16 }
  0xc0   : > { %5355 = vst.msk [vmem:[#allocation3 + $0x158] sm:$0x3] %vm1029_vm1, %v15913_v12 }
  0xc1   : > { %5356 = vst.msk [vmem:[#allocation3 + $0x160] sm:$0xff] %vm1027_vm0, %v15913_v12 }
  0xc2   : > { %v10354_v13 = vpop.f32.mrf.mxu0  ;;  %v10356_v18 = vpop.f32.mrf.mxu1  ;;  %5357 = vst.msk [vmem:[#allocation3 + $0x168] sm:$0x3] %vm1029_vm1, %v15913_v12 }
  0xc3   : > { %v756_v23 = vpop.f32.mrf.mxu2  ;;  %v832_v4 = vpop.f32.mrf.mxu3  ;;  %5358 = vst.msk [vmem:[#allocation3 + $0x170] sm:$0xff] %vm1027_vm0, %v15913_v12  ;;  %v673_v22 = vadd.f32 %v10356_v18, %v524_v20  ;;  %v532_v36 = vadd.f32 %v10431_v55, %v10354_v13 }
  0xc4   : > { %5359 = vst.msk [vmem:[#allocation3 + $0x178] sm:$0x3] %vm1029_vm1, %v15913_v12 }
  0xc5   : > { %5360 = vst.msk [vmem:[#allocation3 + $0x180] sm:$0xff] %vm1027_vm0, %v15913_v12  ;;  %v757_v28 = vadd.f32 %v756_v23, %v673_v22 }
  0xc6   : > { %5361 = vst.msk [vmem:[#allocation3 + $0x188] sm:$0x3] %vm1029_vm1, %v15913_v12 }
  0xc7   : > { %5362 = vst.msk [vmem:[#allocation3 + $0x190] sm:$0xff] %vm1027_vm0, %v15913_v12  ;;  %v833_v35 = vadd.f32 %v832_v4, %v757_v28 }
  0xc8   : > { %5363 = vst.msk [vmem:[#allocation3 + $0x198] sm:$0x3] %vm1029_vm1, %v15913_v12 }
  0xc9   : > { %5364 = vst.msk [vmem:[#allocation3 + $0x1a0] sm:$0xff] %vm1027_vm0, %v15913_v12 }
  0xca   : > { %v10378_v34 = vpop.f32.mrf.mxu0  ;;  %v10380_v37 = vpop.f32.mrf.mxu1  ;;  %5365 = vst.msk [vmem:[#allocation3 + $0x1a8] sm:$0x3] %vm1029_vm1, %v15913_v12 }
  0xcb   : > { %v761_v9 = vpop.f32.mrf.mxu2  ;;  %v838_v21 = vpop.f32.mrf.mxu3  ;;  %5366 = vst.msk [vmem:[#allocation3 + $0x1b0] sm:$0xff] %vm1027_vm0, %v15913_v12  ;;  %v540_v41 = vadd.f32 %v10431_v55, %v10378_v34  ;;  %v677_v54 = vadd.f32 %v10380_v37, %v532_v36 }
  0xcc   : > { %5367 = vst.msk [vmem:[#allocation3 + $0x1b8] sm:$0x3] %vm1029_vm1, %v15913_v12 }
  0xcd   : > { %5368 = vst.msk [vmem:[#allocation3 + $0x1c0] sm:$0xff] %vm1027_vm0, %v15913_v12  ;;  %v762_v0 = vadd.f32 %v761_v9, %v677_v54 }
  0xce   : > { %5369 = vst.msk [vmem:[#allocation3 + $0x1c8] sm:$0x3] %vm1029_vm1, %v15913_v12 }
  0xcf   : > { %5372 = vst.msk [vmem:[#allocation3 + $0x1e0] sm:$0xff] %vm1027_vm0, %v15913_v12  ;;  %v839_v37 = vadd.f32 %v838_v21, %v762_v0 }
  0xd0   : > { %5373 = vst.msk [vmem:[#allocation3 + $0x1e8] sm:$0x3] %vm1029_vm1, %v15913_v12 }
  0xd1   : > { %5374 = vst.msk [vmem:[#allocation3 + $0x1f0] sm:$0xff] %vm1027_vm0, %v15913_v12 }
  0xd2   : > { %v10398_v38 = vpop.f32.mrf.mxu0  ;;  %v10400_v43 = vpop.f32.mrf.mxu1  ;;  %5375 = vst.msk [vmem:[#allocation3 + $0x1f8] sm:$0x3] %vm1029_vm1, %v15913_v12 }
  0xd3   : > { %v766_v25 = vpop.f32.mrf.mxu2  ;;  %v844_v33 = vpop.f32.mrf.mxu3  ;;  %5376 = vst.msk [vmem:[#allocation3 + $0x200] sm:$0xff] %vm1027_vm0, %v15913_v12  ;;  %v548_v48 = vadd.f32 %v10431_v55, %v10398_v38  ;;  %v681_v58 = vadd.f32 %v10400_v43, %v540_v41 }
  0xd4   : > { %5377 = vst.msk [vmem:[#allocation3 + $0x208] sm:$0x3] %vm1029_vm1, %v15913_v12 }
  0xd5   : > { %5378 = vst.msk [vmem:[#allocation3 + $0x210] sm:$0xff] %vm1027_vm0, %v15913_v12  ;;  %v767_v1 = vadd.f32 %v766_v25, %v681_v58 }
  0xd6   : > { %5379 = vst.msk [vmem:[#allocation3 + $0x218] sm:$0x3] %vm1029_vm1, %v15913_v12 }
  0xd7   : > { %5380 = vst.msk [vmem:[#allocation3 + $0x220] sm:$0xff] %vm1027_vm0, %v15913_v12  ;;  %v845_v38 = vadd.f32 %v844_v33, %v767_v1 }
  0xd8   : > { %5381 = vst.msk [vmem:[#allocation3 + $0x228] sm:$0x3] %vm1029_vm1, %v15913_v12 }
  0xd9   : > { %5382 = vst.msk [vmem:[#allocation3 + $0x230] sm:$0xff] %vm1027_vm0, %v15913_v12 }
  0xda   : > { %v10414_v47 = vpop.f32.mrf.mxu0  ;;  %v10416_v49 = vpop.f32.mrf.mxu1  ;;  %5383 = vst.msk [vmem:[#allocation3 + $0x238] sm:$0x3] %vm1029_vm1, %v15913_v12 }
  0xdb   : > { %v771_v52 = vpop.f32.mrf.mxu2  ;;  %v685_v59 = vadd.f32 %v10416_v49, %v548_v48  ;;  %v850_v63 = vpop.f32.mrf.mxu3  ;;  %5384 = vst.msk [vmem:[#allocation3 + $0x240] sm:$0xff] %vm1027_vm0, %v15913_v12  ;;  %v556_v18 = vadd.f32 %v10431_v55, %v10414_v47 }
  0xdc   : > { %5385 = vst.msk [vmem:[#allocation3 + $0x248] sm:$0x3] %vm1029_vm1, %v15913_v12 }
  0xdd   : > { %v772_v34 = vadd.f32 %v771_v52, %v685_v59  ;;  %5386 = vst.msk [vmem:[#allocation3 + $0x250] sm:$0xff] %vm1027_vm0, %v15913_v12  ;;  %v1226_v59 = vld [vmem:[#allocation2 + $0x1e0] sm:$0xff] }
  0xde   : > { %5387 = vst.msk [vmem:[#allocation3 + $0x258] sm:$0x3] %vm1029_vm1, %v15913_v12 }
  0xdf   : > { %5388 = vst.msk [vmem:[#allocation3 + $0x260] sm:$0xff] %vm1027_vm0, %v15913_v12  ;;  %v851_v49 = vadd.f32 %v850_v63, %v772_v34  ;;  %v1260_v63 = vpop.permute.xlu0 %1259 }
  0xe0   : > { %5389 = vst.msk [vmem:[#allocation3 + $0x268] sm:$0x3] %vm1029_vm1, %v15913_v12 }
  0xe1   : > { %1610 = vst.msk [vmem:[#allocation5 + $0xc0] sm:$0xff] %vm1027_vm0, %v10364_v29 }
  0xe2   : > { %v10439_v60 = vpop.f32.mrf.mxu1  ;;  %v10447_v31 = vpop.f32.mrf.mxu0  ;;  %1234 = vst.msk [vmem:[#allocation5] sm:$0xff] %vm1027_vm0, %v1226_v59 }
  0xe3   : > { %v776_v43 = vpop.f32.mrf.mxu2  ;;  %v689_v56 = vadd.f32 %v10439_v60, %v556_v18  ;;  %v856_v53 = vpop.f32.mrf.mxu3  ;;  %1284 = vst.msk [vmem:[#allocation5] sm:$0xff] %vm1283_vm2, %v1260_v63 }
  0xea   : > { %v10463_v50 = vpop.f32.mrf.mxu1  ;;  %v931_v61 = vpop.f32.mrf.mxu0 }
  0xeb   : > { %v932_v8 = vadd.f32 %v931_v61, %v821_v62  ;;  %v564_v62 = vadd.f32 %v10431_v55, %v10447_v31  ;;  %v781_v55 = vpop.f32.mrf.mxu2  ;;  %v862_v29 = vpop.f32.mrf.mxu3 }
  0xed   : > { %v693_v7 = vadd.f32 %v10463_v50, %v564_v62 }
  0xee   : > { %v1635_v54 = vpop.permute.xlu2 %1634 }
  0xef   : > { %v782_v50 = vadd.f32 %v781_v55, %v693_v7  ;;  %1658 = vst.msk [vmem:[#allocation5 + $0xc0] sm:$0xff] %vm1283_vm2, %v1635_v54 }
  0xf1   : > { %v863_v9 = vadd.f32 %v862_v29, %v782_v50 }
  0xf2   : > { %v996_v30 = vpop.f32.mrf.mxu1  ;;  %v935_v3 = vpop.f32.mrf.mxu0 }
  0xf3   : > { %v10483_v32 = vadd.f32 %v996_v30, %v932_v8  ;;  %v936_v19 = vadd.f32 %v935_v3, %v827_v5  ;;  %v777_v8 = vadd.f32 %v776_v43, %v689_v56 }
  0xf5   : > { %16096 = vst [vmem:[#allocation6_spill] sm:$0xff] %v10483_v32  ;;  %1126 = vrot.lane.b32.xlu0 %v10483_v32, %s9902_s22  ;;  %1159 = vrot.lane.b32.xlu1 %v10483_v32, %s9904_s27  ;;  %v857_v39 = vadd.f32 %v856_v53, %v777_v8 }
  0xf6   : > { %1110 = vst.msk [vmem:[#allocation2 + $0x11] sm:$0xff] %vm1027_vm0, %v10483_v32 }
  0xfa   : > { %v939_v10 = vpop.f32.mrf.mxu0  ;;  %v1000_v11 = vpop.f32.mrf.mxu1 }
  0xfb   : > { %v10624_v17 = vadd.f32 %v1000_v11, %v936_v19  ;;  %v940_v40 = vadd.f32 %v939_v10, %v833_v35 }
  0xfd   : > { %1192 = vrot.lane.b32.xlu0 %v10483_v32, %s9903_s24  ;;  %16097 = vst [vmem:[#allocation7_spill] sm:$0xff] %v10624_v17  ;;  %1194 = vrot.lane.b32.xlu2 %v10624_v17, %s9903_s24  ;;  %v1810_v31 = vld [vmem:[#allocation2 + $0x12] sm:$0xff] }
  0xfe   : > { %1128 = vrot.lane.b32.xlu1 %v10624_v17, %s9902_s22  ;;  %1111 = vst.msk [vmem:[#allocation2 + $0x21] sm:$0xff] %vm1027_vm0, %v10624_v17  ;;  %v1390_v14 = vld [vmem:[#allocation2 + $0x11] sm:$0xff] }
  0xff   : > { %v2340_v19 = vld [vmem:[#allocation2 + $0x11] sm:$0xff] }
 0x100   : > { %2348 = vst.msk [vmem:[#allocation5 + $0x240] sm:$0xff] %vm1027_vm0, %v2340_v19 }
 0x102   : > { %v943_v26 = vpop.f32.mrf.mxu0  ;;  %v1004_v27 = vpop.f32.mrf.mxu1 }
 0x103   : > { %v10667_v51 = vadd.f32 %v1004_v27, %v940_v40  ;;  %v944_v47 = vadd.f32 %v943_v26, %v839_v37 }
 0x105   : > { %1161 = vrot.lane.b32.xlu2 %v10624_v17, %s9904_s27  ;;  %16098 = vst [vmem:[#allocation8_spill] sm:$0xff] %v10667_v51  ;;  %1826 = vrot.lane.b32.xlu0 %v1810_v31, %s9903_s24  ;;  %v1391_v23 = vld [vmem:[#allocation2 + $0x21] sm:$0xff] }
 0x106   : > { %1112 = vst.msk [vmem:[#allocation2 + $0x31] sm:$0xff] %vm1027_vm0, %v10667_v51  ;;  %1406 = vrot.lane.b32.xlu1 %v1390_v14, %s9905_s28  ;;  %v10726_v3 = vld [vmem:[#allocation2 + $0x21] sm:$0xff] }
 0x107   : > { %16102 = vst [vmem:[#allocation12_spill] sm:$0xff] %v10726_v3  ;;  %v2692_v20 = vld [vmem:[#allocation2 + $0x22] sm:$0xff] }
 0x108   : > { %2349 = vst.msk [vmem:[#allocation5 + $0x258] sm:$0xff] %vm1027_vm0, %v10726_v3  ;;  %v1811_v48 = vld [vmem:[#allocation2 + $0x22] sm:$0xff] }
 0x109   : > { %2700 = vst.msk [vmem:[#allocation5 + $0x248] sm:$0xff] %vm1027_vm0, %v2692_v20 }
 0x10a   : > { %v947_v42 = vpop.f32.mrf.mxu0  ;;  %v1008_v46 = vpop.f32.mrf.mxu1 }
 0x10b   : > { %v948_v6 = vadd.f32 %v947_v42, %v845_v38  ;;  %v10701_v44 = vadd.f32 %v1008_v46, %v944_v47 }
 0x10d   : > { %1163 = vrot.lane.b32.xlu2 %v10667_v51, %s9904_s27  ;;  %16099 = vst [vmem:[#allocation9_spill] sm:$0xff] %v10701_v44  ;;  %v10735_v5 = vld [vmem:[#allocation2 + $0x31] sm:$0xff]  ;;  %1130 = vrot.lane.b32.xlu0 %v10667_v51, %s9902_s22 }
 0x10e   : > { %1113 = vst.msk [vmem:[#allocation2 + $0x41] sm:$0xff] %vm1027_vm0, %v10701_v44  ;;  %v2693_v22 = vld [vmem:[#allocation2 + $0x32] sm:$0xff]  ;;  %1730 = vrot.lane.b32.xlu1 %v1390_v14, %s9906_s29 }
 0x10f   : > { %16104 = vst [vmem:[#allocation14_spill] sm:$0xff] %v10735_v5  ;;  %v1716_v41 = vld [vmem:[#allocation2 + $0x31] sm:$0xff] }
 0x110   : > { %2350 = vst.msk [vmem:[#allocation5 + $0x270] sm:$0xff] %vm1027_vm0, %v10735_v5  ;;  %v1812_v52 = vld [vmem:[#allocation2 + $0x32] sm:$0xff] }
 0x111   : > { %2701 = vst.msk [vmem:[#allocation5 + $0x260] sm:$0xff] %vm1027_vm0, %v2693_v22 }
 0x112   : > { %v951_v2 = vpop.f32.mrf.mxu0  ;;  %v1012_v13 = vpop.f32.mrf.mxu1 }
 0x113   : > { %v952_v45 = vadd.f32 %v951_v2, %v851_v49  ;;  %v10705_v57 = vadd.f32 %v1012_v13, %v948_v6  ;;  %v1309_v2 = vpop.permute.xlu1 %1308  ;;  %v1683_v13 = vpop.permute.xlu0 %1682 }
 0x114   : > { %1333 = vst.msk [vmem:[#allocation5] sm:$0xff] %vm1332_vm3, %v1309_v2 }
 0x115   : > { %16100 = vst [vmem:[#allocation10_spill] sm:$0xff] %v10705_v57  ;;  %1408 = vrot.lane.b32.xlu2 %v1391_v23, %s9905_s28  ;;  %v2343_v10 = vld [vmem:[#allocation2 + $0x41] sm:$0xff]  ;;  %1132 = vrot.lane.b32.xlu0 %v10701_v44, %s9902_s22 }
 0x116   : > { %1114 = vst.msk [vmem:[#allocation2 + $0x51] sm:$0xff] %vm1027_vm0, %v10705_v57  ;;  %v2694_v27 = vld [vmem:[#allocation2 + $0x42] sm:$0xff]  ;;  %2002 = vrot.lane.b32.xlu1 %v1390_v14, %s9900_s17 }
 0x117   : > { %2351 = vst.msk [vmem:[#allocation5 + $0x288] sm:$0xff] %vm1027_vm0, %v2343_v10  ;;  %v1393_v58 = vld [vmem:[#allocation2 + $0x41] sm:$0xff] }
 0x118   : > { %2702 = vst.msk [vmem:[#allocation5 + $0x278] sm:$0xff] %vm1027_vm0, %v2694_v27  ;;  %v1813_v1 = vld [vmem:[#allocation2 + $0x42] sm:$0xff] }
 0x119   : > { %1706 = vst.msk [vmem:[#allocation5 + $0xc0] sm:$0xff] %vm1332_vm3, %v1683_v13 }
 0x11a   : > { %v1016_v61 = vpop.f32.mrf.mxu1  ;;  %v955_v30 = vpop.f32.mrf.mxu0 }
 0x11b   : > { %v10711_v60 = vadd.f32 %v1016_v61, %v952_v45  ;;  %v956_v15 = vadd.f32 %v955_v30, %v857_v39 }
 0x11d   : > { %16101 = vst [vmem:[#allocation11_spill] sm:$0xff] %v10711_v60  ;;  %v2344_v11 = vld [vmem:[#allocation2 + $0x51] sm:$0xff]  ;;  %1732 = vrot.lane.b32.xlu2 %v1391_v23, %s9906_s29  ;;  %1734 = vrot.lane.b32.xlu0 %v1716_v41, %s9906_s29 }
 0x11e   : > { %1115 = vst.msk [vmem:[#allocation2 + $0x61] sm:$0xff] %vm1027_vm0, %v10711_v60  ;;  %v2695_v28 = vld [vmem:[#allocation2 + $0x52] sm:$0xff]  ;;  %1196 = vrot.lane.b32.xlu1 %v10667_v51, %s9903_s24 }
 0x11f   : > { %2352 = vst.msk [vmem:[#allocation5 + $0x2a0] sm:$0xff] %vm1027_vm0, %v2344_v11  ;;  %v1394_v47 = vld [vmem:[#allocation2 + $0x51] sm:$0xff] }
 0x120   : > { %2703 = vst.msk [vmem:[#allocation5 + $0x290] sm:$0xff] %vm1027_vm0, %v2695_v28 }
 0x122   : > { %v1020_v24 = vpop.f32.mrf.mxu1  ;;  %v959_v16 = vpop.f32.mrf.mxu0 }
 0x123   : > { %v10729_v4 = vadd.f32 %v1020_v24, %v956_v15  ;;  %v960_v21 = vadd.f32 %v959_v16, %v863_v9  ;;  %v1814_v15 = vld [vmem:[#allocation2 + $0x52] sm:$0xff] }
 0x125   : > { %16103 = vst [vmem:[#allocation13_spill] sm:$0xff] %v10729_v4  ;;  %v2345_v33 = vld [vmem:[#allocation2 + $0x61] sm:$0xff]  ;;  %2004 = vrot.lane.b32.xlu2 %v1391_v23, %s9900_s17  ;;  %2006 = vrot.lane.b32.xlu0 %v1716_v41, %s9900_s17 }
 0x126   : > { %1116 = vst.msk [vmem:[#allocation2 + $0x71] sm:$0xff] %vm1027_vm0, %v10729_v4  ;;  %v2696_v35 = vld [vmem:[#allocation2 + $0x62] sm:$0xff]  ;;  %1828 = vrot.lane.b32.xlu1 %v1811_v48, %s9903_s24 }
 0x127   : > { %2353 = vst.msk [vmem:[#allocation5 + $0x2b8] sm:$0xff] %vm1027_vm0, %v2345_v33  ;;  %v1719_v8 = vld [vmem:[#allocation2 + $0x61] sm:$0xff] }
 0x128   : > { %2704 = vst.msk [vmem:[#allocation5 + $0x2a8] sm:$0xff] %vm1027_vm0, %v2696_v35 }
 0x12a   : > { %v1024_v25 = vpop.f32.mrf.mxu1 }
 0x12b   : > { %v10746_v26 = vadd.f32 %v1024_v25, %v960_v21 }
 0x12d   : > { %16105 = vst [vmem:[#allocation15_spill] sm:$0xff] %v10746_v26  ;;  %v2346_v36 = vld [vmem:[#allocation2 + $0x71] sm:$0xff]  ;;  %1165 = vrot.lane.b32.xlu2 %v10701_v44, %s9904_s27  ;;  %1134 = vrot.lane.b32.xlu0 %v10705_v57, %s9902_s22 }
 0x12e   : > { %1117 = vst.msk [vmem:[#allocation2 + $0x81] sm:$0xff] %vm1027_vm0, %v10746_v26  ;;  %v2697_v40 = vld [vmem:[#allocation2 + $0x72] sm:$0xff]  ;;  %2292 = vrot.lane.b32.xlu1 %v1391_v23, %s9902_s22  ;;  %v1815_v23 = vld [vmem:[#allocation2 + $0x62] sm:$0xff] }
 0x12f   : > { %2354 = vst.msk [vmem:[#allocation5 + $0x2d0] sm:$0xff] %vm1027_vm0, %v2346_v36  ;;  %v1396_v29 = vld [vmem:[#allocation2 + $0x71] sm:$0xff] }
 0x130   : > { %2705 = vst.msk [vmem:[#allocation5 + $0x2c0] sm:$0xff] %vm1027_vm0, %v2697_v40  ;;  %v1816_v9 = vld [vmem:[#allocation2 + $0x72] sm:$0xff] }
 0x135   : > { %v2347_v42 = vld [vmem:[#allocation2 + $0x81] sm:$0xff]  ;;  %1410 = vrot.lane.b32.xlu2 %v1716_v41, %s9905_s28  ;;  %1412 = vrot.lane.b32.xlu0 %v1393_v58, %s9905_s28 }
 0x136   : > { %v2698_v46 = vld [vmem:[#allocation2 + $0x82] sm:$0xff]  ;;  %2355 = vst.msk [vmem:[#allocation5 + $0x2e8] sm:$0xff] %vm1027_vm0, %v2347_v42  ;;  %1198 = vrot.lane.b32.xlu1 %v10701_v44, %s9903_s24 }
 0x137   : > { %2706 = vst.msk [vmem:[#allocation5 + $0x2d8] sm:$0xff] %vm1027_vm0, %v2698_v46  ;;  %v1721_v19 = vld [vmem:[#allocation2 + $0x81] sm:$0xff] }
 0x138   : > { %v1817_v48 = vld [vmem:[#allocation2 + $0x82] sm:$0xff] }
 0x13d   : > { %1830 = vrot.lane.b32.xlu2 %v1812_v52, %s9903_s24  ;;  %1832 = vrot.lane.b32.xlu0 %v1813_v1, %s9903_s24 }
 0x13e   : > { %1200 = vrot.lane.b32.xlu1 %v10705_v57, %s9903_s24 }
 0x145   : > { %2294 = vrot.lane.b32.xlu2 %v1716_v41, %s9902_s22  ;;  %1136 = vrot.lane.b32.xlu0 %v10711_v60, %s9902_s22 }
 0x146   : > { %1736 = vrot.lane.b32.xlu1 %v1393_v58, %s9906_s29 }
 0x14d   : > { %1167 = vrot.lane.b32.xlu2 %v10705_v57, %s9904_s27  ;;  %1138 = vrot.lane.b32.xlu0 %v10729_v4, %s9902_s22 }
 0x14e   : > { %1202 = vrot.lane.b32.xlu1 %v10711_v60, %s9903_s24 }
 0x155   : > { %1169 = vrot.lane.b32.xlu2 %v10711_v60, %s9904_s27  ;;  %1171 = vrot.lane.b32.xlu0 %v10729_v4, %s9904_s27 }
 0x156   : > { %1414 = vrot.lane.b32.xlu1 %v1394_v47, %s9905_s28 }
 0x157   : > { %v1195_v0 = vpop.permute.xlu2 %1194 }
 0x158   : > { %1218 = vst.msk [vmem:[#allocation2 + $0x201] sm:$0xff] %vm1027_vm0, %v1195_v0 }
 0x15d   : > { %1738 = vrot.lane.b32.xlu2 %v1394_v47, %s9906_s29  ;;  %1740 = vrot.lane.b32.xlu0 %v1719_v8, %s9906_s29 }
 0x15e   : > { %1834 = vrot.lane.b32.xlu1 %v1814_v15, %s9903_s24 }
 0x15f   : > { %v10791_v18 = vld [vmem:[#allocation2 + $0x201] sm:$0xff]  ;;  %v1162_v34 = vpop.permute.xlu2 %1161 }
 0x160   : > { %1595 = vst.msk [vmem:[#allocation5 + $0x20] sm:$0xff] %vm1027_vm0, %v10791_v18  ;;  %v10803_v43 = vld [vmem:[#allocation2 + $0x200] sm:$0xff] }
 0x161   : > { %1185 = vst.msk [vmem:[#allocation2 + $0x161] sm:$0xff] %vm1027_vm0, %v1162_v34 }
 0x162   : > { %1236 = vst.msk [vmem:[#allocation5 + $0x30] sm:$0xff] %vm1027_vm0, %v10803_v43 }
 0x165   : > { %1416 = vrot.lane.b32.xlu2 %v1719_v8, %s9905_s28  ;;  %1418 = vrot.lane.b32.xlu0 %v1396_v29, %s9905_s28 }
 0x166   : > { %1204 = vrot.lane.b32.xlu1 %v10729_v4, %s9903_s24 }
 0x167   : > { %v1160_v37 = vpop.permute.xlu1 %1159  ;;  %v1127_v38 = vpop.permute.xlu0 %1126 }
 0x168   : > { %1184 = vst.msk [vmem:[#allocation2 + $0x151] sm:$0xff] %vm1027_vm0, %v1160_v37  ;;  %v1164_v49 = vpop.permute.xlu2 %1163  ;;  %v10807_v56 = vld [vmem:[#allocation2 + $0x162] sm:$0xff] }
 0x169   : > { %1151 = vst.msk [vmem:[#allocation2 + $0xb1] sm:$0xff] %vm1027_vm0, %v1127_v38  ;;  %v10822_v53 = vld [vmem:[#allocation2 + $0x161] sm:$0xff] }
 0x16a   : > { %1186 = vst.msk [vmem:[#allocation2 + $0x171] sm:$0xff] %vm1027_vm0, %v1164_v49 }
 0x16b   : > { %1963 = vst.msk [vmem:[#allocation5 + $0xe0] sm:$0xff] %vm1027_vm0, %v10807_v56 }
 0x16c   : > { %1612 = vst.msk [vmem:[#allocation5 + $0xf0] sm:$0xff] %vm1027_vm0, %v10822_v53 }
 0x16d   : > { %1836 = vrot.lane.b32.xlu2 %v1815_v23, %s9903_s24  ;;  %1838 = vrot.lane.b32.xlu0 %v1816_v9, %s9903_s24 }
 0x16e   : > { %1140 = vrot.lane.b32.xlu1 %v10746_v26, %s9902_s22 }
 0x16f   : > { %v10816_v6 = vld [vmem:[#allocation2 + $0x152] sm:$0xff]  ;;  %v1193_v45 = vpop.permute.xlu0 %1192 }
 0x170   : > { %1962 = vst.msk [vmem:[#allocation5 + $0xc8] sm:$0xff] %vm1027_vm0, %v10816_v6  ;;  %v1129_v62 = vpop.permute.xlu1 %1128  ;;  %v1341_v7 = vld [vmem:[#allocation2 + $0xb0] sm:$0xff]  ;;  %v10860_v50 = vpop.permute.xlu2 %1408 }
 0x171   : > { %1217 = vst.msk [vmem:[#allocation2 + $0x1f1] sm:$0xff] %vm1027_vm0, %v1193_v45  ;;  %v10826_v61 = vld [vmem:[#allocation2 + $0x172] sm:$0xff] }
 0x172   : > { %1964 = vst.msk [vmem:[#allocation5 + $0xf8] sm:$0xff] %vm1027_vm0, %v10826_v61  ;;  %v10840_v55 = vld [vmem:[#allocation2 + $0x151] sm:$0xff] }
 0x173   : > { %1152 = vst.msk [vmem:[#allocation2 + $0xc1] sm:$0xff] %vm1027_vm0, %v1129_v62  ;;  %v10842_v31 = vld [vmem:[#allocation2 + $0x171] sm:$0xff] }
 0x174   : > { %1978 = vst.msk [vmem:[#allocation5 + $0x180] sm:$0xff] %vm1027_vm0, %v1341_v7  ;;  %v1439_v22 = vld [vmem:[#allocation2 + $0xb1] sm:$0xff] }
 0x175   : > { %1611 = vst.msk [vmem:[#allocation5 + $0xd8] sm:$0xff] %vm1027_vm0, %v10840_v55  ;;  %1206 = vrot.lane.b32.xlu2 %v10746_v26, %s9903_s24 }
 0x176   : > { %1613 = vst.msk [vmem:[#allocation5 + $0x108] sm:$0xff] %vm1027_vm0, %v10842_v31  ;;  %1173 = vrot.lane.b32.xlu1 %v10746_v26, %s9904_s27 }
 0x177   : > { %v10878_v11 = vpop.permute.xlu0 %1826 }
 0x178   : > { %v10835_v30 = vld [vmem:[#allocation2 + $0x1f1] sm:$0xff]  ;;  %v10867_v16 = vpop.permute.xlu2 %1732  ;;  %v10880_v20 = vpop.permute.xlu1 %1406 }
 0x179   : > { %1594 = vst.msk [vmem:[#allocation5 + $0x8] sm:$0xff] %vm1027_vm0, %v10835_v30  ;;  %v1488_v39 = vld [vmem:[#allocation2 + $0x1f0] sm:$0xff] }
 0x17a   : > { %1235 = vst.msk [vmem:[#allocation5 + $0x18] sm:$0xff] %vm1027_vm0, %v1488_v39  ;;  %v10847_v14 = vld [vmem:[#allocation2 + $0xc1] sm:$0xff]  ;;  %1504 = vrot.lane.b32.xlu0 %v1488_v39, %s9904_s27 }
 0x17b   : > { %2332 = vst.msk [vmem:[#allocation5 + $0x188] sm:$0xff] %vm1027_vm0, %v10847_v14  ;;  %v10855_v24 = vld [vmem:[#allocation2 + $0xc0] sm:$0xff] }
 0x17c   : > { %1979 = vst.msk [vmem:[#allocation5 + $0x198] sm:$0xff] %vm1027_vm0, %v10855_v24 }
 0x17d   : > { %1744 = vrot.lane.b32.xlu2 %v1721_v19, %s9906_s29 }
 0x17e   : > { %1742 = vrot.lane.b32.xlu1 %v1396_v29, %s9906_s29 }
 0x17f   : > { %v1131_v25 = vpop.permute.xlu0 %1130 }
 0x180   : > { %v2005_v10 = vpop.permute.xlu2 %2004  ;;  %v1731_v27 = vpop.permute.xlu1 %1730  ;;  %1153 = vst.msk [vmem:[#allocation2 + $0xd1] sm:$0xff] %vm1027_vm0, %v1131_v25 }
 0x181   : > { %2027 = vst.msk [vmem:[#allocation5 + $0x198] sm:$0xff] %vm1283_vm2, %v2005_v10 }
 0x182   : > { %1636 = vrot.lane.b32.xlu0 %v10835_v30, %s9900_s17  ;;  %1754 = vst.msk [vmem:[#allocation5 + $0xc0] sm:$0xff] %vm1381_vm4, %v1731_v27 }
 0x185   : > { %1357 = vrot.lane.b32.xlu2 %v1341_v7, %s9906_s29 }
 0x186   : > { %1420 = vrot.lane.b32.xlu1 %v1721_v19, %s9905_s28 }
 0x187   : > { %v10903_v36 = vld [vmem:[#allocation2 + $0xd1] sm:$0xff]  ;;  %v1133_v40 = vpop.permute.xlu0 %1132 }
 0x188   : > { %v1166_v21 = vpop.permute.xlu2 %1165  ;;  %v2003_v41 = vpop.permute.xlu1 %2002  ;;  %2333 = vst.msk [vmem:[#allocation5 + $0x1a0] sm:$0xff] %vm1027_vm0, %v10903_v36  ;;  %v10909_v46 = vld [vmem:[#allocation2 + $0xd0] sm:$0xff] }
 0x189   : > { %1187 = vst.msk [vmem:[#allocation2 + $0x181] sm:$0xff] %vm1027_vm0, %v1166_v21 }
 0x18a   : > { %2098 = vrot.lane.b32.xlu0 %v1488_v39, %s9906_s29  ;;  %1154 = vst.msk [vmem:[#allocation2 + $0xe1] sm:$0xff] %vm1027_vm0, %v1133_v40  ;;  %v2787_v40 = vld [vmem:[%s15898_s3 + $0x78] sm:$0xff] }
 0x18b   : > { %2026 = vst.msk [vmem:[#allocation5 + $0x180] sm:$0xff] %vm1283_vm2, %v2003_v41  ;;  %v11030_v41 = vand.u32 4294901760, %v2787_v40 }
 0x18c   : > { %1980 = vst.msk [vmem:[#allocation5 + $0x1b0] sm:$0xff] %vm1027_vm0, %v10909_v46 }
 0x18d   : > { %1455 = vrot.lane.b32.xlu2 %v1439_v22, %s9903_s24  ;;  %3614 = vmatpush.msra.mxu1 %v11030_v41 }
 0x18e   : > { %1840 = vrot.lane.b32.xlu1 %v1817_v48, %s9903_s24  ;;  %v2786_v48 = vld [vmem:[%s15898_s3 + $0x70] sm:$0xff]  ;;  %2891 = vmatpush.msrb.mxu2 %v11030_v41 }
 0x18f   : > { %v10920_v52 = vpop.permute.xlu0 %1734 }
 0x190   : > { %v10888_v28 = vld [vmem:[#allocation2 + $0x182] sm:$0xff]  ;;  %v10890_v33 = vpop.permute.xlu2 %1410  ;;  %v1197_v54 = vpop.permute.xlu1 %1196 }
 0x191   : > { %16106 = vst [vmem:[#allocation16_spill] sm:$0xff] %v10890_v33  ;;  %v10892_v35 = vld [vmem:[#allocation2 + $0x181] sm:$0xff] }
 0x192   : > { %1965 = vst.msk [vmem:[#allocation5 + $0x110] sm:$0xff] %vm1027_vm0, %v10888_v28  ;;  %1359 = vrot.lane.b32.xlu0 %v10855_v24, %s9906_s29  ;;  %v10922_v58 = vld [vmem:[#allocation2 + $0xe1] sm:$0xff] }
 0x193   : > { %1614 = vst.msk [vmem:[#allocation5 + $0x120] sm:$0xff] %vm1027_vm0, %v10892_v35  ;;  %v1973_v63 = vld [vmem:[#allocation2 + $0xe0] sm:$0xff] }
 0x194   : > { %1219 = vst.msk [vmem:[#allocation2 + $0x211] sm:$0xff] %vm1027_vm0, %v1197_v54  ;;  %v11038_v54 = vsub.f32 %v2787_v40, %v11030_v41 }
 0x195   : > { %1553 = vrot.lane.b32.xlu2 %v10840_v55, %s9902_s22  ;;  %2334 = vst.msk [vmem:[#allocation5 + $0x1b8] sm:$0xff] %vm1027_vm0, %v10922_v58 }
 0x196   : > { %1981 = vst.msk [vmem:[#allocation5 + $0x1c8] sm:$0xff] %vm1027_vm0, %v1973_v63  ;;  %1261 = vrot.lane.b32.xlu1 %v10840_v55, %s9900_s17  ;;  %v11040_v63 = vand.u32 4294901760, %v2786_v48  ;;  %3406 = vmatpush.msra.mxu0 %v11038_v54 }
 0x197   : > { %v2007_v1 = vpop.permute.xlu0 %2006 }
 0x198   : > { %v10907_v42 = vpop.permute.xlu2 %1830  ;;  %v10937_v2 = vpop.permute.xlu1 %1828  ;;  %2028 = vst.msk [vmem:[#allocation5 + $0x1b0] sm:$0xff] %vm1283_vm2, %v2007_v1  ;;  %v2785_v1 = vld [vmem:[%s15898_s3 + $0x68] sm:$0xff]  ;;  %3616 = vmatpush.msra.mxu1 %v11040_v63  ;;  %2893 = vmatpush.msrb.mxu2 %v11040_v63 }
 0x199   : > { %16107 = vst [vmem:[#allocation17_spill] sm:$0xff] %v10907_v42 }
 0x19a   : > { %1457 = vrot.lane.b32.xlu0 %v10847_v14, %s9903_s24 }
 0x19b   : > { %v10935_v0 = vld [vmem:[#allocation2 + $0x211] sm:$0xff] }
 0x19c   : > { %1596 = vst.msk [vmem:[#allocation5 + $0x38] sm:$0xff] %vm1027_vm0, %v10935_v0  ;;  %v10941_v34 = vld [vmem:[#allocation2 + $0x210] sm:$0xff] }
 0x19d   : > { %1310 = vrot.lane.b32.xlu2 %v10835_v30, %s9901_s21  ;;  %1237 = vst.msk [vmem:[#allocation5 + $0x48] sm:$0xff] %vm1027_vm0, %v10941_v34 }
 0x19e   : > { %1874 = vrot.lane.b32.xlu1 %v10840_v55, %s9904_s27 }
 0x19f   : > { %v1135_v37 = vpop.permute.xlu0 %1134 }
 0x1a0   : > { %v10925_v59 = vpop.permute.xlu2 %2294  ;;  %v10953_v38 = vpop.permute.xlu1 %2292  ;;  %1155 = vst.msk [vmem:[#allocation2 + $0xf1] sm:$0xff] %vm1027_vm0, %v1135_v37  ;;  %v11053_v37 = vsub.f32 %v2786_v48, %v11040_v63 }
 0x1a1   : > { %16108 = vst [vmem:[#allocation18_spill] sm:$0xff] %v10925_v59 }
 0x1a2   : > { %1555 = vrot.lane.b32.xlu0 %v10822_v53, %s9902_s22  ;;  %v15921_v40 = vand.u32 4294901760, %v11053_v37  ;;  %3409 = vmatpush.msra.mxu0 %v11053_v37 }
 0x1a4   : > { %v3188_v60 = vsub.f32 %v11053_v37, %v15921_v40  ;;  %v2782_v40 = vld [vmem:[%s15898_s3 + $0x50] sm:$0xff] }
 0x1a5   : > { %1778 = vrot.lane.b32.xlu2 %v1439_v22, %s9905_s28  ;;  %v11106_v32 = vand.u32 4294901760, %v2782_v40 }
 0x1a6   : > { %1684 = vrot.lane.b32.xlu1 %v10816_v6, %s9901_s21 }
 0x1a7   : > { %v10970_v62 = vld [vmem:[#allocation2 + $0xf1] sm:$0xff]  ;;  %v10972_v8 = vpop.permute.xlu0 %1412 }
 0x1a8   : > { %v1168_v13 = vpop.permute.xlu2 %1167  ;;  %16110 = vst [vmem:[#allocation20_spill] sm:$0xff] %v10972_v8  ;;  %v1199_v39 = vpop.permute.xlu1 %1198  ;;  %v10983_v6 = vld [vmem:[#allocation2 + $0xf0] sm:$0xff]  ;;  %v2775_v8 = vld [vmem:[%s15898_s3 + $0x18] sm:$0xff] }
 0x1a9   : > { %1188 = vst.msk [vmem:[#allocation2 + $0x191] sm:$0xff] %vm1027_vm0, %v1168_v13  ;;  %v15917_v13 = vand.u32 4294901760, %v11038_v54 }
 0x1aa   : > { %1312 = vrot.lane.b32.xlu0 %v10791_v18, %s9901_s21  ;;  %2335 = vst.msk [vmem:[#allocation5 + $0x1d0] sm:$0xff] %vm1027_vm0, %v10970_v62 }
 0x1ab   : > { %1220 = vst.msk [vmem:[#allocation2 + $0x221] sm:$0xff] %vm1027_vm0, %v1199_v39  ;;  %v2784_v39 = vld [vmem:[%s15898_s3 + $0x60] sm:$0xff] }
 0x1ac   : > { %1982 = vst.msk [vmem:[#allocation5 + $0x1e0] sm:$0xff] %vm1027_vm0, %v10983_v6  ;;  %v11070_v12 = vand.u32 4294901760, %v2784_v39 }
 0x1ad   : > { %1922 = vrot.lane.b32.xlu2 %v10835_v30, %s9902_s22 }
 0x1ae   : > { %2146 = vrot.lane.b32.xlu1 %v10840_v55, %s9905_s28  ;;  %v11088_v44 = vsub.f32 %v2784_v39, %v11070_v12  ;;  %v3189_v39 = vand.u32 4294901760, %v3188_v60 }
 0x1af   : > { %v10997_v29 = vpop.permute.xlu0 %1832 }
 0x1b0   : > { %v1170_v49 = vpop.permute.xlu2 %1169  ;;  %v10956_v47 = vld [vmem:[#allocation2 + $0x192] sm:$0xff]  ;;  %16114 = vst [vmem:[#allocation24_spill] sm:$0xff] %v10997_v29  ;;  %v1201_v9 = vpop.permute.xlu1 %1200  ;;  %v15928_v17 = vand.u32 4294901760, %v11088_v44 }
 0x1b1   : > { %16109 = vst [vmem:[#allocation19_spill] sm:$0xff] %v10956_v47  ;;  %v10959_v45 = vld [vmem:[#allocation2 + $0x191] sm:$0xff] }
 0x1b2   : > { %1189 = vst.msk [vmem:[#allocation2 + $0x1a1] sm:$0xff] %vm1027_vm0, %v1170_v49  ;;  %1780 = vrot.lane.b32.xlu0 %v10847_v14, %s9905_s28  ;;  %v10999_v19 = vld [vmem:[#allocation2 + $0x221] sm:$0xff]  ;;  %v11055_v49 = vand.u32 4294901760, %v2785_v1 }
 0x1b3   : > { %1966 = vst.msk [vmem:[#allocation5 + $0x128] sm:$0xff] %vm1027_vm0, %v10956_v47  ;;  %v11004_v21 = vld [vmem:[#allocation2 + $0x220] sm:$0xff] }
 0x1b4   : > { %1615 = vst.msk [vmem:[#allocation5 + $0x138] sm:$0xff] %vm1027_vm0, %v10959_v45  ;;  %v11068_v48 = vsub.f32 %v2785_v1, %v11055_v49  ;;  %3618 = vmatpush.msra.mxu1 %v11055_v49  ;;  %2895 = vmatpush.msrb.mxu2 %v11055_v49 }
 0x1b5   : > { %2050 = vrot.lane.b32.xlu2 %v1439_v22, %s9901_s21  ;;  %1221 = vst.msk [vmem:[#allocation2 + $0x231] sm:$0xff] %vm1027_vm0, %v1201_v9 }
 0x1b6   : > { %1597 = vst.msk [vmem:[#allocation5 + $0x50] sm:$0xff] %vm1027_vm0, %v10999_v19  ;;  %1506 = vrot.lane.b32.xlu1 %v10803_v43, %s9904_s27  ;;  %v15925_v57 = vand.u32 4294901760, %v11068_v48  ;;  %3412 = vmatpush.msra.mxu0 %v11068_v48 }
 0x1b7   : > { %1238 = vst.msk [vmem:[#allocation5 + $0x60] sm:$0xff] %vm1027_vm0, %v11004_v21  ;;  %v1137_v55 = vpop.permute.xlu0 %1136  ;;  %3620 = vmatpush.msra.mxu1 %v11070_v12  ;;  %2897 = vmatpush.msrb.mxu2 %v11070_v12 }
 0x1b8   : > { %v10978_v15 = vpop.permute.xlu2 %1738  ;;  %v11018_v22 = vpop.permute.xlu1 %1736  ;;  %1156 = vst.msk [vmem:[#allocation2 + $0x101] sm:$0xff] %vm1027_vm0, %v1137_v55  ;;  %v3194_v51 = vsub.f32 %v11068_v48, %v15925_v57  ;;  %3415 = vmatpush.msra.mxu0 %v11088_v44 }
 0x1b9   : > { %v10976_v7 = vld [vmem:[#allocation2 + $0x1a2] sm:$0xff]  ;;  %16112 = vst [vmem:[#allocation22_spill] sm:$0xff] %v10978_v15 }
 0x1ba   : > { %16111 = vst [vmem:[#allocation21_spill] sm:$0xff] %v10976_v7  ;;  %v10980_v23 = vld [vmem:[#allocation2 + $0x1a1] sm:$0xff]  ;;  %1924 = vrot.lane.b32.xlu0 %v10791_v18, %s9902_s22  ;;  %v3195_v60 = vand.u32 4294901760, %v3194_v51 }
 0x1bb   : > { %16113 = vst [vmem:[#allocation23_spill] sm:$0xff] %v10980_v23 }
 0x1bc   : > { %1967 = vst.msk [vmem:[#allocation5 + $0x140] sm:$0xff] %vm1027_vm0, %v10976_v7  ;;  %v11020_v25 = vld [vmem:[#allocation2 + $0x230] sm:$0xff]  ;;  %v11254_v7 = vand.u32 4294901760, %v2775_v8 }
 0x1bd   : > { %1616 = vst.msk [vmem:[#allocation5 + $0x150] sm:$0xff] %vm1027_vm0, %v10980_v23  ;;  %2194 = vrot.lane.b32.xlu2 %v10835_v30, %s9903_s24  ;;  %v11016_v30 = vld [vmem:[#allocation2 + $0x231] sm:$0xff] }
 0x1be   : > { %16116 = vst [vmem:[#allocation26_spill] sm:$0xff] %v11018_v22  ;;  %1638 = vrot.lane.b32.xlu1 %v10791_v18, %s9900_s17 }
 0x1bf   : > { %1598 = vst.msk [vmem:[#allocation5 + $0x68] sm:$0xff] %vm1027_vm0, %v11016_v30  ;;  %v1139_v9 = vpop.permute.xlu0 %1138  ;;  %v11074_v26 = vld [vmem:[#allocation2 + $0x101] sm:$0xff] }
 0x1c0   : > { %v11002_v10 = vpop.permute.xlu2 %1416  ;;  %1239 = vst.msk [vmem:[#allocation5 + $0x78] sm:$0xff] %vm1027_vm0, %v11020_v25  ;;  %v1203_v55 = vpop.permute.xlu1 %1202 }
 0x1c1   : > { %16115 = vst [vmem:[#allocation25_spill] sm:$0xff] %v11002_v10 }
 0x1c2   : > { %2243 = vrot.lane.b32.xlu0 %v10855_v24, %s9904_s27  ;;  %v3182_v24 = vsub.f32 %v11038_v54, %v15917_v13  ;;  %16118 = vst [vmem:[#allocation28_spill] sm:$0xff] %v11074_v26  ;;  %v2783_v13 = vld [vmem:[%s15898_s3 + $0x58] sm:$0xff] }
 0x1c3   : > { %1157 = vst.msk [vmem:[#allocation2 + $0x111] sm:$0xff] %vm1027_vm0, %v1139_v9  ;;  %v11092_v9 = vld [vmem:[#allocation2 + $0x100] sm:$0xff] }
 0x1c4   : > { %2336 = vst.msk [vmem:[#allocation5 + $0x1e8] sm:$0xff] %vm1027_vm0, %v11074_v26  ;;  %v3183_v1 = vand.u32 4294901760, %v3182_v24  ;;  %v11096_v24 = vand.u32 4294901760, %v2783_v13 }
 0x1c5   : > { %1263 = vrot.lane.b32.xlu2 %v10822_v53, %s9900_s17  ;;  %16119 = vst [vmem:[#allocation29_spill] sm:$0xff] %v11092_v9 }
 0x1c6   : > { %1222 = vst.msk [vmem:[#allocation2 + $0x241] sm:$0xff] %vm1027_vm0, %v1203_v55  ;;  %3184 = vmatpush.msrb.mxu3 %v3183_v1  ;;  %v11110_v55 = vsub.f32 %v2783_v13, %v11096_v24  ;;  %2100 = vrot.lane.b32.xlu1 %v10803_v43, %s9906_s29  ;;  %v3200_v13 = vsub.f32 %v11088_v44, %v15928_v17  ;;  %v2780_v43 = vld [vmem:[%s15898_s3 + $0x40] sm:$0xff] }
 0x1c7   : > { %1983 = vst.msk [vmem:[#allocation5 + $0x1f8] sm:$0xff] %vm1027_vm0, %v11092_v9  ;;  %v11127_v1 = vsub.f32 %v2782_v40, %v11106_v32  ;;  %3622 = vmatpush.msra.mxu1 %v11096_v24  ;;  %2899 = vmatpush.msrb.mxu2 %v11096_v24 }
 0x1c8   : > { %v11024_v27 = vpop.permute.xlu2 %1836  ;;  %3190 = vmatpush.msrb.mxu3 %v3189_v39  ;;  %v15929_v5 = vand.u32 4294901760, %v11110_v55  ;;  %v11139_v3 = vpop.permute.xlu1 %1414  ;;  %v3201_v17 = vand.u32 4294901760, %v3200_v13  ;;  %3418 = vmatpush.msra.mxu0 %v11110_v55 }
 0x1c9   : > { %16117 = vst [vmem:[#allocation27_spill] sm:$0xff] %v11024_v27  ;;  %v16124_v10 = vand.u32 4294901760, %v11127_v1  ;;  %3624 = vmatpush.msra.mxu1 %v11106_v32  ;;  %2901 = vmatpush.msrb.mxu2 %v11106_v32 }
 0x1ca   : > { %2052 = vrot.lane.b32.xlu0 %v10847_v14, %s9901_s21  ;;  %v11137_v51 = vld [vmem:[#allocation2 + $0x111] sm:$0xff]  ;;  %v1172_v14 = vpop.permute.xlu0 %1171  ;;  %16121 = vst [vmem:[#allocation31_spill] sm:$0xff] %v11139_v3  ;;  %3196 = vmatpush.msrb.mxu3 %v3195_v60  ;;  %v3206_v13 = vsub.f32 %v11110_v55, %v15929_v5 }
 0x1cb   : > { %16120 = vst [vmem:[#allocation30_spill] sm:$0xff] %v11137_v51  ;;  %v3212_v15 = vsub.f32 %v11127_v1, %v16124_v10  ;;  %3421 = vmatpush.msra.mxu0 %v11127_v1  ;;  %v2778_v10 = vld [vmem:[%s15898_s3 + $0x30] sm:$0xff] }
 0x1cc   : > { %2337 = vst.msk [vmem:[#allocation5 + $0x200] sm:$0xff] %vm1027_vm0, %v11137_v51  ;;  %3202 = vmatpush.msrb.mxu3 %v3201_v17 }
 0x1cd   : > { %1876 = vrot.lane.b32.xlu2 %v10822_v53, %s9904_s27  ;;  %v11160_v40 = vld [vmem:[#allocation2 + $0x241] sm:$0xff]  ;;  %1190 = vst.msk [vmem:[#allocation2 + $0x1b1] sm:$0xff] %vm1027_vm0, %v1172_v14  ;;  %v3207_v14 = vand.u32 4294901760, %v3206_v13  ;;  %v3213_v60 = vand.u32 4294901760, %v3212_v15  ;;  %v11192_v13 = vand.u32 4294901760, %v2778_v10 }
 0x1ce   : > { %16123 = vst [vmem:[#allocation33_spill] sm:$0xff] %v11160_v40  ;;  %v2777_v15 = vld [vmem:[%s15898_s3 + $0x28] sm:$0xff]  ;;  %1361 = vrot.lane.b32.xlu1 %v10909_v46, %s9906_s29 }
 0x1cf   : > { %1599 = vst.msk [vmem:[#allocation5 + $0x80] sm:$0xff] %vm1027_vm0, %v11160_v40  ;;  %3208 = vmatpush.msrb.mxu3 %v3207_v14  ;;  %v11211_v14 = vsub.f32 %v2778_v10, %v11192_v13  ;;  %v2774_v40 = vld [vmem:[%s15898_s3 + $0x10] sm:$0xff] }
 0x1d0   : > { %v1207_v4 = vpop.permute.xlu2 %1206 }
 0x1d1   : > { %1224 = vst.msk [vmem:[#allocation2 + $0x261] sm:$0xff] %vm1027_vm0, %v1207_v4  ;;  %v2781_v4 = vld [vmem:[%s15898_s3 + $0x48] sm:$0xff]  ;;  %3214 = vmatpush.msrb.mxu3 %v3213_v60 }
 0x1d2   : > { %v11129_v57 = vand.u32 4294901760, %v2781_v4  ;;  %2196 = vrot.lane.b32.xlu0 %v10791_v18, %s9903_s24  ;;  %v2776_v18 = vld [vmem:[%s15898_s3 + $0x20] sm:$0xff] }
 0x1d3   : > { %v11232_v60 = vand.u32 4294901760, %v2776_v18 }
 0x1d4   : > { %v11144_v27 = vsub.f32 %v2781_v4, %v11129_v57  ;;  %v2779_v4 = vld [vmem:[%s15898_s3 + $0x38] sm:$0xff]  ;;  %3626 = vmatpush.msra.mxu1 %v11129_v57  ;;  %2903 = vmatpush.msrb.mxu2 %v11129_v57 }
 0x1d5   : > { %1686 = vrot.lane.b32.xlu2 %v10807_v56, %s9901_s21  ;;  %v11147_v56 = vand.u32 4294901760, %v2780_v43  ;;  %v11178_v59 = vand.u32 4294901760, %v2779_v4 }
 0x1d6   : > { %v16127_v51 = vand.u32 4294901760, %v11144_v27  ;;  %3424 = vmatpush.msra.mxu0 %v11144_v27  ;;  %1508 = vrot.lane.b32.xlu1 %v10941_v34, %s9904_s27 }
 0x1d7   : > { %v11169_v5 = vsub.f32 %v2780_v43, %v11147_v56  ;;  %v1976_v43 = vld [vmem:[#allocation2 + $0x110] sm:$0xff]  ;;  %v11195_v22 = vsub.f32 %v2779_v4, %v11178_v59  ;;  %3628 = vmatpush.msra.mxu1 %v11147_v56  ;;  %2905 = vmatpush.msrb.mxu2 %v11147_v56 }
 0x1d8   : > { %v11151_v39 = vpop.permute.xlu2 %1744  ;;  %v11176_v3 = vld [vmem:[#allocation2 + $0x261] sm:$0xff]  ;;  %v3218_v29 = vsub.f32 %v11144_v27, %v16127_v51  ;;  %1984 = vst.msk [vmem:[#allocation5 + $0x210] sm:$0xff] %vm1027_vm0, %v1976_v43  ;;  %v11234_v43 = vld [vmem:[#allocation2 + $0x1b2] sm:$0xff] }
 0x1d9   : > { %16122 = vst [vmem:[#allocation32_spill] sm:$0xff] %v11151_v39  ;;  %v11172_v39 = vld [vmem:[#allocation2 + $0x240] sm:$0xff]  ;;  %v15933_v17 = vand.u32 4294901760, %v11169_v5  ;;  %3427 = vmatpush.msra.mxu0 %v11169_v5  ;;  %3630 = vmatpush.msra.mxu1 %v11178_v59 }
 0x1da   : > { %16125 = vst [vmem:[#allocation34_spill] sm:$0xff] %v11172_v39  ;;  %v3219_v51 = vand.u32 4294901760, %v3218_v29  ;;  %v11222_v29 = vpop.permute.xlu0 %1740  ;;  %2907 = vmatpush.msrb.mxu2 %v11178_v59  ;;  %1459 = vrot.lane.b32.xlu0 %v10903_v36, %s9903_s24 }
 0x1db   : > { %16126 = vst [vmem:[#allocation35_spill] sm:$0xff] %v11176_v3  ;;  %v3224_v4 = vsub.f32 %v11169_v5, %v15933_v17  ;;  %v11224_v17 = vpop.permute.xlu1 %1834  ;;  %3430 = vmatpush.msra.mxu0 %v11195_v22  ;;  %3632 = vmatpush.msra.mxu1 %v11192_v13 }
 0x1dc   : > { %1601 = vst.msk [vmem:[#allocation5 + $0xb0] sm:$0xff] %vm1027_vm0, %v11176_v3  ;;  %v11213_v3 = vand.u32 4294901760, %v2777_v15  ;;  %3220 = vmatpush.msrb.mxu3 %v3219_v51  ;;  %v11263_v51 = vand.u32 4294901760, %v2774_v40  ;;  %2909 = vmatpush.msrb.mxu2 %v11192_v13 }
 0x1dd   : > { %1240 = vst.msk [vmem:[#allocation5 + $0x90] sm:$0xff] %vm1027_vm0, %v11172_v39  ;;  %2148 = vrot.lane.b32.xlu2 %v10822_v53, %s9905_s28  ;;  %v3225_v10 = vand.u32 4294901760, %v3224_v4  ;;  %3433 = vmatpush.msra.mxu0 %v11211_v14 }
 0x1de   : > { %16128 = vst [vmem:[#allocation36_spill] sm:$0xff] %v11222_v29  ;;  %v11230_v53 = vsub.f32 %v2777_v15, %v11213_v3  ;;  %v16131_v29 = vand.u32 4294901760, %v11195_v22  ;;  %v16132_v15 = vand.u32 4294901760, %v11211_v14  ;;  %3634 = vmatpush.msra.mxu1 %v11213_v3  ;;  %2911 = vmatpush.msrb.mxu2 %v11213_v3 }
 0x1df   : > { %16129 = vst [vmem:[#allocation37_spill] sm:$0xff] %v11224_v17  ;;  %3226 = vmatpush.msrb.mxu3 %v3225_v10  ;;  %v11278_v10 = vsub.f32 %v2774_v40, %v11263_v51  ;;  %1314 = vrot.lane.b32.xlu1 %v10935_v0, %s9901_s21 }
 0x1e0   : > { %16130 = vst [vmem:[#allocation38_spill] sm:$0xff] %v11234_v43  ;;  %v1358_v42 = vpop.permute.xlu2 %1357  ;;  %v3230_v4 = vsub.f32 %v11195_v22, %v16131_v29  ;;  %v3236_v17 = vsub.f32 %v11211_v14, %v16132_v15  ;;  %v11252_v29 = vsub.f32 %v2776_v18, %v11232_v60  ;;  %v16134_v39 = vand.u32 4294901760, %v11230_v53  ;;  %3436 = vmatpush.msra.mxu0 %v11230_v53 }
 0x1e1   : > { %1968 = vst.msk [vmem:[#allocation5 + $0x158] sm:$0xff] %vm1027_vm0, %v11234_v43  ;;  %v11259_v43 = vld [vmem:[#allocation2 + $0x1b1] sm:$0xff]  ;;  %3636 = vmatpush.msra.mxu1 %v11232_v60  ;;  %2913 = vmatpush.msrb.mxu2 %v11232_v60 }
 0x1e2   : > { %16133 = vst [vmem:[#allocation39_spill] sm:$0xff] %v11259_v43  ;;  %v3231_v15 = vand.u32 4294901760, %v3230_v4  ;;  %v3237_v18 = vand.u32 4294901760, %v3236_v17  ;;  %v3242_v33 = vsub.f32 %v11230_v53, %v16134_v39  ;;  %v15946_v23 = vand.u32 4294901760, %v11252_v29  ;;  %3439 = vmatpush.msra.mxu0 %v11252_v29  ;;  %1265 = vrot.lane.b32.xlu0 %v10842_v31, %s9900_s17 }
 0x1e3   : > { %1382 = vst.msk [vmem:[#allocation5] sm:$0xff] %vm1381_vm4, %v1358_v42  ;;  %v11274_v42 = vsub.f32 %v2775_v8, %v11254_v7  ;;  %3638 = vmatpush.msra.mxu1 %v11254_v7  ;;  %2915 = vmatpush.msrb.mxu2 %v11254_v7 }
 0x1e4   : > { %1431 = vst.msk [vmem:[#allocation5] sm:$0xff] %vm1430_vm5, %v10880_v20  ;;  %3232 = vmatpush.msrb.mxu3 %v3231_v15  ;;  %v2773_v20 = vld [vmem:[%s15898_s3 + $0x8] sm:$0xff]  ;;  %v3243_v8 = vand.u32 4294901760, %v3242_v33  ;;  %v3248_v39 = vsub.f32 %v11252_v29, %v15946_v23  ;;  %v2772_v15 = vld [vmem:[%s15898_s3] sm:$0xff]  ;;  %v11301_v33 = vpop.permute.xlu0 %1418 }
 0x1e5   : > { %1617 = vst.msk [vmem:[#allocation5 + $0x168] sm:$0xff] %vm1027_vm0, %v11259_v43  ;;  %v15948_v40 = vand.u32 4294901760, %v11274_v42  ;;  %v11293_v17 = vand.u32 4294901760, %v2773_v20  ;;  %1557 = vrot.lane.b32.xlu2 %v10842_v31, %s9902_s22  ;;  %v1205_v43 = vpop.permute.xlu1 %1204  ;;  %v11311_v4 = vand.u32 4294901760, %v2772_v15  ;;  %3442 = vmatpush.msra.mxu0 %v11274_v42 }
 0x1e6   : > { %3238 = vmatpush.msrb.mxu3 %v3237_v18  ;;  %16135 = vst [vmem:[#allocation40_spill] sm:$0xff] %v11301_v33  ;;  %v3249_v9 = vand.u32 4294901760, %v3248_v39  ;;  %v16136_v33 = vand.u32 4294901760, %v11278_v10  ;;  %3640 = vmatpush.msra.mxu1 %v11263_v51 }
 0x1e7   : > { %v3254_v23 = vsub.f32 %v11274_v42, %v15948_v40  ;;  %v11309_v18 = vsub.f32 %v2773_v20, %v11293_v17  ;;  %1223 = vst.msk [vmem:[#allocation2 + $0x251] sm:$0xff] %vm1027_vm0, %v1205_v43  ;;  %v11323_v26 = vsub.f32 %v2772_v15, %v11311_v4  ;;  %3445 = vmatpush.msra.mxu0 %v11278_v10 }
 0x1e8   : > { %v1456_v47 = vpop.permute.xlu2 %1455  ;;  %3244 = vmatpush.msrb.mxu3 %v3243_v8  ;;  %v3260_v39 = vsub.f32 %v11278_v10, %v16136_v33  ;;  %2917 = vmatpush.msrb.mxu2 %v11263_v51 }
 0x1e9   : > { %1480 = vst.msk [vmem:[#allocation5] sm:$0xff] %vm1479_vm6, %v1456_v47  ;;  %v3255_v40 = vand.u32 4294901760, %v3254_v23  ;;  %v15951_v20 = vand.u32 4294901760, %v11309_v18  ;;  %v3271_v23 = vand.u32 4294901760, %v11323_v26  ;;  %3448 = vmatpush.msra.mxu0 %v11309_v18  ;;  %3642 = vmatpush.msra.mxu1 %v11293_v17 }
 0x1ea   : > { %3250 = vmatpush.msrb.mxu3 %v3249_v9  ;;  %v3261_v43 = vand.u32 4294901760, %v3260_v39  ;;  %2919 = vmatpush.msrb.mxu2 %v11293_v17 }
 0x1eb   : > { %v3266_v47 = vsub.f32 %v11309_v18, %v15951_v20  ;;  %v3272_v8 = vsub.f32 %v11323_v26, %v3271_v23  ;;  %3451 = vmatpush.msra.mxu0 %v11323_v26  ;;  %3644 = vmatpush.msra.mxu1 %v11311_v4 }
 0x1ec   : > { %3256 = vmatpush.msrb.mxu3 %v3255_v40  ;;  %v11344_v40 = vpop.permute.xlu0 %1838  ;;  %2921 = vmatpush.msrb.mxu2 %v11311_v4 }
 0x1ed   : > { %v3267_v9 = vand.u32 4294901760, %v3266_v47  ;;  %1640 = vrot.lane.b32.xlu2 %v10935_v0, %s9900_s17  ;;  %v1141_v33 = vpop.permute.xlu1 %1140  ;;  %v3273_v39 = vand.u32 4294901760, %v3272_v8  ;;  %1782 = vrot.lane.b32.xlu1 %v10903_v36, %s9905_s28 }
 0x1ee   : > { %3262 = vmatpush.msrb.mxu3 %v3261_v43  ;;  %v11342_v15 = vld [vmem:[#allocation2 + $0x251] sm:$0xff]  ;;  %1158 = vst.msk [vmem:[#allocation2 + $0x121] sm:$0xff] %vm1027_vm0, %v1141_v33  ;;  %1878 = vrot.lane.b32.xlu0 %v10842_v31, %s9904_s27  ;;  %v16137_v43 = vand.u32 4294901760, %v11038_v54  ;;  %v16139_v54 = vand.u32 4294901760, %v11068_v48 }
 0x1ef   : > { %v11348_v20 = vld [vmem:[#allocation2 + $0x250] sm:$0xff]  ;;  %1600 = vst.msk [vmem:[#allocation5 + $0x98] sm:$0xff] %vm1027_vm0, %v11342_v15 }
 0x1f0   : > { %v1554_v47 = vpop.permute.xlu2 %1553  ;;  %3268 = vmatpush.msrb.mxu3 %v3267_v9  ;;  %1241 = vst.msk [vmem:[#allocation5 + $0xa8] sm:$0xff] %vm1027_vm0, %v11348_v20  ;;  %3841 = vmatpush.msra.mxu2 %v16137_v43  ;;  %v16142_v43 = vand.u32 4294901760, %v11127_v1  ;;  %v16146_v1 = vand.u32 4294901760, %v11211_v14  ;;  %v16150_v14 = vand.u32 4294901760, %v11278_v10 }
 0x1f2   : > { %3274 = vmatpush.msrb.mxu3 %v3273_v39  ;;  %v16138_v39 = vand.u32 4294901760, %v11053_v37  ;;  %v11397_v37 = vld [vmem:[#allocation2 + $0xe0] sm:$0xff] }
 0x1f4   : > { %4032 = vmatpush.msra.mxu3 %v11030_v41  ;;  %v1505_v8 = vpop.permute.xlu0 %1504  ;;  %3845 = vmatpush.msra.mxu2 %v16138_v39  ;;  %v16147_v39 = vand.u32 4294901760, %v11230_v53 }
 0x1f5   : > { %2102 = vrot.lane.b32.xlu2 %v10941_v34, %s9906_s29  ;;  %v1174_v9 = vpop.permute.xlu1 %1173  ;;  %v11372_v33 = vld [vmem:[#allocation2 + $0x121] sm:$0xff]  ;;  %1529 = vst.msk [vmem:[#allocation5] sm:$0xff] %vm1528_vm7, %v1505_v8  ;;  %1926 = vrot.lane.b32.xlu1 %v10935_v0, %s9902_s22 }
 0x1f6   : > { %4034 = vmatpush.msra.mxu3 %v11040_v63  ;;  %1191 = vst.msk [vmem:[#allocation2 + $0x1c1] sm:$0xff] %vm1027_vm0, %v1174_v9  ;;  %v11381_v34 = vld [vmem:[#allocation2 + $0x120] sm:$0xff]  ;;  %3849 = vmatpush.msra.mxu2 %v16139_v54  ;;  %v16140_v63 = vand.u32 4294901760, %v11088_v44 }
 0x1f7   : > { %2338 = vst.msk [vmem:[#allocation5 + $0x218] sm:$0xff] %vm1027_vm0, %v11372_v33  ;;  %1688 = vrot.lane.b32.xlu0 %v10826_v61, %s9901_s21 }
 0x1f8   : > { %v11375_v41 = vpop.permute.xlu2 %1310  ;;  %4036 = vmatpush.msra.mxu3 %v11055_v49  ;;  %1578 = vst.msk [vmem:[#allocation5] sm:$0xff] %vm1577_vm8, %v1554_v47  ;;  %3853 = vmatpush.msra.mxu2 %v16140_v63  ;;  %v16141_v49 = vand.u32 4294901760, %v11110_v55  ;;  %v16143_v55 = vand.u32 4294901760, %v11144_v27  ;;  %v16152_v63 = vld [vmem:[#allocation28_spill] sm:$0xff] }
 0x1f9   : > { %1985 = vst.msk [vmem:[#allocation5 + $0x228] sm:$0xff] %vm1027_vm0, %v11381_v34 }
 0x1fa   : > { %4038 = vmatpush.msra.mxu3 %v11070_v12  ;;  %3857 = vmatpush.msra.mxu2 %v16141_v49 }
 0x1fc   : > { %v1637_v47 = vpop.permute.xlu0 %1636  ;;  %4040 = vmatpush.msra.mxu3 %v11096_v24  ;;  %3861 = vmatpush.msra.mxu2 %v16142_v43  ;;  %v16144_v24 = vand.u32 4294901760, %v11169_v5 }
 0x1fd   : > { %1363 = vrot.lane.b32.xlu2 %v11397_v37, %s9906_s29  ;;  %v1961_v12 = vld [vmem:[#allocation2 + $0x1c2] sm:$0xff]  ;;  %v11403_v48 = vpop.permute.xlu1 %1742  ;;  %1659 = vst.msk [vmem:[#allocation5 + $0xd8] sm:$0xff] %vm1283_vm2, %v1637_v47  ;;  %2245 = vrot.lane.b32.xlu1 %v10909_v46, %s9904_s27  ;;  %v16145_v46 = vand.u32 4294901760, %v11195_v22 }
 0x1fe   : > { %1969 = vst.msk [vmem:[#allocation5 + $0x170] sm:$0xff] %vm1027_vm0, %v1961_v12  ;;  %4042 = vmatpush.msra.mxu3 %v11106_v32  ;;  %3865 = vmatpush.msra.mxu2 %v16143_v55 }
 0x1ff   : > { %v2708_v61 = vld [vmem:[#allocation5] sm:$0xff]  ;;  %2150 = vrot.lane.b32.xlu0 %v10842_v31, %s9905_s28 }
 0x200   : > { %v1779_v44 = vpop.permute.xlu2 %1778  ;;  %v11414_v9 = vand.u32 4294901760, %v2708_v61  ;;  %4044 = vmatpush.msra.mxu3 %v11129_v57  ;;  %3869 = vmatpush.msra.mxu2 %v16144_v24  ;;  %v16156_v24 = vld [vmem:[#allocation16_spill] sm:$0xff] }
 0x201   : > { %1802 = vst.msk [vmem:[#allocation5 + $0xc0] sm:$0xff] %vm1430_vm5, %v1779_v44  ;;  %v16155_v44 = vld [vmem:[#allocation23_spill] sm:$0xff] }
 0x202   : > { %1850 = vst.msk [vmem:[#allocation5 + $0xc0] sm:$0xff] %vm1479_vm6, %v10878_v11  ;;  %v2923_v32 = vsub.f32 %v2708_v61, %v11414_v9  ;;  %3276 = vmatmul.f32.vlgmr.msrb.gmra.mxu3 %v11414_v9  ;;  %3873 = vmatpush.msra.mxu2 %v16145_v46 }
 0x203   : > { %4046 = vmatpush.msra.mxu3 %v11147_v56  ;;  %v16148_v56 = vand.u32 4294901760, %v11252_v29 }
 0x204   : > { %v2099_v11 = vpop.permute.xlu0 %2098  ;;  %3454 = vmatmul.f32.vlgmr.msra.gmra.mxu0 %v2923_v32  ;;  %v2924_v57 = vand.u32 4294901760, %v2923_v32  ;;  %3877 = vmatpush.msra.mxu2 %v16146_v1  ;;  %v16159_v1 = vld [vmem:[#allocation21_spill] sm:$0xff] }
 0x205   : > { %1510 = vrot.lane.b32.xlu2 %v11004_v21, %s9904_s27  ;;  %v11429_v27 = vpop.permute.xlu1 %1420  ;;  %4048 = vmatpush.msra.mxu3 %v11178_v59 }
 0x206   : > { %3648 = vmatmul.f32.vlgmr.msra.gmra.mxu1 %v2924_v57  ;;  %v2925_v31 = vsub.f32 %v2923_v32, %v2924_v57  ;;  %3881 = vmatpush.msra.mxu2 %v16147_v39  ;;  %v16157_v32 = vld [vmem:[#allocation34_spill] sm:$0xff] }
 0x207   : > { %4050 = vmatpush.msra.mxu3 %v11192_v13  ;;  %2054 = vrot.lane.b32.xlu1 %v10903_v36, %s9901_s21  ;;  %v16149_v36 = vand.u32 4294901760, %v11274_v42 }
 0x208   : > { %v1923_v5 = vpop.permute.xlu2 %1922  ;;  %v2926_v8 = vand.u32 4294901760, %v2925_v31  ;;  %1559 = vrot.lane.b32.xlu0 %v10892_v35, %s9902_s22  ;;  %3885 = vmatpush.msra.mxu2 %v16148_v56  ;;  %v11569_v31 = vld [vmem:[#allocation2 + $0x110] sm:$0xff] }
 0x209   : > { %4052 = vmatpush.msra.mxu3 %v11213_v3 }
 0x20a   : > { %2927 = vmatmul.f32.vlgmr.msrb.gmra.mxu2 %v2926_v8 }
 0x20b   : > { %4054 = vmatpush.msra.mxu3 %v11232_v60  ;;  %3889 = vmatpush.msra.mxu2 %v16149_v36  ;;  %v16151_v60 = vand.u32 4294901760, %v11309_v18  ;;  %v16160_v36 = vld [vmem:[#allocation20_spill] sm:$0xff] }
 0x20c   : > { %v1360_v22 = vpop.permute.xlu0 %1359 }
 0x20d   : > { %1316 = vrot.lane.b32.xlu2 %v10999_v19, %s9901_s21  ;;  %v11446_v59 = vpop.permute.xlu1 %1840  ;;  %4056 = vmatpush.msra.mxu3 %v11254_v7 }
 0x20e   : > { %3893 = vmatpush.msra.mxu2 %v16150_v14 }
 0x20f   : > { %2198 = vrot.lane.b32.xlu1 %v10935_v0, %s9903_s24  ;;  %4058 = vmatpush.msra.mxu3 %v11263_v51 }
 0x210   : > { %v2051_v13 = vpop.permute.xlu2 %2050  ;;  %1642 = vrot.lane.b32.xlu0 %v10999_v19, %s9900_s17  ;;  %3897 = vmatpush.msra.mxu2 %v16151_v60 }
 0x211   : > { %2074 = vst.msk [vmem:[#allocation5 + $0x180] sm:$0xff] %vm1332_vm3, %v2051_v13  ;;  %4060 = vmatpush.msra.mxu3 %v11293_v17 }
 0x212   : > { %2122 = vst.msk [vmem:[#allocation5 + $0x180] sm:$0xff] %vm1381_vm4, %v2099_v11  ;;  %3901 = vmatpush.msra.mxu2 %v3271_v23  ;;  %v16158_v11 = vld [vmem:[#allocation33_spill] sm:$0xff] }
 0x213   : > { %4062 = vmatpush.msra.mxu3 %v11311_v4 }
 0x214   : > { %v1458_v53 = vpop.permute.xlu0 %1457 }
 0x215   : > { %1784 = vrot.lane.b32.xlu2 %v10922_v58, %s9905_s28  ;;  %v1262_v3 = vpop.permute.xlu1 %1261 }
 0x216   : > { %1285 = vst.msk [vmem:[#allocation5 + $0x18] sm:$0xff] %vm1283_vm2, %v1262_v3  ;;  %v16161_v3 = vld [vmem:[#allocation39_spill] sm:$0xff] }
 0x217   : > { %1334 = vst.msk [vmem:[#allocation5 + $0x18] sm:$0xff] %vm1332_vm3, %v11375_v41  ;;  %1461 = vrot.lane.b32.xlu1 %v10922_v58, %s9903_s24 }
 0x218   : > { %v2195_v7 = vpop.permute.xlu2 %2194  ;;  %1383 = vst.msk [vmem:[#allocation5 + $0x18] sm:$0xff] %vm1381_vm4, %v1360_v22  ;;  %1365 = vrot.lane.b32.xlu0 %v10983_v6, %s9906_s29 }
 0x219   : > { %1432 = vst.msk [vmem:[#allocation5 + $0x18] sm:$0xff] %vm1430_vm5, %v10860_v50 }
 0x21a   : > { %1481 = vst.msk [vmem:[#allocation5 + $0x18] sm:$0xff] %vm1479_vm6, %v1458_v53 }
 0x21c   : > { %v1556_v0 = vpop.permute.xlu0 %1555 }
 0x21d   : > { %1928 = vrot.lane.b32.xlu2 %v10999_v19, %s9902_s22  ;;  %v1875_v26 = vpop.permute.xlu1 %1874 }
 0x21e   : > { %1898 = vst.msk [vmem:[#allocation5 + $0xc0] sm:$0xff] %vm1528_vm7, %v1875_v26 }
 0x21f   : > { %1946 = vst.msk [vmem:[#allocation5 + $0xc0] sm:$0xff] %vm1577_vm8, %v1923_v5  ;;  %1267 = vrot.lane.b32.xlu1 %v10892_v35, %s9900_s17 }
 0x220   : > { %v1264_v51 = vpop.permute.xlu2 %1263  ;;  %1512 = vrot.lane.b32.xlu0 %v11020_v25, %s9904_s27 }
 0x221   : > { %1286 = vst.msk [vmem:[#allocation5 + $0x30] sm:$0xff] %vm1283_vm2, %v1264_v51  ;;  %v16162_v51 = vld [vmem:[#allocation17_spill] sm:$0xff] }
 0x224   : > { %v1313_v58 = vpop.permute.xlu0 %1312 }
 0x225   : > { %2247 = vrot.lane.b32.xlu2 %v11397_v37, %s9904_s27  ;;  %v1685_v50 = vpop.permute.xlu1 %1684  ;;  %1335 = vst.msk [vmem:[#allocation5 + $0x30] sm:$0xff] %vm1332_vm3, %v1313_v58  ;;  %v16153_v37 = vld [vmem:[#allocation19_spill] sm:$0xff] }
 0x226   : > { %1707 = vst.msk [vmem:[#allocation5 + $0xd8] sm:$0xff] %vm1332_vm3, %v1685_v50 }
 0x227   : > { %1755 = vst.msk [vmem:[#allocation5 + $0xd8] sm:$0xff] %vm1381_vm4, %v10867_v16  ;;  %1880 = vrot.lane.b32.xlu1 %v10892_v35, %s9904_s27 }
 0x228   : > { %v1877_v19 = vpop.permute.xlu2 %1876  ;;  %1318 = vrot.lane.b32.xlu0 %v11016_v30, %s9901_s21 }
 0x22c   : > { %v1781_v42 = vpop.permute.xlu0 %1780 }
 0x22d   : > { %1463 = vrot.lane.b32.xlu2 %v10970_v62, %s9903_s24  ;;  %v2147_v29 = vpop.permute.xlu1 %2146  ;;  %1803 = vst.msk [vmem:[#allocation5 + $0xd8] sm:$0xff] %vm1430_vm5, %v1781_v42  ;;  %v16163_v42 = vld [vmem:[#allocation26_spill] sm:$0xff] }
 0x22e   : > { %2170 = vst.msk [vmem:[#allocation5 + $0x180] sm:$0xff] %vm1430_vm5, %v2147_v29 }
 0x22f   : > { %2218 = vst.msk [vmem:[#allocation5 + $0x180] sm:$0xff] %vm1479_vm6, %v2195_v7  ;;  %1690 = vrot.lane.b32.xlu1 %v10888_v28, %s9901_s21 }
 0x230   : > { %v1687_v10 = vpop.permute.xlu2 %1686  ;;  %1851 = vst.msk [vmem:[#allocation5 + $0xd8] sm:$0xff] %vm1479_vm6, %v10937_v2  ;;  %1786 = vrot.lane.b32.xlu0 %v10970_v62, %s9905_s28 }
 0x231   : > { %1899 = vst.msk [vmem:[#allocation5 + $0xd8] sm:$0xff] %vm1528_vm7, %v1877_v19 }
 0x234   : > { %v1925_v17 = vpop.permute.xlu0 %1924 }
 0x235   : > { %1269 = vrot.lane.b32.xlu2 %v10959_v45, %s9900_s17  ;;  %v1507_v16 = vpop.permute.xlu1 %1506  ;;  %1947 = vst.msk [vmem:[#allocation5 + $0xd8] sm:$0xff] %vm1577_vm8, %v1925_v17 }
 0x236   : > { %1530 = vst.msk [vmem:[#allocation5 + $0x18] sm:$0xff] %vm1528_vm7, %v1507_v16  ;;  %v16165_v16 = vld [vmem:[#allocation30_spill] sm:$0xff] }
 0x237   : > { %1579 = vst.msk [vmem:[#allocation5 + $0x18] sm:$0xff] %vm1577_vm8, %v1556_v0  ;;  %1561 = vrot.lane.b32.xlu1 %v10959_v45, %s9902_s22 }
 0x238   : > { %v2149_v4 = vpop.permute.xlu2 %2148  ;;  %1930 = vrot.lane.b32.xlu0 %v11016_v30, %s9902_s22 }
 0x23c   : > { %v2244_v2 = vpop.permute.xlu0 %2243 }
 0x23d   : > { %1882 = vrot.lane.b32.xlu2 %v10959_v45, %s9904_s27  ;;  %v1639_v28 = vpop.permute.xlu1 %1638  ;;  %2267 = vst.msk [vmem:[#allocation5 + $0x180] sm:$0xff] %vm1528_vm7, %v2244_v2  ;;  %v16166_v2 = vld [vmem:[#allocation18_spill] sm:$0xff] }
 0x23e   : > { %1660 = vst.msk [vmem:[#allocation5 + $0xf0] sm:$0xff] %vm1283_vm2, %v1639_v28  ;;  %v2710_v62 = vld [vmem:[#allocation5 + $0x18] sm:$0xff] }
 0x23f   : > { %1708 = vst.msk [vmem:[#allocation5 + $0xf0] sm:$0xff] %vm1332_vm3, %v1687_v10  ;;  %v11527_v23 = vand.u32 4294901760, %v2710_v62  ;;  %1644 = vrot.lane.b32.xlu1 %v11016_v30, %s9900_s17  ;;  %v16154_v30 = vld [vmem:[#allocation29_spill] sm:$0xff]  ;;  %v16164_v10 = vld [vmem:[#allocation24_spill] sm:$0xff] }
 0x240   : > { %v1558_v18 = vpop.permute.xlu2 %1557  ;;  %1756 = vst.msk [vmem:[#allocation5 + $0xf0] sm:$0xff] %vm1381_vm4, %v10920_v52  ;;  %1465 = vrot.lane.b32.xlu0 %v16152_v63, %s9903_s24 }
 0x241   : > { %3280 = vmatmul.f32.gmra.mxu3 %v11527_v23  ;;  %v2931_v41 = vsub.f32 %v2710_v62, %v11527_v23  ;;  %2316 = vst.msk [vmem:[#allocation5 + $0x180] sm:$0xff] %vm1577_vm8, %v10953_v38  ;;  %v11622_v62 = vld [vmem:[#allocation2 + $0x260] sm:$0xff] }
 0x243   : > { %3459 = vmatmul.f32.gmra.mxu0 %v2931_v41  ;;  %v2932_v54 = vand.u32 4294901760, %v2931_v41 }
 0x244   : > { %v2053_v49 = vpop.permute.xlu0 %2052 }
 0x245   : > { %1692 = vrot.lane.b32.xlu2 %v16153_v37, %s9901_s21  ;;  %3654 = vmatmul.f32.gmra.mxu1 %v2932_v54  ;;  %v2101_v52 = vpop.permute.xlu1 %2100  ;;  %v2933_v12 = vsub.f32 %v2931_v41, %v2932_v54  ;;  %2075 = vst.msk [vmem:[#allocation5 + $0x198] sm:$0xff] %vm1332_vm3, %v2053_v49  ;;  %v16168_v49 = vld [vmem:[#allocation35_spill] sm:$0xff] }
 0x246   : > { %2123 = vst.msk [vmem:[#allocation5 + $0x198] sm:$0xff] %vm1381_vm4, %v2101_v52  ;;  %v16167_v52 = vld [vmem:[#allocation38_spill] sm:$0xff] }
 0x247   : > { %v2934_v38 = vand.u32 4294901760, %v2933_v12  ;;  %2171 = vst.msk [vmem:[#allocation5 + $0x198] sm:$0xff] %vm1430_vm5, %v2149_v4  ;;  %1367 = vrot.lane.b32.xlu1 %v16154_v30, %s9906_s29  ;;  %v11645_v12 = vld [vmem:[#allocation2 + $0x1c1] sm:$0xff] }
 0x248   : > { %v1641_v47 = vpop.permute.xlu2 %1640  ;;  %1271 = vrot.lane.b32.xlu0 %v16155_v44, %s9900_s17 }
 0x249   : > { %2935 = vmatmul.f32.gmra.mxu2 %v2934_v38  ;;  %1661 = vst.msk [vmem:[#allocation5 + $0x108] sm:$0xff] %vm1283_vm2, %v1641_v47 }
 0x24c   : > { %v2197_v61 = vpop.permute.xlu0 %2196 }
 0x24d   : > { %1563 = vrot.lane.b32.xlu2 %v16155_v44, %s9902_s22  ;;  %v1362_v43 = vpop.permute.xlu1 %1361  ;;  %2219 = vst.msk [vmem:[#allocation5 + $0x198] sm:$0xff] %vm1479_vm6, %v2197_v61  ;;  %v11660_v61 = vld [vmem:[#allocation2 + $0xe1] sm:$0xff] }
 0x24e   : > { %1384 = vst.msk [vmem:[#allocation5 + $0x30] sm:$0xff] %vm1381_vm4, %v1362_v43  ;;  %v11656_v43 = vld [vmem:[#allocation2 + $0x41] sm:$0xff] }
 0x24f   : > { %1433 = vst.msk [vmem:[#allocation5 + $0x30] sm:$0xff] %vm1430_vm5, %v16156_v24  ;;  %1514 = vrot.lane.b32.xlu1 %v16157_v32, %s9904_s27 }
 0x250   : > { %v11553_v55 = vpop.permute.xlu2 %2102  ;;  %1884 = vrot.lane.b32.xlu0 %v16155_v44, %s9904_s27 }
 0x254   : > { %v1460_v5 = vpop.permute.xlu0 %1459 }
 0x255   : > { %1646 = vrot.lane.b32.xlu2 %v16158_v11, %s9900_s17  ;;  %v1509_v57 = vpop.permute.xlu1 %1508  ;;  %1482 = vst.msk [vmem:[#allocation5 + $0x30] sm:$0xff] %vm1479_vm6, %v1460_v5 }
 0x256   : > { %1531 = vst.msk [vmem:[#allocation5 + $0x30] sm:$0xff] %vm1528_vm7, %v1509_v57 }
 0x257   : > { %1580 = vst.msk [vmem:[#allocation5 + $0x30] sm:$0xff] %vm1577_vm8, %v1558_v18  ;;  %1320 = vrot.lane.b32.xlu1 %v16158_v11, %s9901_s21 }
 0x258   : > { %v1364_v46 = vpop.permute.xlu2 %1363  ;;  %1694 = vrot.lane.b32.xlu0 %v16159_v1, %s9901_s21 }
 0x25c   : > { %v1266_v39 = vpop.permute.xlu0 %1265 }
 0x25d   : > { %1369 = vrot.lane.b32.xlu2 %v11569_v31, %s9906_s29  ;;  %v1315_v8 = vpop.permute.xlu1 %1314  ;;  %1287 = vst.msk [vmem:[#allocation5 + $0x48] sm:$0xff] %vm1283_vm2, %v1266_v39  ;;  %v11680_v39 = vld [vmem:[#allocation2 + $0x221] sm:$0xff] }
 0x25e   : > { %1336 = vst.msk [vmem:[#allocation5 + $0x48] sm:$0xff] %vm1332_vm3, %v1315_v8  ;;  %v2712_v56 = vld [vmem:[#allocation5 + $0x30] sm:$0xff] }
 0x25f   : > { %1385 = vst.msk [vmem:[#allocation5 + $0x48] sm:$0xff] %vm1381_vm4, %v1364_v46  ;;  %v11580_v13 = vand.u32 4294901760, %v2712_v56  ;;  %1788 = vrot.lane.b32.xlu1 %v16152_v63, %s9905_s28  ;;  %v16169_v46 = vld [vmem:[#allocation31_spill] sm:$0xff] }
 0x260   : > { %v11576_v22 = vpop.permute.xlu2 %1510  ;;  %1434 = vst.msk [vmem:[#allocation5 + $0x48] sm:$0xff] %vm1430_vm5, %v16160_v36  ;;  %1565 = vrot.lane.b32.xlu0 %v16161_v3, %s9902_s22 }
 0x261   : > { %3284 = vmatmul.f32.gmra.mxu3 %v11580_v13  ;;  %v2939_v14 = vsub.f32 %v2712_v56, %v11580_v13 }
 0x263   : > { %3464 = vmatmul.f32.gmra.mxu0 %v2939_v14  ;;  %v2940_v53 = vand.u32 4294901760, %v2939_v14 }
 0x264   : > { %v1879_v7 = vpop.permute.xlu0 %1878 }
 0x265   : > { %v1783_v60 = vpop.permute.xlu1 %1782  ;;  %1516 = vrot.lane.b32.xlu2 %v11348_v20, %s9904_s27  ;;  %3660 = vmatmul.f32.gmra.mxu1 %v2940_v53  ;;  %v2941_v26 = vsub.f32 %v2939_v14, %v2940_v53 }
 0x266   : > { %1804 = vst.msk [vmem:[#allocation5 + $0xf0] sm:$0xff] %vm1430_vm5, %v1783_v60 }
 0x267   : > { %1852 = vst.msk [vmem:[#allocation5 + $0xf0] sm:$0xff] %vm1479_vm6, %v16162_v51  ;;  %v2942_v50 = vand.u32 4294901760, %v2941_v26  ;;  %1932 = vrot.lane.b32.xlu1 %v16158_v11, %s9902_s22  ;;  %v16171_v51 = vld [vmem:[#allocation37_spill] sm:$0xff] }
 0x268   : > { %v11593_v0 = vpop.permute.xlu2 %1316  ;;  %1900 = vst.msk [vmem:[#allocation5 + $0xf0] sm:$0xff] %vm1528_vm7, %v1879_v7  ;;  %1648 = vrot.lane.b32.xlu0 %v11342_v15, %s9900_s17 }
 0x269   : > { %2943 = vmatmul.f32.gmra.mxu2 %v2942_v50 }
 0x26c   : > { %v1689_v19 = vpop.permute.xlu0 %1688 }
 0x26d   : > { %v1927_v58 = vpop.permute.xlu1 %1926  ;;  %1322 = vrot.lane.b32.xlu2 %v11342_v15, %s9901_s21  ;;  %1709 = vst.msk [vmem:[#allocation5 + $0x108] sm:$0xff] %vm1332_vm3, %v1689_v19  ;;  %v11715_v19 = vld [vmem:[#allocation2 + $0x231] sm:$0xff] }
 0x26e   : > { %1948 = vst.msk [vmem:[#allocation5 + $0xf0] sm:$0xff] %vm1577_vm8, %v1927_v58 }
 0x26f   : > { %1757 = vst.msk [vmem:[#allocation5 + $0x108] sm:$0xff] %vm1381_vm4, %v16163_v42  ;;  %1467 = vrot.lane.b32.xlu1 %v16165_v16, %s9903_s24 }
 0x270   : > { %v1785_v29 = vpop.permute.xlu2 %1784  ;;  %1371 = vrot.lane.b32.xlu0 %v11381_v34, %s9906_s29 }
 0x271   : > { %1805 = vst.msk [vmem:[#allocation5 + $0x108] sm:$0xff] %vm1430_vm5, %v1785_v29  ;;  %v11719_v29 = vld [vmem:[#allocation2 + $0x61] sm:$0xff] }
 0x272   : > { %1853 = vst.msk [vmem:[#allocation5 + $0x108] sm:$0xff] %vm1479_vm6, %v16164_v10 }
 0x274   : > { %v2151_v4 = vpop.permute.xlu0 %2150 }
 0x275   : > { %v2246_v17 = vpop.permute.xlu1 %2245  ;;  %1790 = vrot.lane.b32.xlu2 %v16165_v16, %s9905_s28 }
 0x276   : > { %2268 = vst.msk [vmem:[#allocation5 + $0x198] sm:$0xff] %vm1528_vm7, %v2246_v17 }
 0x277   : > { %2317 = vst.msk [vmem:[#allocation5 + $0x198] sm:$0xff] %vm1577_vm8, %v16166_v2  ;;  %1273 = vrot.lane.b32.xlu1 %v16161_v3, %s9900_s17 }
 0x278   : > { %v1929_v28 = vpop.permute.xlu2 %1928  ;;  %1518 = vrot.lane.b32.xlu0 %v11622_v62, %s9904_s27 }
 0x27c   : > { %v1560_v41 = vpop.permute.xlu0 %1559 }
 0x27d   : > { %v2055_v18 = vpop.permute.xlu1 %2054  ;;  %1934 = vrot.lane.b32.xlu2 %v11342_v15, %s9902_s22 }
 0x27e   : > { %2076 = vst.msk [vmem:[#allocation5 + $0x1b0] sm:$0xff] %vm1332_vm3, %v2055_v18 }
 0x27f   : > { %2124 = vst.msk [vmem:[#allocation5 + $0x1b0] sm:$0xff] %vm1381_vm4, %v11553_v55  ;;  %1886 = vrot.lane.b32.xlu1 %v16161_v3, %s9904_s27 }
 0x280   : > { %v2248_v54 = vpop.permute.xlu2 %2247  ;;  %2172 = vst.msk [vmem:[#allocation5 + $0x1b0] sm:$0xff] %vm1430_vm5, %v2151_v4  ;;  %1792 = vrot.lane.b32.xlu0 %v11372_v33, %s9905_s28 }
 0x284   : > { %v1643_v37 = vpop.permute.xlu0 %1642 }
 0x285   : > { %v2199_v63 = vpop.permute.xlu1 %2198  ;;  %1469 = vrot.lane.b32.xlu2 %v11372_v33, %s9903_s24  ;;  %1662 = vst.msk [vmem:[#allocation5 + $0x120] sm:$0xff] %vm1283_vm2, %v1643_v37 }
 0x286   : > { %2220 = vst.msk [vmem:[#allocation5 + $0x1b0] sm:$0xff] %vm1479_vm6, %v2199_v63  ;;  %v16173_v63 = vld [vmem:[#allocation25_spill] sm:$0xff] }
 0x287   : > { %2269 = vst.msk [vmem:[#allocation5 + $0x1b0] sm:$0xff] %vm1528_vm7, %v2248_v54  ;;  %1696 = vrot.lane.b32.xlu1 %v16167_v52, %s9901_s21 }
 0x288   : > { %v1464_v15 = vpop.permute.xlu2 %1463  ;;  %1936 = vrot.lane.b32.xlu0 %v16168_v49, %s9902_s22  ;;  %v11756_v49 = vld [vmem:[#allocation2 + $0x241] sm:$0xff] }
 0x28c   : > { %v1366_v38 = vpop.permute.xlu0 %1365 }
 0x28d   : > { %v1462_v47 = vpop.permute.xlu1 %1461  ;;  %1888 = vrot.lane.b32.xlu2 %v11645_v12, %s9904_s27 }
 0x28e   : > { %1483 = vst.msk [vmem:[#allocation5 + $0x48] sm:$0xff] %vm1479_vm6, %v1462_v47  ;;  %v11760_v47 = vld [vmem:[#allocation2 + $0x71] sm:$0xff] }
 0x28f   : > { %1532 = vst.msk [vmem:[#allocation5 + $0x48] sm:$0xff] %vm1528_vm7, %v11576_v22  ;;  %1567 = vrot.lane.b32.xlu1 %v11645_v12, %s9902_s22 }
 0x290   : > { %v1270_v33 = vpop.permute.xlu2 %1269  ;;  %1581 = vst.msk [vmem:[#allocation5 + $0x48] sm:$0xff] %vm1577_vm8, %v1560_v41  ;;  %2296 = vrot.lane.b32.xlu0 %v11656_v43, %s9902_s22 }
 0x291   : > { %1289 = vst.msk [vmem:[#allocation5 + $0x78] sm:$0xff] %vm1283_vm2, %v1270_v33 }
 0x294   : > { %v1513_v24 = vpop.permute.xlu0 %1512 }
 0x295   : > { %v1268_v55 = vpop.permute.xlu1 %1267  ;;  %2056 = vrot.lane.b32.xlu2 %v11660_v61, %s9901_s21 }
 0x296   : > { %1288 = vst.msk [vmem:[#allocation5 + $0x60] sm:$0xff] %vm1283_vm2, %v1268_v55 }
 0x297   : > { %1337 = vst.msk [vmem:[#allocation5 + $0x60] sm:$0xff] %vm1332_vm3, %v11593_v0  ;;  %v2714_v57 = vld [vmem:[#allocation5 + $0x48] sm:$0xff]  ;;  %2008 = vrot.lane.b32.xlu1 %v11656_v43, %s9900_s17  ;;  %v16170_v0 = vld [vmem:[#allocation22_spill] sm:$0xff] }
 0x298   : > { %v1883_v11 = vpop.permute.xlu2 %1882  ;;  %1386 = vst.msk [vmem:[#allocation5 + $0x60] sm:$0xff] %vm1381_vm4, %v1366_v38  ;;  %v11668_v5 = vand.u32 4294901760, %v2714_v57  ;;  %2104 = vrot.lane.b32.xlu0 %v11004_v21, %s9906_s29  ;;  %v11691_v21 = vld [vmem:[#allocation2 + $0x51] sm:$0xff] }
 0x299   : > { %1435 = vst.msk [vmem:[#allocation5 + $0x60] sm:$0xff] %vm1430_vm5, %v16169_v46 }
 0x29a   : > { %1484 = vst.msk [vmem:[#allocation5 + $0x60] sm:$0xff] %vm1479_vm6, %v1464_v15  ;;  %3288 = vmatmul.f32.gmra.mxu3 %v11668_v5  ;;  %v2947_v1 = vsub.f32 %v2714_v57, %v11668_v5 }
 0x29b   : > { %1533 = vst.msk [vmem:[#allocation5 + $0x60] sm:$0xff] %vm1528_vm7, %v1513_v24 }
 0x29c   : > { %3469 = vmatmul.f32.gmra.mxu0 %v2947_v1  ;;  %v2948_v8 = vand.u32 4294901760, %v2947_v1  ;;  %v1319_v56 = vpop.permute.xlu0 %1318 }
 0x29d   : > { %v1881_v22 = vpop.permute.xlu1 %1880  ;;  %2200 = vrot.lane.b32.xlu2 %v11680_v39, %s9903_s24  ;;  %1338 = vst.msk [vmem:[#allocation5 + $0x78] sm:$0xff] %vm1332_vm3, %v1319_v56  ;;  %v16175_v56 = vld [vmem:[#allocation27_spill] sm:$0xff] }
 0x29e   : > { %1901 = vst.msk [vmem:[#allocation5 + $0x108] sm:$0xff] %vm1528_vm7, %v1881_v22  ;;  %3666 = vmatmul.f32.gmra.mxu1 %v2948_v8  ;;  %v2949_v36 = vsub.f32 %v2947_v1, %v2948_v8  ;;  %v11786_v1 = vld [vmem:[#allocation2 + $0x251] sm:$0xff] }
 0x29f   : > { %1949 = vst.msk [vmem:[#allocation5 + $0x108] sm:$0xff] %vm1577_vm8, %v1929_v28  ;;  %2152 = vrot.lane.b32.xlu1 %v10892_v35, %s9905_s28  ;;  %v11704_v35 = vld [vmem:[#allocation2 + $0xf1] sm:$0xff] }
 0x2a0   : > { %v1693_v14 = vpop.permute.xlu2 %1692  ;;  %v2950_v53 = vand.u32 4294901760, %v2949_v36  ;;  %2249 = vrot.lane.b32.xlu0 %v10983_v6, %s9904_s27 }
 0x2a2   : > { %2951 = vmatmul.f32.gmra.mxu2 %v2950_v53 }
 0x2a4   : > { %v1787_v7 = vpop.permute.xlu0 %1786 }
 0x2a5   : > { %v1691_v60 = vpop.permute.xlu1 %1690  ;;  %2010 = vrot.lane.b32.xlu2 %v11691_v21, %s9900_s17 }
 0x2a6   : > { %1710 = vst.msk [vmem:[#allocation5 + $0x120] sm:$0xff] %vm1332_vm3, %v1691_v60 }
 0x2a7   : > { %1758 = vst.msk [vmem:[#allocation5 + $0x120] sm:$0xff] %vm1381_vm4, %v16170_v0  ;;  %2298 = vrot.lane.b32.xlu1 %v11691_v21, %s9902_s22  ;;  %v11816_v0 = vld [vmem:[#allocation2 + $0x91] sm:$0xff] }
 0x2a8   : > { %v1564_v26 = vpop.permute.xlu2 %1563  ;;  %1806 = vst.msk [vmem:[#allocation5 + $0x120] sm:$0xff] %vm1430_vm5, %v1787_v7  ;;  %2058 = vrot.lane.b32.xlu0 %v11704_v35, %s9901_s21  ;;  %v11806_v7 = vld [vmem:[#allocation2 + $0x121] sm:$0xff] }
 0x2a9   : > { %1854 = vst.msk [vmem:[#allocation5 + $0x120] sm:$0xff] %vm1479_vm6, %v16171_v51  ;;  %v11820_v51 = vld [vmem:[#allocation2 + $0x261] sm:$0xff] }
 0x2aa   : > { %1902 = vst.msk [vmem:[#allocation5 + $0x120] sm:$0xff] %vm1528_vm7, %v1883_v11  ;;  %v16174_v11 = vld [vmem:[#allocation40_spill] sm:$0xff] }
 0x2ac   : > { %v1931_v50 = vpop.permute.xlu0 %1930 }
 0x2ad   : > { %v1562_v6 = vpop.permute.xlu1 %1561  ;;  %2154 = vrot.lane.b32.xlu2 %v10959_v45, %s9905_s28  ;;  %1950 = vst.msk [vmem:[#allocation5 + $0x120] sm:$0xff] %vm1577_vm8, %v1931_v50 }
 0x2ae   : > { %1582 = vst.msk [vmem:[#allocation5 + $0x60] sm:$0xff] %vm1577_vm8, %v1562_v6 }
 0x2af   : > { %2106 = vrot.lane.b32.xlu1 %v11020_v25, %s9906_s29  ;;  %v16172_v25 = vld [vmem:[#allocation36_spill] sm:$0xff] }
 0x2b0   : > { %v1647_v58 = vpop.permute.xlu2 %1646  ;;  %2202 = vrot.lane.b32.xlu0 %v11715_v19, %s9903_s24 }
 0x2b1   : > { %1664 = vst.msk [vmem:[#allocation5 + $0x150] sm:$0xff] %vm1283_vm2, %v1647_v58 }
 0x2b4   : > { %v1466_v45 = vpop.permute.xlu0 %1465 }
 0x2b5   : > { %v1645_v42 = vpop.permute.xlu1 %1644  ;;  %v2716_v10 = vld [vmem:[#allocation5 + $0x60] sm:$0xff]  ;;  %2300 = vrot.lane.b32.xlu2 %v11719_v29, %s9902_s22 }
 0x2b6   : > { %1663 = vst.msk [vmem:[#allocation5 + $0x138] sm:$0xff] %vm1283_vm2, %v1645_v42  ;;  %v11724_v16 = vand.u32 4294901760, %v2716_v10  ;;  %v2234_v42 = vld [vmem:[#allocation2 + $0x130] sm:$0xff] }
 0x2b7   : > { %1711 = vst.msk [vmem:[#allocation5 + $0x138] sm:$0xff] %vm1332_vm3, %v1693_v14  ;;  %2251 = vrot.lane.b32.xlu1 %v16154_v30, %s9904_s27  ;;  %v11744_v30 = vld [vmem:[#allocation2 + $0x101] sm:$0xff] }
 0x2b8   : > { %v1370_v17 = vpop.permute.xlu2 %1369  ;;  %1759 = vst.msk [vmem:[#allocation5 + $0x138] sm:$0xff] %vm1381_vm4, %v16172_v25  ;;  %3292 = vmatmul.f32.gmra.mxu3 %v11724_v16  ;;  %v2955_v4 = vsub.f32 %v2716_v10, %v11724_v16  ;;  %2012 = vrot.lane.b32.xlu0 %v11719_v29, %s9900_s17  ;;  %v2452_v25 = vld [vmem:[#allocation2 + $0x151] sm:$0xff] }
 0x2ba   : > { %3474 = vmatmul.f32.gmra.mxu0 %v2955_v4  ;;  %v2956_v28 = vand.u32 4294901760, %v2955_v4 }
 0x2bc   : > { %3672 = vmatmul.f32.gmra.mxu1 %v2956_v28  ;;  %v2957_v2 = vsub.f32 %v2955_v4, %v2956_v28  ;;  %v1272_v41 = vpop.permute.xlu0 %1271 }
 0x2bd   : > { %v1368_v18 = vpop.permute.xlu1 %1367  ;;  %2108 = vrot.lane.b32.xlu2 %v16157_v32, %s9906_s29  ;;  %1290 = vst.msk [vmem:[#allocation5 + $0x90] sm:$0xff] %vm1283_vm2, %v1272_v41  ;;  %v2404_v41 = vld [vmem:[#allocation2 + $0x12] sm:$0xff] }
 0x2be   : > { %1387 = vst.msk [vmem:[#allocation5 + $0x78] sm:$0xff] %vm1381_vm4, %v1368_v18  ;;  %v2958_v54 = vand.u32 4294901760, %v2957_v2 }
 0x2bf   : > { %1436 = vst.msk [vmem:[#allocation5 + $0x78] sm:$0xff] %vm1430_vm5, %v16173_v63  ;;  %2060 = vrot.lane.b32.xlu1 %v11744_v30, %s9901_s21 }
 0x2c0   : > { %v11740_v37 = vpop.permute.xlu2 %1516  ;;  %1485 = vst.msk [vmem:[#allocation5 + $0x78] sm:$0xff] %vm1479_vm6, %v1466_v45  ;;  %2959 = vmatmul.f32.gmra.mxu2 %v2958_v54  ;;  %2156 = vrot.lane.b32.xlu0 %v16155_v44, %s9905_s28  ;;  %v11764_v44 = vld [vmem:[#allocation2 + $0x111] sm:$0xff] }
 0x2c1   : > { %v2356_v45 = vld [vmem:[#allocation2 + $0xb1] sm:$0xff] }
 0x2c2   : > { %v2500_v54 = vld [vmem:[#allocation2 + $0x1f1] sm:$0xff] }
 0x2c4   : > { %v1885_v15 = vpop.permute.xlu0 %1884 }
 0x2c5   : > { %v1515_v32 = vpop.permute.xlu1 %1514  ;;  %2253 = vrot.lane.b32.xlu2 %v11569_v31, %s9904_s27 }
 0x2c6   : > { %1534 = vst.msk [vmem:[#allocation5 + $0x78] sm:$0xff] %vm1528_vm7, %v1515_v32 }
 0x2c7   : > { %1583 = vst.msk [vmem:[#allocation5 + $0x78] sm:$0xff] %vm1577_vm8, %v1564_v26  ;;  %2204 = vrot.lane.b32.xlu1 %v11756_v49, %s9903_s24 }
 0x2c8   : > { %v11754_v52 = vpop.permute.xlu2 %1322  ;;  %2302 = vrot.lane.b32.xlu0 %v11760_v47, %s9902_s22 }
 0x2cc   : > { %v1695_v38 = vpop.permute.xlu0 %1694 }
 0x2cd   : > { %v1321_v31 = vpop.permute.xlu1 %1320  ;;  %2062 = vrot.lane.b32.xlu2 %v11764_v44, %s9901_s21  ;;  %1712 = vst.msk [vmem:[#allocation5 + $0x150] sm:$0xff] %vm1332_vm3, %v1695_v38  ;;  %v2789_v38 = vld [vmem:[%s15898_s3 + $0x88] sm:$0xff] }
 0x2ce   : > { %1339 = vst.msk [vmem:[#allocation5 + $0x90] sm:$0xff] %vm1332_vm3, %v1321_v31  ;;  %v2718_v33 = vld [vmem:[#allocation5 + $0x78] sm:$0xff] }
 0x2cf   : > { %1388 = vst.msk [vmem:[#allocation5 + $0x90] sm:$0xff] %vm1381_vm4, %v1370_v17  ;;  %v11770_v55 = vand.u32 4294901760, %v2718_v33  ;;  %2014 = vrot.lane.b32.xlu1 %v11760_v47, %s9900_s17  ;;  %v2548_v31 = vld [vmem:[#allocation2 + $0x152] sm:$0xff] }
 0x2d0   : > { %v1791_v24 = vpop.permute.xlu2 %1790  ;;  %1437 = vst.msk [vmem:[#allocation5 + $0x90] sm:$0xff] %vm1430_vm5, %v16174_v11  ;;  %2110 = vrot.lane.b32.xlu0 %v11348_v20, %s9906_s29  ;;  %v11798_v20 = vld [vmem:[#allocation2 + $0x81] sm:$0xff] }
 0x2d1   : > { %3296 = vmatmul.f32.gmra.mxu3 %v11770_v55  ;;  %v2963_v57 = vsub.f32 %v2718_v33, %v11770_v55  ;;  %1760 = vst.msk [vmem:[#allocation5 + $0x150] sm:$0xff] %vm1381_vm4, %v11403_v48  ;;  %v2644_v33 = vld [vmem:[#allocation2 + $0xc1] sm:$0xff] }
 0x2d2   : > { %1808 = vst.msk [vmem:[#allocation5 + $0x150] sm:$0xff] %vm1430_vm5, %v1791_v24  ;;  %v11863_v24 = vand.u32 4294901760, %v2789_v38  ;;  %v2405_v11 = vld [vmem:[#allocation2 + $0x22] sm:$0xff] }
 0x2d3   : > { %3479 = vmatmul.f32.gmra.mxu0 %v2963_v57  ;;  %v2964_v46 = vand.u32 4294901760, %v2963_v57  ;;  %1856 = vst.msk [vmem:[#allocation5 + $0x150] sm:$0xff] %vm1479_vm6, %v11344_v40 }
 0x2d4   : > { %v1566_v48 = vpop.permute.xlu0 %1565  ;;  %4207 = vmatpush.msrb.mxu0 %v11863_v24  ;;  %4818 = vmatpush.msrb.mxu3 %v11863_v24 }
 0x2d5   : > { %3678 = vmatmul.f32.gmra.mxu1 %v2964_v46  ;;  %v1789_v8 = vpop.permute.xlu1 %1788  ;;  %v2965_v22 = vsub.f32 %v2963_v57, %v2964_v46  ;;  %2206 = vrot.lane.b32.xlu2 %v11786_v1, %s9903_s24  ;;  %v11870_v57 = vsub.f32 %v2789_v38, %v11863_v24 }
 0x2d6   : > { %1807 = vst.msk [vmem:[#allocation5 + $0x138] sm:$0xff] %vm1430_vm5, %v1789_v8 }
 0x2d7   : > { %1855 = vst.msk [vmem:[#allocation5 + $0x138] sm:$0xff] %vm1479_vm6, %v16175_v56  ;;  %v2966_v36 = vand.u32 4294901760, %v2965_v22  ;;  %2158 = vrot.lane.b32.xlu1 %v16161_v3, %s9905_s28  ;;  %v4483_v22 = vand.u32 4294901760, %v11870_v57  ;;  %4638 = vmatpush.msrb.mxu2 %v11870_v57  ;;  %v2453_v56 = vld [vmem:[#allocation2 + $0x161] sm:$0xff] }
 0x2d8   : > { %v1935_v14 = vpop.permute.xlu2 %1934  ;;  %1903 = vst.msk [vmem:[#allocation5 + $0x138] sm:$0xff] %vm1528_vm7, %v1885_v15  ;;  %2255 = vrot.lane.b32.xlu0 %v11381_v34, %s9904_s27  ;;  %v16177_v15 = vld [vmem:[#allocation32_spill] sm:$0xff] }
 0x2d9   : > { %2967 = vmatmul.f32.gmra.mxu2 %v2966_v36  ;;  %v2724_v36 = vld [vmem:[#allocation5 + $0xc0] sm:$0xff] }
 0x2dc   : > { %v1649_v53 = vpop.permute.xlu0 %1648 }
 0x2dd   : > { %v1933_v40 = vpop.permute.xlu1 %1932  ;;  %2016 = vrot.lane.b32.xlu2 %v11798_v20, %s9900_s17  ;;  %1665 = vst.msk [vmem:[#allocation5 + $0x168] sm:$0xff] %vm1283_vm2, %v1649_v53 }
 0x2de   : > { %1951 = vst.msk [vmem:[#allocation5 + $0x138] sm:$0xff] %vm1577_vm8, %v1933_v40  ;;  %v2549_v40 = vld [vmem:[#allocation2 + $0x162] sm:$0xff] }
 0x2df   : > { %2304 = vrot.lane.b32.xlu1 %v11798_v20, %s9902_s22 }
 0x2e0   : > { %v1470_v60 = vpop.permute.xlu2 %1469  ;;  %2064 = vrot.lane.b32.xlu0 %v11806_v7, %s9901_s21 }
 0x2e4   : > { %v1372_v3 = vpop.permute.xlu0 %1371 }
 0x2e5   : > { %v1468_v34 = vpop.permute.xlu1 %1467  ;;  %2160 = vrot.lane.b32.xlu2 %v11645_v12, %s9905_s28 }
 0x2e6   : > { %1486 = vst.msk [vmem:[#allocation5 + $0x90] sm:$0xff] %vm1479_vm6, %v1468_v34 }
 0x2e7   : > { %1535 = vst.msk [vmem:[#allocation5 + $0x90] sm:$0xff] %vm1528_vm7, %v11740_v37  ;;  %2112 = vrot.lane.b32.xlu1 %v11622_v62, %s9906_s29  ;;  %v16176_v37 = vld [vmem:[#allocation12_spill] sm:$0xff] }
 0x2e8   : > { %v1889_v26 = vpop.permute.xlu2 %1888  ;;  %1584 = vst.msk [vmem:[#allocation5 + $0x90] sm:$0xff] %vm1577_vm8, %v1566_v48  ;;  %2208 = vrot.lane.b32.xlu0 %v11820_v51, %s9903_s24  ;;  %v4484_v48 = vsub.f32 %v11870_v57, %v4483_v22 }
 0x2ec   : > { %v1519_v6 = vpop.permute.xlu0 %1518 }
 0x2ed   : > { %v1274_v12 = vpop.permute.xlu1 %1273  ;;  %2306 = vrot.lane.b32.xlu2 %v11816_v0, %s9902_s22 }
 0x2ee   : > { %1291 = vst.msk [vmem:[#allocation5 + $0xa8] sm:$0xff] %vm1283_vm2, %v1274_v12 }
 0x2ef   : > { %1340 = vst.msk [vmem:[#allocation5 + $0xa8] sm:$0xff] %vm1332_vm3, %v11754_v52  ;;  %v2720_v50 = vld [vmem:[#allocation5 + $0x90] sm:$0xff]  ;;  %2257 = vrot.lane.b32.xlu1 %v2234_v42, %s9904_s27 }
 0x2f0   : > { %v11829_v58 = vpop.permute.xlu2 %2056  ;;  %1389 = vst.msk [vmem:[#allocation5 + $0xa8] sm:$0xff] %vm1381_vm4, %v1372_v3  ;;  %v11832_v62 = vand.u32 4294901760, %v2720_v50  ;;  %2372 = vrot.lane.b32.xlu0 %v2356_v45, %s9900_s17  ;;  %v2726_v45 = vld [vmem:[#allocation5 + $0xd8] sm:$0xff] }
 0x2f1   : > { %1438 = vst.msk [vmem:[#allocation5 + $0xa8] sm:$0xff] %vm1430_vm5, %v11429_v27 }
 0x2f2   : > { %1487 = vst.msk [vmem:[#allocation5 + $0xa8] sm:$0xff] %vm1479_vm6, %v1470_v60  ;;  %3300 = vmatmul.f32.gmra.mxu3 %v11832_v62  ;;  %v2971_v10 = vsub.f32 %v2720_v50, %v11832_v62  ;;  %v2501_v50 = vld [vmem:[#allocation2 + $0x201] sm:$0xff] }
 0x2f3   : > { %1536 = vst.msk [vmem:[#allocation5 + $0xa8] sm:$0xff] %vm1528_vm7, %v1519_v6 }
 0x2f4   : > { %3484 = vmatmul.f32.gmra.mxu0 %v2971_v10  ;;  %v2972_v17 = vand.u32 4294901760, %v2971_v10  ;;  %v1793_v27 = vpop.permute.xlu0 %1792 }
 0x2f5   : > { %v1887_v4 = vpop.permute.xlu1 %1886  ;;  %2468 = vrot.lane.b32.xlu2 %v2452_v25, %s9906_s29  ;;  %v2645_v25 = vld [vmem:[#allocation2 + $0xd1] sm:$0xff] }
 0x2f6   : > { %1904 = vst.msk [vmem:[#allocation5 + $0x150] sm:$0xff] %vm1528_vm7, %v1887_v4  ;;  %3684 = vmatmul.f32.gmra.mxu1 %v2972_v17  ;;  %v2973_v28 = vsub.f32 %v2971_v10, %v2972_v17  ;;  %v16178_v17 = vld [vmem:[#allocation14_spill] sm:$0xff] }
 0x2f7   : > { %1952 = vst.msk [vmem:[#allocation5 + $0x150] sm:$0xff] %vm1577_vm8, %v1935_v14  ;;  %2420 = vrot.lane.b32.xlu1 %v2404_v41, %s9901_s21  ;;  %v4485_v14 = vand.u32 4294901760, %v4484_v48  ;;  %v11903_v41 = vand.u32 4294901760, %v2726_v45 }
 0x2f8   : > { %v11845_v2 = vpop.permute.xlu2 %2200  ;;  %v2974_v18 = vand.u32 4294901760, %v2973_v28  ;;  %2516 = vrot.lane.b32.xlu0 %v2500_v54, %s9905_s28 }
 0x2f9   : > { %4486 = vmatpush.msrb.mxu1 %v4485_v14  ;;  %v2730_v14 = vld [vmem:[#allocation5 + $0x108] sm:$0xff] }
 0x2fa   : > { %2975 = vmatmul.f32.gmra.mxu2 %v2974_v18 }
 0x2fc   : > { %v1937_v32 = vpop.permute.xlu0 %1936 }
 0x2fd   : > { %v1697_v63 = vpop.permute.xlu1 %1696  ;;  %2612 = vrot.lane.b32.xlu2 %v16176_v37, %s9904_s27  ;;  %v2995_v37 = vsub.f32 %v2726_v45, %v11903_v41  ;;  %v2732_v45 = vld [vmem:[#allocation5 + $0x120] sm:$0xff] }
 0x2fe   : > { %1713 = vst.msk [vmem:[#allocation5 + $0x168] sm:$0xff] %vm1332_vm3, %v1697_v63 }
 0x2ff   : > { %1761 = vst.msk [vmem:[#allocation5 + $0x168] sm:$0xff] %vm1381_vm4, %v16177_v15  ;;  %2564 = vrot.lane.b32.xlu1 %v2548_v31, %s9903_s24  ;;  %v2728_v15 = vld [vmem:[#allocation5 + $0xf0] sm:$0xff] }
 0x300   : > { %v2011_v52 = vpop.permute.xlu2 %2010  ;;  %1809 = vst.msk [vmem:[#allocation5 + $0x168] sm:$0xff] %vm1430_vm5, %v1793_v27  ;;  %2660 = vrot.lane.b32.xlu0 %v2644_v33, %s9902_s22 }
 0x301   : > { %1857 = vst.msk [vmem:[#allocation5 + $0x168] sm:$0xff] %vm1479_vm6, %v11446_v59 }
 0x302   : > { %1905 = vst.msk [vmem:[#allocation5 + $0x168] sm:$0xff] %vm1528_vm7, %v1889_v26  ;;  %v11888_v26 = vand.u32 4294901760, %v2724_v36 }
 0x303   : > { %1953 = vst.msk [vmem:[#allocation5 + $0x168] sm:$0xff] %vm1577_vm8, %v1937_v32  ;;  %v2406_v32 = vld [vmem:[#allocation2 + $0x32] sm:$0xff] }
 0x304   : > { %2030 = vst.msk [vmem:[#allocation5 + $0x1e0] sm:$0xff] %vm1283_vm2, %v2011_v52  ;;  %v2297_v46 = vpop.permute.xlu0 %2296  ;;  %v2987_v10 = vsub.f32 %v2724_v36, %v11888_v26  ;;  %v2502_v52 = vld [vmem:[#allocation2 + $0x211] sm:$0xff] }
 0x305   : > { %v1568_v59 = vpop.permute.xlu1 %1567  ;;  %2422 = vrot.lane.b32.xlu2 %v2405_v11, %s9901_s21  ;;  %2318 = vst.msk [vmem:[#allocation5 + $0x1b0] sm:$0xff] %vm1577_vm8, %v2297_v46  ;;  %v11916_v11 = vand.u32 4294901760, %v2728_v15  ;;  %v2454_v46 = vld [vmem:[#allocation2 + $0x171] sm:$0xff] }
 0x306   : > { %1585 = vst.msk [vmem:[#allocation5 + $0xa8] sm:$0xff] %vm1577_vm8, %v1568_v59  ;;  %v2988_v18 = vand.u32 4294901760, %v2987_v10  ;;  %v2550_v36 = vld [vmem:[#allocation2 + $0x172] sm:$0xff] }
 0x307   : > { %2374 = vrot.lane.b32.xlu1 %v2644_v33, %s9900_s17  ;;  %v2996_v33 = vand.u32 4294901760, %v2995_v37 }
 0x308   : > { %v11875_v8 = vpop.permute.xlu2 %2154  ;;  %2470 = vrot.lane.b32.xlu0 %v2453_v56, %s9906_s29  ;;  %v2989_v63 = vsub.f32 %v2987_v10, %v2988_v18  ;;  %v3003_v56 = vsub.f32 %v2728_v15, %v11916_v11 }
 0x309   : > { %v2997_v48 = vsub.f32 %v2995_v37, %v2996_v33 }
 0x30a   : > { %v2990_v38 = vand.u32 4294901760, %v2989_v63  ;;  %v2734_v63 = vld [vmem:[#allocation5 + $0x138] sm:$0xff] }
 0x30c   : > { %v2105_v34 = vpop.permute.xlu0 %2104 }
 0x30d   : > { %v2009_v53 = vpop.permute.xlu1 %2008  ;;  %v2722_v60 = vld [vmem:[#allocation5 + $0xa8] sm:$0xff]  ;;  %2566 = vrot.lane.b32.xlu2 %v2549_v40, %s9903_s24 }
 0x30e   : > { %2029 = vst.msk [vmem:[#allocation5 + $0x1c8] sm:$0xff] %vm1283_vm2, %v2009_v53  ;;  %v11886_v3 = vand.u32 4294901760, %v2722_v60 }
 0x30f   : > { %2077 = vst.msk [vmem:[#allocation5 + $0x1c8] sm:$0xff] %vm1332_vm3, %v11829_v58  ;;  %2518 = vrot.lane.b32.xlu1 %v2501_v50, %s9905_s28 }
 0x310   : > { %v11892_v12 = vpop.permute.xlu2 %2300  ;;  %2125 = vst.msk [vmem:[#allocation5 + $0x1c8] sm:$0xff] %vm1381_vm4, %v2105_v34  ;;  %3304 = vmatmul.f32.gmra.mxu3 %v11886_v3  ;;  %v2979_v6 = vsub.f32 %v2722_v60, %v11886_v3  ;;  %2614 = vrot.lane.b32.xlu0 %v16178_v17, %s9904_s27  ;;  %v2998_v60 = vand.u32 4294901760, %v2997_v48  ;;  %v3004_v34 = vand.u32 4294901760, %v3003_v56 }
 0x312   : > { %3489 = vmatmul.f32.gmra.mxu0 %v2979_v6  ;;  %v2980_v42 = vand.u32 4294901760, %v2979_v6 }
 0x314   : > { %3690 = vmatmul.f32.gmra.mxu1 %v2980_v42  ;;  %v2981_v58 = vsub.f32 %v2979_v6, %v2980_v42  ;;  %v2250_v27 = vpop.permute.xlu0 %2249  ;;  %v11928_v6 = vand.u32 4294901760, %v2730_v14  ;;  %v3005_v42 = vsub.f32 %v3003_v56, %v3004_v34 }
 0x315   : > { %v2153_v4 = vpop.permute.xlu1 %2152  ;;  %2376 = vrot.lane.b32.xlu2 %v2645_v25, %s9900_s17 }
 0x316   : > { %2173 = vst.msk [vmem:[#allocation5 + $0x1c8] sm:$0xff] %vm1430_vm5, %v2153_v4  ;;  %v2982_v28 = vand.u32 4294901760, %v2981_v58 }
 0x317   : > { %2221 = vst.msk [vmem:[#allocation5 + $0x1c8] sm:$0xff] %vm1479_vm6, %v11845_v2  ;;  %2662 = vrot.lane.b32.xlu1 %v2645_v25, %s9902_s22  ;;  %v3006_v25 = vand.u32 4294901760, %v3005_v42 }
 0x318   : > { %v11907_v54 = vpop.permute.xlu2 %2108  ;;  %2270 = vst.msk [vmem:[#allocation5 + $0x1c8] sm:$0xff] %vm1528_vm7, %v2250_v27  ;;  %2983 = vmatmul.f32.gmra.mxu2 %v2982_v28  ;;  %3308 = vmatmul.f32.gmra.mxu3 %v11888_v26  ;;  %v11943_v27 = vand.u32 4294901760, %v2732_v45 }
 0x319   : > { %2424 = vrot.lane.b32.xlu0 %v2406_v32, %s9901_s21 }
 0x31a   : > { %3494 = vmatmul.f32.gmra.mxu0 %v2987_v10  ;;  %v3011_v10 = vsub.f32 %v2730_v14, %v11928_v6 }
 0x31c   : > { %3696 = vmatmul.f32.gmra.mxu1 %v2988_v18  ;;  %v2059_v31 = vpop.permute.xlu0 %2058  ;;  %v3012_v4 = vand.u32 4294901760, %v3011_v10  ;;  %v3019_v18 = vsub.f32 %v2732_v45, %v11943_v27 }
 0x31d   : > { %v2299_v2 = vpop.permute.xlu1 %2298  ;;  %2520 = vrot.lane.b32.xlu2 %v2502_v52, %s9905_s28  ;;  %2078 = vst.msk [vmem:[#allocation5 + $0x1e0] sm:$0xff] %vm1332_vm3, %v2059_v31  ;;  %v11958_v52 = vand.u32 4294901760, %v2734_v63 }
 0x31e   : > { %2319 = vst.msk [vmem:[#allocation5 + $0x1c8] sm:$0xff] %vm1577_vm8, %v2299_v2  ;;  %v3013_v28 = vsub.f32 %v3011_v10, %v3012_v4  ;;  %v3020_v15 = vand.u32 4294901760, %v3019_v18 }
 0x31f   : > { %2472 = vrot.lane.b32.xlu1 %v2454_v46, %s9906_s29  ;;  %v3027_v31 = vsub.f32 %v2734_v63, %v11958_v52 }
 0x320   : > { %v11919_v59 = vpop.permute.xlu2 %2253  ;;  %2991 = vmatmul.f32.gmra.mxu2 %v2990_v38  ;;  %3312 = vmatmul.f32.gmra.mxu3 %v11903_v41  ;;  %v3014_v32 = vand.u32 4294901760, %v3013_v28  ;;  %v2736_v38 = vld [vmem:[#allocation5 + $0x150] sm:$0xff] }
 0x321   : > { %2568 = vrot.lane.b32.xlu0 %v2550_v36, %s9903_s24  ;;  %v11971_v36 = vand.u32 4294901760, %v2736_v38 }
 0x322   : > { %3499 = vmatmul.f32.gmra.mxu0 %v2995_v37 }
 0x324   : > { %3702 = vmatmul.f32.gmra.mxu1 %v2996_v33  ;;  %v2203_v53 = vpop.permute.xlu0 %2202 }
 0x325   : > { %v2107_v40 = vpop.permute.xlu1 %2106  ;;  %2664 = vrot.lane.b32.xlu2 %v11660_v61, %s9902_s22 }
 0x326   : > { %2126 = vst.msk [vmem:[#allocation5 + $0x1e0] sm:$0xff] %vm1381_vm4, %v2107_v40 }
 0x327   : > { %2174 = vst.msk [vmem:[#allocation5 + $0x1e0] sm:$0xff] %vm1430_vm5, %v11875_v8  ;;  %2616 = vrot.lane.b32.xlu1 %v11656_v43, %s9904_s27  ;;  %v2455_v8 = vld [vmem:[#allocation2 + $0x181] sm:$0xff] }
 0x328   : > { %v11932_v50 = vpop.permute.xlu2 %2062  ;;  %2222 = vst.msk [vmem:[#allocation5 + $0x1e0] sm:$0xff] %vm1479_vm6, %v2203_v53  ;;  %2999 = vmatmul.f32.gmra.mxu2 %v2998_v60  ;;  %3316 = vmatmul.f32.gmra.mxu3 %v11916_v11  ;;  %v3035_v53 = vsub.f32 %v2736_v38, %v11971_v36  ;;  %v2456_v60 = vld [vmem:[#allocation2 + $0x191] sm:$0xff] }
 0x329   : > { %2378 = vrot.lane.b32.xlu0 %v11660_v61, %s9900_s17  ;;  %v2407_v61 = vld [vmem:[#allocation2 + $0x42] sm:$0xff] }
 0x32a   : > { %3504 = vmatmul.f32.gmra.mxu0 %v3003_v56  ;;  %v3028_v56 = vand.u32 4294901760, %v3027_v31 }
 0x32c   : > { %3708 = vmatmul.f32.gmra.mxu1 %v3004_v34  ;;  %v2013_v58 = vpop.permute.xlu0 %2012  ;;  %v3029_v40 = vsub.f32 %v3027_v31, %v3028_v56  ;;  %v2738_v34 = vld [vmem:[#allocation5 + $0x168] sm:$0xff] }
 0x32d   : > { %v2252_v17 = vpop.permute.xlu1 %2251  ;;  %2474 = vrot.lane.b32.xlu2 %v2455_v8, %s9906_s29  ;;  %2031 = vst.msk [vmem:[#allocation5 + $0x1f8] sm:$0xff] %vm1283_vm2, %v2013_v58  ;;  %v3036_v8 = vand.u32 4294901760, %v3035_v53 }
 0x32e   : > { %2271 = vst.msk [vmem:[#allocation5 + $0x1e0] sm:$0xff] %vm1528_vm7, %v2252_v17  ;;  %v3030_v45 = vand.u32 4294901760, %v3029_v40  ;;  %v11985_v17 = vand.u32 4294901760, %v2738_v34 }
 0x32f   : > { %2320 = vst.msk [vmem:[#allocation5 + $0x1e0] sm:$0xff] %vm1577_vm8, %v11892_v12  ;;  %2426 = vrot.lane.b32.xlu1 %v2407_v61, %s9901_s21  ;;  %v3037_v58 = vsub.f32 %v3035_v53, %v3036_v8 }
 0x330   : > { %v11947_v43 = vpop.permute.xlu2 %2206  ;;  %3007 = vmatmul.f32.gmra.mxu2 %v3006_v25  ;;  %3320 = vmatmul.f32.gmra.mxu3 %v11928_v6  ;;  %v3043_v25 = vsub.f32 %v2738_v34, %v11985_v17 }
 0x331   : > { %2522 = vrot.lane.b32.xlu0 %v11680_v39, %s9905_s28  ;;  %v2551_v39 = vld [vmem:[#allocation2 + $0x182] sm:$0xff]  ;;  %v3038_v28 = vand.u32 4294901760, %v3037_v58 }
 0x332   : > { %3509 = vmatmul.f32.gmra.mxu0 %v3011_v10 }
 0x334   : > { %3714 = vmatmul.f32.gmra.mxu1 %v3012_v4  ;;  %v2157_v37 = vpop.permute.xlu0 %2156  ;;  %v2740_v4 = vld [vmem:[#allocation5 + $0x180] sm:$0xff] }
 0x335   : > { %v2061_v12 = vpop.permute.xlu1 %2060  ;;  %2618 = vrot.lane.b32.xlu2 %v11691_v21, %s9904_s27  ;;  %v3021_v21 = vsub.f32 %v3019_v18, %v3020_v15  ;;  %v12001_v63 = vand.u32 4294901760, %v2740_v4 }
 0x336   : > { %2079 = vst.msk [vmem:[#allocation5 + $0x1f8] sm:$0xff] %vm1332_vm3, %v2061_v12 }
 0x337   : > { %2127 = vst.msk [vmem:[#allocation5 + $0x1f8] sm:$0xff] %vm1381_vm4, %v11907_v54  ;;  %2570 = vrot.lane.b32.xlu1 %v2551_v39, %s9903_s24  ;;  %v2408_v54 = vld [vmem:[#allocation2 + $0x52] sm:$0xff]  ;;  %v3022_v48 = vand.u32 4294901760, %v3021_v21  ;;  %v3051_v12 = vsub.f32 %v2740_v4, %v12001_v63  ;;  %v12045_v4 = vpop.f32.mrf.mxu2 }
 0x338   : > { %v2017_v2 = vpop.permute.xlu2 %2016  ;;  %2175 = vst.msk [vmem:[#allocation5 + $0x1f8] sm:$0xff] %vm1430_vm5, %v2157_v37  ;;  %3015 = vmatmul.f32.gmra.mxu2 %v3014_v32  ;;  %3324 = vmatmul.f32.gmra.mxu3 %v11943_v27  ;;  %v2409_v37 = vld [vmem:[#allocation2 + $0x62] sm:$0xff]  ;;  %v2742_v32 = vld [vmem:[#allocation5 + $0x198] sm:$0xff] }
 0x339   : > { %2033 = vst.msk [vmem:[#allocation5 + $0x228] sm:$0xff] %vm1283_vm2, %v2017_v2  ;;  %2666 = vrot.lane.b32.xlu0 %v11704_v35, %s9902_s22  ;;  %v3052_v39 = vand.u32 4294901760, %v3051_v12  ;;  %v12016_v21 = vand.u32 4294901760, %v2742_v32 }
 0x33a   : > { %3514 = vmatmul.f32.gmra.mxu0 %v3019_v18  ;;  %v3044_v18 = vand.u32 4294901760, %v3043_v25 }
 0x33b   : > { %v3053_v38 = vsub.f32 %v3051_v12, %v3052_v39 }
 0x33c   : > { %3720 = vmatmul.f32.gmra.mxu1 %v3020_v15  ;;  %v2303_v46 = vpop.permute.xlu0 %2302 }
 0x33d   : > { %v2205_v33 = vpop.permute.xlu1 %2204  ;;  %2428 = vrot.lane.b32.xlu2 %v2408_v54, %s9901_s21  ;;  %v3059_v54 = vsub.f32 %v2742_v32, %v12016_v21 }
 0x33e   : > { %2223 = vst.msk [vmem:[#allocation5 + $0x1f8] sm:$0xff] %vm1479_vm6, %v2205_v33  ;;  %v2744_v33 = vld [vmem:[#allocation5 + $0x1b0] sm:$0xff] }
 0x33f   : > { %2272 = vst.msk [vmem:[#allocation5 + $0x1f8] sm:$0xff] %vm1528_vm7, %v11919_v59  ;;  %2380 = vrot.lane.b32.xlu1 %v11704_v35, %s9900_s17  ;;  %v2552_v59 = vld [vmem:[#allocation2 + $0x192] sm:$0xff]  ;;  %v3060_v40 = vand.u32 4294901760, %v3059_v54 }
 0x340   : > { %v11975_v14 = vpop.permute.xlu2 %2160  ;;  %2321 = vst.msk [vmem:[#allocation5 + $0x1f8] sm:$0xff] %vm1577_vm8, %v2303_v46  ;;  %3023 = vmatmul.f32.gmra.mxu2 %v3022_v48  ;;  %3328 = vmatmul.f32.gmra.mxu3 %v11958_v52 }
 0x341   : > { %2476 = vrot.lane.b32.xlu0 %v2456_v60, %s9906_s29  ;;  %v3061_v34 = vsub.f32 %v3059_v54, %v3060_v40 }
 0x342   : > { %3519 = vmatmul.f32.gmra.mxu0 %v3027_v31 }
 0x344   : > { %3726 = vmatmul.f32.gmra.mxu1 %v3028_v56  ;;  %v2111_v10 = vpop.permute.xlu0 %2110  ;;  %v3054_v56 = vand.u32 4294901760, %v3053_v38 }
 0x345   : > { %v2015_v42 = vpop.permute.xlu1 %2014  ;;  %2572 = vrot.lane.b32.xlu2 %v2552_v59, %s9903_s24 }
 0x346   : > { %2032 = vst.msk [vmem:[#allocation5 + $0x210] sm:$0xff] %vm1283_vm2, %v2015_v42  ;;  %v2746_v42 = vld [vmem:[#allocation5 + $0x1c8] sm:$0xff] }
 0x347   : > { %2080 = vst.msk [vmem:[#allocation5 + $0x210] sm:$0xff] %vm1332_vm3, %v11932_v50  ;;  %2524 = vrot.lane.b32.xlu1 %v11715_v19, %s9905_s28 }
 0x348   : > { %v11989_v35 = vpop.permute.xlu2 %2306  ;;  %2128 = vst.msk [vmem:[#allocation5 + $0x210] sm:$0xff] %vm1381_vm4, %v2111_v10  ;;  %3031 = vmatmul.f32.gmra.mxu2 %v3030_v45  ;;  %3332 = vmatmul.f32.gmra.mxu3 %v11971_v36 }
 0x349   : > { %2620 = vrot.lane.b32.xlu0 %v11719_v29, %s9904_s27  ;;  %v3045_v29 = vsub.f32 %v3043_v25, %v3044_v18 }
 0x34a   : > { %3524 = vmatmul.f32.gmra.mxu0 %v3035_v53  ;;  %v12028_v53 = vand.u32 4294901760, %v2744_v33 }
 0x34b   : > { %v3046_v2 = vand.u32 4294901760, %v3045_v29  ;;  %v12058_v29 = vpop.f32.mrf.mxu1 }
 0x34c   : > { %3732 = vmatmul.f32.gmra.mxu1 %v3036_v8  ;;  %v2256_v61 = vpop.permute.xlu0 %2255  ;;  %v3067_v59 = vsub.f32 %v2744_v33, %v12028_v53  ;;  %v3062_v8 = vand.u32 4294901760, %v3061_v34  ;;  %v2411_v33 = vld [vmem:[#allocation2 + $0x82] sm:$0xff] }
 0x34d   : > { %v2159_v50 = vpop.permute.xlu1 %2158  ;;  %2382 = vrot.lane.b32.xlu2 %v11744_v30, %s9900_s17 }
 0x34e   : > { %2176 = vst.msk [vmem:[#allocation5 + $0x210] sm:$0xff] %vm1430_vm5, %v2159_v50  ;;  %v3068_v58 = vand.u32 4294901760, %v3067_v59  ;;  %v12051_v50 = vpop.f32.mrf.mxu0 }
 0x34f   : > { %2224 = vst.msk [vmem:[#allocation5 + $0x210] sm:$0xff] %vm1479_vm6, %v11947_v43  ;;  %2668 = vrot.lane.b32.xlu1 %v11744_v30, %s9902_s22  ;;  %v2457_v30 = vld [vmem:[#allocation2 + $0x1a1] sm:$0xff] }
 0x350   : > { %v12005_v19 = vpop.permute.xlu2 %2468  ;;  %2273 = vst.msk [vmem:[#allocation5 + $0x210] sm:$0xff] %vm1528_vm7, %v2256_v61  ;;  %3039 = vmatmul.f32.gmra.mxu2 %v3038_v28  ;;  %3336 = vmatmul.f32.gmra.mxu3 %v11985_v17  ;;  %v2410_v61 = vld [vmem:[#allocation2 + $0x72] sm:$0xff]  ;;  %v3069_v28 = vsub.f32 %v3067_v59, %v3068_v58 }
 0x351   : > { %2430 = vrot.lane.b32.xlu0 %v2409_v37, %s9901_s21 }
 0x352   : > { %3529 = vmatmul.f32.gmra.mxu0 %v3043_v25  ;;  %v12043_v25 = vand.u32 4294901760, %v2746_v42  ;;  %v3070_v32 = vand.u32 4294901760, %v3069_v28  ;;  %v2555_v28 = vld [vmem:[#allocation2 + $0x1c2] sm:$0xff] }
 0x354   : > { %3738 = vmatmul.f32.gmra.mxu1 %v3044_v18  ;;  %v2065_v15 = vpop.permute.xlu0 %2064  ;;  %v3075_v18 = vsub.f32 %v2746_v42, %v12043_v25 }
 0x355   : > { %v2305_v43 = vpop.permute.xlu1 %2304  ;;  %2526 = vrot.lane.b32.xlu2 %v11756_v49, %s9905_s28  ;;  %2081 = vst.msk [vmem:[#allocation5 + $0x228] sm:$0xff] %vm1332_vm3, %v2065_v15  ;;  %v2553_v49 = vld [vmem:[#allocation2 + $0x1a2] sm:$0xff] }
 0x356   : > { %2322 = vst.msk [vmem:[#allocation5 + $0x210] sm:$0xff] %vm1577_vm8, %v2305_v43  ;;  %v3076_v43 = vand.u32 4294901760, %v3075_v18 }
 0x357   : > { %2478 = vrot.lane.b32.xlu1 %v2457_v30, %s9906_s29  ;;  %v12072_v30 = vpop.f32.mrf.mxu0 }
 0x358   : > { %v12019_v31 = vpop.permute.xlu2 %2612  ;;  %3047 = vmatmul.f32.gmra.mxu2 %v3046_v2  ;;  %3340 = vmatmul.f32.gmra.mxu3 %v12001_v63  ;;  %v12068_v2 = vpop.f32.mrf.mxu2  ;;  %v3077_v38 = vsub.f32 %v3075_v18, %v3076_v43 }
 0x359   : > { %2574 = vrot.lane.b32.xlu0 %v2553_v49, %s9903_s24  ;;  %v12080_v49 = vpop.f32.mrf.mxu1 }
 0x35a   : > { %3534 = vmatmul.f32.gmra.mxu0 %v3051_v12 }
 0x35c   : > { %3744 = vmatmul.f32.gmra.mxu1 %v3052_v39  ;;  %v2209_v48 = vpop.permute.xlu0 %2208 }
 0x35d   : > { %v2113_v46 = vpop.permute.xlu1 %2112  ;;  %2670 = vrot.lane.b32.xlu2 %v11764_v44, %s9902_s22 }
 0x35e   : > { %2129 = vst.msk [vmem:[#allocation5 + $0x228] sm:$0xff] %vm1381_vm4, %v2113_v46 }
 0x35f   : > { %2177 = vst.msk [vmem:[#allocation5 + $0x228] sm:$0xff] %vm1430_vm5, %v11975_v14  ;;  %2622 = vrot.lane.b32.xlu1 %v11760_v47, %s9904_s27  ;;  %v2458_v14 = vld [vmem:[#allocation2 + $0x1b1] sm:$0xff] }
 0x360   : > { %v12032_v60 = vpop.permute.xlu2 %2422  ;;  %2225 = vst.msk [vmem:[#allocation5 + $0x228] sm:$0xff] %vm1479_vm6, %v2209_v48  ;;  %3055 = vmatmul.f32.gmra.mxu2 %v3054_v56  ;;  %3344 = vmatmul.f32.gmra.mxu3 %v12016_v21  ;;  %v3078_v56 = vand.u32 4294901760, %v3077_v38 }
 0x361   : > { %2384 = vrot.lane.b32.xlu0 %v11764_v44, %s9900_s17  ;;  %v12055_v44 = vpop.f32.mrf.mxu3 }
 0x362   : > { %3539 = vmatmul.f32.gmra.mxu0 %v3059_v54 }
 0x364   : > { %3750 = vmatmul.f32.gmra.mxu1 %v3060_v40  ;;  %v2373_v45 = vpop.permute.xlu0 %2372 }
 0x365   : > { %v2258_v10 = vpop.permute.xlu1 %2257  ;;  %2480 = vrot.lane.b32.xlu2 %v2458_v14, %s9906_s29  ;;  %2396 = vst.msk [vmem:[#allocation5 + $0x240] sm:$0xff] %vm1283_vm2, %v2373_v45  ;;  %v12095_v14 = vpop.f32.mrf.mxu0 }
 0x366   : > { %2274 = vst.msk [vmem:[#allocation5 + $0x228] sm:$0xff] %vm1528_vm7, %v2258_v10 }
 0x367   : > { %2323 = vst.msk [vmem:[#allocation5 + $0x228] sm:$0xff] %vm1577_vm8, %v11989_v35  ;;  %2432 = vrot.lane.b32.xlu1 %v2410_v61, %s9901_s21  ;;  %v2748_v35 = vld [vmem:[#allocation5 + $0x1e0] sm:$0xff]  ;;  %v2752_v61 = vld [vmem:[#allocation5 + $0x210] sm:$0xff] }
 0x368   : > { %v12049_v47 = vpop.permute.xlu2 %2566  ;;  %3063 = vmatmul.f32.gmra.mxu2 %v3062_v8  ;;  %3348 = vmatmul.f32.gmra.mxu3 %v12028_v53  ;;  %v12066_v15 = vand.u32 4294901760, %v2748_v35 }
 0x369   : > { %2528 = vrot.lane.b32.xlu0 %v11786_v1, %s9905_s28  ;;  %v12076_v1 = vpop.f32.mrf.mxu3 }
 0x36a   : > { %3544 = vmatmul.f32.gmra.mxu0 %v3067_v59  ;;  %v3083_v54 = vsub.f32 %v2748_v35, %v12066_v15  ;;  %v12089_v59 = vpop.f32.mrf.mxu2 }
 0x36c   : > { %3756 = vmatmul.f32.gmra.mxu1 %v3068_v58  ;;  %v2517_v37 = vpop.permute.xlu0 %2516  ;;  %v3084_v40 = vand.u32 4294901760, %v3083_v54  ;;  %v12102_v58 = vpop.f32.mrf.mxu1 }
 0x36d   : > { %v2421_v12 = vpop.permute.xlu1 %2420  ;;  %2624 = vrot.lane.b32.xlu2 %v11798_v20, %s9904_s27  ;;  %v2554_v20 = vld [vmem:[#allocation2 + $0x1b2] sm:$0xff] }
 0x36e   : > { %2444 = vst.msk [vmem:[#allocation5 + $0x240] sm:$0xff] %vm1332_vm3, %v2421_v12  ;;  %v3085_v45 = vsub.f32 %v3083_v54, %v3084_v40 }
 0x36f   : > { %2492 = vst.msk [vmem:[#allocation5 + $0x240] sm:$0xff] %vm1381_vm4, %v12005_v19  ;;  %2576 = vrot.lane.b32.xlu1 %v2554_v20, %s9903_s24  ;;  %v2750_v19 = vld [vmem:[#allocation5 + $0x1f8] sm:$0xff] }
 0x370   : > { %v2377_v39 = vpop.permute.xlu2 %2376  ;;  %2540 = vst.msk [vmem:[#allocation5 + $0x240] sm:$0xff] %vm1430_vm5, %v2517_v37  ;;  %3071 = vmatmul.f32.gmra.mxu2 %v3070_v32  ;;  %3352 = vmatmul.f32.gmra.mxu3 %v12043_v25  ;;  %v12087_v34 = vand.u32 4294901760, %v2750_v19  ;;  %v3086_v12 = vand.u32 4294901760, %v3085_v45  ;;  %v12109_v32 = vand.u32 4294901760, %v2752_v61 }
 0x371   : > { %2398 = vst.msk [vmem:[#allocation5 + $0x270] sm:$0xff] %vm1283_vm2, %v2377_v39  ;;  %2672 = vrot.lane.b32.xlu0 %v11806_v7, %s9902_s22  ;;  %v12099_v10 = vpop.f32.mrf.mxu3  ;;  %v12117_v39 = vpop.f32.mrf.mxu0 }
 0x372   : > { %3549 = vmatmul.f32.gmra.mxu0 %v3075_v18  ;;  %v3091_v8 = vsub.f32 %v2750_v19, %v12087_v34  ;;  %16179 = vst [vmem:[#allocation28_spill] sm:$0xff] %v12109_v32  ;;  %v2788_v19 = vld [vmem:[%s15898_s3 + $0x80] sm:$0xff] }
 0x374   : > { %3762 = vmatmul.f32.gmra.mxu1 %v3076_v43  ;;  %v2661_v48 = vpop.permute.xlu0 %2660  ;;  %v3092_v37 = vand.u32 4294901760, %v3091_v8  ;;  %v12111_v43 = vpop.f32.mrf.mxu2 }
 0x375   : > { %v2565_v46 = vpop.permute.xlu1 %2564  ;;  %2434 = vrot.lane.b32.xlu2 %v2411_v33, %s9901_s21  ;;  %v2754_v33 = vld [vmem:[#allocation5 + $0x228] sm:$0xff] }
 0x376   : > { %2588 = vst.msk [vmem:[#allocation5 + $0x240] sm:$0xff] %vm1479_vm6, %v2565_v46  ;;  %v3093_v38 = vsub.f32 %v3091_v8, %v3092_v37  ;;  %v4208_v46 = vand.u32 4294901760, %v2788_v19 }
 0x377   : > { %2636 = vst.msk [vmem:[#allocation5 + $0x240] sm:$0xff] %vm1528_vm7, %v12019_v31  ;;  %2386 = vrot.lane.b32.xlu1 %v11806_v7, %s9900_s17  ;;  %v2459_v31 = vld [vmem:[#allocation2 + $0x1c1] sm:$0xff] }
 0x378   : > { %v12093_v42 = vpop.permute.xlu2 %2520  ;;  %2684 = vst.msk [vmem:[#allocation5 + $0x240] sm:$0xff] %vm1577_vm8, %v2661_v48  ;;  %3079 = vmatmul.f32.gmra.mxu2 %v3078_v56  ;;  %3356 = vmatmul.f32.gmra.mxu3 %v12066_v15 }
 0x379   : > { %2482 = vrot.lane.b32.xlu0 %v2459_v31, %s9906_s29  ;;  %v12121_v20 = vpop.f32.mrf.mxu3  ;;  %4209 = vmatpush.msrb.mxu0 %v4208_v46  ;;  %v4488_v31 = vsub.f32 %v2788_v19, %v4208_v46 }
 0x37a   : > { %3554 = vmatmul.f32.gmra.mxu0 %v3083_v54  ;;  %v3099_v54 = vsub.f32 %v2752_v61, %v12109_v32  ;;  %4820 = vmatpush.msrb.mxu3 %v4208_v46  ;;  %v12144_v61 = vpop.f32.mrf.mxu0 }
 0x37b   : > { %5031 = vmatpush.msra.mxu0 %v4483_v22  ;;  %4641 = vmatpush.msrb.mxu2 %v4488_v31 }
 0x37c   : > { %3768 = vmatmul.f32.gmra.mxu1 %v3084_v40  ;;  %v2471_v35 = vpop.permute.xlu0 %2470  ;;  %v3094_v40 = vand.u32 4294901760, %v3093_v38  ;;  %v3100_v45 = vand.u32 4294901760, %v3099_v54 }
 0x37d   : > { %v2375_v18 = vpop.permute.xlu1 %2374  ;;  %2578 = vrot.lane.b32.xlu2 %v2555_v28, %s9903_s24  ;;  %v2651_v28 = vld [vmem:[#allocation2 + $0x131] sm:$0xff] }
 0x37e   : > { %2397 = vst.msk [vmem:[#allocation5 + $0x258] sm:$0xff] %vm1283_vm2, %v2375_v18  ;;  %v4489_v18 = vand.u32 4294901760, %v4488_v31  ;;  %v3101_v57 = vsub.f32 %v3099_v54, %v3100_v45 }
 0x37f   : > { %2445 = vst.msk [vmem:[#allocation5 + $0x258] sm:$0xff] %vm1332_vm3, %v12032_v60  ;;  %v12127_v60 = vpop.f32.mrf.mxu1  ;;  %2530 = vrot.lane.b32.xlu1 %v11820_v51, %s9905_s28  ;;  %v12138_v51 = vpop.f32.mrf.mxu2 }
 0x380   : > { %v12115_v7 = vpop.permute.xlu2 %2664  ;;  %2493 = vst.msk [vmem:[#allocation5 + $0x258] sm:$0xff] %vm1381_vm4, %v2471_v35  ;;  %3087 = vmatmul.f32.gmra.mxu2 %v3086_v12  ;;  %3360 = vmatmul.f32.gmra.mxu3 %v12087_v34  ;;  %v4490_v12 = vsub.f32 %v4488_v31, %v4489_v18 }
 0x381   : > { %2626 = vrot.lane.b32.xlu0 %v11816_v0, %s9904_s27  ;;  %v12148_v35 = vpop.f32.mrf.mxu3  ;;  %5035 = vmatpush.msra.mxu0 %v4489_v18 }
 0x382   : > { %3559 = vmatmul.f32.gmra.mxu0 %v3091_v8  ;;  %v12134_v8 = vand.u32 4294901760, %v2754_v33  ;;  %v4491_v38 = vand.u32 4294901760, %v4490_v12  ;;  %v12163_v31 = vpop.f32.mrf.mxu0 }
 0x383   : > { %16182 = vst [vmem:[#allocation23_spill] sm:$0xff] %v12163_v31 }
 0x384   : > { %3774 = vmatmul.f32.gmra.mxu1 %v3092_v37  ;;  %v2615_v56 = vpop.permute.xlu0 %2614  ;;  %16180 = vst [vmem:[#allocation19_spill] sm:$0xff] %v12134_v8  ;;  %v3107_v22 = vsub.f32 %v2754_v33, %v12134_v8  ;;  %v2756_v37 = vld [vmem:[#allocation5 + $0x240] sm:$0xff] }
 0x385   : > { %v2519_v48 = vpop.permute.xlu1 %2518  ;;  %4492 = vmatpush.msrb.mxu1 %v4491_v38 }
 0x386   : > { %2541 = vst.msk [vmem:[#allocation5 + $0x258] sm:$0xff] %vm1430_vm5, %v2519_v48 }
 0x387   : > { %2589 = vst.msk [vmem:[#allocation5 + $0x258] sm:$0xff] %vm1479_vm6, %v12049_v47  ;;  %v12151_v47 = vpop.f32.mrf.mxu1  ;;  %2674 = vrot.lane.b32.xlu1 %v2651_v28, %s9902_s22  ;;  %5180 = vmatpush.msra.mxu1 %v11863_v24 }
 0x388   : > { %v12142_v0 = vpop.permute.xlu2 %2474  ;;  %2637 = vst.msk [vmem:[#allocation5 + $0x258] sm:$0xff] %vm1528_vm7, %v2615_v56  ;;  %3095 = vmatmul.f32.gmra.mxu2 %v3094_v40  ;;  %3364 = vmatmul.f32.gmra.mxu3 %v12109_v32  ;;  %v3102_v56 = vand.u32 4294901760, %v3101_v57  ;;  %v3108_v40 = vand.u32 4294901760, %v3107_v22  ;;  %v12155_v32 = vand.u32 4294901760, %v2756_v37 }
 0x389   : > { %5182 = vmatpush.msra.mxu1 %v4208_v46 }
 0x38a   : > { %3564 = vmatmul.f32.gmra.mxu0 %v3099_v54  ;;  %16181 = vst [vmem:[#allocation29_spill] sm:$0xff] %v12155_v32  ;;  %v12157_v54 = vpop.f32.mrf.mxu2  ;;  %v3109_v28 = vsub.f32 %v3107_v22, %v3108_v40  ;;  %v3115_v18 = vsub.f32 %v2756_v37, %v12155_v32 }
 0x38c   : > { %3780 = vmatmul.f32.gmra.mxu1 %v3100_v45  ;;  %v2425_v48 = vpop.permute.xlu0 %2424  ;;  %v12166_v45 = vpop.f32.mrf.mxu3 }
 0x38d   : > { %v2663_v19 = vpop.permute.xlu1 %2662  ;;  %2446 = vst.msk [vmem:[#allocation5 + $0x270] sm:$0xff] %vm1332_vm3, %v2425_v48  ;;  %v3116_v48 = vand.u32 4294901760, %v3115_v18 }
 0x38e   : > { %2685 = vst.msk [vmem:[#allocation5 + $0x258] sm:$0xff] %vm1577_vm8, %v2663_v19  ;;  %v3110_v19 = vand.u32 4294901760, %v3109_v28 }
 0x38f   : > { %v12169_v57 = vpop.f32.mrf.mxu1 }
 0x390   : > { %v12160_v33 = vpop.permute.xlu2 %2618  ;;  %3103 = vmatmul.f32.gmra.mxu2 %v3102_v56  ;;  %3368 = vmatmul.f32.gmra.mxu3 %v12134_v8  ;;  %16183 = vst [vmem:[#allocation16_spill] sm:$0xff] %v12169_v57 }
 0x392   : > { %3569 = vmatmul.f32.gmra.mxu0 %v3107_v22  ;;  %v12174_v8 = vpop.f32.mrf.mxu2  ;;  %v12180_v22 = vpop.f32.mrf.mxu0 }
 0x393   : > { %16185 = vst [vmem:[#allocation33_spill] sm:$0xff] %v12174_v8 }
 0x394   : > { %3786 = vmatmul.f32.gmra.mxu1 %v3108_v40  ;;  %v2569_v24 = vpop.permute.xlu0 %2568  ;;  %16186 = vst [vmem:[#allocation21_spill] sm:$0xff] %v12180_v22  ;;  %v12184_v37 = vpop.f32.mrf.mxu3  ;;  %v3117_v40 = vsub.f32 %v3115_v18, %v3116_v48 }
 0x395   : > { %v2473_v12 = vpop.permute.xlu1 %2472  ;;  %v2758_v38 = vld [vmem:[#allocation5 + $0x258] sm:$0xff] }
 0x396   : > { %2494 = vst.msk [vmem:[#allocation5 + $0x270] sm:$0xff] %vm1381_vm4, %v2473_v12  ;;  %v12172_v56 = vand.u32 4294901760, %v2758_v38  ;;  %v3118_v31 = vand.u32 4294901760, %v3117_v40 }
 0x397   : > { %2542 = vst.msk [vmem:[#allocation5 + $0x270] sm:$0xff] %vm1430_vm5, %v12093_v42  ;;  %v12187_v12 = vpop.f32.mrf.mxu1 }
 0x398   : > { %16184 = vst [vmem:[#allocation34_spill] sm:$0xff] %v12172_v56  ;;  %v12178_v46 = vpop.permute.xlu2 %2428  ;;  %3111 = vmatmul.f32.gmra.mxu2 %v3110_v19  ;;  %3372 = vmatmul.f32.gmra.mxu3 %v12155_v32  ;;  %v3123_v28 = vsub.f32 %v2758_v38, %v12172_v56 }
 0x399   : > { %2590 = vst.msk [vmem:[#allocation5 + $0x270] sm:$0xff] %vm1479_vm6, %v2569_v24 }
 0x39a   : > { %3574 = vmatmul.f32.gmra.mxu0 %v3115_v18  ;;  %16187 = vst [vmem:[#allocation20_spill] sm:$0xff] %v12187_v12  ;;  %v3124_v22 = vand.u32 4294901760, %v3123_v28  ;;  %v12194_v19 = vpop.f32.mrf.mxu0 }
 0x39b   : > { %v12190_v8 = vpop.f32.mrf.mxu2  ;;  %16188 = vst [vmem:[#allocation39_spill] sm:$0xff] %v12194_v19 }
 0x39c   : > { %3792 = vmatmul.f32.gmra.mxu1 %v3116_v48  ;;  %v2379_v42 = vpop.permute.xlu0 %2378  ;;  %v12198_v18 = vpop.f32.mrf.mxu3 }
 0x39d   : > { %v2617_v57 = vpop.permute.xlu1 %2616  ;;  %2399 = vst.msk [vmem:[#allocation5 + $0x288] sm:$0xff] %vm1283_vm2, %v2379_v42 }
 0x39e   : > { %2638 = vst.msk [vmem:[#allocation5 + $0x270] sm:$0xff] %vm1528_vm7, %v2617_v57  ;;  %v3125_v57 = vsub.f32 %v3123_v28, %v3124_v22 }
 0x39f   : > { %2686 = vst.msk [vmem:[#allocation5 + $0x270] sm:$0xff] %vm1577_vm8, %v12115_v7  ;;  %v12200_v38 = vpop.f32.mrf.mxu1 }
 0x3a0   : > { %v2573_v24 = vpop.permute.xlu2 %2572  ;;  %3119 = vmatmul.f32.gmra.mxu2 %v3118_v31  ;;  %3376 = vmatmul.f32.gmra.mxu3 %v12172_v56  ;;  %16189 = vst [vmem:[#allocation17_spill] sm:$0xff] %v12200_v38  ;;  %v3126_v7 = vand.u32 4294901760, %v3125_v57 }
 0x3a2   : > { %3579 = vmatmul.f32.gmra.mxu0 %v3123_v28  ;;  %v12213_v28 = vpop.f32.mrf.mxu0 }
 0x3a3   : > { %v12208_v56 = vpop.f32.mrf.mxu2  ;;  %16192 = vst [vmem:[#allocation30_spill] sm:$0xff] %v12213_v28 }
 0x3a4   : > { %3798 = vmatmul.f32.gmra.mxu1 %v3124_v22  ;;  %v2523_v40 = vpop.permute.xlu0 %2522  ;;  %16191 = vst [vmem:[#allocation24_spill] sm:$0xff] %v12208_v56  ;;  %v12215_v57 = vpop.f32.mrf.mxu3 }
 0x3a5   : > { %v2427_v48 = vpop.permute.xlu1 %2426  ;;  %16193 = vst [vmem:[#allocation18_spill] sm:$0xff] %v12215_v57 }
 0x3a6   : > { %2447 = vst.msk [vmem:[#allocation5 + $0x288] sm:$0xff] %vm1332_vm3, %v2427_v48  ;;  %v2760_v32 = vld [vmem:[#allocation5 + $0x270] sm:$0xff] }
 0x3a7   : > { %2495 = vst.msk [vmem:[#allocation5 + $0x288] sm:$0xff] %vm1381_vm4, %v12142_v0  ;;  %v12205_v42 = vand.u32 4294901760, %v2760_v32  ;;  %v12217_v48 = vpop.f32.mrf.mxu1 }
 0x3a8   : > { %v2383_v31 = vpop.permute.xlu2 %2382  ;;  %2543 = vst.msk [vmem:[#allocation5 + $0x288] sm:$0xff] %vm1430_vm5, %v2523_v40  ;;  %3127 = vmatmul.f32.gmra.mxu2 %v3126_v7 }
 0x3a9   : > { %16190 = vst [vmem:[#allocation26_spill] sm:$0xff] %v12205_v42  ;;  %3380 = vmatmul.f32.gmra.mxu3 %v12205_v42  ;;  %v3131_v22 = vsub.f32 %v2760_v32, %v12205_v42 }
 0x3aa   : > { %2401 = vst.msk [vmem:[#allocation5 + $0x2b8] sm:$0xff] %vm1283_vm2, %v2383_v31  ;;  %v12225_v42 = vpop.f32.mrf.mxu0 }
 0x3ab   : > { %3584 = vmatmul.f32.gmra.mxu0 %v3131_v22  ;;  %v3132_v0 = vand.u32 4294901760, %v3131_v22  ;;  %16194 = vst [vmem:[#allocation38_spill] sm:$0xff] %v12217_v48  ;;  %v12223_v31 = vpop.f32.mrf.mxu2 }
 0x3ac   : > { %v2667_v7 = vpop.permute.xlu0 %2666  ;;  %16195 = vst [vmem:[#allocation35_spill] sm:$0xff] %v12223_v31  ;;  %v12227_v28 = vpop.f32.mrf.mxu3 }
 0x3ad   : > { %3804 = vmatmul.f32.gmra.mxu1 %v3132_v0  ;;  %v2571_v38 = vpop.permute.xlu1 %2570  ;;  %v3133_v40 = vsub.f32 %v3131_v22, %v3132_v0  ;;  %16196 = vst [vmem:[#allocation31_spill] sm:$0xff] %v12225_v42 }
 0x3ae   : > { %2591 = vst.msk [vmem:[#allocation5 + $0x288] sm:$0xff] %vm1479_vm6, %v2571_v38 }
 0x3af   : > { %2639 = vst.msk [vmem:[#allocation5 + $0x288] sm:$0xff] %vm1528_vm7, %v12160_v33  ;;  %v3134_v32 = vand.u32 4294901760, %v3133_v40  ;;  %v12230_v0 = vpop.f32.mrf.mxu1 }
 0x3b0   : > { %2687 = vst.msk [vmem:[#allocation5 + $0x288] sm:$0xff] %vm1577_vm8, %v2667_v7 }
 0x3b1   : > { %3135 = vmatmul.f32.gmra.mxu2 %v3134_v32  ;;  %16197 = vst [vmem:[#allocation22_spill] sm:$0xff] %v12227_v28 }
 0x3b2   : > { %16198 = vst [vmem:[#allocation37_spill] sm:$0xff] %v12230_v0  ;;  %v12241_v42 = vpop.f32.mrf.mxu0 }
 0x3b3   : > { %v12239_v32 = vpop.f32.mrf.mxu2  ;;  %16201 = vst [vmem:[#allocation40_spill] sm:$0xff] %v12241_v42 }
 0x3b4   : > { %v2477_v22 = vpop.permute.xlu0 %2476  ;;  %16200 = vst [vmem:[#allocation25_spill] sm:$0xff] %v12239_v32  ;;  %v12244_v28 = vpop.f32.mrf.mxu3 }
 0x3b5   : > { %v2381_v48 = vpop.permute.xlu1 %2380  ;;  %16202 = vst [vmem:[#allocation27_spill] sm:$0xff] %v12244_v28 }
 0x3b6   : > { %2400 = vst.msk [vmem:[#allocation5 + $0x2a0] sm:$0xff] %vm1283_vm2, %v2381_v48 }
 0x3b7   : > { %2448 = vst.msk [vmem:[#allocation5 + $0x2a0] sm:$0xff] %vm1332_vm3, %v12178_v46  ;;  %v2762_v33 = vld [vmem:[#allocation5 + $0x288] sm:$0xff] }
 0x3b8   : > { %2496 = vst.msk [vmem:[#allocation5 + $0x2a0] sm:$0xff] %vm1381_vm4, %v2477_v22  ;;  %v12235_v38 = vand.u32 4294901760, %v2762_v33 }
 0x3ba   : > { %16199 = vst [vmem:[#allocation36_spill] sm:$0xff] %v12235_v38  ;;  %3384 = vmatmul.f32.gmra.mxu3 %v12235_v38  ;;  %v3139_v40 = vsub.f32 %v2762_v33, %v12235_v38  ;;  %v12248_v33 = vpop.f32.mrf.mxu1  ;;  %v2527_v38 = vpop.permute.xlu2 %2526 }
 0x3bb   : > { %16203 = vst [vmem:[#allocation12_spill] sm:$0xff] %v12248_v33  ;;  %v12251_v31 = vpop.f32.mrf.mxu2 }
 0x3bc   : > { %3589 = vmatmul.f32.gmra.mxu0 %v3139_v40  ;;  %v3140_v7 = vand.u32 4294901760, %v3139_v40  ;;  %v2621_v46 = vpop.permute.xlu0 %2620  ;;  %16204 = vst [vmem:[#allocation32_spill] sm:$0xff] %v12251_v31 }
 0x3bd   : > { %v2525_v48 = vpop.permute.xlu1 %2524 }
 0x3be   : > { %2544 = vst.msk [vmem:[#allocation5 + $0x2a0] sm:$0xff] %vm1430_vm5, %v2525_v48  ;;  %3810 = vmatmul.f32.gmra.mxu1 %v3140_v7  ;;  %v3141_v0 = vsub.f32 %v3139_v40, %v3140_v7  ;;  %v12254_v40 = vpop.f32.mrf.mxu0  ;;  %v12256_v7 = vpop.f32.mrf.mxu3 }
 0x3bf   : > { %2592 = vst.msk [vmem:[#allocation5 + $0x2a0] sm:$0xff] %vm1479_vm6, %v2573_v24 }
 0x3c0   : > { %2640 = vst.msk [vmem:[#allocation5 + $0x2a0] sm:$0xff] %vm1528_vm7, %v2621_v46  ;;  %v3142_v22 = vand.u32 4294901760, %v3141_v0 }
 0x3c1   : > { %16205 = vst [vmem:[#allocation14_spill] sm:$0xff] %v12254_v40 }
 0x3c2   : > { %3143 = vmatmul.f32.gmra.mxu2 %v3142_v22  ;;  %16206 = vst [vmem:[#allocation41_spill] sm:$0xff] %v12256_v7  ;;  %v12258_v24 = vpop.f32.mrf.mxu1  ;;  %v2671_v46 = vpop.permute.xlu2 %2670 }
 0x3c3   : > { %16207 = vst [vmem:[#allocation42_spill] sm:$0xff] %v12258_v24 }
 0x3c4   : > { %v2431_v42 = vpop.permute.xlu0 %2430 }
 0x3c5   : > { %v2669_v32 = vpop.permute.xlu1 %2668  ;;  %2449 = vst.msk [vmem:[#allocation5 + $0x2b8] sm:$0xff] %vm1332_vm3, %v2431_v42 }
 0x3c6   : > { %2688 = vst.msk [vmem:[#allocation5 + $0x2a0] sm:$0xff] %vm1577_vm8, %v2669_v32  ;;  %v12267_v32 = vpop.f32.mrf.mxu2  ;;  %v12269_v40 = vpop.f32.mrf.mxu0 }
 0x3c7   : > { %16209 = vst [vmem:[#allocation44_spill] sm:$0xff] %v12267_v32  ;;  %v12271_v7 = vpop.f32.mrf.mxu3 }
 0x3c8   : > { %16210 = vst [vmem:[#allocation45_spill] sm:$0xff] %v12269_v40 }
 0x3c9   : > { %16211 = vst [vmem:[#allocation46_spill] sm:$0xff] %v12271_v7 }
 0x3ca   : > { %v12273_v31 = vpop.f32.mrf.mxu1 }
 0x3cb   : > { %16212 = vst [vmem:[#allocation47_spill] sm:$0xff] %v12273_v31 }
 0x3cc   : > { %v2575_v22 = vpop.permute.xlu0 %2574 }
 0x3cd   : > { %v2479_v48 = vpop.permute.xlu1 %2478  ;;  %v2764_v0 = vld [vmem:[#allocation5 + $0x2a0] sm:$0xff] }
 0x3ce   : > { %2497 = vst.msk [vmem:[#allocation5 + $0x2b8] sm:$0xff] %vm1381_vm4, %v2479_v48  ;;  %v12261_v33 = vand.u32 4294901760, %v2764_v0  ;;  %v12278_v40 = vpop.f32.mrf.mxu2 }
 0x3cf   : > { %2545 = vst.msk [vmem:[#allocation5 + $0x2b8] sm:$0xff] %vm1430_vm5, %v2527_v38  ;;  %v12282_v7 = vpop.f32.mrf.mxu3 }
 0x3d0   : > { %16208 = vst [vmem:[#allocation43_spill] sm:$0xff] %v12261_v33  ;;  %3388 = vmatmul.f32.gmra.mxu3 %v12261_v33  ;;  %v3147_v42 = vsub.f32 %v2764_v0, %v12261_v33  ;;  %v2481_v0 = vpop.permute.xlu2 %2480  ;;  %v12280_v33 = vpop.f32.mrf.mxu0 }
 0x3d1   : > { %2593 = vst.msk [vmem:[#allocation5 + $0x2b8] sm:$0xff] %vm1479_vm6, %v2575_v22 }
 0x3d2   : > { %3594 = vmatmul.f32.gmra.mxu0 %v3147_v42  ;;  %v3148_v24 = vand.u32 4294901760, %v3147_v42  ;;  %16213 = vst [vmem:[#allocation48_spill] sm:$0xff] %v12278_v40 }
 0x3d3   : > { %16214 = vst [vmem:[#allocation49_spill] sm:$0xff] %v12280_v33 }
 0x3d4   : > { %3816 = vmatmul.f32.gmra.mxu1 %v3148_v24  ;;  %v3149_v48 = vsub.f32 %v3147_v42, %v3148_v24  ;;  %v2385_v38 = vpop.permute.xlu0 %2384  ;;  %16215 = vst [vmem:[#allocation50_spill] sm:$0xff] %v12282_v7 }
 0x3d5   : > { %v2623_v28 = vpop.permute.xlu1 %2622  ;;  %2402 = vst.msk [vmem:[#allocation5 + $0x2d0] sm:$0xff] %vm1283_vm2, %v2385_v38 }
 0x3d6   : > { %2641 = vst.msk [vmem:[#allocation5 + $0x2b8] sm:$0xff] %vm1528_vm7, %v2623_v28  ;;  %v3150_v22 = vand.u32 4294901760, %v3149_v48  ;;  %v12285_v28 = vpop.f32.mrf.mxu1  ;;  %v12293_v33 = vpop.f32.mrf.mxu2 }
 0x3d7   : > { %2689 = vst.msk [vmem:[#allocation5 + $0x2b8] sm:$0xff] %vm1577_vm8, %v2671_v46  ;;  %v12298_v40 = vpop.f32.mrf.mxu3 }
 0x3d8   : > { %3151 = vmatmul.f32.gmra.mxu2 %v3150_v22  ;;  %16216 = vst [vmem:[#allocation51_spill] sm:$0xff] %v12285_v28  ;;  %v2625_v38 = vpop.permute.xlu2 %2624 }
 0x3d9   : > { %16218 = vst [vmem:[#allocation53_spill] sm:$0xff] %v12293_v33 }
 0x3da   : > { %16220 = vst [vmem:[#allocation55_spill] sm:$0xff] %v12298_v40 }
 0x3dc   : > { %v2529_v42 = vpop.permute.xlu0 %2528 }
 0x3dd   : > { %v2433_v24 = vpop.permute.xlu1 %2432 }
 0x3de   : > { %2450 = vst.msk [vmem:[#allocation5 + $0x2d0] sm:$0xff] %vm1332_vm3, %v2433_v24  ;;  %v2766_v31 = vld [vmem:[#allocation5 + $0x2b8] sm:$0xff] }
 0x3df   : > { %2498 = vst.msk [vmem:[#allocation5 + $0x2d0] sm:$0xff] %vm1381_vm4, %v2481_v0  ;;  %v12288_v46 = vand.u32 4294901760, %v2766_v31  ;;  %v12296_v0 = vpop.f32.mrf.mxu0 }
 0x3e0   : > { %2546 = vst.msk [vmem:[#allocation5 + $0x2d0] sm:$0xff] %vm1430_vm5, %v2529_v42 }
 0x3e1   : > { %16217 = vst [vmem:[#allocation52_spill] sm:$0xff] %v12288_v46  ;;  %3392 = vmatmul.f32.gmra.mxu3 %v12288_v46  ;;  %v3155_v48 = vsub.f32 %v2766_v31, %v12288_v46  ;;  %v12302_v31 = vpop.f32.mrf.mxu1  ;;  %v2435_v46 = vpop.permute.xlu2 %2434 }
 0x3e2   : > { %16219 = vst [vmem:[#allocation54_spill] sm:$0xff] %v12296_v0 }
 0x3e3   : > { %3599 = vmatmul.f32.gmra.mxu0 %v3155_v48  ;;  %v3156_v22 = vand.u32 4294901760, %v3155_v48  ;;  %16221 = vst [vmem:[#allocation56_spill] sm:$0xff] %v12302_v31 }
 0x3e4   : > { %v2673_v28 = vpop.permute.xlu0 %2672 }
 0x3e5   : > { %3822 = vmatmul.f32.gmra.mxu1 %v3156_v22  ;;  %v2577_v24 = vpop.permute.xlu1 %2576  ;;  %v3157_v7 = vsub.f32 %v3155_v48, %v3156_v22  ;;  %v12305_v22 = vpop.f32.mrf.mxu2 }
 0x3e6   : > { %2594 = vst.msk [vmem:[#allocation5 + $0x2d0] sm:$0xff] %vm1479_vm6, %v2577_v24 }
 0x3e7   : > { %2642 = vst.msk [vmem:[#allocation5 + $0x2d0] sm:$0xff] %vm1528_vm7, %v2625_v38  ;;  %v3158_v42 = vand.u32 4294901760, %v3157_v7  ;;  %v12311_v7 = vpop.f32.mrf.mxu0 }
 0x3e8   : > { %2690 = vst.msk [vmem:[#allocation5 + $0x2d0] sm:$0xff] %vm1577_vm8, %v2673_v28  ;;  %v12313_v28 = vpop.f32.mrf.mxu3 }
 0x3e9   : > { %3159 = vmatmul.f32.gmra.mxu2 %v3158_v42  ;;  %16222 = vst [vmem:[#allocation57_spill] sm:$0xff] %v12305_v22  ;;  %v12317_v42 = vpop.f32.mrf.mxu1  ;;  %v2579_v22 = vpop.permute.xlu2 %2578 }
 0x3ea   : > { %16224 = vst [vmem:[#allocation59_spill] sm:$0xff] %v12311_v7 }
 0x3eb   : > { %16225 = vst [vmem:[#allocation60_spill] sm:$0xff] %v12313_v28 }
 0x3ec   : > { %v2483_v48 = vpop.permute.xlu0 %2482  ;;  %16226 = vst [vmem:[#allocation61_spill] sm:$0xff] %v12317_v42 }
 0x3ed   : > { %v2387_v33 = vpop.permute.xlu1 %2386  ;;  %v12322_v28 = vpop.f32.mrf.mxu2 }
 0x3ee   : > { %2403 = vst.msk [vmem:[#allocation5 + $0x2e8] sm:$0xff] %vm1283_vm2, %v2387_v33 }
 0x3ef   : > { %2451 = vst.msk [vmem:[#allocation5 + $0x2e8] sm:$0xff] %vm1332_vm3, %v2435_v46  ;;  %v2768_v24 = vld [vmem:[#allocation5 + $0x2d0] sm:$0xff]  ;;  %v12324_v40 = vpop.f32.mrf.mxu0 }
 0x3f0   : > { %2499 = vst.msk [vmem:[#allocation5 + $0x2e8] sm:$0xff] %vm1381_vm4, %v2483_v48  ;;  %v12309_v0 = vand.u32 4294901760, %v2768_v24  ;;  %v12326_v42 = vpop.f32.mrf.mxu3 }
 0x3f1   : > { %16227 = vst [vmem:[#allocation62_spill] sm:$0xff] %v12322_v28 }
 0x3f2   : > { %16223 = vst [vmem:[#allocation58_spill] sm:$0xff] %v12309_v0  ;;  %3396 = vmatmul.f32.gmra.mxu3 %v12309_v0  ;;  %v3163_v38 = vsub.f32 %v2768_v24, %v12309_v0  ;;  %v2709_v24 = vld [vmem:[#allocation5 + $0x8] sm:$0xff]  ;;  %v12328_v0 = vpop.f32.mrf.mxu1 }
 0x3f3   : > { %16228 = vst [vmem:[#allocation63_spill] sm:$0xff] %v12324_v40 }
 0x3f4   : > { %3604 = vmatmul.f32.gmra.mxu0 %v3163_v38  ;;  %v3164_v33 = vand.u32 4294901760, %v3163_v38  ;;  %v2627_v48 = vpop.permute.xlu0 %2626  ;;  %16229 = vst [vmem:[#allocation64_spill] sm:$0xff] %v12326_v42 }
 0x3f5   : > { %v2531_v31 = vpop.permute.xlu1 %2530  ;;  %16230 = vst [vmem:[#allocation65_spill] sm:$0xff] %v12328_v0 }
 0x3f6   : > { %2547 = vst.msk [vmem:[#allocation5 + $0x2e8] sm:$0xff] %vm1430_vm5, %v2531_v31  ;;  %3828 = vmatmul.f32.gmra.mxu1 %v3164_v33  ;;  %v3165_v46 = vsub.f32 %v3163_v38, %v3164_v33  ;;  %v2795_v31 = vsel %vm1027_vm0, %v2709_v24, 0  ;;  %v12334_v33 = vpop.f32.mrf.mxu2 }
 0x3f7   : > { %2595 = vst.msk [vmem:[#allocation5 + $0x2e8] sm:$0xff] %vm1479_vm6, %v2579_v22  ;;  %v12332_v38 = vand.u32 4294901760, %v2795_v31  ;;  %v2711_v22 = vld [vmem:[#allocation5 + $0x20] sm:$0xff] }
 0x3f8   : > { %v3166_v7 = vand.u32 4294901760, %v3165_v46  ;;  %2643 = vst.msk [vmem:[#allocation5 + $0x2e8] sm:$0xff] %vm1528_vm7, %v2627_v48  ;;  %v12341_v48 = vpop.f32.mrf.mxu3  ;;  %v2798_v0 = vsel %vm1027_vm0, %v2711_v22, 0 }
 0x3f9   : > { %16231 = vst [vmem:[#allocation66_spill] sm:$0xff] %v12334_v33  ;;  %v12337_v46 = vsub.f32 %v2795_v31, %v12332_v38  ;;  %v12351_v28 = vand.u32 4294901760, %v2798_v0 }
 0x3fa   : > { %3167 = vmatmul.f32.gmra.mxu2 %v3166_v7  ;;  %v12339_v7 = vpop.f32.mrf.mxu0  ;;  %16233 = vst [vmem:[#allocation68_spill] sm:$0xff] %v12341_v48  ;;  %v12346_v24 = vpop.f32.mrf.mxu1 }
 0x3fb   : > { %16232 = vst [vmem:[#allocation67_spill] sm:$0xff] %v12339_v7  ;;  %v15972_v33 = vand.u32 4294901760, %v12337_v46  ;;  %v2713_v7 = vld [vmem:[#allocation5 + $0x38] sm:$0xff]  ;;  %v12357_v57 = vsub.f32 %v2798_v0, %v12351_v28  ;;  %v2715_v0 = vld [vmem:[#allocation5 + $0x50] sm:$0xff] }
 0x3fc   : > { %16235 = vst [vmem:[#allocation70_spill] sm:$0xff] %v12346_v24 }
 0x3fd   : > { %v2675_v32 = vpop.permute.xlu1 %2674  ;;  %16236 = vst [vmem:[#allocation71_spill] sm:$0xff] %v12351_v28  ;;  %v4213_v22 = vsub.f32 %v12337_v46, %v15972_v33 }
 0x3fe   : > { %2691 = vst.msk [vmem:[#allocation5 + $0x2e8] sm:$0xff] %vm1577_vm8, %v2675_v32  ;;  %v12359_v24 = vpop.f32.mrf.mxu2 }
 0x3ff   : > { %16237 = vst [vmem:[#allocation72_spill] sm:$0xff] %v12359_v24 }
 0x400   : > { %v12364_v56 = vpop.f32.mrf.mxu3 }
 0x401   : > { %16239 = vst [vmem:[#allocation74_spill] sm:$0xff] %v12364_v56 }
 0x402   : > { %v12362_v19 = vpop.f32.mrf.mxu0  ;;  %v12370_v33 = vpop.f32.mrf.mxu1 }
 0x403   : > { %16238 = vst [vmem:[#allocation73_spill] sm:$0xff] %v12362_v19 }
 0x404   : > { %16241 = vst [vmem:[#allocation76_spill] sm:$0xff] %v12370_v33 }
 0x405   : > { %v2770_v40 = vld [vmem:[#allocation5 + $0x2e8] sm:$0xff] }
 0x406   : > { %v12344_v42 = vand.u32 4294901760, %v2770_v40 }
 0x408   : > { %16234 = vst [vmem:[#allocation69_spill] sm:$0xff] %v12344_v42  ;;  %3400 = vmatmul.f32.gmra.mxu3 %v12344_v42  ;;  %v3171_v32 = vsub.f32 %v2770_v40, %v12344_v42  ;;  %v2801_v40 = vsel %vm1027_vm0, %v2713_v7, 0  ;;  %v12389_v24 = vpop.f32.mrf.mxu3 }
 0x409   : > { %v12368_v12 = vand.u32 4294901760, %v2801_v40  ;;  %16245 = vst [vmem:[#allocation80_spill] sm:$0xff] %v12389_v24 }
 0x40a   : > { %3609 = vmatmul.f32.gmra.mxu0 %v3171_v32  ;;  %v3172_v31 = vand.u32 4294901760, %v3171_v32  ;;  %v12387_v56 = vpop.f32.mrf.mxu0 }
 0x40b   : > { %16240 = vst [vmem:[#allocation75_spill] sm:$0xff] %v12368_v12 }
 0x40c   : > { %3834 = vmatmul.f32.gmra.mxu1 %v3172_v31  ;;  %v3173_v48 = vsub.f32 %v3171_v32, %v3172_v31  ;;  %v4214_v32 = vand.u32 4294901760, %v4213_v22  ;;  %v15973_v31 = vand.u32 4294901760, %v12357_v57  ;;  %v12380_v22 = vpop.f32.mrf.mxu2  ;;  %16244 = vst [vmem:[#allocation79_spill] sm:$0xff] %v12387_v56 }
 0x40d   : > { %16242 = vst [vmem:[#allocation77_spill] sm:$0xff] %v12380_v22  ;;  %v2719_v22 = vld [vmem:[#allocation5 + $0x80] sm:$0xff] }
 0x40e   : > { %v3174_v42 = vand.u32 4294901760, %v3173_v48  ;;  %v4221_v7 = vsub.f32 %v12357_v57, %v15973_v31  ;;  %v12377_v48 = vsub.f32 %v2801_v40, %v12368_v12  ;;  %v2717_v40 = vld [vmem:[#allocation5 + $0x68] sm:$0xff]  ;;  %v12391_v31 = vpop.f32.mrf.mxu1 }
 0x40f   : > { %16246 = vst [vmem:[#allocation81_spill] sm:$0xff] %v12391_v31 }
 0x410   : > { %3175 = vmatmul.f32.gmra.mxu2 %v3174_v42  ;;  %4064 = vmatmul.f32.vlgmr.msra.gmra.mxu3 %v11414_v9  ;;  %v2804_v42 = vsel %vm1027_vm0, %v2715_v0, 0  ;;  %v4222_v33 = vand.u32 4294901760, %v4221_v7  ;;  %v2807_v7 = vsel %vm1027_vm0, %v2717_v40, 0 }
 0x411   : > { %v12385_v19 = vand.u32 4294901760, %v2804_v42  ;;  %v12404_v24 = vand.u32 4294901760, %v2807_v7 }
 0x412   : > { %4215 = vmatmul.f32.vlgmr.msrb.gmra.mxu0 %v4214_v32  ;;  %v15976_v32 = vand.u32 4294901760, %v12377_v48 }
 0x413   : > { %16243 = vst [vmem:[#allocation78_spill] sm:$0xff] %v12385_v19  ;;  %v12398_v0 = vsub.f32 %v2804_v42, %v12385_v19  ;;  %v12417_v42 = vsub.f32 %v2807_v7, %v12404_v24 }
 0x414   : > { %4494 = vmatmul.f32.vlgmr.msrb.gmra.mxu1 %v12332_v38  ;;  %16247 = vst [vmem:[#allocation82_spill] sm:$0xff] %v12404_v24  ;;  %v12406_v31 = vpop.f32.mrf.mxu2 }
 0x415   : > { %16248 = vst [vmem:[#allocation83_spill] sm:$0xff] %v12406_v31  ;;  %v2721_v31 = vld [vmem:[#allocation5 + $0x98] sm:$0xff] }
 0x416   : > { %v12419_v40 = vpop.f32.mrf.mxu1 }
 0x417   : > { %16251 = vst [vmem:[#allocation86_spill] sm:$0xff] %v12419_v40 }
 0x418   : > { %3903 = vmatmul.f32.vlgmr.msra.gmra.mxu2 %v11414_v9  ;;  %4068 = vmatmul.f32.gmra.mxu3 %v11527_v23  ;;  %v4229_v9 = vsub.f32 %v12377_v48, %v15976_v32  ;;  %v12410_v32 = vpop.f32.mrf.mxu3 }
 0x419   : > { %16250 = vst [vmem:[#allocation85_spill] sm:$0xff] %v12410_v32 }
 0x41a   : > { %4223 = vmatmul.f32.gmra.mxu0 %v4222_v33  ;;  %v4230_v56 = vand.u32 4294901760, %v4229_v9  ;;  %v15979_v33 = vand.u32 4294901760, %v12398_v0  ;;  %v2810_v9 = vsel %vm1027_vm0, %v2719_v22, 0 }
 0x41b   : > { %v12425_v32 = vand.u32 4294901760, %v2810_v9 }
 0x41c   : > { %4498 = vmatmul.f32.gmra.mxu1 %v12351_v28  ;;  %v12408_v28 = vpop.f32.mrf.mxu0 }
 0x41d   : > { %16249 = vst [vmem:[#allocation84_spill] sm:$0xff] %v12408_v28  ;;  %v15982_v28 = vand.u32 4294901760, %v12417_v42  ;;  %v12434_v22 = vsub.f32 %v2810_v9, %v12425_v32  ;;  %v2723_v9 = vld [vmem:[#allocation5 + $0xb0] sm:$0xff] }
 0x41e   : > { %16252 = vst [vmem:[#allocation87_spill] sm:$0xff] %v12425_v32  ;;  %v12441_v40 = vpop.f32.mrf.mxu1 }
 0x41f   : > { %v4245_v7 = vsub.f32 %v12417_v42, %v15982_v28  ;;  %16256 = vst [vmem:[#allocation91_spill] sm:$0xff] %v12441_v40 }
 0x420   : > { %3907 = vmatmul.f32.gmra.mxu2 %v11527_v23  ;;  %4072 = vmatmul.f32.gmra.mxu3 %v11580_v13  ;;  %v4237_v23 = vsub.f32 %v12398_v0, %v15979_v33  ;;  %v2813_v33 = vsel %vm1027_vm0, %v2721_v31, 0 }
 0x422   : > { %4231 = vmatmul.f32.gmra.mxu0 %v4230_v56  ;;  %v4238_v56 = vand.u32 4294901760, %v4237_v23  ;;  %v12438_v23 = vpop.f32.mrf.mxu3 }
 0x423   : > { %16255 = vst [vmem:[#allocation90_spill] sm:$0xff] %v12438_v23 }
 0x424   : > { %4502 = vmatmul.f32.gmra.mxu1 %v12368_v12  ;;  %v12427_v12 = vpop.f32.mrf.mxu2 }
 0x425   : > { %16253 = vst [vmem:[#allocation88_spill] sm:$0xff] %v12427_v12  ;;  %v15985_v12 = vand.u32 4294901760, %v12434_v22 }
 0x427   : > { %v4253_v28 = vsub.f32 %v12434_v22, %v15985_v12  ;;  %v12467_v12 = vpop.f32.mrf.mxu1 }
 0x428   : > { %3911 = vmatmul.f32.gmra.mxu2 %v11580_v13  ;;  %4076 = vmatmul.f32.gmra.mxu3 %v11668_v5  ;;  %v12436_v13 = vpop.f32.mrf.mxu0  ;;  %16262 = vst [vmem:[#allocation97_spill] sm:$0xff] %v12467_v12 }
 0x429   : > { %16254 = vst [vmem:[#allocation89_spill] sm:$0xff] %v12436_v13 }
 0x42a   : > { %4239 = vmatmul.f32.gmra.mxu0 %v4238_v56  ;;  %v4246_v56 = vand.u32 4294901760, %v4245_v7  ;;  %v12460_v13 = vpop.f32.mrf.mxu3 }
 0x42b   : > { %16260 = vst [vmem:[#allocation95_spill] sm:$0xff] %v12460_v13 }
 0x42c   : > { %4506 = vmatmul.f32.gmra.mxu1 %v12385_v19  ;;  %v12446_v19 = vand.u32 4294901760, %v2813_v33  ;;  %v12455_v40 = vpop.f32.mrf.mxu2 }
 0x42d   : > { %16258 = vst [vmem:[#allocation93_spill] sm:$0xff] %v12455_v40 }
 0x42e   : > { %16257 = vst [vmem:[#allocation92_spill] sm:$0xff] %v12446_v19  ;;  %v12453_v31 = vsub.f32 %v2813_v33, %v12446_v19  ;;  %v2725_v33 = vld [vmem:[#allocation5 + $0xc8] sm:$0xff] }
 0x430   : > { %3915 = vmatmul.f32.gmra.mxu2 %v11668_v5  ;;  %4080 = vmatmul.f32.gmra.mxu3 %v11724_v16  ;;  %v2816_v5 = vsel %vm1027_vm0, %v2723_v9, 0  ;;  %v12458_v7 = vpop.f32.mrf.mxu0  ;;  %v15988_v23 = vand.u32 4294901760, %v12453_v31 }
 0x431   : > { %16259 = vst [vmem:[#allocation94_spill] sm:$0xff] %v12458_v7 }
 0x432   : > { %4247 = vmatmul.f32.gmra.mxu0 %v4246_v56  ;;  %v4254_v56 = vand.u32 4294901760, %v4253_v28  ;;  %v4261_v9 = vsub.f32 %v12453_v31, %v15988_v23  ;;  %v12488_v23 = vpop.f32.mrf.mxu1 }
 0x433   : > { %16267 = vst [vmem:[#allocation102_spill] sm:$0xff] %v12488_v23 }
 0x434   : > { %4510 = vmatmul.f32.gmra.mxu1 %v12404_v24  ;;  %v12465_v24 = vand.u32 4294901760, %v2816_v5  ;;  %v12477_v28 = vpop.f32.mrf.mxu2  ;;  %v4262_v12 = vand.u32 4294901760, %v4261_v9 }
 0x435   : > { %16263 = vst [vmem:[#allocation98_spill] sm:$0xff] %v12477_v28  ;;  %v2729_v28 = vld [vmem:[#allocation5 + $0xf8] sm:$0xff] }
 0x436   : > { %16261 = vst [vmem:[#allocation96_spill] sm:$0xff] %v12465_v24  ;;  %v12474_v7 = vsub.f32 %v2816_v5, %v12465_v24  ;;  %v2727_v5 = vld [vmem:[#allocation5 + $0xe0] sm:$0xff] }
 0x437   : > { %v2822_v9 = vsel %vm1027_vm0, %v2727_v5, 0 }
 0x438   : > { %3919 = vmatmul.f32.gmra.mxu2 %v11724_v16  ;;  %4084 = vmatmul.f32.gmra.mxu3 %v11770_v55  ;;  %v2819_v16 = vsel %vm1027_vm0, %v2725_v33, 0  ;;  %v12484_v40 = vpop.f32.mrf.mxu0 }
 0x439   : > { %v12482_v13 = vand.u32 4294901760, %v2819_v16  ;;  %16265 = vst [vmem:[#allocation100_spill] sm:$0xff] %v12484_v40 }
 0x43a   : > { %4255 = vmatmul.f32.gmra.mxu0 %v4254_v56  ;;  %v15991_v56 = vand.u32 4294901760, %v12474_v7  ;;  %v12516_v5 = vpop.f32.mrf.mxu1 }
 0x43b   : > { %16264 = vst [vmem:[#allocation99_spill] sm:$0xff] %v12482_v13  ;;  %v12495_v33 = vsub.f32 %v2819_v16, %v12482_v13 }
 0x43c   : > { %4514 = vmatmul.f32.gmra.mxu1 %v12425_v32  ;;  %v12486_v32 = vpop.f32.mrf.mxu3  ;;  %v12503_v23 = vpop.f32.mrf.mxu2  ;;  %16272 = vst [vmem:[#allocation107_spill] sm:$0xff] %v12516_v5 }
 0x43d   : > { %16266 = vst [vmem:[#allocation101_spill] sm:$0xff] %v12486_v32  ;;  %v12501_v32 = vand.u32 4294901760, %v2822_v9 }
 0x43e   : > { %16269 = vst [vmem:[#allocation104_spill] sm:$0xff] %v12503_v23  ;;  %v2731_v23 = vld [vmem:[#allocation5 + $0x110] sm:$0xff] }
 0x43f   : > { %16268 = vst [vmem:[#allocation103_spill] sm:$0xff] %v12501_v32  ;;  %v12514_v16 = vsub.f32 %v2822_v9, %v12501_v32 }
 0x440   : > { %3923 = vmatmul.f32.gmra.mxu2 %v11770_v55  ;;  %4088 = vmatmul.f32.gmra.mxu3 %v11832_v62  ;;  %v4269_v55 = vsub.f32 %v12474_v7, %v15991_v56 }
 0x442   : > { %4263 = vmatmul.f32.gmra.mxu0 %v4262_v12  ;;  %v4270_v40 = vand.u32 4294901760, %v4269_v55  ;;  %v15994_v12 = vand.u32 4294901760, %v12495_v33  ;;  %v2825_v55 = vsel %vm1027_vm0, %v2729_v28, 0  ;;  %v12538_v5 = vpop.f32.mrf.mxu1 }
 0x443   : > { %16278 = vst [vmem:[#allocation113_spill] sm:$0xff] %v12538_v5 }
 0x444   : > { %4518 = vmatmul.f32.gmra.mxu1 %v12446_v19  ;;  %v12505_v19 = vpop.f32.mrf.mxu0  ;;  %v12507_v56 = vpop.f32.mrf.mxu3 }
 0x445   : > { %16270 = vst [vmem:[#allocation105_spill] sm:$0xff] %v12505_v19  ;;  %v15997_v19 = vand.u32 4294901760, %v12514_v16 }
 0x446   : > { %16271 = vst [vmem:[#allocation106_spill] sm:$0xff] %v12507_v56  ;;  %v12522_v56 = vand.u32 4294901760, %v2825_v55 }
 0x447   : > { %v4285_v9 = vsub.f32 %v12514_v16, %v15997_v19 }
 0x448   : > { %3927 = vmatmul.f32.gmra.mxu2 %v11832_v62  ;;  %4092 = vmatmul.f32.gmra.mxu3 %v11886_v3  ;;  %v4277_v62 = vsub.f32 %v12495_v33, %v15994_v12  ;;  %16273 = vst [vmem:[#allocation108_spill] sm:$0xff] %v12522_v56  ;;  %v12531_v28 = vsub.f32 %v2825_v55, %v12522_v56  ;;  %v2828_v12 = vsel %vm1027_vm0, %v2731_v23, 0  ;;  %v2733_v55 = vld [vmem:[#allocation5 + $0x128] sm:$0xff] }
 0x44a   : > { %4271 = vmatmul.f32.gmra.mxu0 %v4270_v40  ;;  %v4278_v40 = vand.u32 4294901760, %v4277_v62  ;;  %16275 = vst [vmem:[#allocation110_spill] sm:$0xff] %v12531_v28 }
 0x44c   : > { %4522 = vmatmul.f32.gmra.mxu1 %v12465_v24  ;;  %v12524_v24 = vpop.f32.mrf.mxu2  ;;  %v12535_v62 = vpop.f32.mrf.mxu3 }
 0x44d   : > { %16274 = vst [vmem:[#allocation109_spill] sm:$0xff] %v12524_v24  ;;  %v16000_v24 = vand.u32 4294901760, %v12531_v28 }
 0x44e   : > { %16277 = vst [vmem:[#allocation112_spill] sm:$0xff] %v12535_v62 }
 0x44f   : > { %v4293_v19 = vsub.f32 %v12531_v28, %v16000_v24  ;;  %v12564_v24 = vpop.f32.mrf.mxu1 }
 0x450   : > { %3931 = vmatmul.f32.gmra.mxu2 %v11886_v3  ;;  %4096 = vmatmul.f32.gmra.mxu3 %v11888_v26  ;;  %v12533_v3 = vpop.f32.mrf.mxu0  ;;  %16285 = vst [vmem:[#allocation120_spill] sm:$0xff] %v12564_v24 }
 0x451   : > { %16276 = vst [vmem:[#allocation111_spill] sm:$0xff] %v12533_v3 }
 0x452   : > { %4279 = vmatmul.f32.gmra.mxu0 %v4278_v40  ;;  %v4286_v40 = vand.u32 4294901760, %v4285_v9 }
 0x454   : > { %4526 = vmatmul.f32.gmra.mxu1 %v12482_v13  ;;  %v12543_v13 = vand.u32 4294901760, %v2828_v12  ;;  %v12552_v5 = vpop.f32.mrf.mxu2  ;;  %v12557_v3 = vpop.f32.mrf.mxu3 }
 0x455   : > { %16281 = vst [vmem:[#allocation116_spill] sm:$0xff] %v12552_v5 }
 0x456   : > { %16279 = vst [vmem:[#allocation114_spill] sm:$0xff] %v12543_v13  ;;  %v12550_v23 = vsub.f32 %v2828_v12, %v12543_v13  ;;  %v2735_v12 = vld [vmem:[#allocation5 + $0x140] sm:$0xff] }
 0x457   : > { %16283 = vst [vmem:[#allocation118_spill] sm:$0xff] %v12557_v3 }
 0x458   : > { %3935 = vmatmul.f32.gmra.mxu2 %v11888_v26  ;;  %4100 = vmatmul.f32.gmra.mxu3 %v11903_v41  ;;  %16280 = vst [vmem:[#allocation115_spill] sm:$0xff] %v12550_v23  ;;  %v2831_v26 = vsel %vm1027_vm0, %v2733_v55, 0  ;;  %v12555_v9 = vpop.f32.mrf.mxu0 }
 0x459   : > { %16282 = vst [vmem:[#allocation117_spill] sm:$0xff] %v12555_v9  ;;  %v12562_v62 = vand.u32 4294901760, %v2831_v26 }
 0x45a   : > { %4287 = vmatmul.f32.gmra.mxu0 %v4286_v40  ;;  %v4294_v40 = vand.u32 4294901760, %v4293_v19  ;;  %v2834_v19 = vsel %vm1027_vm0, %v2735_v12, 0 }
 0x45b   : > { %16284 = vst [vmem:[#allocation119_spill] sm:$0xff] %v12562_v62  ;;  %v12571_v9 = vsub.f32 %v2831_v26, %v12562_v62  ;;  %v2737_v26 = vld [vmem:[#allocation5 + $0x158] sm:$0xff] }
 0x45c   : > { %4530 = vmatmul.f32.gmra.mxu1 %v12501_v32  ;;  %v16005_v32 = vand.u32 4294901760, %v12550_v23  ;;  %v12578_v28 = vpop.f32.mrf.mxu3 }
 0x45d   : > { %16286 = vst [vmem:[#allocation121_spill] sm:$0xff] %v12571_v9  ;;  %v16010_v24 = vand.u32 4294901760, %v12571_v9 }
 0x45e   : > { %v4301_v55 = vsub.f32 %v12550_v23, %v16005_v32  ;;  %16289 = vst [vmem:[#allocation124_spill] sm:$0xff] %v12578_v28  ;;  %v12585_v32 = vpop.f32.mrf.mxu1 }
 0x45f   : > { %16291 = vst [vmem:[#allocation126_spill] sm:$0xff] %v12585_v32  ;;  %v4309_v12 = vsub.f32 %v12571_v9, %v16010_v24 }
 0x460   : > { %3939 = vmatmul.f32.gmra.mxu2 %v11903_v41  ;;  %4104 = vmatmul.f32.gmra.mxu3 %v11916_v11  ;;  %v12573_v41 = vpop.f32.mrf.mxu2  ;;  %v12576_v3 = vpop.f32.mrf.mxu0 }
 0x461   : > { %16287 = vst [vmem:[#allocation122_spill] sm:$0xff] %v12573_v41 }
 0x462   : > { %4295 = vmatmul.f32.gmra.mxu0 %v4294_v40  ;;  %16288 = vst [vmem:[#allocation123_spill] sm:$0xff] %v12576_v3  ;;  %v4302_v40 = vand.u32 4294901760, %v4301_v55  ;;  %v2837_v55 = vsel %vm1027_vm0, %v2737_v26, 0 }
 0x464   : > { %4534 = vmatmul.f32.gmra.mxu1 %v12522_v56  ;;  %v12583_v56 = vand.u32 4294901760, %v2834_v19  ;;  %v12599_v23 = vpop.f32.mrf.mxu3 }
 0x465   : > { %16295 = vst [vmem:[#allocation130_spill] sm:$0xff] %v12599_v23 }
 0x466   : > { %16290 = vst [vmem:[#allocation125_spill] sm:$0xff] %v12583_v56  ;;  %v12592_v3 = vsub.f32 %v2834_v19, %v12583_v56  ;;  %v12606_v24 = vpop.f32.mrf.mxu1  ;;  %v2739_v19 = vld [vmem:[#allocation5 + $0x170] sm:$0xff] }
 0x467   : > { %16297 = vst [vmem:[#allocation132_spill] sm:$0xff] %v12606_v24 }
 0x468   : > { %3943 = vmatmul.f32.gmra.mxu2 %v11916_v11  ;;  %4108 = vmatmul.f32.gmra.mxu3 %v11928_v6  ;;  %16292 = vst [vmem:[#allocation127_spill] sm:$0xff] %v12592_v3  ;;  %v12594_v11 = vpop.f32.mrf.mxu2  ;;  %v12597_v28 = vpop.f32.mrf.mxu0  ;;  %v16015_v32 = vand.u32 4294901760, %v12592_v3 }
 0x469   : > { %16293 = vst [vmem:[#allocation128_spill] sm:$0xff] %v12594_v11 }
 0x46a   : > { %4303 = vmatmul.f32.gmra.mxu0 %v4302_v40  ;;  %16294 = vst [vmem:[#allocation129_spill] sm:$0xff] %v12597_v28  ;;  %v4310_v40 = vand.u32 4294901760, %v4309_v12  ;;  %v4317_v26 = vsub.f32 %v12592_v3, %v16015_v32  ;;  %v2840_v12 = vsel %vm1027_vm0, %v2739_v19, 0  ;;  %v12632_v19 = vld [vmem:[%s15899_s4] ss:$0 sm:$0xff] }
 0x46c   : > { %4538 = vmatmul.f32.gmra.mxu1 %v12543_v13  ;;  %v12604_v13 = vand.u32 4294901760, %v2837_v55  ;;  %v12620_v9 = vpop.f32.mrf.mxu3 }
 0x46d   : > { %16301 = vst [vmem:[#allocation136_spill] sm:$0xff] %v12620_v9 }
 0x46e   : > { %16296 = vst [vmem:[#allocation131_spill] sm:$0xff] %v12604_v13  ;;  %v12613_v28 = vsub.f32 %v2837_v55, %v12604_v13  ;;  %v12627_v32 = vpop.f32.mrf.mxu1  ;;  %v2741_v55 = vld [vmem:[#allocation5 + $0x188] sm:$0xff] }
 0x46f   : > { %16303 = vst [vmem:[#allocation138_spill] sm:$0xff] %v12627_v32  ;;  %v2843_v9 = vsel %vm1027_vm0, %v2741_v55, 0 }
 0x470   : > { %3947 = vmatmul.f32.gmra.mxu2 %v11928_v6  ;;  %4112 = vmatmul.f32.gmra.mxu3 %v11943_v27  ;;  %16298 = vst [vmem:[#allocation133_spill] sm:$0xff] %v12613_v28  ;;  %v12615_v6 = vpop.f32.mrf.mxu2  ;;  %v12618_v23 = vpop.f32.mrf.mxu0  ;;  %v16020_v24 = vand.u32 4294901760, %v12613_v28  ;;  %v12646_v41 = vand.u32 4294901760, %v2843_v9 }
 0x471   : > { %16299 = vst [vmem:[#allocation134_spill] sm:$0xff] %v12615_v6 }
 0x472   : > { %4311 = vmatmul.f32.gmra.mxu0 %v4310_v40  ;;  %16300 = vst [vmem:[#allocation135_spill] sm:$0xff] %v12618_v23  ;;  %v4318_v40 = vand.u32 4294901760, %v4317_v26 }
 0x473   : > { %16305 = vst [vmem:[#allocation140_spill] sm:$0xff] %v12646_v41 }
 0x474   : > { %4542 = vmatmul.f32.gmra.mxu1 %v12562_v62  ;;  %v12625_v62 = vand.u32 4294901760, %v2840_v12 }
 0x475   : > { %v3397_v3 = vpop.f32.mrf.mxu3 }
 0x476   : > { %16302 = vst [vmem:[#allocation137_spill] sm:$0xff] %v12625_v62  ;;  %v12639_v26 = vsub.f32 %v2840_v12, %v12625_v62  ;;  %v2743_v12 = vld [vmem:[#allocation5 + $0x1a0] sm:$0xff] }
 0x477   : > { %v2846_v55 = vsel %vm1027_vm0, %v2743_v12, 0 }
 0x478   : > { %3951 = vmatmul.f32.gmra.mxu2 %v11943_v27  ;;  %4116 = vmatmul.f32.gmra.mxu3 %v11958_v52  ;;  %v4325_v27 = vsub.f32 %v12613_v28, %v16020_v24  ;;  %16304 = vst [vmem:[#allocation139_spill] sm:$0xff] %v12639_v26  ;;  %v3605_v32 = vpop.f32.mrf.mxu0  ;;  %v16023_v11 = vand.u32 4294901760, %v12639_v26  ;;  %v3829_v24 = vpop.f32.mrf.mxu1 }
 0x47a   : > { %4319 = vmatmul.f32.gmra.mxu0 %v4318_v40 }
 0x47c   : > { %4546 = vmatmul.f32.gmra.mxu1 %v12583_v56  ;;  %v4326_v56 = vand.u32 4294901760, %v4325_v27 }
 0x47d   : > { %v3168_v23 = vpop.f32.mrf.mxu2 }
 0x47e   : > { %v3169_v40 = vadd.f32 %v12632_v19, %v3168_v23  ;;  %v4333_v23 = vsub.f32 %v12639_v26, %v16023_v11  ;;  %v2745_v11 = vld [vmem:[#allocation5 + $0x1b8] sm:$0xff] }
 0x480   : > { %v3398_v6 = vadd.f32 %v3397_v3, %v3169_v40  ;;  %3955 = vmatmul.f32.gmra.mxu2 %v11958_v52  ;;  %4120 = vmatmul.f32.gmra.mxu3 %v11971_v36  ;;  %v12653_v3 = vsub.f32 %v2843_v9, %v12646_v41  ;;  %v2929_v9 = vadd.f32 %v12632_v19, %v12045_v4 }
 0x482   : > { %4327 = vmatmul.f32.gmra.mxu0 %v4326_v56  ;;  %v3606_v28 = vadd.f32 %v3605_v32, %v3398_v6  ;;  %16306 = vst [vmem:[#allocation141_spill] sm:$0xff] %v12653_v3  ;;  %v4334_v56 = vand.u32 4294901760, %v4333_v23  ;;  %v16028_v32 = vand.u32 4294901760, %v12653_v3  ;;  %v12661_v6 = vand.u32 4294901760, %v2846_v55 }
 0x484   : > { %4550 = vmatmul.f32.gmra.mxu1 %v12604_v13  ;;  %v12655_v52 = vadd.f32 %v3829_v24, %v3606_v28  ;;  %v4341_v24 = vsub.f32 %v12653_v3, %v16028_v32  ;;  %v12668_v28 = vsub.f32 %v2846_v55, %v12661_v6  ;;  %v3278_v32 = vadd.f32 %v12055_v44, %v2929_v9  ;;  %v2747_v55 = vld [vmem:[#allocation5 + $0x1d0] sm:$0xff] }
 0x485   : > { %v2937_v44 = vadd.f32 %v12632_v19, %v12068_v2 }
 0x486   : > { %16307 = vst [vmem:[#allocation142_spill] sm:$0xff] %v12655_v52  ;;  %v4342_v23 = vand.u32 4294901760, %v4341_v24  ;;  %v2852_v24 = vsel %vm1027_vm0, %v2747_v55, 0 }
 0x487   : > { %v3610_v27 = vpop.f32.mrf.mxu0  ;;  %16308 = vst [vmem:[#allocation143_spill] sm:$0xff] %v12668_v28  ;;  %v3282_v55 = vadd.f32 %v12076_v1, %v2937_v44 }
 0x488   : > { %3959 = vmatmul.f32.gmra.mxu2 %v11971_v36  ;;  %4124 = vmatmul.f32.gmra.mxu3 %v11985_v17  ;;  %v2849_v36 = vsel %vm1027_vm0, %v2745_v11, 0 }
 0x489   : > { %v3835_v40 = vpop.f32.mrf.mxu1  ;;  %v12676_v52 = vand.u32 4294901760, %v2849_v36 }
 0x48a   : > { %4335 = vmatmul.f32.gmra.mxu0 %v4334_v56  ;;  %v16035_v56 = vand.u32 4294901760, %v12668_v28 }
 0x48b   : > { %v3401_v26 = vpop.f32.mrf.mxu3  ;;  %v12685_v4 = vsub.f32 %v2849_v36, %v12676_v52 }
 0x48c   : > { %4554 = vmatmul.f32.gmra.mxu1 %v12625_v62 }
 0x48f   : > { %v4216_v12 = vpop.f32.mrf.mxu0 }
 0x490   : > { %3963 = vmatmul.f32.gmra.mxu2 %v11985_v17  ;;  %4128 = vmatmul.f32.gmra.mxu3 %v12001_v63  ;;  %v4349_v17 = vsub.f32 %v12668_v28, %v16035_v56  ;;  %v12694_v56 = vand.u32 4294901760, %v2852_v24 }
 0x491   : > { %v4495_v62 = vpop.f32.mrf.mxu1 }
 0x492   : > { %4343 = vmatmul.f32.gmra.mxu0 %v4342_v23  ;;  %v3456_v23 = vadd.f32 %v12051_v50, %v3278_v32 }
 0x493   : > { %v3176_v3 = vpop.f32.mrf.mxu2  ;;  %v4065_v11 = vpop.f32.mrf.mxu3 }
 0x494   : > { %v3177_v13 = vadd.f32 %v12632_v19, %v3176_v3  ;;  %4558 = vmatmul.f32.gmra.mxu1 %v12646_v41  ;;  %v4350_v3 = vand.u32 4294901760, %v4349_v17  ;;  %v16045_v41 = vand.u32 4294901760, %v12685_v4  ;;  %v3650_v2 = vadd.f32 %v12058_v29, %v3456_v23 }
 0x495   : > { %v2945_v29 = vadd.f32 %v12632_v19, %v12089_v59 }
 0x496   : > { %v3402_v9 = vadd.f32 %v3401_v26, %v3177_v13  ;;  %v2749_v13 = vld [vmem:[#allocation5 + $0x1e8] sm:$0xff]  ;;  %v4357_v17 = vsub.f32 %v12685_v4, %v16045_v41  ;;  %v16330_v41 = vld [vmem:[#allocation22_spill] sm:$0xff] }
 0x497   : > { %v4224_v5 = vpop.f32.mrf.mxu0  ;;  %v2855_v1 = vsel %vm1027_vm0, %v2749_v13, 0  ;;  %v3286_v13 = vadd.f32 %v12099_v10, %v2945_v29 }
 0x498   : > { %3967 = vmatmul.f32.gmra.mxu2 %v12001_v63  ;;  %4132 = vmatmul.f32.gmra.mxu3 %v12016_v21  ;;  %v3611_v36 = vadd.f32 %v3610_v27, %v3402_v9  ;;  %v12705_v27 = vsub.f32 %v2852_v24, %v12694_v56  ;;  %v4358_v23 = vand.u32 4294901760, %v4357_v17  ;;  %v2331_v17 = vld [vmem:[#allocation2 + $0x131] sm:$0xff] }
 0x499   : > { %v4499_v28 = vpop.f32.mrf.mxu1  ;;  %2339 = vst.msk [vmem:[#allocation5 + $0x230] sm:$0xff] %vm1027_vm0, %v2331_v17  ;;  %v3466_v29 = vadd.f32 %v12095_v14, %v3286_v13 }
 0x49a   : > { %4351 = vmatmul.f32.gmra.mxu0 %v4350_v3  ;;  %v12698_v26 = vadd.f32 %v3835_v40, %v3611_v36  ;;  %v3461_v40 = vadd.f32 %v12072_v30, %v3282_v55  ;;  %v16044_v3 = vand.u32 4294901760, %v12705_v27  ;;  %v12714_v36 = vand.u32 4294901760, %v2855_v1 }
 0x49b   : > { %v3904_v50 = vpop.f32.mrf.mxu2  ;;  %v4069_v32 = vpop.f32.mrf.mxu3 }
 0x49c   : > { %v3905_v63 = vadd.f32 %v3904_v50, %v3650_v2  ;;  %4562 = vmatmul.f32.gmra.mxu1 %v12661_v6  ;;  %v3656_v59 = vadd.f32 %v12080_v49, %v3461_v40  ;;  %v2953_v49 = vadd.f32 %v12632_v19, %v12111_v43  ;;  %v3662_v43 = vadd.f32 %v12102_v58, %v3466_v29 }
 0x49d   : > { %v2961_v58 = vadd.f32 %v12632_v19, %v12138_v51 }
 0x49e   : > { %v4066_v44 = vadd.f32 %v4065_v11, %v3905_v63  ;;  %v2751_v11 = vld [vmem:[#allocation5 + $0x200] sm:$0xff]  ;;  %v4365_v63 = vsub.f32 %v12705_v27, %v16044_v3 }
 0x49f   : > { %v4232_v9 = vpop.f32.mrf.mxu0  ;;  %v2858_v10 = vsel %vm1027_vm0, %v2751_v11, 0  ;;  %v3290_v11 = vadd.f32 %v12121_v20, %v2953_v49 }
 0x4a0   : > { %3971 = vmatmul.f32.gmra.mxu2 %v12016_v21  ;;  %4136 = vmatmul.f32.gmra.mxu3 %v12028_v53  ;;  %v4217_v24 = vadd.f32 %v4216_v12, %v4066_v44  ;;  %v12725_v12 = vsub.f32 %v2855_v1, %v12714_v36  ;;  %v4366_v40 = vand.u32 4294901760, %v4365_v63 }
 0x4a1   : > { %v4503_v2 = vpop.f32.mrf.mxu1 }
 0x4a2   : > { %4359 = vmatmul.f32.gmra.mxu0 %v4358_v23  ;;  %v12718_v50 = vadd.f32 %v4495_v62, %v4217_v24  ;;  %v16042_v1 = vand.u32 4294901760, %v12725_v12  ;;  %v12735_v23 = vand.u32 4294901760, %v2858_v10 }
 0x4a3   : > { %v3908_v30 = vpop.f32.mrf.mxu2  ;;  %v4073_v55 = vpop.f32.mrf.mxu3 }
 0x4a4   : > { %v3909_v21 = vadd.f32 %v3908_v30, %v3656_v59  ;;  %4566 = vmatmul.f32.gmra.mxu1 %v12676_v52 }
 0x4a6   : > { %v4070_v62 = vadd.f32 %v4069_v32, %v3909_v21  ;;  %v2753_v32 = vld [vmem:[#allocation5 + $0x218] sm:$0xff]  ;;  %v4373_v21 = vsub.f32 %v12725_v12, %v16042_v1 }
 0x4a7   : > { %v4240_v44 = vpop.f32.mrf.mxu0  ;;  %v2861_v20 = vsel %vm1027_vm0, %v2753_v32, 0  ;;  %v16324_v1 = vld [vmem:[#allocation17_spill] sm:$0xff] }
 0x4a8   : > { %3975 = vmatmul.f32.gmra.mxu2 %v12028_v53  ;;  %4140 = vmatmul.f32.gmra.mxu3 %v12043_v25  ;;  %v4225_v24 = vadd.f32 %v4224_v5, %v4070_v62  ;;  %v12746_v5 = vsub.f32 %v2858_v10, %v12735_v23  ;;  %v4374_v49 = vand.u32 4294901760, %v4373_v21  ;;  %v12755_v29 = vand.u32 4294901760, %v2861_v20  ;;  %v2755_v10 = vld [vmem:[#allocation5 + $0x230] sm:$0xff] }
 0x4a9   : > { %v4507_v59 = vpop.f32.mrf.mxu1 }
 0x4aa   : > { %4367 = vmatmul.f32.gmra.mxu0 %v4366_v40  ;;  %v12739_v30 = vadd.f32 %v4499_v28, %v4225_v24  ;;  %v3471_v28 = vadd.f32 %v12117_v39, %v3290_v11  ;;  %v16041_v62 = vand.u32 4294901760, %v12746_v5 }
 0x4ab   : > { %v3912_v14 = vpop.f32.mrf.mxu2  ;;  %v4077_v13 = vpop.f32.mrf.mxu3 }
 0x4ac   : > { %v3913_v53 = vadd.f32 %v3912_v14, %v3662_v43  ;;  %4570 = vmatmul.f32.gmra.mxu1 %v12694_v56  ;;  %v3294_v43 = vadd.f32 %v12148_v35, %v2961_v58  ;;  %v3668_v51 = vadd.f32 %v12127_v60, %v3471_v28  ;;  %v4381_v14 = vsub.f32 %v12746_v5, %v16041_v62  ;;  %v16323_v62 = vld [vmem:[#allocation18_spill] sm:$0xff] }
 0x4ad   : > { %v2969_v35 = vadd.f32 %v12632_v19, %v12157_v54 }
 0x4ae   : > { %v4074_v63 = vadd.f32 %v4073_v55, %v3913_v53  ;;  %v4382_v58 = vand.u32 4294901760, %v4381_v14 }
 0x4af   : > { %v4248_v17 = vpop.f32.mrf.mxu0 }
 0x4b0   : > { %3979 = vmatmul.f32.gmra.mxu2 %v12043_v25  ;;  %4144 = vmatmul.f32.gmra.mxu3 %v12066_v15  ;;  %v4233_v40 = vadd.f32 %v4232_v9, %v4074_v63  ;;  %v2864_v25 = vsel %vm1027_vm0, %v2755_v10, 0  ;;  %v12767_v9 = vsub.f32 %v2861_v20, %v12755_v29  ;;  %v3298_v20 = vadd.f32 %v12166_v45, %v2969_v35  ;;  %v16311_v35 = vld [vmem:[#allocation28_spill] sm:$0xff] }
 0x4b1   : > { %v4511_v24 = vpop.f32.mrf.mxu1  ;;  %v12772_v53 = vand.u32 4294901760, %v2864_v25 }
 0x4b2   : > { %4375 = vmatmul.f32.gmra.mxu0 %v4374_v49  ;;  %v12759_v55 = vadd.f32 %v4503_v2, %v4233_v40  ;;  %v3476_v2 = vadd.f32 %v12144_v61, %v3294_v43  ;;  %v16040_v63 = vand.u32 4294901760, %v12767_v9  ;;  %v2757_v61 = vld [vmem:[#allocation5 + $0x248] sm:$0xff] }
 0x4b3   : > { %v3916_v39 = vpop.f32.mrf.mxu2  ;;  %v4081_v11 = vpop.f32.mrf.mxu3  ;;  %v2867_v45 = vsel %vm1027_vm0, %v2757_v61, 0  ;;  %v16313_v61 = vld [vmem:[#allocation16_spill] sm:$0xff] }
 0x4b4   : > { %v3917_v32 = vadd.f32 %v3916_v39, %v3668_v51  ;;  %4574 = vmatmul.f32.gmra.mxu1 %v12714_v36  ;;  %v3674_v54 = vadd.f32 %v12151_v47, %v3476_v2  ;;  %v16309_v51 = vld [vmem:[#allocation33_spill] sm:$0xff]  ;;  %v12795_v2 = vand.u32 4294901760, %v2867_v45 }
 0x4b5   : > { %v2977_v47 = vadd.f32 %v12632_v19, %v16309_v51 }
 0x4b6   : > { %v4078_v60 = vadd.f32 %v4077_v13, %v3917_v32  ;;  %v12780_v13 = vsub.f32 %v2864_v25, %v12772_v53  ;;  %v16310_v25 = vld [vmem:[#allocation23_spill] sm:$0xff]  ;;  %16312 = vst [vmem:[#allocation33_spill] sm:$0xff] %v12795_v2 }
 0x4b7   : > { %v4256_v21 = vpop.f32.mrf.mxu0  ;;  %v3481_v32 = vadd.f32 %v16310_v25, %v3298_v20  ;;  %v2759_v20 = vld [vmem:[#allocation5 + $0x260] sm:$0xff] }
 0x4b8   : > { %3983 = vmatmul.f32.gmra.mxu2 %v12066_v15  ;;  %4148 = vmatmul.f32.gmra.mxu3 %v12087_v34  ;;  %v4241_v28 = vadd.f32 %v4240_v44, %v4078_v60  ;;  %v4389_v44 = vsub.f32 %v12767_v9, %v16040_v63 }
 0x4b9   : > { %v4515_v49 = vpop.f32.mrf.mxu1 }
 0x4ba   : > { %4383 = vmatmul.f32.gmra.mxu0 %v4382_v58  ;;  %v12782_v10 = vadd.f32 %v4507_v59, %v4241_v28  ;;  %v16038_v59 = vand.u32 4294901760, %v12780_v13  ;;  %v4390_v60 = vand.u32 4294901760, %v4389_v44  ;;  %v2985_v44 = vadd.f32 %v12632_v19, %v12190_v8 }
 0x4bb   : > { %v3920_v40 = vpop.f32.mrf.mxu2  ;;  %v4085_v15 = vpop.f32.mrf.mxu3 }
 0x4bc   : > { %v3921_v43 = vadd.f32 %v3920_v40, %v3674_v54  ;;  %4578 = vmatmul.f32.gmra.mxu1 %v12735_v23  ;;  %v3302_v54 = vadd.f32 %v12184_v37, %v2977_v47  ;;  %v3680_v40 = vadd.f32 %v16313_v61, %v3481_v32  ;;  %v2870_v37 = vsel %vm1027_vm0, %v2759_v20, 0  ;;  %v16314_v32 = vld [vmem:[#allocation21_spill] sm:$0xff] }
 0x4bd   : > { %v3306_v20 = vadd.f32 %v12198_v18, %v2985_v44  ;;  %v16319_v44 = vld [vmem:[#allocation24_spill] sm:$0xff] }
 0x4be   : > { %v4082_v39 = vadd.f32 %v4081_v11, %v3921_v43  ;;  %v4397_v11 = vsub.f32 %v12780_v13, %v16038_v59  ;;  %v16317_v59 = vld [vmem:[#allocation20_spill] sm:$0xff] }
 0x4bf   : > { %v4264_v14 = vpop.f32.mrf.mxu0 }
 0x4c0   : > { %3987 = vmatmul.f32.gmra.mxu2 %v12087_v34  ;;  %4152 = vmatmul.f32.gmra.mxu3 %v16311_v35  ;;  %v4249_v58 = vadd.f32 %v4248_v17, %v4082_v39  ;;  %v12806_v17 = vsub.f32 %v2867_v45, %v12795_v2  ;;  %v4398_v39 = vand.u32 4294901760, %v4397_v11 }
 0x4c1   : > { %v4519_v28 = vpop.f32.mrf.mxu1 }
 0x4c2   : > { %4391 = vmatmul.f32.gmra.mxu0 %v4390_v60  ;;  %v12802_v43 = vadd.f32 %v4511_v24, %v4249_v58  ;;  %v3486_v60 = vadd.f32 %v16314_v32, %v3302_v54  ;;  %v16315_v24 = vld [vmem:[#allocation19_spill] sm:$0xff]  ;;  %v16039_v58 = vand.u32 4294901760, %v12806_v17 }
 0x4c3   : > { %v3924_v34 = vpop.f32.mrf.mxu2  ;;  %v4089_v51 = vpop.f32.mrf.mxu3 }
 0x4c4   : > { %v3925_v25 = vadd.f32 %v3924_v34, %v3680_v40  ;;  %4582 = vmatmul.f32.gmra.mxu1 %v12755_v29  ;;  %v12815_v40 = vand.u32 4294901760, %v2870_v37  ;;  %v3686_v8 = vadd.f32 %v16317_v59, %v3486_v60  ;;  %v2993_v59 = vadd.f32 %v12632_v19, %v16319_v44 }
 0x4c6   : > { %v4086_v47 = vadd.f32 %v4085_v15, %v3925_v25  ;;  %16316 = vst [vmem:[#allocation23_spill] sm:$0xff] %v12815_v40  ;;  %v2761_v15 = vld [vmem:[#allocation5 + $0x278] sm:$0xff] }
 0x4c7   : > { %v4272_v61 = vpop.f32.mrf.mxu0  ;;  %v2873_v18 = vsel %vm1027_vm0, %v2761_v15, 0  ;;  %v3310_v15 = vadd.f32 %v16323_v62, %v2993_v59  ;;  %v16326_v59 = vld [vmem:[#allocation35_spill] sm:$0xff] }
 0x4c8   : > { %3991 = vmatmul.f32.gmra.mxu2 %v16311_v35  ;;  %4156 = vmatmul.f32.gmra.mxu3 %v16315_v24  ;;  %v4257_v45 = vadd.f32 %v4256_v21, %v4086_v47  ;;  %v4405_v35 = vsub.f32 %v12806_v17, %v16039_v58  ;;  %v12826_v21 = vsub.f32 %v2870_v37, %v12815_v40  ;;  %v12835_v58 = vand.u32 4294901760, %v2873_v18 }
 0x4c9   : > { %v4523_v34 = vpop.f32.mrf.mxu1 }
 0x4ca   : > { %4399 = vmatmul.f32.gmra.mxu0 %v4398_v39  ;;  %v12819_v11 = vadd.f32 %v4515_v49, %v4257_v45  ;;  %16318 = vst [vmem:[#allocation28_spill] sm:$0xff] %v12826_v21  ;;  %v16320_v49 = vld [vmem:[#allocation39_spill] sm:$0xff]  ;;  %v16321_v45 = vld [vmem:[#allocation29_spill] sm:$0xff] }
 0x4cb   : > { %v3928_v54 = vpop.f32.mrf.mxu2  ;;  %v4093_v25 = vpop.f32.mrf.mxu3  ;;  %v3491_v39 = vadd.f32 %v16320_v49, %v3306_v20  ;;  %16322 = vst [vmem:[#allocation16_spill] sm:$0xff] %v12835_v58 }
 0x4cc   : > { %v3929_v32 = vadd.f32 %v3928_v54, %v3686_v8  ;;  %4586 = vmatmul.f32.gmra.mxu1 %v12772_v53  ;;  %v4406_v8 = vand.u32 4294901760, %v4405_v35  ;;  %v16043_v54 = vand.u32 4294901760, %v12826_v21 }
 0x4cd   : > { %v3692_v44 = vadd.f32 %v16324_v1, %v3491_v39  ;;  %v3001_v1 = vadd.f32 %v12632_v19, %v16326_v59 }
 0x4ce   : > { %v4090_v47 = vadd.f32 %v4089_v51, %v3929_v32  ;;  %v2763_v51 = vld [vmem:[#allocation5 + $0x290] sm:$0xff]  ;;  %v4413_v35 = vsub.f32 %v12826_v21, %v16043_v54  ;;  %v16331_v21 = vld [vmem:[#allocation38_spill] sm:$0xff] }
 0x4cf   : > { %v4280_v60 = vpop.f32.mrf.mxu0  ;;  %v2876_v62 = vsel %vm1027_vm0, %v2763_v51, 0  ;;  %v3314_v51 = vadd.f32 %v16330_v41, %v3001_v1  ;;  %v16334_v1 = vld [vmem:[#allocation25_spill] sm:$0xff] }
 0x4d0   : > { %3995 = vmatmul.f32.gmra.mxu2 %v16315_v24  ;;  %4160 = vmatmul.f32.gmra.mxu3 %v16321_v45  ;;  %v4265_v37 = vadd.f32 %v4264_v14, %v4090_v47  ;;  %v12846_v14 = vsub.f32 %v2873_v18, %v12835_v58  ;;  %v12855_v54 = vand.u32 4294901760, %v2876_v62 }
 0x4d1   : > { %v4527_v63 = vpop.f32.mrf.mxu1 }
 0x4d2   : > { %4407 = vmatmul.f32.gmra.mxu0 %v4406_v8  ;;  %v12839_v32 = vadd.f32 %v4519_v28, %v4265_v37  ;;  %16325 = vst [vmem:[#allocation21_spill] sm:$0xff] %v12846_v14  ;;  %v16327_v28 = vld [vmem:[#allocation30_spill] sm:$0xff] }
 0x4d3   : > { %v3932_v20 = vpop.f32.mrf.mxu2  ;;  %v4097_v49 = vpop.f32.mrf.mxu3  ;;  %v3496_v39 = vadd.f32 %v16327_v28, %v3310_v15  ;;  %v16328_v37 = vld [vmem:[#allocation34_spill] sm:$0xff]  ;;  %16329 = vst [vmem:[#allocation19_spill] sm:$0xff] %v12855_v54 }
 0x4d4   : > { %v3933_v24 = vadd.f32 %v3932_v20, %v3692_v44  ;;  %4590 = vmatmul.f32.gmra.mxu1 %v12795_v2  ;;  %v4414_v44 = vand.u32 4294901760, %v4413_v35  ;;  %v16048_v20 = vand.u32 4294901760, %v12846_v14 }
 0x4d5   : > { %v3698_v59 = vadd.f32 %v16331_v21, %v3496_v39  ;;  %v3009_v21 = vadd.f32 %v12632_v19, %v16334_v1 }
 0x4d6   : > { %v4094_v47 = vadd.f32 %v4093_v25, %v3933_v24  ;;  %v2765_v25 = vld [vmem:[#allocation5 + $0x2a8] sm:$0xff]  ;;  %v4421_v35 = vsub.f32 %v12846_v14, %v16048_v20 }
 0x4d7   : > { %v4288_v8 = vpop.f32.mrf.mxu0  ;;  %v2879_v41 = vsel %vm1027_vm0, %v2765_v25, 0 }
 0x4d8   : > { %3999 = vmatmul.f32.gmra.mxu2 %v16321_v45  ;;  %4164 = vmatmul.f32.gmra.mxu3 %v16328_v37  ;;  %v4273_v18 = vadd.f32 %v4272_v61, %v4094_v47  ;;  %v12866_v61 = vsub.f32 %v2876_v62, %v12855_v54  ;;  %v12875_v20 = vand.u32 4294901760, %v2879_v41 }
 0x4d9   : > { %v4531_v3 = vpop.f32.mrf.mxu1 }
 0x4da   : > { %4415 = vmatmul.f32.gmra.mxu0 %v4414_v44  ;;  %v12859_v24 = vadd.f32 %v4523_v34, %v4273_v18  ;;  %16333 = vst [vmem:[#allocation24_spill] sm:$0xff] %v12866_v61  ;;  %v16335_v34 = vld [vmem:[#allocation31_spill] sm:$0xff]  ;;  %v16336_v18 = vld [vmem:[#allocation26_spill] sm:$0xff] }
 0x4db   : > { %v3936_v15 = vpop.f32.mrf.mxu2  ;;  %v4101_v28 = vpop.f32.mrf.mxu3  ;;  %v3501_v39 = vadd.f32 %v16335_v34, %v3314_v51  ;;  %16337 = vst [vmem:[#allocation39_spill] sm:$0xff] %v12875_v20 }
 0x4dc   : > { %16332 = vst [vmem:[#allocation20_spill] sm:$0xff] %v12859_v24  ;;  %v3937_v45 = vadd.f32 %v3936_v15, %v3698_v59  ;;  %4594 = vmatmul.f32.gmra.mxu1 %v12815_v40  ;;  %v4422_v59 = vand.u32 4294901760, %v4421_v35  ;;  %v16053_v15 = vand.u32 4294901760, %v12866_v61  ;;  %v16338_v40 = vld [vmem:[#allocation27_spill] sm:$0xff]  ;;  %v16339_v24 = vld [vmem:[#allocation37_spill] sm:$0xff] }
 0x4dd   : > { %v3318_v25 = vadd.f32 %v16338_v40, %v3009_v21  ;;  %v3704_v1 = vadd.f32 %v16339_v24, %v3501_v39  ;;  %v16342_v24 = vld [vmem:[#allocation32_spill] sm:$0xff] }
 0x4de   : > { %v4098_v47 = vadd.f32 %v4097_v49, %v3937_v45  ;;  %v2767_v49 = vld [vmem:[#allocation5 + $0x2c0] sm:$0xff]  ;;  %v4429_v35 = vsub.f32 %v12866_v61, %v16053_v15  ;;  %v16343_v39 = vld [vmem:[#allocation40_spill] sm:$0xff] }
 0x4df   : > { %v4296_v44 = vpop.f32.mrf.mxu0  ;;  %v2882_v40 = vsel %vm1027_vm0, %v2767_v49, 0 }
 0x4e0   : > { %4003 = vmatmul.f32.gmra.mxu2 %v16328_v37  ;;  %4168 = vmatmul.f32.gmra.mxu3 %v16336_v18  ;;  %v4281_v62 = vadd.f32 %v4280_v60, %v4098_v47  ;;  %v12886_v60 = vsub.f32 %v2879_v41, %v12875_v20  ;;  %v2699_v47 = vld [vmem:[#allocation2 + $0x92] sm:$0xff]  ;;  %v12896_v15 = vand.u32 4294901760, %v2882_v40 }
 0x4e1   : > { %v4535_v14 = vpop.f32.mrf.mxu1  ;;  %2707 = vst.msk [vmem:[#allocation5 + $0x2f0] sm:$0xff] %vm1027_vm0, %v2699_v47 }
 0x4e2   : > { %4423 = vmatmul.f32.gmra.mxu0 %v4422_v59  ;;  %v12879_v45 = vadd.f32 %v4527_v63, %v4281_v62  ;;  %16341 = vst [vmem:[#allocation18_spill] sm:$0xff] %v12886_v60  ;;  %v3017_v63 = vadd.f32 %v12632_v19, %v16342_v24  ;;  %v3506_v59 = vadd.f32 %v16343_v39, %v3318_v25  ;;  %v16058_v41 = vand.u32 4294901760, %v12886_v60 }
 0x4e3   : > { %v3940_v51 = vpop.f32.mrf.mxu2  ;;  %v4105_v34 = vpop.f32.mrf.mxu3  ;;  %16345 = vst [vmem:[#allocation17_spill] sm:$0xff] %v12896_v15 }
 0x4e4   : > { %16340 = vst [vmem:[#allocation29_spill] sm:$0xff] %v12879_v45  ;;  %v3941_v37 = vadd.f32 %v3940_v51, %v3704_v1  ;;  %4598 = vmatmul.f32.gmra.mxu1 %v12835_v58  ;;  %v16344_v1 = vld [vmem:[#allocation36_spill] sm:$0xff]  ;;  %v4430_v51 = vand.u32 4294901760, %v4429_v35  ;;  %v16346_v58 = vld [vmem:[#allocation41_spill] sm:$0xff]  ;;  %v4437_v35 = vsub.f32 %v12886_v60, %v16058_v41 }
 0x4e5   : > { %v3322_v47 = vadd.f32 %v16346_v58, %v3017_v63  ;;  %v16347_v45 = vld [vmem:[#allocation12_spill] sm:$0xff] }
 0x4e6   : > { %v4102_v21 = vadd.f32 %v4101_v28, %v3941_v37  ;;  %v3710_v24 = vadd.f32 %v16347_v45, %v3506_v59  ;;  %v2769_v28 = vld [vmem:[#allocation5 + $0x2d8] sm:$0xff]  ;;  %v16350_v63 = vld [vmem:[#allocation44_spill] sm:$0xff] }
 0x4e7   : > { %v4304_v62 = vpop.f32.mrf.mxu0  ;;  %v2885_v58 = vsel %vm1027_vm0, %v2769_v28, 0  ;;  %v3025_v45 = vadd.f32 %v12632_v19, %v16350_v63  ;;  %v16354_v28 = vld [vmem:[#allocation46_spill] sm:$0xff] }
 0x4e8   : > { %4007 = vmatmul.f32.gmra.mxu2 %v16336_v18  ;;  %4172 = vmatmul.f32.gmra.mxu3 %v16344_v1  ;;  %v4289_v61 = vadd.f32 %v4288_v8, %v4102_v21  ;;  %v12907_v8 = vsub.f32 %v2882_v40, %v12896_v15  ;;  %v12916_v41 = vand.u32 4294901760, %v2885_v58  ;;  %v2771_v40 = vld [vmem:[#allocation5 + $0x2f0] sm:$0xff]  ;;  %v16355_v63 = vld [vmem:[#allocation42_spill] sm:$0xff] }
 0x4e9   : > { %v4539_v49 = vpop.f32.mrf.mxu1 }
 0x4ea   : > { %4431 = vmatmul.f32.gmra.mxu0 %v4430_v51  ;;  %v12900_v37 = vadd.f32 %v4531_v3, %v4289_v61  ;;  %16349 = vst [vmem:[#allocation30_spill] sm:$0xff] %v12907_v8  ;;  %v16351_v3 = vld [vmem:[#allocation14_spill] sm:$0xff]  ;;  %v16352_v51 = vld [vmem:[#allocation43_spill] sm:$0xff] }
 0x4eb   : > { %v3944_v25 = vpop.f32.mrf.mxu2  ;;  %v4109_v39 = vpop.f32.mrf.mxu3  ;;  %v3511_v61 = vadd.f32 %v16351_v3, %v3322_v47  ;;  %16353 = vst [vmem:[#allocation34_spill] sm:$0xff] %v12916_v41 }
 0x4ec   : > { %16348 = vst [vmem:[#allocation35_spill] sm:$0xff] %v12900_v37  ;;  %v3945_v18 = vadd.f32 %v3944_v25, %v3710_v24  ;;  %4602 = vmatmul.f32.gmra.mxu1 %v12855_v54  ;;  %v4438_v24 = vand.u32 4294901760, %v4437_v35  ;;  %v16065_v25 = vand.u32 4294901760, %v12907_v8  ;;  %v3326_v37 = vadd.f32 %v16354_v28, %v3025_v45  ;;  %v16357_v45 = vld [vmem:[#allocation48_spill] sm:$0xff] }
 0x4ee   : > { %v4106_v21 = vadd.f32 %v4105_v34, %v3945_v18  ;;  %v3716_v34 = vadd.f32 %v16355_v63, %v3511_v61  ;;  %v4445_v35 = vsub.f32 %v12907_v8, %v16065_v25 }
 0x4ef   : > { %v4312_v59 = vpop.f32.mrf.mxu0 }
 0x4f0   : > { %4011 = vmatmul.f32.gmra.mxu2 %v16344_v1  ;;  %4176 = vmatmul.f32.gmra.mxu3 %v16352_v51  ;;  %v4297_v60 = vadd.f32 %v4296_v44, %v4106_v21  ;;  %v2888_v1 = vsel %vm1027_vm0, %v2771_v40, 0  ;;  %v12928_v44 = vsub.f32 %v2885_v58, %v12916_v41  ;;  %v3033_v21 = vadd.f32 %v12632_v19, %v16357_v45  ;;  %v16359_v40 = vld [vmem:[#allocation52_spill] sm:$0xff]  ;;  %v16360_v58 = vld [vmem:[#allocation50_spill] sm:$0xff] }
 0x4f1   : > { %v4543_v54 = vpop.f32.mrf.mxu1  ;;  %v4446_v63 = vand.u32 4294901760, %v4445_v35  ;;  %v16363_v35 = vld [vmem:[#allocation53_spill] sm:$0xff] }
 0x4f2   : > { %4439 = vmatmul.f32.gmra.mxu0 %v4438_v24  ;;  %v12920_v18 = vadd.f32 %v4535_v14, %v4297_v60  ;;  %16356 = vst [vmem:[#allocation22_spill] sm:$0xff] %v12928_v44  ;;  %v16358_v14 = vld [vmem:[#allocation45_spill] sm:$0xff]  ;;  %v12933_v24 = vand.u32 4294901760, %v2888_v1  ;;  %v3330_v8 = vadd.f32 %v16360_v58, %v3033_v21  ;;  %v3041_v21 = vadd.f32 %v12632_v19, %v16363_v35 }
 0x4f3   : > { %v3948_v47 = vpop.f32.mrf.mxu2  ;;  %v4113_v3 = vpop.f32.mrf.mxu3  ;;  %v3516_v60 = vadd.f32 %v16358_v14, %v3326_v37 }
 0x4f4   : > { %v3949_v2 = vadd.f32 %v3948_v47, %v3716_v34  ;;  %4606 = vmatmul.f32.gmra.mxu1 %v12875_v20  ;;  %v16072_v34 = vand.u32 4294901760, %v12928_v44  ;;  %v16361_v20 = vld [vmem:[#allocation47_spill] sm:$0xff] }
 0x4f5   : > { %v3722_v45 = vadd.f32 %v16361_v20, %v3516_v60 }
 0x4f6   : > { %v4110_v61 = vadd.f32 %v4109_v39, %v3949_v2  ;;  %v12941_v2 = vsub.f32 %v2888_v1, %v12933_v24 }
 0x4f7   : > { %v4320_v28 = vpop.f32.mrf.mxu0 }
 0x4f8   : > { %4015 = vmatmul.f32.gmra.mxu2 %v16352_v51  ;;  %4180 = vmatmul.f32.gmra.mxu3 %v16359_v40  ;;  %v4305_v47 = vadd.f32 %v4304_v62, %v4110_v61  ;;  %16362 = vst [vmem:[#allocation38_spill] sm:$0xff] %v12941_v2  ;;  %v4453_v62 = vsub.f32 %v12928_v44, %v16072_v34  ;;  %v16075_v1 = vand.u32 4294901760, %v12941_v2  ;;  %v16367_v34 = vld [vmem:[#allocation51_spill] sm:$0xff] }
 0x4f9   : > { %v4547_v25 = vpop.f32.mrf.mxu1 }
 0x4fa   : > { %4447 = vmatmul.f32.gmra.mxu0 %v4446_v63  ;;  %v12943_v37 = vadd.f32 %v4539_v49, %v4305_v47  ;;  %v16364_v63 = vld [vmem:[#allocation49_spill] sm:$0xff]  ;;  %v16365_v49 = vld [vmem:[#allocation58_spill] sm:$0xff]  ;;  %v4454_v47 = vand.u32 4294901760, %v4453_v62 }
 0x4fb   : > { %v3952_v39 = vpop.f32.mrf.mxu2  ;;  %v4117_v14 = vpop.f32.mrf.mxu3  ;;  %v3521_v20 = vadd.f32 %v16364_v63, %v3330_v8 }
 0x4fc   : > { %v3953_v51 = vadd.f32 %v3952_v39, %v3722_v45  ;;  %4610 = vmatmul.f32.gmra.mxu1 %v12896_v15  ;;  %v16366_v39 = vld [vmem:[#allocation55_spill] sm:$0xff] }
 0x4fd   : > { %v3334_v15 = vadd.f32 %v16366_v39, %v3041_v21  ;;  %v3728_v44 = vadd.f32 %v16367_v34, %v3521_v20  ;;  %v16369_v21 = vld [vmem:[#allocation54_spill] sm:$0xff]  ;;  %v16370_v34 = vld [vmem:[#allocation69_spill] sm:$0xff] }
 0x4fe   : > { %v4114_v61 = vadd.f32 %v4113_v3, %v3953_v51  ;;  %v4461_v3 = vsub.f32 %v12941_v2, %v16075_v1 }
 0x4ff   : > { %v4328_v60 = vpop.f32.mrf.mxu0 }
 0x500   : > { %4019 = vmatmul.f32.gmra.mxu2 %v16359_v40  ;;  %4184 = vmatmul.f32.gmra.mxu3 %v16365_v49  ;;  %v4313_v58 = vadd.f32 %v4312_v59, %v4114_v61  ;;  %v16368_v40 = vld [vmem:[#allocation57_spill] sm:$0xff]  ;;  %v4462_v61 = vand.u32 4294901760, %v4461_v3 }
 0x501   : > { %v4551_v45 = vpop.f32.mrf.mxu1  ;;  %v3049_v59 = vadd.f32 %v12632_v19, %v16368_v40 }
 0x502   : > { %4455 = vmatmul.f32.gmra.mxu0 %v4454_v47  ;;  %v12960_v8 = vadd.f32 %v4543_v54, %v4313_v58  ;;  %v3526_v47 = vadd.f32 %v16369_v21, %v3334_v15  ;;  %v16371_v58 = vld [vmem:[#allocation60_spill] sm:$0xff]  ;;  %v16373_v15 = vld [vmem:[#allocation62_spill] sm:$0xff] }
 0x503   : > { %v3956_v51 = vpop.f32.mrf.mxu2  ;;  %v4121_v35 = vpop.f32.mrf.mxu3  ;;  %v3338_v1 = vadd.f32 %v16371_v58, %v3049_v59  ;;  %v3057_v3 = vadd.f32 %v12632_v19, %v16373_v15  ;;  %v16375_v59 = vand.u32 4294901760, %v12337_v46  ;;  %v16379_v15 = vld [vmem:[#allocation63_spill] sm:$0xff] }
 0x504   : > { %v3957_v63 = vadd.f32 %v3956_v51, %v3728_v44  ;;  %4614 = vmatmul.f32.gmra.mxu1 %v12916_v41  ;;  %v16372_v44 = vld [vmem:[#allocation56_spill] sm:$0xff] }
 0x505   : > { %v3734_v51 = vadd.f32 %v16372_v44, %v3526_v47 }
 0x506   : > { %v4118_v62 = vadd.f32 %v4117_v14, %v3957_v63  ;;  %v16374_v63 = vld [vmem:[#allocation59_spill] sm:$0xff] }
 0x507   : > { %v4336_v39 = vpop.f32.mrf.mxu0  ;;  %v3531_v21 = vadd.f32 %v16374_v63, %v3338_v1  ;;  %v16378_v1 = vld [vmem:[#allocation66_spill] sm:$0xff] }
 0x508   : > { %4023 = vmatmul.f32.gmra.mxu2 %v16365_v49  ;;  %4188 = vmatmul.f32.gmra.mxu3 %v16370_v34  ;;  %v4321_v20 = vadd.f32 %v4320_v28, %v4118_v62 }
 0x509   : > { %v4555_v54 = vpop.f32.mrf.mxu1 }
 0x50a   : > { %4463 = vmatmul.f32.gmra.mxu0 %v4462_v61  ;;  %v12970_v2 = vadd.f32 %v4547_v25, %v4321_v20  ;;  %v16376_v61 = vld [vmem:[#allocation64_spill] sm:$0xff] }
 0x50b   : > { %v3960_v41 = vpop.f32.mrf.mxu2  ;;  %v4125_v40 = vpop.f32.mrf.mxu3  ;;  %v3342_v47 = vadd.f32 %v16376_v61, %v3057_v3  ;;  %v16380_v3 = vand.u32 4294901760, %v12357_v57  ;;  %v16383_v61 = vld [vmem:[#allocation65_spill] sm:$0xff] }
 0x50c   : > { %v3961_v14 = vadd.f32 %v3960_v41, %v3734_v51  ;;  %4618 = vmatmul.f32.gmra.mxu1 %v12933_v24  ;;  %v16377_v41 = vld [vmem:[#allocation61_spill] sm:$0xff] }
 0x50d   : > { %v3740_v20 = vadd.f32 %v16377_v41, %v3531_v21  ;;  %v16381_v21 = vld [vmem:[#allocation68_spill] sm:$0xff] }
 0x50e   : > { %v4122_v49 = vadd.f32 %v4121_v35, %v3961_v14 }
 0x50f   : > { %v4344_v28 = vpop.f32.mrf.mxu0 }
 0x510   : > { %4027 = vmatmul.f32.gmra.mxu2 %v16370_v34  ;;  %4824 = vmatmul.f32.vlgmr.msrb.gmra.mxu3 %v16375_v59  ;;  %v4329_v62 = vadd.f32 %v4328_v60, %v4122_v49  ;;  %v3065_v34 = vadd.f32 %v12632_v19, %v16378_v1  ;;  %v3536_v60 = vadd.f32 %v16379_v15, %v3342_v47  ;;  %v16384_v47 = vld [vmem:[#allocation72_spill] sm:$0xff]  ;;  %v16385_v1 = vld [vmem:[#allocation67_spill] sm:$0xff] }
 0x511   : > { %v4559_v25 = vpop.f32.mrf.mxu1 }
 0x512   : > { %5037 = vmatmul.f32.vlgmr.msra.gmra.mxu0 %v12332_v38  ;;  %v12982_v58 = vadd.f32 %v4551_v45, %v4329_v62  ;;  %v3346_v59 = vadd.f32 %v16381_v21, %v3065_v34  ;;  %v16382_v62 = vld [vmem:[#allocation71_spill] sm:$0xff]  ;;  %v16386_v34 = vand.u32 4294901760, %v12377_v48  ;;  %v16389_v21 = vld [vmem:[#allocation70_spill] sm:$0xff] }
 0x513   : > { %v3964_v44 = vpop.f32.mrf.mxu2  ;;  %v4129_v35 = vpop.f32.mrf.mxu3 }
 0x514   : > { %v3965_v51 = vadd.f32 %v3964_v44, %v3740_v20  ;;  %5184 = vmatmul.f32.vlgmr.msra.gmra.mxu1 %v12332_v38  ;;  %v3746_v38 = vadd.f32 %v16383_v61, %v3536_v60  ;;  %v16387_v60 = vld [vmem:[#allocation74_spill] sm:$0xff] }
 0x516   : > { %v4126_v14 = vadd.f32 %v4125_v40, %v3965_v51 }
 0x517   : > { %v4352_v49 = vpop.f32.mrf.mxu0 }
 0x518   : > { %4644 = vmatmul.f32.vlgmr.msrb.gmra.mxu2 %v12337_v46  ;;  %4830 = vmatmul.f32.gmra.mxu3 %v16380_v3  ;;  %v4337_v63 = vadd.f32 %v4336_v39, %v4126_v14  ;;  %v3073_v46 = vadd.f32 %v12632_v19, %v16384_v47  ;;  %v3541_v39 = vadd.f32 %v16385_v1, %v3346_v59  ;;  %v16390_v59 = vld [vmem:[#allocation77_spill] sm:$0xff] }
 0x519   : > { %v4563_v45 = vpop.f32.mrf.mxu1  ;;  %v16391_v47 = vld [vmem:[#allocation73_spill] sm:$0xff] }
 0x51a   : > { %5041 = vmatmul.f32.gmra.mxu0 %v16382_v62  ;;  %v12994_v41 = vadd.f32 %v4555_v54, %v4337_v63  ;;  %v3350_v3 = vadd.f32 %v16387_v60, %v3073_v46  ;;  %v16388_v63 = vld [vmem:[#allocation75_spill] sm:$0xff]  ;;  %v16392_v46 = vand.u32 4294901760, %v12398_v0  ;;  %v16395_v60 = vld [vmem:[#allocation76_spill] sm:$0xff] }
 0x51b   : > { %v3968_v20 = vpop.f32.mrf.mxu2  ;;  %v4133_v40 = vpop.f32.mrf.mxu3 }
 0x51c   : > { %v3969_v44 = vadd.f32 %v3968_v20, %v3746_v38  ;;  %5188 = vmatmul.f32.gmra.mxu1 %v16382_v62  ;;  %v3752_v62 = vadd.f32 %v16389_v21, %v3541_v39  ;;  %v16393_v39 = vld [vmem:[#allocation80_spill] sm:$0xff] }
 0x51e   : > { %v4130_v51 = vadd.f32 %v4129_v35, %v3969_v44 }
 0x51f   : > { %v4360_v14 = vpop.f32.mrf.mxu0 }
 0x520   : > { %4649 = vmatmul.f32.gmra.mxu2 %v12357_v57  ;;  %4836 = vmatmul.f32.gmra.mxu3 %v16386_v34  ;;  %v4345_v15 = vadd.f32 %v4344_v28, %v4130_v51  ;;  %v3081_v57 = vadd.f32 %v12632_v19, %v16390_v59  ;;  %v3546_v28 = vadd.f32 %v16391_v47, %v3350_v3  ;;  %v16396_v3 = vld [vmem:[#allocation83_spill] sm:$0xff] }
 0x521   : > { %v4567_v54 = vpop.f32.mrf.mxu1  ;;  %v16397_v59 = vld [vmem:[#allocation79_spill] sm:$0xff] }
 0x522   : > { %5045 = vmatmul.f32.gmra.mxu0 %v16388_v63  ;;  %v13006_v61 = vadd.f32 %v4559_v25, %v4345_v15  ;;  %v3354_v34 = vadd.f32 %v16393_v39, %v3081_v57  ;;  %v16394_v15 = vld [vmem:[#allocation78_spill] sm:$0xff]  ;;  %v16398_v57 = vand.u32 4294901760, %v12417_v42  ;;  %v16401_v39 = vld [vmem:[#allocation81_spill] sm:$0xff] }
 0x523   : > { %v3972_v38 = vpop.f32.mrf.mxu2  ;;  %v4137_v35 = vpop.f32.mrf.mxu3 }
 0x524   : > { %v3973_v20 = vadd.f32 %v3972_v38, %v3752_v62  ;;  %5192 = vmatmul.f32.gmra.mxu1 %v16388_v63  ;;  %v3758_v63 = vadd.f32 %v16395_v60, %v3546_v28  ;;  %v16399_v28 = vld [vmem:[#allocation85_spill] sm:$0xff] }
 0x526   : > { %v4134_v44 = vadd.f32 %v4133_v40, %v3973_v20 }
 0x527   : > { %v4368_v51 = vpop.f32.mrf.mxu0 }
 0x528   : > { %4654 = vmatmul.f32.gmra.mxu2 %v12377_v48  ;;  %4842 = vmatmul.f32.gmra.mxu3 %v16392_v46  ;;  %v4353_v1 = vadd.f32 %v4352_v49, %v4134_v44  ;;  %v3089_v48 = vadd.f32 %v12632_v19, %v16396_v3  ;;  %v3551_v49 = vadd.f32 %v16397_v59, %v3354_v34  ;;  %v16402_v34 = vld [vmem:[#allocation88_spill] sm:$0xff] }
 0x529   : > { %v4571_v25 = vpop.f32.mrf.mxu1  ;;  %v16403_v3 = vld [vmem:[#allocation84_spill] sm:$0xff] }
 0x52a   : > { %5049 = vmatmul.f32.gmra.mxu0 %v16394_v15  ;;  %v13018_v21 = vadd.f32 %v4563_v45, %v4353_v1  ;;  %v3358_v46 = vadd.f32 %v16399_v28, %v3089_v48  ;;  %v16400_v1 = vld [vmem:[#allocation82_spill] sm:$0xff]  ;;  %v16404_v48 = vand.u32 4294901760, %v12434_v22 }
 0x52b   : > { %v3976_v62 = vpop.f32.mrf.mxu2  ;;  %v4141_v40 = vpop.f32.mrf.mxu3  ;;  %v16407_v28 = vld [vmem:[#allocation86_spill] sm:$0xff] }
 0x52c   : > { %v3977_v38 = vadd.f32 %v3976_v62, %v3758_v63  ;;  %5196 = vmatmul.f32.gmra.mxu1 %v16394_v15  ;;  %v3764_v15 = vadd.f32 %v16401_v39, %v3551_v49  ;;  %v16405_v49 = vld [vmem:[#allocation90_spill] sm:$0xff] }
 0x52e   : > { %v4138_v20 = vadd.f32 %v4137_v35, %v3977_v38 }
 0x52f   : > { %v4376_v44 = vpop.f32.mrf.mxu0 }
 0x530   : > { %4659 = vmatmul.f32.gmra.mxu2 %v12398_v0  ;;  %4848 = vmatmul.f32.gmra.mxu3 %v16398_v57  ;;  %v4361_v47 = vadd.f32 %v4360_v14, %v4138_v20  ;;  %v3097_v0 = vadd.f32 %v12632_v19, %v16402_v34  ;;  %v3556_v14 = vadd.f32 %v16403_v3, %v3358_v46  ;;  %v16408_v46 = vld [vmem:[#allocation93_spill] sm:$0xff] }
 0x531   : > { %v4575_v45 = vpop.f32.mrf.mxu1  ;;  %v16409_v34 = vld [vmem:[#allocation89_spill] sm:$0xff] }
 0x532   : > { %5053 = vmatmul.f32.gmra.mxu0 %v16400_v1  ;;  %v13030_v60 = vadd.f32 %v4567_v54, %v4361_v47  ;;  %v3362_v57 = vadd.f32 %v16405_v49, %v3097_v0  ;;  %v16406_v47 = vld [vmem:[#allocation87_spill] sm:$0xff]  ;;  %v16410_v0 = vand.u32 4294901760, %v12453_v31 }
 0x533   : > { %v3980_v63 = vpop.f32.mrf.mxu2  ;;  %v4145_v35 = vpop.f32.mrf.mxu3  ;;  %v16413_v49 = vld [vmem:[#allocation91_spill] sm:$0xff] }
 0x534   : > { %v3981_v62 = vadd.f32 %v3980_v63, %v3764_v15  ;;  %5200 = vmatmul.f32.gmra.mxu1 %v16400_v1  ;;  %v3770_v1 = vadd.f32 %v16407_v28, %v3556_v14  ;;  %v16411_v14 = vld [vmem:[#allocation95_spill] sm:$0xff] }
 0x536   : > { %v4142_v38 = vadd.f32 %v4141_v40, %v3981_v62 }
 0x537   : > { %v4384_v20 = vpop.f32.mrf.mxu0 }
 0x538   : > { %4664 = vmatmul.f32.gmra.mxu2 %v12417_v42  ;;  %4854 = vmatmul.f32.gmra.mxu3 %v16404_v48  ;;  %v4369_v59 = vadd.f32 %v4368_v51, %v4142_v38  ;;  %v3105_v42 = vadd.f32 %v12632_v19, %v16408_v46  ;;  %v3561_v51 = vadd.f32 %v16409_v34, %v3362_v57  ;;  %v16414_v57 = vld [vmem:[#allocation98_spill] sm:$0xff] }
 0x539   : > { %v4579_v54 = vpop.f32.mrf.mxu1  ;;  %v16415_v46 = vld [vmem:[#allocation94_spill] sm:$0xff] }
 0x53a   : > { %5057 = vmatmul.f32.gmra.mxu0 %v16406_v47  ;;  %v13042_v39 = vadd.f32 %v4571_v25, %v4369_v59  ;;  %v3366_v48 = vadd.f32 %v16411_v14, %v3105_v42  ;;  %v16412_v59 = vld [vmem:[#allocation92_spill] sm:$0xff]  ;;  %v16416_v42 = vand.u32 4294901760, %v12474_v7  ;;  %v16419_v14 = vld [vmem:[#allocation97_spill] sm:$0xff] }
 0x53b   : > { %v3984_v15 = vpop.f32.mrf.mxu2  ;;  %v4149_v40 = vpop.f32.mrf.mxu3 }
 0x53c   : > { %v3985_v63 = vadd.f32 %v3984_v15, %v3770_v1  ;;  %5204 = vmatmul.f32.gmra.mxu1 %v16406_v47  ;;  %v3776_v47 = vadd.f32 %v16413_v49, %v3561_v51  ;;  %v16417_v51 = vld [vmem:[#allocation101_spill] sm:$0xff] }
 0x53e   : > { %v4146_v62 = vadd.f32 %v4145_v35, %v3985_v63 }
 0x53f   : > { %v4392_v38 = vpop.f32.mrf.mxu0 }
 0x540   : > { %4669 = vmatmul.f32.gmra.mxu2 %v12434_v22  ;;  %4860 = vmatmul.f32.gmra.mxu3 %v16410_v0  ;;  %v4377_v3 = vadd.f32 %v4376_v44, %v4146_v62  ;;  %v3113_v22 = vadd.f32 %v12632_v19, %v16414_v57  ;;  %v3566_v44 = vadd.f32 %v16415_v46, %v3366_v48 }
 0x541   : > { %v4583_v25 = vpop.f32.mrf.mxu1 }
 0x542   : > { %5061 = vmatmul.f32.gmra.mxu0 %v16412_v59  ;;  %v13054_v28 = vadd.f32 %v4575_v45, %v4377_v3  ;;  %v3370_v0 = vadd.f32 %v16417_v51, %v3113_v22  ;;  %v16418_v3 = vld [vmem:[#allocation96_spill] sm:$0xff]  ;;  %v16425_v51 = vld [vmem:[#allocation102_spill] sm:$0xff] }
 0x543   : > { %v3988_v1 = vpop.f32.mrf.mxu2  ;;  %v4153_v35 = vpop.f32.mrf.mxu3 }
 0x544   : > { %v3989_v15 = vadd.f32 %v3988_v1, %v3776_v47  ;;  %5208 = vmatmul.f32.gmra.mxu1 %v16412_v59  ;;  %v3782_v59 = vadd.f32 %v16419_v14, %v3566_v44  ;;  %v16423_v44 = vld [vmem:[#allocation106_spill] sm:$0xff] }
 0x546   : > { %v4150_v63 = vadd.f32 %v4149_v40, %v3989_v15  ;;  %v16421_v15 = vld [vmem:[#allocation100_spill] sm:$0xff] }
 0x547   : > { %v4400_v62 = vpop.f32.mrf.mxu0  ;;  %v3571_v57 = vadd.f32 %v16421_v15, %v3370_v0  ;;  %v16426_v0 = vld [vmem:[#allocation109_spill] sm:$0xff] }
 0x548   : > { %4674 = vmatmul.f32.gmra.mxu2 %v12453_v31  ;;  %4866 = vmatmul.f32.gmra.mxu3 %v16416_v42  ;;  %v4385_v34 = vadd.f32 %v4384_v20, %v4150_v63  ;;  %v13072_v31 = vld [vmem:[%s15899_s4] ss:$0 sm:$0xff]  ;;  %v16420_v20 = vld [vmem:[#allocation104_spill] sm:$0xff] }
 0x549   : > { %v4587_v45 = vpop.f32.mrf.mxu1  ;;  %v3121_v48 = vadd.f32 %v13072_v31, %v16420_v20  ;;  %v16427_v20 = vld [vmem:[#allocation105_spill] sm:$0xff] }
 0x54a   : > { %5065 = vmatmul.f32.gmra.mxu0 %v16418_v3  ;;  %v13066_v49 = vadd.f32 %v4579_v54, %v4385_v34  ;;  %v16422_v54 = vand.u32 4294901760, %v12495_v33  ;;  %v16424_v34 = vld [vmem:[#allocation99_spill] sm:$0xff] }
 0x54b   : > { %v3992_v19 = vpop.f32.mrf.mxu2  ;;  %v4157_v40 = vpop.f32.mrf.mxu3  ;;  %v3374_v42 = vadd.f32 %v16423_v44, %v3121_v48  ;;  %v16428_v48 = vand.u32 4294901760, %v12514_v16  ;;  %v16431_v44 = vld [vmem:[#allocation107_spill] sm:$0xff] }
 0x54c   : > { %v3993_v47 = vadd.f32 %v3992_v19, %v3782_v59  ;;  %5212 = vmatmul.f32.gmra.mxu1 %v16418_v3  ;;  %v3788_v3 = vadd.f32 %v16425_v51, %v3571_v57  ;;  %v16429_v57 = vld [vmem:[#allocation112_spill] sm:$0xff] }
 0x54e   : > { %v4154_v1 = vadd.f32 %v4153_v35, %v3993_v47 }
 0x54f   : > { %v4408_v22 = vpop.f32.mrf.mxu0 }
 0x550   : > { %4679 = vmatmul.f32.gmra.mxu2 %v12474_v7  ;;  %4872 = vmatmul.f32.gmra.mxu3 %v16422_v54  ;;  %v4393_v63 = vadd.f32 %v4392_v38, %v4154_v1  ;;  %v3129_v7 = vadd.f32 %v13072_v31, %v16426_v0  ;;  %v3576_v38 = vadd.f32 %v16427_v20, %v3374_v42  ;;  %v16432_v42 = vld [vmem:[#allocation116_spill] sm:$0xff]  ;;  %v16433_v0 = vld [vmem:[#allocation111_spill] sm:$0xff] }
 0x551   : > { %v4591_v46 = vpop.f32.mrf.mxu1 }
 0x552   : > { %5069 = vmatmul.f32.gmra.mxu0 %v16424_v34  ;;  %v13083_v14 = vadd.f32 %v4583_v25, %v4393_v63  ;;  %v3378_v54 = vadd.f32 %v16429_v57, %v3129_v7  ;;  %v16430_v63 = vld [vmem:[#allocation103_spill] sm:$0xff]  ;;  %v16434_v7 = vld [vmem:[#allocation110_spill] sm:$0xff]  ;;  %v16437_v57 = vld [vmem:[#allocation108_spill] sm:$0xff] }
 0x553   : > { %v3996_v59 = vpop.f32.mrf.mxu2  ;;  %v4161_v35 = vpop.f32.mrf.mxu3  ;;  %v16435_v20 = vand.u32 4294901760, %v16434_v7 }
 0x554   : > { %v3997_v19 = vadd.f32 %v3996_v59, %v3788_v3  ;;  %5216 = vmatmul.f32.gmra.mxu1 %v16424_v34  ;;  %v3794_v34 = vadd.f32 %v16431_v44, %v3576_v38  ;;  %v16438_v44 = vld [vmem:[#allocation113_spill] sm:$0xff] }
 0x556   : > { %v4158_v47 = vadd.f32 %v4157_v40, %v3997_v19 }
 0x557   : > { %v4416_v1 = vpop.f32.mrf.mxu0 }
 0x558   : > { %4684 = vmatmul.f32.gmra.mxu2 %v12495_v33  ;;  %4878 = vmatmul.f32.gmra.mxu3 %v16428_v48  ;;  %v4401_v15 = vadd.f32 %v4400_v62, %v4158_v47  ;;  %v3137_v33 = vadd.f32 %v13072_v31, %v16432_v42  ;;  %v3581_v62 = vadd.f32 %v16433_v0, %v3378_v54  ;;  %v16436_v48 = vld [vmem:[#allocation118_spill] sm:$0xff]  ;;  %v16440_v0 = vld [vmem:[#allocation117_spill] sm:$0xff] }
 0x559   : > { %v4595_v25 = vpop.f32.mrf.mxu1  ;;  %v16439_v54 = vld [vmem:[#allocation122_spill] sm:$0xff] }
 0x55a   : > { %5073 = vmatmul.f32.gmra.mxu0 %v16430_v63  ;;  %v13095_v51 = vadd.f32 %v4587_v45, %v4401_v15  ;;  %v3382_v15 = vadd.f32 %v16436_v48, %v3137_v33  ;;  %v16441_v33 = vld [vmem:[#allocation115_spill] sm:$0xff] }
 0x55b   : > { %v4000_v3 = vpop.f32.mrf.mxu2  ;;  %v4165_v40 = vpop.f32.mrf.mxu3 }
 0x55c   : > { %v4001_v59 = vadd.f32 %v4000_v3, %v3794_v34  ;;  %5220 = vmatmul.f32.gmra.mxu1 %v16430_v63  ;;  %v3800_v63 = vadd.f32 %v16438_v44, %v3581_v62  ;;  %v16444_v44 = vld [vmem:[#allocation114_spill] sm:$0xff] }
 0x55e   : > { %v4162_v19 = vadd.f32 %v4161_v35, %v4001_v59 }
 0x55f   : > { %v4424_v47 = vpop.f32.mrf.mxu0 }
 0x560   : > { %4689 = vmatmul.f32.gmra.mxu2 %v12514_v16  ;;  %4884 = vmatmul.f32.gmra.mxu3 %v16435_v20  ;;  %v4409_v38 = vadd.f32 %v4408_v22, %v4162_v19  ;;  %v3145_v16 = vadd.f32 %v13072_v31, %v16439_v54  ;;  %v3586_v22 = vadd.f32 %v16440_v0, %v3382_v15  ;;  %v16442_v20 = vand.u32 4294901760, %v16441_v33  ;;  %v16447_v15 = vld [vmem:[#allocation128_spill] sm:$0xff] }
 0x561   : > { %v4599_v45 = vpop.f32.mrf.mxu1 }
 0x562   : > { %5077 = vmatmul.f32.gmra.mxu0 %v16437_v57  ;;  %v13107_v34 = vadd.f32 %v4591_v46, %v4409_v38  ;;  %v16443_v38 = vld [vmem:[#allocation124_spill] sm:$0xff] }
 0x563   : > { %v4004_v3 = vpop.f32.mrf.mxu2  ;;  %v4169_v35 = vpop.f32.mrf.mxu3  ;;  %v3386_v48 = vadd.f32 %v16443_v38, %v3145_v16  ;;  %v16449_v16 = vld [vmem:[#allocation121_spill] sm:$0xff] }
 0x564   : > { %v4005_v59 = vadd.f32 %v4004_v3, %v3800_v63  ;;  %5224 = vmatmul.f32.gmra.mxu1 %v16437_v57  ;;  %v16445_v63 = vld [vmem:[#allocation120_spill] sm:$0xff]  ;;  %v16450_v38 = vand.u32 4294901760, %v16449_v16 }
 0x565   : > { %v3806_v57 = vadd.f32 %v16445_v63, %v3586_v22 }
 0x566   : > { %v4166_v42 = vadd.f32 %v4165_v40, %v4005_v59 }
 0x567   : > { %v4432_v19 = vpop.f32.mrf.mxu0 }
 0x568   : > { %4694 = vmatmul.f32.gmra.mxu2 %v16434_v7  ;;  %4890 = vmatmul.f32.gmra.mxu3 %v16442_v20  ;;  %v4417_v62 = vadd.f32 %v4416_v1, %v4166_v42  ;;  %v3153_v7 = vadd.f32 %v13072_v31, %v16447_v15  ;;  %v16448_v20 = vld [vmem:[#allocation123_spill] sm:$0xff] }
 0x569   : > { %v4603_v46 = vpop.f32.mrf.mxu1  ;;  %v3591_v1 = vadd.f32 %v16448_v20, %v3386_v48  ;;  %v16455_v48 = vld [vmem:[#allocation134_spill] sm:$0xff] }
 0x56a   : > { %5081 = vmatmul.f32.gmra.mxu0 %v16444_v44  ;;  %v13119_v3 = vadd.f32 %v4595_v25, %v4417_v62  ;;  %v16451_v62 = vld [vmem:[#allocation130_spill] sm:$0xff] }
 0x56b   : > { %v4008_v54 = vpop.f32.mrf.mxu2  ;;  %v4173_v40 = vpop.f32.mrf.mxu3  ;;  %v3390_v63 = vadd.f32 %v16451_v62, %v3153_v7  ;;  %v16457_v7 = vld [vmem:[#allocation127_spill] sm:$0xff] }
 0x56c   : > { %16446 = vst [vmem:[#allocation25_spill] sm:$0xff] %v13119_v3  ;;  %v4009_v59 = vadd.f32 %v4008_v54, %v3806_v57  ;;  %5228 = vmatmul.f32.gmra.mxu1 %v16444_v44  ;;  %v16452_v3 = vld [vmem:[#allocation119_spill] sm:$0xff]  ;;  %v16453_v57 = vld [vmem:[#allocation126_spill] sm:$0xff]  ;;  %v16458_v62 = vand.u32 4294901760, %v16457_v7 }
 0x56d   : > { %v3812_v44 = vadd.f32 %v16453_v57, %v3591_v1 }
 0x56e   : > { %v4170_v0 = vadd.f32 %v4169_v35, %v4009_v59 }
 0x56f   : > { %v4440_v42 = vpop.f32.mrf.mxu0 }
 0x570   : > { %4699 = vmatmul.f32.gmra.mxu2 %v16441_v33  ;;  %4896 = vmatmul.f32.gmra.mxu3 %v16450_v38  ;;  %v4425_v22 = vadd.f32 %v4424_v47, %v4170_v0  ;;  %v3161_v33 = vadd.f32 %v13072_v31, %v16455_v48  ;;  %v16456_v38 = vld [vmem:[#allocation129_spill] sm:$0xff] }
 0x571   : > { %v4607_v25 = vpop.f32.mrf.mxu1  ;;  %v3596_v47 = vadd.f32 %v16456_v38, %v3390_v63 }
 0x572   : > { %5085 = vmatmul.f32.gmra.mxu0 %v16452_v3  ;;  %v13131_v54 = vadd.f32 %v4599_v45, %v4425_v22  ;;  %v16459_v22 = vld [vmem:[#allocation136_spill] sm:$0xff] }
 0x573   : > { %v4012_v15 = vpop.f32.mrf.mxu2  ;;  %v4177_v35 = vpop.f32.mrf.mxu3  ;;  %v3394_v57 = vadd.f32 %v16459_v22, %v3161_v33  ;;  %v16465_v22 = vld [vmem:[#allocation131_spill] sm:$0xff] }
 0x574   : > { %16454 = vst [vmem:[#allocation31_spill] sm:$0xff] %v13131_v54  ;;  %v4013_v59 = vadd.f32 %v4012_v15, %v3812_v44  ;;  %5232 = vmatmul.f32.gmra.mxu1 %v16452_v3  ;;  %v16460_v54 = vld [vmem:[#allocation125_spill] sm:$0xff]  ;;  %v16461_v44 = vld [vmem:[#allocation132_spill] sm:$0xff] }
 0x575   : > { %v3818_v3 = vadd.f32 %v16461_v44, %v3596_v47 }
 0x576   : > { %v4174_v20 = vadd.f32 %v4173_v40, %v4013_v59 }
 0x577   : > { %v4448_v0 = vpop.f32.mrf.mxu0 }
 0x578   : > { %4704 = vmatmul.f32.gmra.mxu2 %v16449_v16  ;;  %4902 = vmatmul.f32.gmra.mxu3 %v16458_v62  ;;  %v4433_v1 = vadd.f32 %v4432_v19, %v4174_v20  ;;  %v16462_v16 = vld [vmem:[#allocation135_spill] sm:$0xff]  ;;  %v16463_v19 = vld [vmem:[#allocation133_spill] sm:$0xff] }
 0x579   : > { %v4611_v45 = vpop.f32.mrf.mxu1  ;;  %v3601_v48 = vadd.f32 %v16462_v16, %v3394_v57  ;;  %v16464_v20 = vand.u32 4294901760, %v16463_v19 }
 0x57a   : > { %5089 = vmatmul.f32.gmra.mxu0 %v16460_v54  ;;  %v13143_v15 = vadd.f32 %v4603_v46, %v4433_v1  ;;  %v16466_v46 = vld [vmem:[#allocation138_spill] sm:$0xff] }
 0x57b   : > { %v4016_v31 = vpop.f32.mrf.mxu2  ;;  %v4181_v40 = vpop.f32.mrf.mxu3  ;;  %v3824_v47 = vadd.f32 %v16466_v46, %v3601_v48  ;;  %v16471_v46 = vld [vmem:[#allocation141_spill] sm:$0xff] }
 0x57c   : > { %v4017_v59 = vadd.f32 %v4016_v31, %v3818_v3  ;;  %5236 = vmatmul.f32.gmra.mxu1 %v16460_v54 }
 0x57e   : > { %v4178_v63 = vadd.f32 %v4177_v35, %v4017_v59 }
 0x57f   : > { %v4456_v38 = vpop.f32.mrf.mxu0 }
 0x580   : > { %4709 = vmatmul.f32.gmra.mxu2 %v16457_v7  ;;  %4908 = vmatmul.f32.gmra.mxu3 %v16464_v20  ;;  %v4441_v33 = vadd.f32 %v4440_v42, %v4178_v63  ;;  %v16467_v7 = vld [vmem:[#allocation139_spill] sm:$0xff]  ;;  %v16469_v63 = vld [vmem:[#allocation137_spill] sm:$0xff]  ;;  %v16470_v20 = vld [vmem:[#allocation142_spill] sm:$0xff] }
 0x581   : > { %v4615_v62 = vpop.f32.mrf.mxu1  ;;  %v16468_v31 = vand.u32 4294901760, %v16467_v7 }
 0x582   : > { %5093 = vmatmul.f32.gmra.mxu0 %v16465_v22  ;;  %v13152_v1 = vadd.f32 %v4607_v25, %v4441_v33 }
 0x583   : > { %v4020_v44 = vpop.f32.mrf.mxu2  ;;  %v4185_v3 = vpop.f32.mrf.mxu3 }
 0x584   : > { %v4021_v54 = vadd.f32 %v4020_v44, %v3824_v47  ;;  %5240 = vmatmul.f32.gmra.mxu1 %v16465_v22  ;;  %v5446_v22 = vld [vmem:[#allocation3 + $0x141] sm:$0xff] }
 0x585   : > { %5462 = vrot.lane.b32.xlu2 %v5446_v22, %s9900_s17 }
 0x586   : > { %v4182_v35 = vadd.f32 %v4181_v40, %v4021_v54 }
 0x587   : > { %v4464_v57 = vpop.f32.mrf.mxu0 }
 0x588   : > { %4714 = vmatmul.f32.gmra.mxu2 %v16463_v19  ;;  %4914 = vmatmul.f32.gmra.mxu3 %v16468_v31  ;;  %v4449_v42 = vadd.f32 %v4448_v0, %v4182_v35  ;;  %v16472_v0 = vand.u32 4294901760, %v16471_v46 }
 0x589   : > { %v4619_v59 = vpop.f32.mrf.mxu1 }
 0x58a   : > { %5097 = vmatmul.f32.gmra.mxu0 %v16469_v63  ;;  %v13159_v16 = vadd.f32 %v4611_v45, %v4449_v42  ;;  %v16473_v45 = vld [vmem:[#allocation140_spill] sm:$0xff] }
 0x58b   : > { %v4024_v25 = vpop.f32.mrf.mxu2  ;;  %v4189_v48 = vpop.f32.mrf.mxu3 }
 0x58c   : > { %v4025_v33 = vadd.f32 %v4024_v25, %v16470_v20  ;;  %5244 = vmatmul.f32.gmra.mxu1 %v16469_v63  ;;  %v5494_v63 = vld [vmem:[#allocation3 + $0x1e1] sm:$0xff] }
 0x58d   : > { %5510 = vrot.lane.b32.xlu0 %v5494_v63, %s9901_s21  ;;  %v16474_v25 = vld [vmem:[#allocation143_spill] sm:$0xff] }
 0x58e   : > { %v4186_v40 = vadd.f32 %v4185_v3, %v4025_v33 }
 0x58f   : > { %v5038_v19 = vpop.f32.mrf.mxu0 }
 0x590   : > { %4719 = vmatmul.f32.gmra.mxu2 %v16467_v7  ;;  %4920 = vmatmul.f32.gmra.mxu3 %v16472_v0  ;;  %v4457_v47 = vadd.f32 %v4456_v38, %v4186_v40  ;;  %v16475_v38 = vand.u32 4294901760, %v16474_v25 }
 0x591   : > { %v5185_v44 = vpop.f32.mrf.mxu1 }
 0x592   : > { %5101 = vmatmul.f32.gmra.mxu0 %v16473_v45  ;;  %v13168_v54 = vadd.f32 %v4615_v62, %v4457_v47 }
 0x593   : > { %v4028_v35 = vpop.f32.mrf.mxu2  ;;  %v4825_v31 = vpop.f32.mrf.mxu3 }
 0x594   : > { %v4029_v42 = vadd.f32 %v4028_v35, %v12698_v26  ;;  %5248 = vmatmul.f32.gmra.mxu1 %v16473_v45 }
 0x596   : > { %v4190_v3 = vadd.f32 %v4189_v48, %v4029_v42  ;;  %v16477_v42 = vand.u32 4294901760, %v12705_v27 }
 0x597   : > { %v5042_v7 = vpop.f32.mrf.mxu0 }
 0x598   : > { %4724 = vmatmul.f32.gmra.mxu2 %v16471_v46  ;;  %4926 = vmatmul.f32.gmra.mxu3 %v16475_v38  ;;  %v4465_v20 = vadd.f32 %v4464_v57, %v4190_v3  ;;  %v16476_v46 = vand.u32 4294901760, %v12685_v4 }
 0x599   : > { %v5189_v33 = vpop.f32.mrf.mxu1 }
 0x59a   : > { %5105 = vmatmul.f32.gmra.mxu0 %v12661_v6  ;;  %v13177_v62 = vadd.f32 %v4619_v59, %v4465_v20  ;;  %v16478_v20 = vand.u32 4294901760, %v12725_v12 }
 0x59b   : > { %v4645_v22 = vpop.f32.mrf.mxu2  ;;  %v4831_v26 = vpop.f32.mrf.mxu3 }
 0x59c   : > { %v4646_v40 = vadd.f32 %v4645_v22, %v12718_v50  ;;  %5252 = vmatmul.f32.gmra.mxu1 %v12661_v6 }
 0x59e   : > { %v4826_v0 = vadd.f32 %v4825_v31, %v4646_v40 }
 0x59f   : > { %v5046_v48 = vpop.f32.mrf.mxu0 }
 0x5a0   : > { %v5039_v47 = vadd.f32 %v5038_v19, %v4826_v0  ;;  %4729 = vmatmul.f32.gmra.mxu2 %v16474_v25  ;;  %4932 = vmatmul.f32.gmra.mxu3 %v16476_v46 }
 0x5a1   : > { %v5193_v57 = vpop.f32.mrf.mxu1 }
 0x5a2   : > { %v5186_v45 = vadd.f32 %v5185_v44, %v5039_v47  ;;  %5109 = vmatmul.f32.gmra.mxu0 %v12676_v52  ;;  %v16479_v47 = vand.u32 4294901760, %v12746_v5 }
 0x5a3   : > { %v4650_v59 = vpop.f32.mrf.mxu2  ;;  %v4837_v35 = vpop.f32.mrf.mxu3 }
 0x5a4   : > { %5393 = vst.msk [vmem:[#allocation3 + $0x11] sm:$0xff] %vm1027_vm0, %v5186_v45  ;;  %v4651_v50 = vadd.f32 %v4650_v59, %v12739_v30  ;;  %5256 = vmatmul.f32.gmra.mxu1 %v12676_v52 }
 0x5a6   : > { %v4832_v6 = vadd.f32 %v4831_v26, %v4651_v50 }
 0x5a7   : > { %v5050_v31 = vpop.f32.mrf.mxu0 }
 0x5a8   : > { %v5043_v19 = vadd.f32 %v5042_v7, %v4832_v6  ;;  %4734 = vmatmul.f32.gmra.mxu2 %v12685_v4  ;;  %4938 = vmatmul.f32.gmra.mxu3 %v16477_v42  ;;  %v16480_v6 = vand.u32 4294901760, %v12767_v9 }
 0x5a9   : > { %v5197_v63 = vpop.f32.mrf.mxu1 }
 0x5aa   : > { %v5190_v44 = vadd.f32 %v5189_v33, %v5043_v19  ;;  %5113 = vmatmul.f32.gmra.mxu0 %v12694_v56 }
 0x5ab   : > { %v4655_v3 = vpop.f32.mrf.mxu2  ;;  %v4843_v25 = vpop.f32.mrf.mxu3  ;;  %v5590_v38 = vld [vmem:[#allocation3 + $0x11] sm:$0xff] }
 0x5ac   : > { %5394 = vst.msk [vmem:[#allocation3 + $0x21] sm:$0xff] %vm1027_vm0, %v5190_v44  ;;  %v4656_v30 = vadd.f32 %v4655_v3, %v12759_v55  ;;  %5260 = vmatmul.f32.gmra.mxu1 %v12694_v56  ;;  %5606 = vrot.lane.b32.xlu2 %v5590_v38, %s9905_s28 }
 0x5ae   : > { %v4838_v52 = vadd.f32 %v4837_v35, %v4656_v30 }
 0x5af   : > { %v5054_v4 = vpop.f32.mrf.mxu0 }
 0x5b0   : > { %v5047_v7 = vadd.f32 %v5046_v48, %v4838_v52  ;;  %4739 = vmatmul.f32.gmra.mxu2 %v12705_v27  ;;  %4944 = vmatmul.f32.gmra.mxu3 %v16478_v20 }
 0x5b1   : > { %v5201_v33 = vpop.f32.mrf.mxu1 }
 0x5b2   : > { %v5194_v22 = vadd.f32 %v5193_v57, %v5047_v7  ;;  %5117 = vmatmul.f32.gmra.mxu0 %v12714_v36 }
 0x5b3   : > { %v4660_v26 = vpop.f32.mrf.mxu2  ;;  %v4849_v40 = vpop.f32.mrf.mxu3  ;;  %v5591_v0 = vld [vmem:[#allocation3 + $0x21] sm:$0xff] }
 0x5b4   : > { %5395 = vst.msk [vmem:[#allocation3 + $0x31] sm:$0xff] %vm1027_vm0, %v5194_v22  ;;  %v4661_v56 = vadd.f32 %v4660_v26, %v12782_v10  ;;  %5264 = vmatmul.f32.gmra.mxu1 %v12714_v36  ;;  %5608 = vrot.lane.b32.xlu0 %v5591_v0, %s9905_s28 }
 0x5b6   : > { %v4844_v55 = vadd.f32 %v4843_v25, %v4661_v56  ;;  %v16481_v25 = vand.u32 4294901760, %v12780_v13 }
 0x5b7   : > { %v5058_v27 = vpop.f32.mrf.mxu0 }
 0x5b8   : > { %v5051_v48 = vadd.f32 %v5050_v31, %v4844_v55  ;;  %4744 = vmatmul.f32.gmra.mxu2 %v12725_v12  ;;  %4950 = vmatmul.f32.gmra.mxu3 %v16479_v47  ;;  %v16485_v47 = vld [vmem:[#allocation28_spill] sm:$0xff] }
 0x5b9   : > { %v5205_v46 = vpop.f32.mrf.mxu1 }
 0x5ba   : > { %v5198_v57 = vadd.f32 %v5197_v63, %v5051_v48  ;;  %5121 = vmatmul.f32.gmra.mxu0 %v12735_v23 }
 0x5bb   : > { %v4665_v45 = vpop.f32.mrf.mxu2  ;;  %v4855_v59 = vpop.f32.mrf.mxu3  ;;  %v5592_v35 = vld [vmem:[#allocation3 + $0x31] sm:$0xff] }
 0x5bc   : > { %5396 = vst.msk [vmem:[#allocation3 + $0x41] sm:$0xff] %vm1027_vm0, %v5198_v57  ;;  %v4666_v36 = vadd.f32 %v4665_v45, %v12802_v43  ;;  %5268 = vmatmul.f32.gmra.mxu1 %v12735_v23  ;;  %5610 = vrot.lane.b32.xlu1 %v5592_v35, %s9905_s28 }
 0x5be   : > { %v4850_v10 = vadd.f32 %v4849_v40, %v4666_v36  ;;  %v16483_v40 = vld [vmem:[#allocation33_spill] sm:$0xff] }
 0x5bf   : > { %v5062_v12 = vpop.f32.mrf.mxu0 }
 0x5c0   : > { %v5055_v50 = vadd.f32 %v5054_v4, %v4850_v10  ;;  %4749 = vmatmul.f32.gmra.mxu2 %v12746_v5  ;;  %4956 = vmatmul.f32.gmra.mxu3 %v16480_v6  ;;  %v16488_v10 = vld [vmem:[#allocation29_spill] sm:$0xff] }
 0x5c1   : > { %v5209_v31 = vpop.f32.mrf.mxu1 }
 0x5c2   : > { %v5202_v19 = vadd.f32 %v5201_v33, %v5055_v50  ;;  %5125 = vmatmul.f32.gmra.mxu0 %v12755_v29  ;;  %v16482_v33 = vand.u32 4294901760, %v12806_v17 }
 0x5c3   : > { %v4670_v42 = vpop.f32.mrf.mxu2  ;;  %v4861_v63 = vpop.f32.mrf.mxu3  ;;  %v5593_v44 = vld [vmem:[#allocation3 + $0x41] sm:$0xff] }
 0x5c4   : > { %5397 = vst.msk [vmem:[#allocation3 + $0x51] sm:$0xff] %vm1027_vm0, %v5202_v19  ;;  %v4671_v23 = vadd.f32 %v4670_v42, %v12819_v11  ;;  %5272 = vmatmul.f32.gmra.mxu1 %v12755_v29  ;;  %5612 = vrot.lane.b32.xlu2 %v5593_v44, %s9905_s28  ;;  %v16491_v44 = vld [vmem:[#allocation16_spill] sm:$0xff] }
 0x5c6   : > { %v4856_v43 = vadd.f32 %v4855_v59, %v4671_v23  ;;  %v16487_v59 = vld [vmem:[#allocation23_spill] sm:$0xff] }
 0x5c7   : > { %v5066_v5 = vpop.f32.mrf.mxu0 }
 0x5c8   : > { %v5059_v3 = vadd.f32 %v5058_v27, %v4856_v43  ;;  %4754 = vmatmul.f32.gmra.mxu2 %v12767_v9  ;;  %4962 = vmatmul.f32.gmra.mxu3 %v16481_v25  ;;  %v5429_v25 = vld [vmem:[#allocation3 + $0x1e0] sm:$0xff] }
 0x5c9   : > { %v5213_v38 = vpop.f32.mrf.mxu1  ;;  %5437 = vst.msk [vmem:[#allocation5] sm:$0xff] %vm1027_vm0, %v5429_v25 }
 0x5ca   : > { %v5206_v30 = vadd.f32 %v5205_v46, %v5059_v3  ;;  %5129 = vmatmul.f32.gmra.mxu0 %v12772_v53  ;;  %v16486_v46 = vand.u32 4294901760, %v16485_v47 }
 0x5cb   : > { %v4675_v52 = vpop.f32.mrf.mxu2  ;;  %v4867_v4 = vpop.f32.mrf.mxu3  ;;  %v5594_v7 = vld [vmem:[#allocation3 + $0x51] sm:$0xff] }
 0x5cc   : > { %5398 = vst.msk [vmem:[#allocation3 + $0x61] sm:$0xff] %vm1027_vm0, %v5206_v30  ;;  %v4676_v29 = vadd.f32 %v4675_v52, %v12839_v32  ;;  %5276 = vmatmul.f32.gmra.mxu1 %v12772_v53  ;;  %5614 = vrot.lane.b32.xlu0 %v5594_v7, %s9905_s28  ;;  %v16484_v53 = vld [vmem:[#allocation20_spill] sm:$0xff] }
 0x5ce   : > { %v4862_v11 = vadd.f32 %v4861_v63, %v4676_v29 }
 0x5cf   : > { %v5070_v9 = vpop.f32.mrf.mxu0 }
 0x5d0   : > { %v5063_v20 = vadd.f32 %v5062_v12, %v4862_v11  ;;  %4759 = vmatmul.f32.gmra.mxu2 %v12780_v13  ;;  %4968 = vmatmul.f32.gmra.mxu3 %v16482_v33 }
 0x5d1   : > { %v5217_v22 = vpop.f32.mrf.mxu1 }
 0x5d2   : > { %v5210_v26 = vadd.f32 %v5209_v31, %v5063_v20  ;;  %5133 = vmatmul.f32.gmra.mxu0 %v16483_v40 }
 0x5d3   : > { %v4680_v0 = vpop.f32.mrf.mxu2  ;;  %v4873_v56 = vpop.f32.mrf.mxu3  ;;  %v5595_v55 = vld [vmem:[#allocation3 + $0x61] sm:$0xff] }
 0x5d4   : > { %5399 = vst.msk [vmem:[#allocation3 + $0x71] sm:$0xff] %vm1027_vm0, %v5210_v26  ;;  %v4681_v32 = vadd.f32 %v4680_v0, %v16484_v53  ;;  %5280 = vmatmul.f32.gmra.mxu1 %v16483_v40  ;;  %5616 = vrot.lane.b32.xlu1 %v5595_v55, %s9905_s28  ;;  %v16495_v26 = vld [vmem:[#allocation19_spill] sm:$0xff] }
 0x5d6   : > { %v4868_v27 = vadd.f32 %v4867_v4, %v4681_v32 }
 0x5d7   : > { %v5074_v13 = vpop.f32.mrf.mxu0 }
 0x5d8   : > { %v5067_v48 = vadd.f32 %v5066_v5, %v4868_v27  ;;  %4764 = vmatmul.f32.gmra.mxu2 %v12806_v17  ;;  %4974 = vmatmul.f32.gmra.mxu3 %v16486_v46  ;;  %v16489_v17 = vld [vmem:[#allocation21_spill] sm:$0xff]  ;;  %v16492_v5 = vld [vmem:[#allocation35_spill] sm:$0xff]  ;;  %v16496_v46 = vld [vmem:[#allocation18_spill] sm:$0xff] }
 0x5d9   : > { %v5221_v57 = vpop.f32.mrf.mxu1  ;;  %v16490_v19 = vand.u32 4294901760, %v16489_v17 }
 0x5da   : > { %v5214_v45 = vadd.f32 %v5213_v38, %v5067_v48  ;;  %5137 = vmatmul.f32.gmra.mxu0 %v16487_v59  ;;  %v5829_v38 = vld [vmem:[%s15900_s5 + $0x78] sm:$0xff] }
 0x5db   : > { %v4685_v35 = vpop.f32.mrf.mxu2  ;;  %v4879_v36 = vpop.f32.mrf.mxu3  ;;  %v13254_v30 = vand.u32 4294901760, %v5829_v38 }
 0x5dc   : > { %5400 = vst.msk [vmem:[#allocation3 + $0x81] sm:$0xff] %vm1027_vm0, %v5214_v45  ;;  %v4686_v12 = vadd.f32 %v4685_v35, %v16488_v10  ;;  %5284 = vmatmul.f32.gmra.mxu1 %v16487_v59  ;;  %v16498_v35 = vld [vmem:[#allocation39_spill] sm:$0xff] }
 0x5dd   : > { %5861 = vmatpush.msra.mxu2 %v13254_v30  ;;  %v13258_v29 = vsub.f32 %v5829_v38, %v13254_v30  ;;  %6176 = vmatpush.msrb.mxu1 %v13254_v30 }
 0x5de   : > { %v4874_v50 = vadd.f32 %v4873_v56, %v4686_v12 }
 0x5df   : > { %v5078_v6 = vpop.f32.mrf.mxu0  ;;  %v5463_v7 = vpop.permute.xlu2 %5462  ;;  %6088 = vmatpush.msrb.mxu0 %v13258_v29  ;;  %v5959_v32 = vand.u32 4294901760, %v13258_v29 }
 0x5e0   : > { %v5071_v31 = vadd.f32 %v5070_v9, %v4874_v50  ;;  %4769 = vmatmul.f32.gmra.mxu2 %v16485_v47  ;;  %4980 = vmatmul.f32.gmra.mxu3 %v16490_v19  ;;  %v16493_v9 = vld [vmem:[#allocation24_spill] sm:$0xff]  ;;  %5486 = vst.msk [vmem:[#allocation5] sm:$0xff] %vm1283_vm2, %v5463_v7 }
 0x5e1   : > { %v5225_v42 = vpop.f32.mrf.mxu1  ;;  %v16494_v20 = vand.u32 4294901760, %v16493_v9 }
 0x5e2   : > { %v5218_v63 = vadd.f32 %v5217_v22, %v5071_v31  ;;  %5141 = vmatmul.f32.gmra.mxu0 %v16491_v44 }
 0x5e3   : > { %v4690_v23 = vpop.f32.mrf.mxu2  ;;  %v4885_v43 = vpop.f32.mrf.mxu3 }
 0x5e4   : > { %5402 = vst.msk [vmem:[#allocation3 + $0xb1] sm:$0xff] %vm1027_vm0, %v5218_v63  ;;  %v4691_v3 = vadd.f32 %v4690_v23, %v16492_v5  ;;  %5288 = vmatmul.f32.gmra.mxu1 %v16491_v44  ;;  %v16501_v5 = vld [vmem:[#allocation17_spill] sm:$0xff] }
 0x5e6   : > { %v4880_v52 = vadd.f32 %v4879_v36, %v4691_v3 }
 0x5e7   : > { %v5082_v4 = vpop.f32.mrf.mxu0 }
 0x5e8   : > { %v5075_v11 = vadd.f32 %v5074_v13, %v4880_v52  ;;  %4774 = vmatmul.f32.gmra.mxu2 %v16489_v17  ;;  %4986 = vmatmul.f32.gmra.mxu3 %v16494_v20  ;;  %v5960_v13 = vsub.f32 %v13258_v29, %v5959_v32 }
 0x5e9   : > { %v5229_v33 = vpop.f32.mrf.mxu1 }
 0x5ea   : > { %v5222_v22 = vadd.f32 %v5221_v57, %v5075_v11  ;;  %5145 = vmatmul.f32.gmra.mxu0 %v16495_v26  ;;  %v16497_v57 = vand.u32 4294901760, %v16496_v46 }
 0x5eb   : > { %v4695_v40 = vpop.f32.mrf.mxu2  ;;  %v4891_v0 = vpop.f32.mrf.mxu3  ;;  %v5542_v56 = vld [vmem:[#allocation3 + $0xb0] sm:$0xff] }
 0x5ec   : > { %v5638_v55 = vld [vmem:[#allocation3 + $0xb1] sm:$0xff]  ;;  %5403 = vst.msk [vmem:[#allocation3 + $0xc1] sm:$0xff] %vm1027_vm0, %v5222_v22  ;;  %v4696_v53 = vadd.f32 %v4695_v40, %v12920_v18  ;;  %5292 = vmatmul.f32.gmra.mxu1 %v16495_v26  ;;  %5558 = vrot.lane.b32.xlu1 %v5542_v56, %s9906_s29  ;;  %v5961_v18 = vand.u32 4294901760, %v5960_v13  ;;  %v16502_v22 = vld [vmem:[#allocation22_spill] sm:$0xff] }
 0x5ed   : > { %5654 = vrot.lane.b32.xlu0 %v5638_v55, %s9903_s24  ;;  %v16504_v56 = vld [vmem:[#allocation34_spill] sm:$0xff] }
 0x5ee   : > { %v4886_v27 = vadd.f32 %v4885_v43, %v4696_v53  ;;  %5962 = vmatpush.msra.mxu3 %v5961_v18 }
 0x5ef   : > { %v5086_v48 = vpop.f32.mrf.mxu0 }
 0x5f0   : > { %v5079_v47 = vadd.f32 %v5078_v6, %v4886_v27  ;;  %4779 = vmatmul.f32.gmra.mxu2 %v16493_v9  ;;  %4992 = vmatmul.f32.gmra.mxu3 %v16497_v57  ;;  %v5828_v6 = vld [vmem:[%s15900_s5 + $0x70] sm:$0xff] }
 0x5f1   : > { %v5233_v45 = vpop.f32.mrf.mxu1  ;;  %v13288_v17 = vand.u32 4294901760, %v5828_v6 }
 0x5f2   : > { %v5226_v59 = vadd.f32 %v5225_v42, %v5079_v47  ;;  %5149 = vmatmul.f32.gmra.mxu0 %v16498_v35 }
 0x5f3   : > { %v4700_v36 = vpop.f32.mrf.mxu2  ;;  %v4897_v10 = vpop.f32.mrf.mxu3  ;;  %v5639_v12 = vld [vmem:[#allocation3 + $0xc1] sm:$0xff]  ;;  %5863 = vmatpush.msra.mxu2 %v13288_v17  ;;  %6178 = vmatpush.msrb.mxu1 %v13288_v17 }
 0x5f4   : > { %v5543_v50 = vld [vmem:[#allocation3 + $0xc0] sm:$0xff]  ;;  %5404 = vst.msk [vmem:[#allocation3 + $0xd1] sm:$0xff] %vm1027_vm0, %v5226_v59  ;;  %v4701_v31 = vadd.f32 %v4700_v36, %v12943_v37  ;;  %5296 = vmatmul.f32.gmra.mxu1 %v16498_v35  ;;  %5656 = vrot.lane.b32.xlu1 %v5639_v12, %s9903_s24 }
 0x5f5   : > { %5560 = vrot.lane.b32.xlu2 %v5543_v50, %s9906_s29  ;;  %v16499_v37 = vld [vmem:[#allocation30_spill] sm:$0xff] }
 0x5f6   : > { %v4892_v19 = vadd.f32 %v4891_v0, %v4701_v31  ;;  %v16500_v44 = vand.u32 4294901760, %v16499_v37  ;;  %v16505_v35 = vld [vmem:[#allocation38_spill] sm:$0xff] }
 0x5f7   : > { %v5090_v42 = vpop.f32.mrf.mxu0  ;;  %v16506_v36 = vand.u32 4294901760, %v16505_v35 }
 0x5f8   : > { %v5083_v63 = vadd.f32 %v5082_v4, %v4892_v19  ;;  %4784 = vmatmul.f32.gmra.mxu2 %v16496_v46  ;;  %4998 = vmatmul.f32.gmra.mxu3 %v16500_v44  ;;  %v13301_v4 = vsub.f32 %v5828_v6, %v13288_v17  ;;  %v5827_v46 = vld [vmem:[%s15900_s5 + $0x68] sm:$0xff] }
 0x5f9   : > { %v5237_v23 = vpop.f32.mrf.mxu1  ;;  %v13321_v57 = vand.u32 4294901760, %v5827_v46 }
 0x5fa   : > { %v5230_v43 = vadd.f32 %v5229_v33, %v5083_v63  ;;  %5153 = vmatmul.f32.gmra.mxu0 %v16501_v5  ;;  %v5965_v9 = vand.u32 4294901760, %v13301_v4 }
 0x5fb   : > { %v4705_v3 = vpop.f32.mrf.mxu2  ;;  %v4903_v25 = vpop.f32.mrf.mxu3  ;;  %v5544_v38 = vld [vmem:[#allocation3 + $0xd0] sm:$0xff]  ;;  %6091 = vmatpush.msrb.mxu0 %v13301_v4  ;;  %5865 = vmatpush.msra.mxu2 %v13321_v57 }
 0x5fc   : > { %v5640_v52 = vld [vmem:[#allocation3 + $0xd1] sm:$0xff]  ;;  %5405 = vst.msk [vmem:[#allocation3 + $0xe1] sm:$0xff] %vm1027_vm0, %v5230_v43  ;;  %v4706_v7 = vadd.f32 %v4705_v3, %v12960_v8  ;;  %5300 = vmatmul.f32.gmra.mxu1 %v16501_v5  ;;  %5562 = vrot.lane.b32.xlu0 %v5544_v38, %s9906_s29  ;;  %v16503_v8 = vand.u32 4294901760, %v16502_v22  ;;  %v5966_v26 = vsub.f32 %v13301_v4, %v5965_v9 }
 0x5fd   : > { %5658 = vrot.lane.b32.xlu2 %v5640_v52, %s9903_s24  ;;  %6180 = vmatpush.msrb.mxu1 %v13321_v57 }
 0x5fe   : > { %v4898_v11 = vadd.f32 %v4897_v10, %v4706_v7  ;;  %v5967_v55 = vand.u32 4294901760, %v5966_v26 }
 0x5ff   : > { %v5094_v20 = vpop.f32.mrf.mxu0  ;;  %v5511_v59 = vpop.permute.xlu0 %5510 }
 0x600   : > { %v5087_v33 = vadd.f32 %v5086_v48, %v4898_v11  ;;  %4789 = vmatmul.f32.gmra.mxu2 %v16499_v37  ;;  %5004 = vmatmul.f32.gmra.mxu3 %v16503_v8  ;;  %5534 = vst.msk [vmem:[#allocation5] sm:$0xff] %vm1332_vm3, %v5511_v59 }
 0x601   : > { %v5241_v40 = vpop.f32.mrf.mxu1  ;;  %5968 = vmatpush.msra.mxu3 %v5967_v55 }
 0x602   : > { %v5234_v0 = vadd.f32 %v5233_v45, %v5087_v33  ;;  %5157 = vmatmul.f32.gmra.mxu0 %v16504_v56 }
 0x603   : > { %v4710_v53 = vpop.f32.mrf.mxu2  ;;  %v4909_v27 = vpop.f32.mrf.mxu3  ;;  %v5545_v13 = vld [vmem:[#allocation3 + $0xe0] sm:$0xff] }
 0x604   : > { %v5641_v47 = vld [vmem:[#allocation3 + $0xe1] sm:$0xff]  ;;  %5406 = vst.msk [vmem:[#allocation3 + $0xf1] sm:$0xff] %vm1027_vm0, %v5234_v0  ;;  %v4711_v48 = vadd.f32 %v4710_v53, %v12970_v2  ;;  %5304 = vmatmul.f32.gmra.mxu1 %v16504_v56  ;;  %5564 = vrot.lane.b32.xlu1 %v5545_v13, %s9906_s29 }
 0x605   : > { %5660 = vrot.lane.b32.xlu0 %v5641_v47, %s9903_s24 }
 0x606   : > { %v4904_v18 = vadd.f32 %v4903_v25, %v4711_v48 }
 0x607   : > { %v5098_v45 = vpop.f32.mrf.mxu0 }
 0x608   : > { %v5091_v2 = vadd.f32 %v5090_v42, %v4904_v18  ;;  %4794 = vmatmul.f32.gmra.mxu2 %v16502_v22  ;;  %5010 = vmatmul.f32.gmra.mxu3 %v16506_v36  ;;  %v13335_v42 = vsub.f32 %v5827_v46, %v13321_v57  ;;  %v5825_v36 = vld [vmem:[%s15900_s5 + $0x58] sm:$0xff] }
 0x609   : > { %v5245_v10 = vpop.f32.mrf.mxu1 }
 0x60a   : > { %v5238_v12 = vadd.f32 %v5237_v23, %v5091_v2  ;;  %5161 = vmatmul.f32.gmra.mxu0 %v12933_v24  ;;  %v5971_v44 = vand.u32 4294901760, %v13335_v42 }
 0x60b   : > { %v4715_v50 = vpop.f32.mrf.mxu2  ;;  %v4915_v31 = vpop.f32.mrf.mxu3  ;;  %v5642_v6 = vld [vmem:[#allocation3 + $0xf1] sm:$0xff]  ;;  %6094 = vmatpush.msrb.mxu0 %v13335_v42 }
 0x60c   : > { %v5546_v19 = vld [vmem:[#allocation3 + $0xf0] sm:$0xff]  ;;  %5407 = vst.msk [vmem:[#allocation3 + $0x101] sm:$0xff] %vm1027_vm0, %v5238_v12  ;;  %v4716_v63 = vadd.f32 %v4715_v50, %v12982_v58  ;;  %5662 = vrot.lane.b32.xlu1 %v5642_v6, %s9903_s24  ;;  %5308 = vmatmul.f32.gmra.mxu1 %v12933_v24  ;;  %v5972_v58 = vsub.f32 %v13335_v42, %v5971_v44 }
 0x60d   : > { %5566 = vrot.lane.b32.xlu2 %v5546_v19, %s9906_s29 }
 0x60e   : > { %v4910_v37 = vadd.f32 %v4909_v27, %v4716_v63  ;;  %v5973_v25 = vand.u32 4294901760, %v5972_v58 }
 0x60f   : > { %v5102_v23 = vpop.f32.mrf.mxu0 }
 0x610   : > { %v5095_v43 = vadd.f32 %v5094_v20, %v4910_v37  ;;  %4799 = vmatmul.f32.gmra.mxu2 %v16505_v35  ;;  %v5826_v20 = vld [vmem:[%s15900_s5 + $0x60] sm:$0xff]  ;;  %5974 = vmatpush.msra.mxu3 %v5973_v25 }
 0x611   : > { %v5249_v5 = vpop.f32.mrf.mxu1  ;;  %v13351_v33 = vand.u32 4294901760, %v5826_v20 }
 0x612   : > { %v5242_v3 = vadd.f32 %v5241_v40, %v5095_v43 }
 0x613   : > { %v4720_v38 = vpop.f32.mrf.mxu2  ;;  %v4921_v52 = vpop.f32.mrf.mxu3  ;;  %v5547_v7 = vld [vmem:[#allocation3 + $0x100] sm:$0xff]  ;;  %5867 = vmatpush.msra.mxu2 %v13351_v33  ;;  %6182 = vmatpush.msrb.mxu1 %v13351_v33  ;;  %v13358_v53 = vsub.f32 %v5826_v20, %v13351_v33 }
 0x614   : > { %v5643_v24 = vld [vmem:[#allocation3 + $0x101] sm:$0xff]  ;;  %5408 = vst.msk [vmem:[#allocation3 + $0x111] sm:$0xff] %vm1027_vm0, %v5242_v3  ;;  %v4721_v11 = vadd.f32 %v4720_v38, %v12994_v41  ;;  %5568 = vrot.lane.b32.xlu0 %v5547_v7, %s9906_s29 }
 0x615   : > { %5664 = vrot.lane.b32.xlu2 %v5643_v24, %s9903_s24  ;;  %v5977_v13 = vand.u32 4294901760, %v13358_v53  ;;  %6097 = vmatpush.msrb.mxu0 %v13358_v53 }
 0x616   : > { %v4916_v22 = vadd.f32 %v4915_v31, %v4721_v11 }
 0x617   : > { %v5106_v8 = vpop.f32.mrf.mxu0  ;;  %v5978_v46 = vsub.f32 %v13358_v53, %v5977_v13 }
 0x618   : > { %v5099_v26 = vadd.f32 %v5098_v45, %v4916_v22 }
 0x619   : > { %v5253_v40 = vpop.f32.mrf.mxu1  ;;  %v5979_v59 = vand.u32 4294901760, %v5978_v46 }
 0x61a   : > { %v5246_v41 = vadd.f32 %v5245_v10, %v5099_v26  ;;  %v13370_v10 = vand.u32 4294901760, %v5825_v36 }
 0x61b   : > { %v4725_v0 = vpop.f32.mrf.mxu2  ;;  %v4927_v56 = vpop.f32.mrf.mxu3  ;;  %5980 = vmatpush.msra.mxu3 %v5979_v59 }
 0x61c   : > { %5409 = vst.msk [vmem:[#allocation3 + $0x121] sm:$0xff] %vm1027_vm0, %v5246_v41  ;;  %v4726_v55 = vadd.f32 %v4725_v0, %v13006_v61  ;;  %5869 = vmatpush.msra.mxu2 %v13370_v10  ;;  %6184 = vmatpush.msrb.mxu1 %v13370_v10  ;;  %v13379_v43 = vsub.f32 %v5825_v36, %v13370_v10 }
 0x61e   : > { %v4922_v27 = vadd.f32 %v4921_v52, %v4726_v55  ;;  %6100 = vmatpush.msrb.mxu0 %v13379_v43 }
 0x61f   : > { %v5110_v47 = vpop.f32.mrf.mxu0 }
 0x620   : > { %v5103_v48 = vadd.f32 %v5102_v23, %v4922_v27 }
 0x621   : > { %v5257_v18 = vpop.f32.mrf.mxu1 }
 0x622   : > { %v5250_v45 = vadd.f32 %v5249_v5, %v5103_v48  ;;  %v5983_v5 = vand.u32 4294901760, %v13379_v43 }
 0x623   : > { %v4730_v2 = vpop.f32.mrf.mxu2  ;;  %v4933_v35 = vpop.f32.mrf.mxu3 }
 0x624   : > { %5411 = vst.msk [vmem:[#allocation3 + $0x151] sm:$0xff] %vm1027_vm0, %v5250_v45  ;;  %v4731_v61 = vadd.f32 %v4730_v2, %v13018_v21  ;;  %v5984_v38 = vsub.f32 %v13379_v43, %v5983_v5  ;;  %v5831_v43 = vld [vmem:[%s15900_s5 + $0x88] sm:$0xff] }
 0x626   : > { %v4928_v12 = vadd.f32 %v4927_v56, %v4731_v61  ;;  %v5985_v7 = vand.u32 4294901760, %v5984_v38 }
 0x627   : > { %v5114_v50 = vpop.f32.mrf.mxu0 }
 0x628   : > { %v5107_v31 = vadd.f32 %v5106_v8, %v4928_v12  ;;  %v5824_v8 = vld [vmem:[%s15900_s5 + $0x50] sm:$0xff]  ;;  %5986 = vmatpush.msra.mxu3 %v5985_v7 }
 0x629   : > { %v5261_v6 = vpop.f32.mrf.mxu1  ;;  %v13393_v26 = vand.u32 4294901760, %v5824_v8 }
 0x62a   : > { %v5254_v19 = vadd.f32 %v5253_v40, %v5107_v31 }
 0x62b   : > { %v4735_v63 = vpop.f32.mrf.mxu2  ;;  %v4939_v37 = vpop.f32.mrf.mxu3  ;;  %v5447_v23 = vld [vmem:[#allocation3 + $0x151] sm:$0xff]  ;;  %5871 = vmatpush.msra.mxu2 %v13393_v26  ;;  %6186 = vmatpush.msrb.mxu1 %v13393_v26  ;;  %v13402_v46 = vsub.f32 %v5824_v8, %v13393_v26 }
 0x62c   : > { %5412 = vst.msk [vmem:[#allocation3 + $0x161] sm:$0xff] %vm1027_vm0, %v5254_v19  ;;  %v4736_v21 = vadd.f32 %v4735_v63, %v13030_v60  ;;  %5464 = vrot.lane.b32.xlu0 %v5447_v23, %s9900_s17  ;;  %5750 = vrot.lane.b32.xlu2 %v5447_v23, %s9902_s22 }
 0x62d   : > { %v5989_v45 = vand.u32 4294901760, %v13402_v46  ;;  %6103 = vmatpush.msrb.mxu0 %v13402_v46 }
 0x62e   : > { %v4934_v58 = vadd.f32 %v4933_v35, %v4736_v21 }
 0x62f   : > { %v5118_v3 = vpop.f32.mrf.mxu0  ;;  %v5990_v35 = vsub.f32 %v13402_v46, %v5989_v45 }
 0x630   : > { %v5111_v25 = vadd.f32 %v5110_v47, %v4934_v58 }
 0x631   : > { %v5265_v52 = vpop.f32.mrf.mxu1  ;;  %v5991_v36 = vand.u32 4294901760, %v5990_v35 }
 0x632   : > { %v5258_v60 = vadd.f32 %v5257_v18, %v5111_v25 }
 0x633   : > { %v4740_v24 = vpop.f32.mrf.mxu2  ;;  %v4945_v11 = vpop.f32.mrf.mxu3  ;;  %v5448_v20 = vld [vmem:[#allocation3 + $0x161] sm:$0xff]  ;;  %5992 = vmatpush.msra.mxu3 %v5991_v36 }
 0x634   : > { %5413 = vst.msk [vmem:[#allocation3 + $0x171] sm:$0xff] %vm1027_vm0, %v5258_v60  ;;  %v4741_v22 = vadd.f32 %v4740_v24, %v13042_v39  ;;  %5466 = vrot.lane.b32.xlu1 %v5448_v20, %s9900_s17  ;;  %5752 = vrot.lane.b32.xlu0 %v5448_v20, %s9902_s22  ;;  %v13422_v60 = vpop.permute.xlu1 %5610 }
 0x636   : > { %v4940_v40 = vadd.f32 %v4939_v37, %v4741_v22 }
 0x637   : > { %v5122_v41 = vpop.f32.mrf.mxu0 }
 0x638   : > { %v5115_v0 = vadd.f32 %v5114_v50, %v4940_v40 }
 0x639   : > { %v5269_v56 = vpop.f32.mrf.mxu1 }
 0x63a   : > { %v5262_v39 = vadd.f32 %v5261_v6, %v5115_v0 }
 0x63b   : > { %v4745_v55 = vpop.f32.mrf.mxu2  ;;  %v4951_v27 = vpop.f32.mrf.mxu3  ;;  %v5736_v47 = vld [vmem:[#allocation3 + $0x171] sm:$0xff] }
 0x63c   : > { %5414 = vst.msk [vmem:[#allocation3 + $0x181] sm:$0xff] %vm1027_vm0, %v5262_v39  ;;  %v4746_v48 = vadd.f32 %v4745_v55, %v13054_v28  ;;  %5754 = vrot.lane.b32.xlu1 %v5736_v47, %s9902_s22  ;;  %5468 = vrot.lane.b32.xlu2 %v5736_v47, %s9900_s17 }
 0x63e   : > { %v4946_v18 = vadd.f32 %v4945_v11, %v4746_v48 }
 0x63f   : > { %v5126_v59 = vpop.f32.mrf.mxu0 }
 0x640   : > { %v5119_v2 = vadd.f32 %v5118_v3, %v4946_v18 }
 0x641   : > { %v5273_v61 = vpop.f32.mrf.mxu1 }
 0x642   : > { %v5266_v28 = vadd.f32 %v5265_v52, %v5119_v2 }
 0x643   : > { %v4750_v12 = vpop.f32.mrf.mxu2  ;;  %v4957_v50 = vpop.f32.mrf.mxu3  ;;  %v5450_v31 = vld [vmem:[#allocation3 + $0x181] sm:$0xff] }
 0x644   : > { %5415 = vst.msk [vmem:[#allocation3 + $0x191] sm:$0xff] %vm1027_vm0, %v5266_v28  ;;  %v4751_v6 = vadd.f32 %v4750_v12, %v13066_v49  ;;  %5470 = vrot.lane.b32.xlu0 %v5450_v31, %s9900_s17  ;;  %5756 = vrot.lane.b32.xlu2 %v5450_v31, %s9902_s22  ;;  %v5823_v49 = vld [vmem:[%s15900_s5 + $0x48] sm:$0xff] }
 0x645   : > { %v13420_v52 = vand.u32 4294901760, %v5823_v49 }
 0x646   : > { %v4952_v19 = vadd.f32 %v4951_v27, %v4751_v6  ;;  %v5822_v27 = vld [vmem:[%s15900_s5 + $0x40] sm:$0xff]  ;;  %v13447_v18 = vpop.permute.xlu1 %5616 }
 0x647   : > { %v5130_v63 = vpop.f32.mrf.mxu0  ;;  %5873 = vmatpush.msra.mxu2 %v13420_v52  ;;  %v13426_v24 = vsub.f32 %v5823_v49, %v13420_v52  ;;  %6188 = vmatpush.msrb.mxu1 %v13420_v52  ;;  %v13445_v48 = vand.u32 4294901760, %v5822_v27 }
 0x648   : > { %v5123_v37 = vadd.f32 %v5122_v41, %v4952_v19 }
 0x649   : > { %v5277_v23 = vpop.f32.mrf.mxu1  ;;  %v5995_v22 = vand.u32 4294901760, %v13426_v24  ;;  %6106 = vmatpush.msrb.mxu0 %v13426_v24  ;;  %5875 = vmatpush.msra.mxu2 %v13445_v48  ;;  %v13456_v31 = vsub.f32 %v5822_v27, %v13445_v48 }
 0x64a   : > { %v5270_v21 = vadd.f32 %v5269_v56, %v5123_v37  ;;  %6190 = vmatpush.msrb.mxu1 %v13445_v48 }
 0x64b   : > { %v4755_v58 = vpop.f32.mrf.mxu2  ;;  %v4963_v3 = vpop.f32.mrf.mxu3  ;;  %v5451_v25 = vld [vmem:[#allocation3 + $0x191] sm:$0xff]  ;;  %v5996_v39 = vsub.f32 %v13426_v24, %v5995_v22  ;;  %6109 = vmatpush.msrb.mxu0 %v13456_v31 }
 0x64c   : > { %5416 = vst.msk [vmem:[#allocation3 + $0x1a1] sm:$0xff] %vm1027_vm0, %v5270_v21  ;;  %v4756_v38 = vadd.f32 %v4755_v58, %v13083_v14  ;;  %5472 = vrot.lane.b32.xlu1 %v5451_v25, %s9900_s17  ;;  %5758 = vrot.lane.b32.xlu0 %v5451_v25, %s9902_s22  ;;  %v13429_v14 = vpop.permute.xlu0 %5608  ;;  %v6001_v21 = vand.u32 4294901760, %v13456_v31 }
 0x64d   : > { %v5997_v47 = vand.u32 4294901760, %v5996_v39 }
 0x64e   : > { %v4958_v7 = vadd.f32 %v4957_v50, %v4756_v38 }
 0x64f   : > { %v5134_v20 = vpop.f32.mrf.mxu0  ;;  %5998 = vmatpush.msra.mxu3 %v5997_v47 }
 0x650   : > { %v5127_v11 = vadd.f32 %v5126_v59, %v4958_v7  ;;  %v16507_v7 = vld [vmem:[#allocation25_spill] sm:$0xff] }
 0x651   : > { %v5281_v40 = vpop.f32.mrf.mxu1 }
 0x652   : > { %v5274_v8 = vadd.f32 %v5273_v61, %v5127_v11 }
 0x653   : > { %v4760_v41 = vpop.f32.mrf.mxu2  ;;  %v4969_v0 = vpop.f32.mrf.mxu3  ;;  %v13433_v56 = vld [vmem:[#allocation3 + $0x1a1] sm:$0xff] }
 0x654   : > { %5417 = vst.msk [vmem:[#allocation3 + $0x1b1] sm:$0xff] %vm1027_vm0, %v5274_v8  ;;  %v4761_v55 = vadd.f32 %v4760_v41, %v13095_v51  ;;  %5474 = vrot.lane.b32.xlu2 %v13433_v56, %s9900_s17  ;;  %v13450_v2 = vpop.permute.xlu0 %5614  ;;  %v5607_v51 = vpop.permute.xlu2 %5606 }
 0x656   : > { %v4964_v59 = vadd.f32 %v4963_v3, %v4761_v55 }
 0x657   : > { %v5138_v28 = vpop.f32.mrf.mxu0 }
 0x658   : > { %v5131_v35 = vadd.f32 %v5130_v63, %v4964_v59 }
 0x659   : > { %v5285_v6 = vpop.f32.mrf.mxu1 }
 0x65a   : > { %v5278_v61 = vadd.f32 %v5277_v23, %v5131_v35 }
 0x65b   : > { %v4765_v36 = vpop.f32.mrf.mxu2  ;;  %v4975_v12 = vpop.f32.mrf.mxu3 }
 0x65c   : > { %5418 = vst.msk [vmem:[#allocation3 + $0x1c1] sm:$0xff] %vm1027_vm0, %v5278_v61  ;;  %v4766_v50 = vadd.f32 %v4765_v36, %v13107_v34  ;;  %v6002_v34 = vsub.f32 %v13456_v31, %v6001_v21  ;;  %v13466_v58 = vpop.permute.xlu2 %5612 }
 0x65e   : > { %v4970_v19 = vadd.f32 %v4969_v0, %v4766_v50  ;;  %v5559_v37 = vpop.permute.xlu1 %5558  ;;  %v6003_v25 = vand.u32 4294901760, %v6002_v34 }
 0x65f   : > { %5582 = vst.msk [vmem:[#allocation5] sm:$0xff] %vm1381_vm4, %v5559_v37  ;;  %v5655_v23 = vpop.permute.xlu0 %5654  ;;  %v5142_v8 = vpop.f32.mrf.mxu0 }
 0x660   : > { %v5135_v63 = vadd.f32 %v5134_v20, %v4970_v19  ;;  %5630 = vst.msk [vmem:[#allocation5] sm:$0xff] %vm1430_vm5, %v5607_v51  ;;  %6004 = vmatpush.msra.mxu3 %v6003_v25  ;;  %v5821_v20 = vld [vmem:[%s15900_s5 + $0x38] sm:$0xff]  ;;  %v16508_v51 = vld [vmem:[#allocation31_spill] sm:$0xff] }
 0x661   : > { %5678 = vst.msk [vmem:[#allocation5] sm:$0xff] %vm1479_vm6, %v5655_v23  ;;  %v13473_v41 = vand.u32 4294901760, %v5821_v20  ;;  %v5289_v39 = vpop.f32.mrf.mxu1 }
 0x662   : > { %v5282_v3 = vadd.f32 %v5281_v40, %v5135_v63 }
 0x663   : > { %v4770_v38 = vpop.f32.mrf.mxu2  ;;  %v4981_v49 = vpop.f32.mrf.mxu3  ;;  %5877 = vmatpush.msra.mxu2 %v13473_v41  ;;  %6192 = vmatpush.msrb.mxu1 %v13473_v41  ;;  %v13483_v36 = vsub.f32 %v5821_v20, %v13473_v41 }
 0x664   : > { %5420 = vst.msk [vmem:[#allocation3 + $0x1f1] sm:$0xff] %vm1027_vm0, %v5282_v3  ;;  %v4771_v11 = vadd.f32 %v4770_v38, %v16507_v7  ;;  %v13477_v55 = vpop.permute.xlu2 %5560 }
 0x665   : > { %6112 = vmatpush.msrb.mxu0 %v13483_v36 }
 0x666   : > { %v4976_v0 = vadd.f32 %v4975_v12, %v4771_v11  ;;  %v5820_v11 = vld [vmem:[%s15900_s5 + $0x30] sm:$0xff] }
 0x667   : > { %v13501_v20 = vand.u32 4294901760, %v5820_v11 }
 0x668   : > { %v5139_v40 = vadd.f32 %v5138_v28, %v4976_v0  ;;  %v16085_v28 = vand.u32 4294901760, %v13483_v36 }
 0x669   : > { %v5293_v63 = vpop.f32.mrf.mxu1  ;;  %5879 = vmatpush.msra.mxu2 %v13501_v20  ;;  %6194 = vmatpush.msrb.mxu1 %v13501_v20 }
 0x66a   : > { %v5286_v27 = vadd.f32 %v5285_v6, %v5139_v40  ;;  %v5146_v6 = vpop.f32.mrf.mxu0  ;;  %v6008_v37 = vsub.f32 %v13483_v36, %v16085_v28 }
 0x66b   : > { %v5782_v47 = vld [vmem:[#allocation3 + $0x1f1] sm:$0xff]  ;;  %v4775_v59 = vpop.f32.mrf.mxu2  ;;  %v4987_v12 = vpop.f32.mrf.mxu3 }
 0x66c   : > { %v5686_v35 = vld [vmem:[#allocation3 + $0x1f0] sm:$0xff]  ;;  %5790 = vst.msk [vmem:[#allocation5 + $0x8] sm:$0xff] %vm1027_vm0, %v5782_v47  ;;  %v4776_v61 = vadd.f32 %v4775_v59, %v16508_v51  ;;  %v6009_v34 = vand.u32 4294901760, %v6008_v37  ;;  %v13492_v25 = vpop.permute.xlu2 %5658 }
 0x66d   : > { %5702 = vrot.lane.b32.xlu1 %v5686_v35, %s9904_s27  ;;  %5421 = vst.msk [vmem:[#allocation3 + $0x201] sm:$0xff] %vm1027_vm0, %v5286_v27 }
 0x66e   : > { %v4982_v50 = vadd.f32 %v4981_v49, %v4776_v61  ;;  %5438 = vst.msk [vmem:[#allocation5 + $0x18] sm:$0xff] %vm1027_vm0, %v5686_v35  ;;  %6010 = vmatpush.msra.mxu3 %v6009_v34 }
 0x670   : > { %v5143_v19 = vadd.f32 %v5142_v8, %v4982_v50 }
 0x671   : > { %v5297_v59 = vpop.f32.mrf.mxu1 }
 0x672   : > { %v5290_v23 = vadd.f32 %v5289_v39, %v5143_v19  ;;  %v5150_v40 = vpop.f32.mrf.mxu0 }
 0x673   : > { %v4780_v3 = vpop.f32.mrf.mxu2  ;;  %v4993_v0 = vpop.f32.mrf.mxu3 }
 0x674   : > { %5422 = vst.msk [vmem:[#allocation3 + $0x211] sm:$0xff] %vm1027_vm0, %v5290_v23  ;;  %v4781_v38 = vadd.f32 %v4780_v3, %v13143_v15  ;;  %v5687_v49 = vld [vmem:[#allocation3 + $0x200] sm:$0xff]  ;;  %v13507_v15 = vsub.f32 %v5820_v11, %v13501_v20  ;;  %v13515_v50 = vpop.permute.xlu2 %5566  ;;  %v13525_v11 = vpop.permute.xlu0 %5562 }
 0x675   : > { %5512 = vrot.lane.b32.xlu1 %v5782_v47, %s9901_s21  ;;  %v5496_v7 = vld [vmem:[#allocation3 + $0x201] sm:$0xff]  ;;  %5704 = vrot.lane.b32.xlu2 %v5687_v49, %s9904_s27  ;;  %5439 = vst.msk [vmem:[#allocation5 + $0x30] sm:$0xff] %vm1027_vm0, %v5687_v49 }
 0x676   : > { %v4988_v8 = vadd.f32 %v4987_v12, %v4781_v38  ;;  %5791 = vst.msk [vmem:[#allocation5 + $0x20] sm:$0xff] %vm1027_vm0, %v5496_v7  ;;  %v16081_v27 = vand.u32 4294901760, %v13507_v15  ;;  %6115 = vmatpush.msrb.mxu0 %v13507_v15 }
 0x678   : > { %v5147_v39 = vadd.f32 %v5146_v6, %v4988_v8  ;;  %v6014_v12 = vsub.f32 %v13507_v15, %v16081_v27  ;;  %v5819_v8 = vld [vmem:[%s15900_s5 + $0x28] sm:$0xff] }
 0x67a   : > { %v5294_v47 = vadd.f32 %v5293_v63, %v5147_v39  ;;  %v6015_v19 = vand.u32 4294901760, %v6014_v12  ;;  %v5154_v3 = vpop.f32.mrf.mxu0  ;;  %v13535_v39 = vand.u32 4294901760, %v5819_v8 }
 0x67b   : > { %v4785_v35 = vpop.f32.mrf.mxu2  ;;  %v5688_v51 = vld [vmem:[#allocation3 + $0x210] sm:$0xff]  ;;  %v4999_v23 = vpop.f32.mrf.mxu3 }
 0x67c   : > { %v5497_v61 = vld [vmem:[#allocation3 + $0x211] sm:$0xff]  ;;  %5423 = vst.msk [vmem:[#allocation3 + $0x221] sm:$0xff] %vm1027_vm0, %v5294_v47  ;;  %v4786_v6 = vadd.f32 %v4785_v35, %v13152_v1  ;;  %5706 = vrot.lane.b32.xlu0 %v5688_v51, %s9904_s27  ;;  %6016 = vmatpush.msra.mxu3 %v6015_v19 }
 0x67d   : > { %5760 = vrot.lane.b32.xlu1 %v13433_v56, %s9902_s22  ;;  %5514 = vrot.lane.b32.xlu2 %v5496_v7, %s9901_s21  ;;  %5440 = vst.msk [vmem:[#allocation5 + $0x48] sm:$0xff] %vm1027_vm0, %v5688_v51  ;;  %v5596_v7 = vld [vmem:[#allocation3 + $0x71] sm:$0xff] }
 0x67e   : > { %v4994_v37 = vadd.f32 %v4993_v0, %v4786_v6  ;;  %5792 = vst.msk [vmem:[#allocation5 + $0x38] sm:$0xff] %vm1027_vm0, %v5497_v61  ;;  %v5301_v0 = vpop.f32.mrf.mxu1  ;;  %5881 = vmatpush.msra.mxu2 %v13535_v39  ;;  %6196 = vmatpush.msrb.mxu1 %v13535_v39  ;;  %v5644_v6 = vld [vmem:[#allocation3 + $0x111] sm:$0xff] }
 0x680   : > { %v5151_v63 = vadd.f32 %v5150_v40, %v4994_v37  ;;  %v13538_v40 = vpop.permute.xlu2 %5664 }
 0x682   : > { %v5298_v34 = vadd.f32 %v5297_v59, %v5151_v63 }
 0x683   : > { %v4790_v38 = vpop.f32.mrf.mxu2  ;;  %v5689_v1 = vld [vmem:[#allocation3 + $0x220] sm:$0xff] }
 0x684   : > { %v5498_v49 = vld [vmem:[#allocation3 + $0x221] sm:$0xff]  ;;  %5424 = vst.msk [vmem:[#allocation3 + $0x231] sm:$0xff] %vm1027_vm0, %v5298_v34  ;;  %v4791_v56 = vadd.f32 %v4790_v38, %v13159_v16  ;;  %5516 = vrot.lane.b32.xlu0 %v5497_v61, %s9901_s21  ;;  %v13543_v16 = vsub.f32 %v5819_v8, %v13535_v39  ;;  %v5005_v61 = vpop.f32.mrf.mxu3 }
 0x685   : > { %5708 = vrot.lane.b32.xlu1 %v5689_v1, %s9904_s27  ;;  %5618 = vrot.lane.b32.xlu2 %v5596_v7, %s9905_s28  ;;  %5441 = vst.msk [vmem:[#allocation5 + $0x60] sm:$0xff] %vm1027_vm0, %v5689_v1  ;;  %v13559_v1 = vpop.permute.xlu0 %5660 }
 0x686   : > { %v5000_v47 = vadd.f32 %v4999_v23, %v4791_v56  ;;  %5793 = vst.msk [vmem:[#allocation5 + $0x50] sm:$0xff] %vm1027_vm0, %v5498_v49  ;;  %v16080_v35 = vand.u32 4294901760, %v13543_v16  ;;  %6118 = vmatpush.msrb.mxu0 %v13543_v16  ;;  %v13551_v23 = vpop.permute.xlu1 %5656  ;;  %v5305_v8 = vpop.f32.mrf.mxu1  ;;  %v16511_v4 = vand.u32 4294901760, %v13543_v16 }
 0x688   : > { %v5155_v59 = vadd.f32 %v5154_v3, %v5000_v47  ;;  %v6020_v63 = vsub.f32 %v13543_v16, %v16080_v35  ;;  %v5158_v3 = vpop.f32.mrf.mxu0  ;;  %v13561_v56 = vpop.permute.xlu2 %5750 }
 0x68a   : > { %v5302_v51 = vadd.f32 %v5301_v0, %v5155_v59  ;;  %v6021_v38 = vand.u32 4294901760, %v6020_v63  ;;  %v5548_v59 = vld [vmem:[#allocation3 + $0x110] sm:$0xff] }
 0x68b   : > { %v4795_v12 = vpop.f32.mrf.mxu2  ;;  %v5690_v19 = vld [vmem:[#allocation3 + $0x230] sm:$0xff] }
 0x68c   : > { %v5499_v37 = vld [vmem:[#allocation3 + $0x231] sm:$0xff]  ;;  %5425 = vst.msk [vmem:[#allocation3 + $0x241] sm:$0xff] %vm1027_vm0, %v5302_v51  ;;  %v4796_v34 = vadd.f32 %v4795_v12, %v13168_v54  ;;  %5666 = vrot.lane.b32.xlu0 %v5644_v6, %s9903_s24  ;;  %6022 = vmatpush.msra.mxu3 %v6021_v38  ;;  %v5818_v54 = vld [vmem:[%s15900_s5 + $0x20] sm:$0xff]  ;;  %v5011_v6 = vpop.f32.mrf.mxu3 }
 0x68d   : > { %5518 = vrot.lane.b32.xlu1 %v5498_v49, %s9901_s21  ;;  %5710 = vrot.lane.b32.xlu2 %v5690_v19, %s9904_s27  ;;  %5442 = vst.msk [vmem:[#allocation5 + $0x78] sm:$0xff] %vm1027_vm0, %v5690_v19  ;;  %v13567_v0 = vand.u32 4294901760, %v5818_v54  ;;  %v5453_v12 = vld [vmem:[#allocation3 + $0x1b1] sm:$0xff] }
 0x68e   : > { %v5006_v7 = vadd.f32 %v5005_v61, %v4796_v34  ;;  %5794 = vst.msk [vmem:[#allocation5 + $0x68] sm:$0xff] %vm1027_vm0, %v5499_v37  ;;  %v13574_v34 = vpop.permute.xlu1 %5564 }
 0x68f   : > { %5883 = vmatpush.msra.mxu2 %v13567_v0  ;;  %v13571_v51 = vsub.f32 %v5818_v54, %v13567_v0  ;;  %6198 = vmatpush.msrb.mxu1 %v13567_v0 }
 0x690   : > { %v5159_v49 = vadd.f32 %v5158_v3, %v5006_v7  ;;  %v5162_v7 = vpop.f32.mrf.mxu0 }
 0x691   : > { %v16083_v38 = vand.u32 4294901760, %v13571_v51  ;;  %6121 = vmatpush.msrb.mxu0 %v13571_v51  ;;  %v16512_v42 = vand.u32 4294901760, %v13571_v51 }
 0x692   : > { %v5306_v47 = vadd.f32 %v5305_v8, %v5159_v49  ;;  %v13584_v8 = vpop.permute.xlu0 %5568 }
 0x693   : > { %v4800_v61 = vpop.f32.mrf.mxu2  ;;  %v5691_v19 = vld [vmem:[#allocation3 + $0x240] sm:$0xff] }
 0x694   : > { %v5500_v63 = vld [vmem:[#allocation3 + $0x241] sm:$0xff]  ;;  %5426 = vst.msk [vmem:[#allocation3 + $0x251] sm:$0xff] %vm1027_vm0, %v5306_v47  ;;  %v4801_v3 = vadd.f32 %v4800_v61, %v13177_v62  ;;  %5476 = vrot.lane.b32.xlu0 %v5453_v12, %s9900_s17  ;;  %v6026_v62 = vsub.f32 %v13571_v51, %v16083_v38  ;;  %v5309_v47 = vpop.f32.mrf.mxu1  ;;  %s15865_s17 = scalar_lea.vmem %s15908_s13, %s9826_s18 }
 0x695   : > { %5570 = vrot.lane.b32.xlu1 %v5548_v59, %s9906_s29  ;;  %5520 = vrot.lane.b32.xlu2 %v5499_v37, %s9901_s21  ;;  %5443 = vst.msk [vmem:[#allocation5 + $0x90] sm:$0xff] %vm1027_vm0, %v5691_v19 }
 0x696   : > { %v5012_v54 = vadd.f32 %v5011_v6, %v4801_v3  ;;  %v5469_v49 = vpop.permute.xlu2 %5468  ;;  %5795 = vst.msk [vmem:[#allocation5 + $0x80] sm:$0xff] %vm1027_vm0, %v5500_v63  ;;  %v6027_v37 = vand.u32 4294901760, %v6026_v62  ;;  %v13596_v6 = vpop.permute.xlu1 %5662 }
 0x697   : > { %5489 = vst.msk [vmem:[#allocation5 + $0x48] sm:$0xff] %vm1283_vm2, %v5469_v49 }
 0x698   : > { %v5163_v59 = vadd.f32 %v5162_v7, %v5012_v54  ;;  %6028 = vmatpush.msra.mxu3 %v6027_v37  ;;  %v5817_v7 = vld [vmem:[%s15900_s5 + $0x18] sm:$0xff] }
 0x699   : > { %v13603_v54 = vand.u32 4294901760, %v5817_v7 }
 0x69a   : > { %v5310_v61 = vadd.f32 %v5309_v47, %v5163_v59 }
 0x69b   : > { %v5692_v35 = vld [vmem:[#allocation3 + $0x250] sm:$0xff]  ;;  %5885 = vmatpush.msra.mxu2 %v13603_v54  ;;  %6200 = vmatpush.msrb.mxu1 %v13603_v54 }
 0x69c   : > { %v5501_v27 = vld [vmem:[#allocation3 + $0x251] sm:$0xff]  ;;  %5427 = vst.msk [vmem:[#allocation3 + $0x261] sm:$0xff] %vm1027_vm0, %v5310_v61  ;;  %5712 = vrot.lane.b32.xlu0 %v5691_v19, %s9904_s27  ;;  %v13607_v19 = vsub.f32 %v5817_v7, %v13603_v54 }
 0x69d   : > { %5714 = vrot.lane.b32.xlu1 %v5692_v35, %s9904_s27  ;;  %5762 = vrot.lane.b32.xlu2 %v5453_v12, %s9902_s22  ;;  %5444 = vst.msk [vmem:[#allocation5 + $0xa8] sm:$0xff] %vm1027_vm0, %v5692_v35  ;;  %v5549_v12 = vld [vmem:[#allocation3 + $0x120] sm:$0xff] }
 0x69e   : > { %v5465_v3 = vpop.permute.xlu0 %5464  ;;  %5796 = vst.msk [vmem:[#allocation5 + $0x98] sm:$0xff] %vm1027_vm0, %v5501_v27  ;;  %v16082_v49 = vand.u32 4294901760, %v13607_v19  ;;  %6124 = vmatpush.msrb.mxu0 %v13607_v19  ;;  %v13616_v62 = vpop.permute.xlu2 %5756 }
 0x69f   : > { %5487 = vst.msk [vmem:[#allocation5 + $0x18] sm:$0xff] %vm1283_vm2, %v5465_v3 }
 0x6a0   : > { %v6032_v59 = vsub.f32 %v13607_v19, %v16082_v49 }
 0x6a2   : > { %v6033_v37 = vand.u32 4294901760, %v6032_v59  ;;  %v5741_v59 = vld [vmem:[#allocation3 + $0x1c1] sm:$0xff] }
 0x6a3   : > { %v5789_v35 = vld [vmem:[#allocation3 + $0x261] sm:$0xff] }
 0x6a4   : > { %5797 = vst.msk [vmem:[#allocation5 + $0xb0] sm:$0xff] %vm1027_vm0, %v5789_v35  ;;  %5522 = vrot.lane.b32.xlu0 %v5500_v63, %s9901_s21  ;;  %6034 = vmatpush.msra.mxu3 %v6033_v37  ;;  %v5597_v63 = vld [vmem:[#allocation3 + $0x81] sm:$0xff]  ;;  %v5816_v35 = vld [vmem:[%s15900_s5 + $0x10] sm:$0xff] }
 0x6a5   : > { %5524 = vrot.lane.b32.xlu1 %v5501_v27, %s9901_s21  ;;  %5572 = vrot.lane.b32.xlu2 %v5549_v12, %s9906_s29  ;;  %v5645_v27 = vld [vmem:[#allocation3 + $0x121] sm:$0xff]  ;;  %v13631_v12 = vand.u32 4294901760, %v5816_v35 }
 0x6a6   : > { %v5467_v47 = vpop.permute.xlu1 %5466  ;;  %v5693_v61 = vld [vmem:[#allocation3 + $0x260] sm:$0xff]  ;;  %v13625_v3 = vpop.permute.xlu0 %5752 }
 0x6a7   : > { %5488 = vst.msk [vmem:[#allocation5 + $0x30] sm:$0xff] %vm1283_vm2, %v5467_v47  ;;  %5887 = vmatpush.msra.mxu2 %v13631_v12  ;;  %v13635_v47 = vsub.f32 %v5816_v35, %v13631_v12  ;;  %6202 = vmatpush.msrb.mxu1 %v13631_v12 }
 0x6a9   : > { %v16084_v37 = vand.u32 4294901760, %v13635_v47  ;;  %6127 = vmatpush.msrb.mxu0 %v13635_v47 }
 0x6ac   : > { %5620 = vrot.lane.b32.xlu0 %v5597_v63, %s9905_s28 }
 0x6ad   : > { %5668 = vrot.lane.b32.xlu1 %v5645_v27, %s9903_s24  ;;  %5716 = vrot.lane.b32.xlu2 %v5693_v61, %s9904_s27  ;;  %v6038_v61 = vsub.f32 %v13635_v47, %v16084_v37 }
 0x6ae   : > { %v5475_v7 = vpop.permute.xlu2 %5474  ;;  %v13641_v27 = vpop.permute.xlu1 %5754 }
 0x6af   : > { %5492 = vst.msk [vmem:[#allocation5 + $0x90] sm:$0xff] %vm1283_vm2, %v5475_v7  ;;  %v6039_v7 = vand.u32 4294901760, %v6038_v61 }
 0x6b1   : > { %6040 = vmatpush.msra.mxu3 %v6039_v7 }
 0x6b4   : > { %5764 = vrot.lane.b32.xlu0 %v5741_v59, %s9902_s22  ;;  %v5815_v59 = vld [vmem:[%s15900_s5 + $0x8] sm:$0xff] }
 0x6b5   : > { %v13651_v49 = vand.u32 4294901760, %v5815_v59 }
 0x6b6   : > { %v5471_v63 = vpop.permute.xlu0 %5470 }
 0x6b7   : > { %5490 = vst.msk [vmem:[#allocation5 + $0x60] sm:$0xff] %vm1283_vm2, %v5471_v63  ;;  %5889 = vmatpush.msra.mxu2 %v13651_v49  ;;  %v13655_v38 = vsub.f32 %v5815_v59, %v13651_v49  ;;  %6204 = vmatpush.msrb.mxu1 %v13651_v49 }
 0x6b9   : > { %v16086_v63 = vand.u32 4294901760, %v13655_v38  ;;  %6130 = vmatpush.msrb.mxu0 %v13655_v38 }
 0x6bb   : > { %v6044_v61 = vsub.f32 %v13655_v38, %v16086_v63 }
 0x6bd   : > { %v6045_v7 = vand.u32 4294901760, %v6044_v61 }
 0x6be   : > { %v5473_v35 = vpop.permute.xlu1 %5472 }
 0x6bf   : > { %5491 = vst.msk [vmem:[#allocation5 + $0x78] sm:$0xff] %vm1283_vm2, %v5473_v35  ;;  %6046 = vmatpush.msra.mxu3 %v6045_v7  ;;  %v5814_v35 = vld [vmem:[%s15900_s5] sm:$0xff] }
 0x6c0   : > { %v13666_v37 = vand.u32 4294901760, %v5814_v35 }
 0x6c2   : > { %v13669_v28 = vsub.f32 %v5814_v35, %v13666_v37  ;;  %6206 = vmatpush.msrb.mxu1 %v13666_v37  ;;  %5891 = vmatpush.msra.mxu2 %v13666_v37 }
 0x6c4   : > { %6259 = vmatpush.msrb.mxu2 %v5959_v32  ;;  %v6049_v61 = vand.u32 4294901760, %v13669_v28  ;;  %6133 = vmatpush.msrb.mxu0 %v13669_v28  ;;  %v16509_v32 = vand.u32 4294901760, %v13483_v36 }
 0x6c6   : > { %6263 = vmatpush.msrb.mxu2 %v5965_v9  ;;  %v6050_v7 = vsub.f32 %v13669_v28, %v6049_v61  ;;  %v13717_v9 = vpop.permute.xlu0 %5758 }
 0x6c8   : > { %6267 = vmatpush.msrb.mxu2 %v5971_v44  ;;  %v6051_v35 = vand.u32 4294901760, %v6050_v7 }
 0x6ca   : > { %6271 = vmatpush.msrb.mxu2 %v5977_v13  ;;  %6052 = vmatpush.msra.mxu3 %v6051_v35  ;;  %v16513_v13 = vand.u32 4294901760, %v13607_v19 }
 0x6cc   : > { %6354 = vmatpush.msrb.mxu3 %v13254_v30  ;;  %6275 = vmatpush.msrb.mxu2 %v5983_v5  ;;  %v16514_v5 = vand.u32 4294901760, %v13635_v47 }
 0x6ce   : > { %6356 = vmatpush.msrb.mxu3 %v13288_v17  ;;  %6279 = vmatpush.msrb.mxu2 %v5989_v45  ;;  %v16510_v17 = vand.u32 4294901760, %v13507_v15  ;;  %v16515_v45 = vand.u32 4294901760, %v13655_v38 }
 0x6cf   : > { %v5705_v59 = vpop.permute.xlu2 %5704 }
 0x6d0   : > { %6358 = vmatpush.msrb.mxu3 %v13321_v57  ;;  %6283 = vmatpush.msrb.mxu2 %v5995_v22 }
 0x6d2   : > { %6360 = vmatpush.msrb.mxu3 %v13351_v33  ;;  %6287 = vmatpush.msrb.mxu2 %v6001_v21 }
 0x6d4   : > { %6362 = vmatpush.msrb.mxu3 %v13370_v10  ;;  %6291 = vmatpush.msrb.mxu2 %v16509_v32 }
 0x6d6   : > { %6364 = vmatpush.msrb.mxu3 %v13393_v26  ;;  %6295 = vmatpush.msrb.mxu2 %v16510_v17  ;;  %v13744_v26 = vand.u32 4294901760, %v5831_v43 }
 0x6d7   : > { %v5515_v63 = vpop.permute.xlu2 %5514 }
 0x6d8   : > { %5536 = vst.msk [vmem:[#allocation5 + $0x30] sm:$0xff] %vm1332_vm3, %v5515_v63  ;;  %6366 = vmatpush.msrb.mxu3 %v13420_v52  ;;  %6299 = vmatpush.msrb.mxu2 %v16511_v4  ;;  %v13753_v52 = vsub.f32 %v5831_v43, %v13744_v26 }
 0x6d9   : > { %5584 = vst.msk [vmem:[#allocation5 + $0x30] sm:$0xff] %vm1381_vm4, %v13525_v11  ;;  %6433 = vmatpush.msra.mxu0 %v13744_v26 }
 0x6da   : > { %5632 = vst.msk [vmem:[#allocation5 + $0x30] sm:$0xff] %vm1430_vm5, %v13422_v60  ;;  %6368 = vmatpush.msrb.mxu3 %v13445_v48  ;;  %6303 = vmatpush.msrb.mxu2 %v16512_v42  ;;  %v6517_v48 = vand.u32 4294901760, %v13753_v52 }
 0x6db   : > { %5680 = vst.msk [vmem:[#allocation5 + $0x30] sm:$0xff] %vm1479_vm6, %v13492_v25 }
 0x6dc   : > { %6370 = vmatpush.msrb.mxu3 %v13473_v41  ;;  %6307 = vmatpush.msrb.mxu2 %v16513_v13  ;;  %v6518_v21 = vsub.f32 %v13753_v52, %v6517_v48 }
 0x6de   : > { %6311 = vmatpush.msrb.mxu2 %v16514_v5  ;;  %6372 = vmatpush.msrb.mxu3 %v13501_v20 }
 0x6df   : > { %v5703_v30 = vpop.permute.xlu1 %5702  ;;  %v13704_v29 = vpop.permute.xlu2 %5618 }
 0x6e0   : > { %5726 = vst.msk [vmem:[#allocation5] sm:$0xff] %vm1528_vm7, %v5703_v30  ;;  %6315 = vmatpush.msrb.mxu2 %v16515_v45  ;;  %6374 = vmatpush.msrb.mxu3 %v13535_v39 }
 0x6e1   : > { %5774 = vst.msk [vmem:[#allocation5] sm:$0xff] %vm1577_vm8, %v13561_v56 }
 0x6e2   : > { %6319 = vmatpush.msrb.mxu2 %v6049_v61  ;;  %6376 = vmatpush.msrb.mxu3 %v13567_v0 }
 0x6e4   : > { %6378 = vmatpush.msrb.mxu3 %v13603_v54 }
 0x6e6   : > { %6380 = vmatpush.msrb.mxu3 %v13631_v12 }
 0x6e7   : > { %v5513_v57 = vpop.permute.xlu1 %5512  ;;  %v13723_v44 = vpop.permute.xlu2 %5710 }
 0x6e8   : > { %5535 = vst.msk [vmem:[#allocation5 + $0x18] sm:$0xff] %vm1332_vm3, %v5513_v57  ;;  %v5798_v33 = vld [vmem:[#allocation5] sm:$0xff]  ;;  %6382 = vmatpush.msrb.mxu3 %v13651_v49 }
 0x6e9   : > { %5583 = vst.msk [vmem:[#allocation5 + $0x18] sm:$0xff] %vm1381_vm4, %v13477_v55  ;;  %v13727_v53 = vand.u32 4294901760, %v5798_v33  ;;  %v6519_v55 = vand.u32 4294901760, %v6518_v21 }
 0x6ea   : > { %5631 = vst.msk [vmem:[#allocation5 + $0x18] sm:$0xff] %vm1430_vm5, %v13429_v14  ;;  %6384 = vmatpush.msrb.mxu3 %v13666_v37 }
 0x6eb   : > { %5679 = vst.msk [vmem:[#allocation5 + $0x18] sm:$0xff] %vm1479_vm6, %v13551_v23  ;;  %6054 = vmatmul.f32.vlgmr.msra.gmra.mxu3 %v13727_v53  ;;  %v5893_v10 = vsub.f32 %v5798_v33, %v13727_v53  ;;  %6520 = vmatpush.msra.mxu1 %v6519_v55 }
 0x6ec   : > { %5727 = vst.msk [vmem:[#allocation5 + $0x18] sm:$0xff] %vm1528_vm7, %v5705_v59  ;;  %6636 = vmatpush.msra.mxu3 %v13744_v26 }
 0x6ed   : > { %5775 = vst.msk [vmem:[#allocation5 + $0x18] sm:$0xff] %vm1577_vm8, %v13625_v3  ;;  %6136 = vmatmul.f32.vlgmr.msrb.gmra.mxu0 %v5893_v10  ;;  %v5894_v46 = vand.u32 4294901760, %v5893_v10  ;;  %v5830_v3 = vld [vmem:[%s15900_s5 + $0x80] sm:$0xff] }
 0x6ee   : > { %v5707_v24 = vpop.permute.xlu0 %5706  ;;  %v6434_v12 = vand.u32 4294901760, %v5830_v3 }
 0x6ef   : > { %v13756_v60 = vpop.permute.xlu1 %5760  ;;  %6210 = vmatmul.f32.vlgmr.msrb.gmra.mxu1 %v5894_v46  ;;  %v5895_v14 = vsub.f32 %v5893_v10, %v5894_v46  ;;  %5728 = vst.msk [vmem:[#allocation5 + $0x30] sm:$0xff] %vm1528_vm7, %v5707_v24  ;;  %v5521_v22 = vpop.permute.xlu2 %5520 }
 0x6f0   : > { %5776 = vst.msk [vmem:[#allocation5 + $0x30] sm:$0xff] %vm1577_vm8, %v13641_v27  ;;  %6435 = vmatpush.msra.mxu0 %v6434_v12  ;;  %v6522_v63 = vsub.f32 %v5830_v3, %v6434_v12  ;;  %6638 = vmatpush.msra.mxu3 %v6434_v12  ;;  %v5807_v3 = vld [vmem:[#allocation5 + $0x68] sm:$0xff] }
 0x6f1   : > { %v5896_v31 = vand.u32 4294901760, %v5895_v14  ;;  %5539 = vst.msk [vmem:[#allocation5 + $0x78] sm:$0xff] %vm1332_vm3, %v5521_v22 }
 0x6f2   : > { %5587 = vst.msk [vmem:[#allocation5 + $0x78] sm:$0xff] %vm1381_vm4, %v13584_v8  ;;  %v6523_v61 = vand.u32 4294901760, %v6522_v63  ;;  %6705 = vmatpush.msrb.mxu0 %v6517_v48  ;;  %v5801_v48 = vld [vmem:[#allocation5 + $0x20] sm:$0xff] }
 0x6f3   : > { %5897 = vmatmul.f32.vlgmr.msra.gmra.mxu2 %v5896_v31  ;;  %5635 = vst.msk [vmem:[#allocation5 + $0x78] sm:$0xff] %vm1430_vm5, %v13447_v18 }
 0x6f4   : > { %v5800_v41 = vld [vmem:[#allocation5 + $0x18] sm:$0xff]  ;;  %6576 = vmatpush.msra.mxu2 %v13753_v52  ;;  %5683 = vst.msk [vmem:[#allocation5 + $0x78] sm:$0xff] %vm1479_vm6, %v13538_v40  ;;  %v6524_v35 = vsub.f32 %v6522_v63, %v6523_v61  ;;  %6709 = vmatpush.msrb.mxu0 %v6523_v61 }
 0x6f5   : > { %v13776_v36 = vand.u32 4294901760, %v5800_v41 }
 0x6f6   : > { %v5517_v25 = vpop.permute.xlu0 %5516  ;;  %6579 = vmatpush.msra.mxu2 %v6522_v63  ;;  %v6525_v17 = vand.u32 4294901760, %v6524_v35 }
 0x6f7   : > { %v5709_v28 = vpop.permute.xlu1 %5708  ;;  %6058 = vmatmul.f32.gmra.mxu3 %v13776_v36  ;;  %v5901_v18 = vsub.f32 %v5800_v41, %v13776_v36  ;;  %5537 = vst.msk [vmem:[#allocation5 + $0x48] sm:$0xff] %vm1332_vm3, %v5517_v25  ;;  %v5802_v20 = vld [vmem:[#allocation5 + $0x30] sm:$0xff]  ;;  %v5763_v54 = vpop.permute.xlu2 %5762 }
 0x6f8   : > { %5585 = vst.msk [vmem:[#allocation5 + $0x48] sm:$0xff] %vm1381_vm4, %v13574_v34  ;;  %v13785_v11 = vand.u32 4294901760, %v5802_v20  ;;  %6526 = vmatpush.msra.mxu1 %v6525_v17  ;;  %v5811_v17 = vld [vmem:[#allocation5 + $0x98] sm:$0xff] }
 0x6f9   : > { %6141 = vmatmul.f32.gmra.mxu0 %v5901_v18  ;;  %v5902_v15 = vand.u32 4294901760, %v5901_v18  ;;  %5633 = vst.msk [vmem:[#allocation5 + $0x48] sm:$0xff] %vm1430_vm5, %v13466_v58 }
 0x6fa   : > { %5681 = vst.msk [vmem:[#allocation5 + $0x48] sm:$0xff] %vm1479_vm6, %v13559_v1  ;;  %v5909_v40 = vsub.f32 %v5802_v20, %v13785_v11  ;;  %6758 = vmatpush.msrb.mxu1 %v13744_v26 }
 0x6fb   : > { %6216 = vmatmul.f32.gmra.mxu1 %v5902_v15  ;;  %v5903_v39 = vsub.f32 %v5901_v18, %v5902_v15  ;;  %5729 = vst.msk [vmem:[#allocation5 + $0x48] sm:$0xff] %vm1528_vm7, %v5709_v28  ;;  %v5840_v28 = vsel %vm1027_vm0, %v5801_v48, 0 }
 0x6fc   : > { %5777 = vst.msk [vmem:[#allocation5 + $0x48] sm:$0xff] %vm1577_vm8, %v13616_v62  ;;  %v5910_v23 = vand.u32 4294901760, %v5909_v40  ;;  %6760 = vmatpush.msrb.mxu1 %v6434_v12  ;;  %v13862_v15 = vand.u32 4294901760, %v5840_v28 }
 0x6fd   : > { %v5904_v16 = vand.u32 4294901760, %v5903_v39 }
 0x6fe   : > { %v13796_v0 = vpop.permute.xlu0 %5666  ;;  %v5911_v58 = vsub.f32 %v5909_v40, %v5910_v23 }
 0x6ff   : > { %v5519_v56 = vpop.permute.xlu1 %5518  ;;  %5905 = vmatmul.f32.gmra.mxu2 %v5904_v16  ;;  %6062 = vmatmul.f32.gmra.mxu3 %v13785_v11  ;;  %v5573_v32 = vpop.permute.xlu2 %5572 }
 0x700   : > { %5538 = vst.msk [vmem:[#allocation5 + $0x60] sm:$0xff] %vm1332_vm3, %v5519_v56  ;;  %v5912_v51 = vand.u32 4294901760, %v5911_v58  ;;  %v13868_v56 = vsub.f32 %v5840_v28, %v13862_v15 }
 0x701   : > { %5586 = vst.msk [vmem:[#allocation5 + $0x60] sm:$0xff] %vm1381_vm4, %v13515_v50  ;;  %6146 = vmatmul.f32.gmra.mxu0 %v5909_v40  ;;  %v5803_v40 = vld [vmem:[#allocation5 + $0x38] sm:$0xff] }
 0x702   : > { %5634 = vst.msk [vmem:[#allocation5 + $0x60] sm:$0xff] %vm1430_vm5, %v13450_v2 }
 0x703   : > { %5682 = vst.msk [vmem:[#allocation5 + $0x60] sm:$0xff] %vm1479_vm6, %v13596_v6  ;;  %6222 = vmatmul.f32.gmra.mxu1 %v5910_v23  ;;  %v5804_v1 = vld [vmem:[#allocation5 + $0x48] sm:$0xff] }
 0x704   : > { %5730 = vst.msk [vmem:[#allocation5 + $0x60] sm:$0xff] %vm1528_vm7, %v13723_v44  ;;  %v13810_v34 = vand.u32 4294901760, %v5804_v1 }
 0x705   : > { %5778 = vst.msk [vmem:[#allocation5 + $0x60] sm:$0xff] %vm1577_vm8, %v13717_v9 }
 0x706   : > { %v5477_v38 = vpop.permute.xlu0 %5476  ;;  %v5917_v2 = vsub.f32 %v5804_v1, %v13810_v34 }
 0x707   : > { %v5571_v50 = vpop.permute.xlu1 %5570  ;;  %5913 = vmatmul.f32.gmra.mxu2 %v5912_v51  ;;  %6066 = vmatmul.f32.gmra.mxu3 %v13810_v34  ;;  %5493 = vst.msk [vmem:[#allocation5 + $0xa8] sm:$0xff] %vm1283_vm2, %v5477_v38  ;;  %v5717_v5 = vpop.permute.xlu2 %5716  ;;  %v6446_v51 = vand.u32 4294901760, %v13868_v56  ;;  %v5805_v38 = vld [vmem:[#allocation5 + $0x50] sm:$0xff] }
 0x708   : > { %v5918_v8 = vand.u32 4294901760, %v5917_v2 }
 0x709   : > { %6151 = vmatmul.f32.gmra.mxu0 %v5917_v2 }
 0x70a   : > { %v5919_v6 = vsub.f32 %v5917_v2, %v5918_v8  ;;  %v6447_v2 = vsub.f32 %v13868_v56, %v6446_v51 }
 0x70b   : > { %6228 = vmatmul.f32.gmra.mxu1 %v5918_v8 }
 0x70c   : > { %v5806_v19 = vld [vmem:[#allocation5 + $0x60] sm:$0xff]  ;;  %v5920_v49 = vand.u32 4294901760, %v5919_v6  ;;  %v5846_v6 = vsel %vm1027_vm0, %v5805_v38, 0 }
 0x70d   : > { %v13815_v62 = vand.u32 4294901760, %v5806_v19 }
 0x70e   : > { %v5713_v37 = vpop.permute.xlu0 %5712 }
 0x70f   : > { %v5715_v47 = vpop.permute.xlu1 %5714  ;;  %5921 = vmatmul.f32.gmra.mxu2 %v5920_v49  ;;  %6070 = vmatmul.f32.gmra.mxu3 %v13815_v62  ;;  %v5925_v27 = vsub.f32 %v5806_v19, %v13815_v62  ;;  %5731 = vst.msk [vmem:[#allocation5 + $0x78] sm:$0xff] %vm1528_vm7, %v5713_v37  ;;  %v13886_v49 = vand.u32 4294901760, %v5846_v6 }
 0x710   : > { %5779 = vst.msk [vmem:[#allocation5 + $0x78] sm:$0xff] %vm1577_vm8, %v13756_v60 }
 0x711   : > { %6156 = vmatmul.f32.gmra.mxu0 %v5925_v27  ;;  %v5926_v59 = vand.u32 4294901760, %v5925_v27 }
 0x713   : > { %6234 = vmatmul.f32.gmra.mxu1 %v5926_v59  ;;  %v5927_v7 = vsub.f32 %v5925_v27, %v5926_v59  ;;  %v5809_v59 = vld [vmem:[#allocation5 + $0x80] sm:$0xff] }
 0x715   : > { %v5928_v30 = vand.u32 4294901760, %v5927_v7 }
 0x716   : > { %v5523_v9 = vpop.permute.xlu0 %5522 }
 0x717   : > { %v5525_v4 = vpop.permute.xlu1 %5524  ;;  %5929 = vmatmul.f32.gmra.mxu2 %v5928_v30  ;;  %v5808_v57 = vld [vmem:[#allocation5 + $0x78] sm:$0xff]  ;;  %5540 = vst.msk [vmem:[#allocation5 + $0x90] sm:$0xff] %vm1332_vm3, %v5523_v9 }
 0x718   : > { %5541 = vst.msk [vmem:[#allocation5 + $0xa8] sm:$0xff] %vm1332_vm3, %v5525_v4  ;;  %v13829_v42 = vand.u32 4294901760, %v5808_v57 }
 0x719   : > { %5589 = vst.msk [vmem:[#allocation5 + $0xa8] sm:$0xff] %vm1381_vm4, %v5573_v32 }
 0x71a   : > { %5588 = vst.msk [vmem:[#allocation5 + $0x90] sm:$0xff] %vm1381_vm4, %v5571_v50  ;;  %6074 = vmatmul.f32.gmra.mxu3 %v13829_v42  ;;  %v5933_v44 = vsub.f32 %v5808_v57, %v13829_v42 }
 0x71b   : > { %5636 = vst.msk [vmem:[#allocation5 + $0x90] sm:$0xff] %vm1430_vm5, %v13704_v29  ;;  %v5799_v29 = vld [vmem:[#allocation5 + $0x8] sm:$0xff] }
 0x71c   : > { %5684 = vst.msk [vmem:[#allocation5 + $0x90] sm:$0xff] %vm1479_vm6, %v13796_v0  ;;  %6161 = vmatmul.f32.gmra.mxu0 %v5933_v44  ;;  %v5934_v33 = vand.u32 4294901760, %v5933_v44  ;;  %v5837_v60 = vsel %vm1027_vm0, %v5799_v29, 0  ;;  %v5843_v0 = vsel %vm1027_vm0, %v5803_v40, 0 }
 0x71d   : > { %5732 = vst.msk [vmem:[#allocation5 + $0x90] sm:$0xff] %vm1528_vm7, %v5715_v47  ;;  %v13851_v14 = vand.u32 4294901760, %v5837_v60  ;;  %v13873_v50 = vand.u32 4294901760, %v5843_v0  ;;  %v13893_v47 = vsub.f32 %v5846_v6, %v13886_v49 }
 0x71e   : > { %5780 = vst.msk [vmem:[#allocation5 + $0x90] sm:$0xff] %vm1577_vm8, %v5763_v54  ;;  %v5621_v10 = vpop.permute.xlu0 %5620  ;;  %6240 = vmatmul.f32.gmra.mxu1 %v5934_v33  ;;  %v5935_v43 = vsub.f32 %v5933_v44, %v5934_v33  ;;  %v6448_v54 = vand.u32 4294901760, %v6447_v2 }
 0x71f   : > { %v5669_v13 = vpop.permute.xlu1 %5668  ;;  %5637 = vst.msk [vmem:[#allocation5 + $0xa8] sm:$0xff] %vm1430_vm5, %v5621_v10  ;;  %v13854_v21 = vsub.f32 %v5837_v60, %v13851_v14  ;;  %v13880_v8 = vsub.f32 %v5843_v0, %v13873_v50  ;;  %v6462_v27 = vand.u32 4294901760, %v13893_v47 }
 0x720   : > { %5685 = vst.msk [vmem:[#allocation5 + $0xa8] sm:$0xff] %vm1479_vm6, %v5669_v13  ;;  %v5936_v26 = vand.u32 4294901760, %v5935_v43  ;;  %v5813_v13 = vld [vmem:[#allocation5 + $0xb0] sm:$0xff] }
 0x721   : > { %5733 = vst.msk [vmem:[#allocation5 + $0xa8] sm:$0xff] %vm1528_vm7, %v5717_v5  ;;  %v6438_v20 = vand.u32 4294901760, %v13854_v21  ;;  %v6454_v19 = vand.u32 4294901760, %v13880_v8  ;;  %v6463_v61 = vsub.f32 %v13893_v47, %v6462_v27 }
 0x722   : > { %5937 = vmatmul.f32.gmra.mxu2 %v5936_v26 }
 0x723   : > { %v6439_v23 = vsub.f32 %v13854_v21, %v6438_v20  ;;  %v6455_v12 = vsub.f32 %v13880_v8, %v6454_v19  ;;  %v6464_v35 = vand.u32 4294901760, %v6463_v61 }
 0x725   : > { %v5810_v46 = vld [vmem:[#allocation5 + $0x90] sm:$0xff]  ;;  %v6440_v1 = vand.u32 4294901760, %v6439_v23  ;;  %v6456_v37 = vand.u32 4294901760, %v6455_v12 }
 0x726   : > { %v5765_v45 = vpop.permute.xlu0 %5764  ;;  %v13845_v52 = vand.u32 4294901760, %v5810_v46 }
 0x727   : > { %5781 = vst.msk [vmem:[#allocation5 + $0xa8] sm:$0xff] %vm1577_vm8, %v5765_v45 }
 0x728   : > { %6078 = vmatmul.f32.gmra.mxu3 %v13845_v52  ;;  %v5941_v24 = vsub.f32 %v5810_v46, %v13845_v52 }
 0x72a   : > { %6166 = vmatmul.f32.gmra.mxu0 %v5941_v24  ;;  %v5942_v22 = vand.u32 4294901760, %v5941_v24 }
 0x72c   : > { %6246 = vmatmul.f32.gmra.mxu1 %v5942_v22  ;;  %v5943_v31 = vsub.f32 %v5941_v24, %v5942_v22 }
 0x72e   : > { %v5944_v41 = vand.u32 4294901760, %v5943_v31  ;;  %v5812_v55 = vld [vmem:[#allocation5 + $0xa8] sm:$0xff] }
 0x72f   : > { %v13857_v25 = vand.u32 4294901760, %v5812_v55 }
 0x730   : > { %5945 = vmatmul.f32.gmra.mxu2 %v5944_v41 }
 0x731   : > { %6082 = vmatmul.f32.gmra.mxu3 %v13857_v25  ;;  %v5949_v18 = vsub.f32 %v5812_v55, %v13857_v25 }
 0x733   : > { %6171 = vmatmul.f32.gmra.mxu0 %v5949_v18  ;;  %v5950_v39 = vand.u32 4294901760, %v5949_v18 }
 0x735   : > { %6252 = vmatmul.f32.gmra.mxu1 %v5950_v39  ;;  %v5951_v16 = vsub.f32 %v5949_v18, %v5950_v39 }
 0x737   : > { %v5952_v58 = vand.u32 4294901760, %v5951_v16 }
 0x739   : > { %5953 = vmatmul.f32.gmra.mxu2 %v5952_v58  ;;  %6386 = vmatmul.f32.vlgmr.msrb.gmra.mxu3 %v13727_v53 }
 0x73b   : > { %6441 = vmatmul.f32.vlgmr.msra.gmra.mxu0 %v6440_v1 }
 0x73d   : > { %6528 = vmatmul.f32.vlgmr.msra.gmra.mxu1 %v13851_v14 }
 0x741   : > { %6321 = vmatmul.f32.vlgmr.msrb.gmra.mxu2 %v13727_v53  ;;  %6390 = vmatmul.f32.gmra.mxu3 %v13776_v36  ;;  %v5849_v53 = vsel %vm1027_vm0, %v5807_v3, 0 }
 0x742   : > { %v13899_v63 = vand.u32 4294901760, %v5849_v53 }
 0x743   : > { %6449 = vmatmul.f32.gmra.mxu0 %v6448_v54 }
 0x744   : > { %v13906_v7 = vsub.f32 %v5849_v53, %v13899_v63 }
 0x745   : > { %6532 = vmatmul.f32.gmra.mxu1 %v13862_v15 }
 0x746   : > { %v6470_v30 = vand.u32 4294901760, %v13906_v7 }
 0x748   : > { %v6471_v4 = vsub.f32 %v13906_v7, %v6470_v30 }
 0x749   : > { %6325 = vmatmul.f32.gmra.mxu2 %v13776_v36  ;;  %6394 = vmatmul.f32.gmra.mxu3 %v13785_v11  ;;  %v5852_v36 = vsel %vm1027_vm0, %v5809_v59, 0 }
 0x74a   : > { %v13912_v32 = vand.u32 4294901760, %v5852_v36  ;;  %v6472_v57 = vand.u32 4294901760, %v6471_v4 }
 0x74b   : > { %6457 = vmatmul.f32.gmra.mxu0 %v6456_v37 }
 0x74c   : > { %v13919_v9 = vsub.f32 %v5852_v36, %v13912_v32 }
 0x74d   : > { %6536 = vmatmul.f32.gmra.mxu1 %v13873_v50 }
 0x74e   : > { %v6478_v44 = vand.u32 4294901760, %v13919_v9 }
 0x750   : > { %v6479_v10 = vsub.f32 %v13919_v9, %v6478_v44 }
 0x751   : > { %6329 = vmatmul.f32.gmra.mxu2 %v13785_v11  ;;  %6398 = vmatmul.f32.gmra.mxu3 %v13810_v34  ;;  %v5855_v11 = vsel %vm1027_vm0, %v5811_v17, 0 }
 0x752   : > { %v13925_v33 = vand.u32 4294901760, %v5855_v11  ;;  %v6480_v5 = vand.u32 4294901760, %v6479_v10 }
 0x753   : > { %6465 = vmatmul.f32.gmra.mxu0 %v6464_v35 }
 0x754   : > { %v13932_v43 = vsub.f32 %v5855_v11, %v13925_v33 }
 0x755   : > { %6540 = vmatmul.f32.gmra.mxu1 %v13886_v49 }
 0x756   : > { %v6486_v26 = vand.u32 4294901760, %v13932_v43 }
 0x758   : > { %v6487_v46 = vsub.f32 %v13932_v43, %v6486_v26 }
 0x759   : > { %6333 = vmatmul.f32.gmra.mxu2 %v13810_v34  ;;  %6402 = vmatmul.f32.gmra.mxu3 %v13815_v62  ;;  %v5858_v34 = vsel %vm1027_vm0, %v5813_v13, 0 }
 0x75a   : > { %v13938_v29 = vand.u32 4294901760, %v5858_v34 }
 0x75b   : > { %6473 = vmatmul.f32.gmra.mxu0 %v6472_v57 }
 0x75c   : > { %v13945_v45 = vsub.f32 %v5858_v34, %v13938_v29 }
 0x75d   : > { %6544 = vmatmul.f32.gmra.mxu1 %v13899_v63 }
 0x75e   : > { %v6494_v60 = vand.u32 4294901760, %v13945_v45 }
 0x760   : > { %v6495_v24 = vsub.f32 %v13945_v45, %v6494_v60 }
 0x761   : > { %6337 = vmatmul.f32.gmra.mxu2 %v13815_v62  ;;  %6406 = vmatmul.f32.gmra.mxu3 %v13829_v42  ;;  %v6488_v62 = vand.u32 4294901760, %v6487_v46 }
 0x762   : > { %v6496_v22 = vand.u32 4294901760, %v6495_v24 }
 0x763   : > { %6481 = vmatmul.f32.gmra.mxu0 %v6480_v5  ;;  %v14107_v5 = vld [vmem:[%s15901_s6] ss:$0 sm:$0xff] }
 0x765   : > { %6548 = vmatmul.f32.gmra.mxu1 %v13912_v32 }
 0x769   : > { %6341 = vmatmul.f32.gmra.mxu2 %v13829_v42  ;;  %6410 = vmatmul.f32.gmra.mxu3 %v13845_v52 }
 0x76a   : > { %v13956_v48 = vpop.f32.mrf.mxu0 }
 0x76b   : > { %6489 = vmatmul.f32.gmra.mxu0 %v6488_v62 }
 0x76c   : > { %v13958_v42 = vpop.f32.mrf.mxu1 }
 0x76d   : > { %6552 = vmatmul.f32.gmra.mxu1 %v13925_v33 }
 0x76e   : > { %v13961_v31 = vpop.f32.mrf.mxu3 }
 0x771   : > { %6345 = vmatmul.f32.gmra.mxu2 %v13845_v52  ;;  %6414 = vmatmul.f32.gmra.mxu3 %v13857_v25 }
 0x773   : > { %6497 = vmatmul.f32.gmra.mxu0 %v6496_v22 }
 0x775   : > { %6556 = vmatmul.f32.gmra.mxu1 %v13938_v29 }
 0x776   : > { %v13966_v41 = vpop.f32.mrf.mxu0  ;;  %v13972_v55 = vpop.f32.mrf.mxu2 }
 0x778   : > { %v13969_v52 = vpop.f32.mrf.mxu1 }
 0x779   : > { %6349 = vmatmul.f32.gmra.mxu2 %v13857_v25  ;;  %6642 = vmatmul.f32.vlgmr.msra.gmra.mxu3 %v6438_v20 }
 0x77a   : > { %v13974_v28 = vpop.f32.mrf.mxu3 }
 0x77b   : > { %6711 = vmatmul.f32.vlgmr.msrb.gmra.mxu0 %v13851_v14 }
 0x77d   : > { %6762 = vmatmul.f32.vlgmr.msrb.gmra.mxu1 %v13851_v14 }
 0x77e   : > { %v13980_v25 = vpop.f32.mrf.mxu0 }
 0x780   : > { %v13983_v18 = vpop.f32.mrf.mxu1 }
 0x781   : > { %6582 = vmatmul.f32.vlgmr.msra.gmra.mxu2 %v13854_v21  ;;  %6648 = vmatmul.f32.gmra.mxu3 %v6446_v51 }
 0x782   : > { %v13985_v20 = vpop.f32.mrf.mxu2  ;;  %v13987_v14 = vpop.f32.mrf.mxu3 }
 0x783   : > { %6715 = vmatmul.f32.gmra.mxu0 %v13862_v15 }
 0x785   : > { %6766 = vmatmul.f32.gmra.mxu1 %v13862_v15 }
 0x786   : > { %v13994_v21 = vpop.f32.mrf.mxu0 }
 0x788   : > { %v13996_v39 = vpop.f32.mrf.mxu1 }
 0x789   : > { %6587 = vmatmul.f32.gmra.mxu2 %v13868_v56  ;;  %6654 = vmatmul.f32.gmra.mxu3 %v6454_v19 }
 0x78a   : > { %v13998_v15 = vpop.f32.mrf.mxu2  ;;  %v14003_v40 = vpop.f32.mrf.mxu3 }
 0x78b   : > { %6719 = vmatmul.f32.gmra.mxu0 %v13873_v50 }
 0x78d   : > { %6770 = vmatmul.f32.gmra.mxu1 %v13873_v50 }
 0x78e   : > { %v14007_v16 = vpop.f32.mrf.mxu0 }
 0x790   : > { %v14012_v23 = vpop.f32.mrf.mxu1 }
 0x791   : > { %6592 = vmatmul.f32.gmra.mxu2 %v13880_v8  ;;  %6660 = vmatmul.f32.gmra.mxu3 %v6462_v27 }
 0x792   : > { %v14014_v56 = vpop.f32.mrf.mxu2  ;;  %v14017_v0 = vpop.f32.mrf.mxu3 }
 0x793   : > { %6723 = vmatmul.f32.gmra.mxu0 %v13886_v49 }
 0x795   : > { %6774 = vmatmul.f32.gmra.mxu1 %v13886_v49 }
 0x799   : > { %6597 = vmatmul.f32.gmra.mxu2 %v13893_v47  ;;  %6666 = vmatmul.f32.gmra.mxu3 %v6470_v30  ;;  %v14020_v58 = vpop.f32.mrf.mxu0 }
 0x79a   : > { %v14028_v51 = vpop.f32.mrf.mxu2 }
 0x79b   : > { %6727 = vmatmul.f32.gmra.mxu0 %v13899_v63  ;;  %v14025_v1 = vpop.f32.mrf.mxu1 }
 0x79d   : > { %6778 = vmatmul.f32.gmra.mxu1 %v13899_v63  ;;  %v14030_v50 = vpop.f32.mrf.mxu3 }
 0x7a1   : > { %6602 = vmatmul.f32.gmra.mxu2 %v13906_v7  ;;  %6672 = vmatmul.f32.gmra.mxu3 %v6478_v44 }
 0x7a3   : > { %6731 = vmatmul.f32.gmra.mxu0 %v13912_v32 }
 0x7a5   : > { %6782 = vmatmul.f32.gmra.mxu1 %v13912_v32  ;;  %v14041_v8 = vpop.f32.mrf.mxu2 }
 0x7a7   : > { %v14033_v38 = vpop.f32.mrf.mxu0 }
 0x7a9   : > { %6607 = vmatmul.f32.gmra.mxu2 %v13919_v9  ;;  %6678 = vmatmul.f32.gmra.mxu3 %v6486_v26  ;;  %v14038_v2 = vpop.f32.mrf.mxu1 }
 0x7ab   : > { %6735 = vmatmul.f32.gmra.mxu0 %v13925_v33  ;;  %v14043_v6 = vpop.f32.mrf.mxu3 }
 0x7ad   : > { %6786 = vmatmul.f32.gmra.mxu1 %v13925_v33 }
 0x7b0   : > { %v14046_v54 = vpop.f32.mrf.mxu0 }
 0x7b1   : > { %6612 = vmatmul.f32.gmra.mxu2 %v13932_v43  ;;  %6684 = vmatmul.f32.gmra.mxu3 %v6494_v60  ;;  %v16518_v60 = vmov 0.0  }
 0x7b2   : > { %v14051_v19 = vpop.f32.mrf.mxu1  ;;  %6798 = vst.msk [vmem:[#allocation4 + $0x10] sm:$0xff] %vm6794_vm9, %v16518_v60 }
 0x7b3   : > { %6739 = vmatmul.f32.gmra.mxu0 %v13938_v29  ;;  %v14054_v49 = vpop.f32.mrf.mxu2  ;;  %6799 = vst.msk [vmem:[#allocation4 + $0x18] sm:$0x3] %vm6796_vm10, %v16518_v60 }
 0x7b4   : > { %v14056_v3 = vpop.f32.mrf.mxu3  ;;  %6795 = vst.msk [vmem:[#allocation4] sm:$0xff] %vm6794_vm9, %v16518_v60 }
 0x7b5   : > { %6790 = vmatmul.f32.gmra.mxu1 %v13938_v29  ;;  %v5899_v29 = vadd.f32 %v14107_v5, %v13972_v55  ;;  %6797 = vst.msk [vmem:[#allocation4 + $0x8] sm:$0x3] %vm6796_vm10, %v16518_v60  ;;  %v5907_v55 = vadd.f32 %v14107_v5, %v13985_v20 }
 0x7b6   : > { %6800 = vst.msk [vmem:[#allocation4 + $0x20] sm:$0xff] %vm6794_vm9, %v16518_v60 }
 0x7b7   : > { %v6056_v24 = vadd.f32 %v13961_v31, %v5899_v29  ;;  %6801 = vst.msk [vmem:[#allocation4 + $0x28] sm:$0x3] %vm6796_vm10, %v16518_v60 }
 0x7b8   : > { %v14059_v12 = vpop.f32.mrf.mxu0  ;;  %6802 = vst.msk [vmem:[#allocation4 + $0x30] sm:$0xff] %vm6794_vm9, %v16518_v60 }
 0x7b9   : > { %6617 = vmatmul.f32.gmra.mxu2 %v13945_v45  ;;  %6803 = vst.msk [vmem:[#allocation4 + $0x38] sm:$0x3] %vm6796_vm10, %v16518_v60 }
 0x7ba   : > { %v14062_v47 = vpop.f32.mrf.mxu1  ;;  %6804 = vst.msk [vmem:[#allocation4 + $0x40] sm:$0xff] %vm6794_vm9, %v16518_v60 }
 0x7bb   : > { %6805 = vst.msk [vmem:[#allocation4 + $0x48] sm:$0x3] %vm6796_vm10, %v16518_v60 }
 0x7bc   : > { %v14064_v53 = vpop.f32.mrf.mxu2  ;;  %v6387_v37 = vpop.f32.mrf.mxu3  ;;  %6806 = vst.msk [vmem:[#allocation4 + $0x50] sm:$0xff] %vm6794_vm9, %v16518_v60 }
 0x7bd   : > { %6807 = vst.msk [vmem:[#allocation4 + $0x58] sm:$0x3] %vm6796_vm10, %v16518_v60 }
 0x7be   : > { %6808 = vst.msk [vmem:[#allocation4 + $0x60] sm:$0xff] %vm6794_vm9, %v16518_v60 }
 0x7bf   : > { %6809 = vst.msk [vmem:[#allocation4 + $0x68] sm:$0x3] %vm6796_vm10, %v16518_v60 }
 0x7c0   : > { %v14066_v27 = vpop.f32.mrf.mxu0  ;;  %6810 = vst.msk [vmem:[#allocation4 + $0x70] sm:$0xff] %vm6794_vm9, %v16518_v60 }
 0x7c1   : > { %6811 = vst.msk [vmem:[#allocation4 + $0x78] sm:$0x3] %vm6796_vm10, %v16518_v60 }
 0x7c2   : > { %v14068_v63 = vpop.f32.mrf.mxu1  ;;  %6812 = vst.msk [vmem:[#allocation4 + $0x80] sm:$0xff] %vm6794_vm9, %v16518_v60 }
 0x7c3   : > { %6813 = vst.msk [vmem:[#allocation4 + $0x88] sm:$0x3] %vm6796_vm10, %v16518_v60 }
 0x7c4   : > { %v6322_v59 = vpop.f32.mrf.mxu2  ;;  %v14070_v61 = vpop.f32.mrf.mxu3  ;;  %6814 = vst.msk [vmem:[#allocation4 + $0x90] sm:$0xff] %vm6794_vm9, %v16518_v60 }
 0x7c5   : > { %6815 = vst.msk [vmem:[#allocation4 + $0x98] sm:$0x3] %vm6796_vm10, %v16518_v60 }
 0x7c8   : > { %v14072_v7 = vpop.f32.mrf.mxu0 }
 0x7ca   : > { %v14074_v36 = vpop.f32.mrf.mxu1 }
 0x7cc   : > { %v14076_v35 = vpop.f32.mrf.mxu2  ;;  %v14078_v30 = vpop.f32.mrf.mxu3 }
 0x7d0   : > { %v14080_v32 = vpop.f32.mrf.mxu0 }
 0x7d2   : > { %v14082_v17 = vpop.f32.mrf.mxu1 }
 0x7d4   : > { %v14084_v4 = vpop.f32.mrf.mxu2  ;;  %v14086_v9 = vpop.f32.mrf.mxu3 }
 0x7d8   : > { %v14088_v11 = vpop.f32.mrf.mxu0 }
 0x7da   : > { %v14090_v57 = vpop.f32.mrf.mxu1 }
 0x7dc   : > { %v14092_v44 = vpop.f32.mrf.mxu2  ;;  %v14094_v33 = vpop.f32.mrf.mxu3 }
 0x7e0   : > { %v14096_v13 = vpop.f32.mrf.mxu0 }
 0x7e2   : > { %v14098_v10 = vpop.f32.mrf.mxu1 }
 0x7e4   : > { %v14100_v43 = vpop.f32.mrf.mxu2  ;;  %v14102_v34 = vpop.f32.mrf.mxu3 }
 0x7e8   : > { %v14109_v26 = vpop.f32.mrf.mxu0 }
 0x7e9   : > { %16516 = vst [vmem:[#allocation26_spill] sm:$0xff] %v14109_v26 }
 0x7ea   : > { %v14113_v46 = vpop.f32.mrf.mxu1 }
 0x7eb   : > { %16517 = vst [vmem:[#allocation27_spill] sm:$0xff] %v14113_v46  ;;  %v6138_v46 = vadd.f32 %v13956_v48, %v6056_v24  ;;  %v6060_v48 = vadd.f32 %v13974_v28, %v5907_v55  ;;  %v6841_v24 = vld [vmem:[#allocation4 + $0x1] sm:$0xff] }
 0x7ec   : > { %v14115_v45 = vpop.f32.mrf.mxu2  ;;  %v14117_v62 = vpop.f32.mrf.mxu3  ;;  %6857 = vrot.lane.b32.xlu1 %v6841_v24, %s9901_s21 }
 0x7ed   : > { %v6212_v20 = vadd.f32 %v13958_v42, %v6138_v46  ;;  %v5915_v42 = vadd.f32 %v14107_v5, %v13998_v15  ;;  %v6143_v28 = vadd.f32 %v13966_v41, %v6060_v48  ;;  %v5923_v48 = vadd.f32 %v14107_v5, %v14014_v56 }
 0x7ef   : > { %v6323_v26 = vadd.f32 %v6322_v59, %v6212_v20  ;;  %v6064_v41 = vadd.f32 %v13987_v14, %v5915_v42  ;;  %v6218_v15 = vadd.f32 %v13969_v52, %v6143_v28 }
 0x7f0   : > { %v14128_v22 = vpop.f32.mrf.mxu0 }
 0x7f1   : > { %16519 = vst [vmem:[#allocation37_spill] sm:$0xff] %v14128_v22  ;;  %v6388_v59 = vadd.f32 %v6387_v37, %v6323_v26  ;;  %v6327_v37 = vadd.f32 %v14076_v35, %v6218_v15  ;;  %v6148_v14 = vadd.f32 %v13980_v25, %v6064_v41  ;;  %v5931_v25 = vadd.f32 %v14107_v5, %v14028_v51 }
 0x7f2   : > { %v14137_v31 = vpop.f32.mrf.mxu1 }
 0x7f3   : > { %16520 = vst [vmem:[#allocation32_spill] sm:$0xff] %v14137_v31  ;;  %v6890_v31 = vld [vmem:[#allocation4 + $0x2] sm:$0xff]  ;;  %v6443_v26 = vadd.f32 %v14059_v12, %v6388_v59  ;;  %v6392_v52 = vadd.f32 %v14070_v61, %v6327_v37  ;;  %v6224_v35 = vadd.f32 %v13983_v18, %v6148_v14 }
 0x7f4   : > { %v14143_v29 = vpop.f32.mrf.mxu2  ;;  %v14145_v22 = vpop.f32.mrf.mxu3  ;;  %6906 = vrot.lane.b32.xlu2 %v6890_v31, %s9905_s28 }
 0x7f5   : > { %16521 = vst [vmem:[#allocation40_spill] sm:$0xff] %v14145_v22  ;;  %v6530_v42 = vadd.f32 %v14062_v47, %v6443_v26  ;;  %v6331_v60 = vadd.f32 %v14084_v4, %v6224_v35  ;;  %v6451_v56 = vadd.f32 %v14066_v27, %v6392_v52 }
 0x7f7   : > { %v6396_v47 = vadd.f32 %v14078_v30, %v6331_v60  ;;  %v5939_v30 = vadd.f32 %v14107_v5, %v14041_v8 }
 0x7f8   : > { %v6712_v46 = vpop.f32.mrf.mxu0 }
 0x7fa   : > { %v6763_v55 = vpop.f32.mrf.mxu1 }
 0x7fc   : > { %v14170_v31 = vpop.f32.mrf.mxu2  ;;  %v6643_v20 = vpop.f32.mrf.mxu3 }
 0x7fd   : > { %16522 = vst [vmem:[#allocation36_spill] sm:$0xff] %v14170_v31  ;;  %v6068_v31 = vadd.f32 %v14003_v40, %v5923_v48  ;;  %v6534_v40 = vadd.f32 %v14068_v63, %v6451_v56  ;;  %v6072_v48 = vadd.f32 %v14017_v0, %v5931_v25 }
 0x7ff   : > { %v6153_v61 = vadd.f32 %v13994_v21, %v6068_v31  ;;  %v6459_v21 = vadd.f32 %v14072_v7, %v6396_v47  ;;  %v6158_v63 = vadd.f32 %v14007_v16, %v6072_v48 }
 0x800   : > { %v6716_v24 = vpop.f32.mrf.mxu0 }
 0x801   : > { %v6230_v4 = vadd.f32 %v13996_v39, %v6153_v61  ;;  %v6538_v39 = vadd.f32 %v14074_v36, %v6459_v21  ;;  %v6236_v7 = vadd.f32 %v14012_v23, %v6158_v63 }
 0x802   : > { %v6767_v59 = vpop.f32.mrf.mxu1 }
 0x803   : > { %v6335_v51 = vadd.f32 %v14092_v44, %v6230_v4  ;;  %v6339_v36 = vadd.f32 %v14100_v43, %v6236_v7 }
 0x804   : > { %v6583_v28 = vpop.f32.mrf.mxu2  ;;  %v6649_v22 = vpop.f32.mrf.mxu3 }
 0x805   : > { %v6584_v12 = vadd.f32 %v6583_v28, %v6530_v42  ;;  %v6400_v0 = vadd.f32 %v14086_v9, %v6335_v51  ;;  %v6404_v60 = vadd.f32 %v14094_v33, %v6339_v36  ;;  %v16524_v36 = vld [vmem:[#allocation26_spill] sm:$0xff] }
 0x807   : > { %v6644_v15 = vadd.f32 %v6643_v20, %v6584_v12  ;;  %v6475_v47 = vadd.f32 %v14088_v11, %v6404_v60 }
 0x808   : > { %v6720_v20 = vpop.f32.mrf.mxu0 }
 0x809   : > { %v6713_v41 = vadd.f32 %v6712_v46, %v6644_v15 }
 0x80a   : > { %v6771_v46 = vpop.f32.mrf.mxu1 }
 0x80b   : > { %v6764_v37 = vadd.f32 %v6763_v55, %v6713_v41 }
 0x80c   : > { %v6588_v26 = vpop.f32.mrf.mxu2  ;;  %v6655_v18 = vpop.f32.mrf.mxu3 }
 0x80d   : > { %6817 = vst.msk [vmem:[#allocation4 + $0x11] sm:$0xff] %vm6794_vm9, %v6764_v37  ;;  %v6589_v27 = vadd.f32 %v6588_v26, %v6534_v40  ;;  %v5955_v40 = vadd.f32 %v14107_v5, %v14064_v53 }
 0x80f   : > { %v6650_v14 = vadd.f32 %v6649_v22, %v6589_v27  ;;  %v6076_v22 = vadd.f32 %v14030_v50, %v5939_v30  ;;  %v6467_v50 = vadd.f32 %v14080_v32, %v6400_v0 }
 0x810   : > { %v6724_v23 = vpop.f32.mrf.mxu0 }
 0x811   : > { %v6717_v55 = vadd.f32 %v6716_v24, %v6650_v14  ;;  %v5947_v24 = vadd.f32 %v14107_v5, %v14054_v49  ;;  %v6163_v35 = vadd.f32 %v14020_v58, %v6076_v22  ;;  %v6542_v56 = vadd.f32 %v14082_v17, %v6467_v50 }
 0x813   : > { %v6768_v31 = vadd.f32 %v6767_v59, %v6717_v55  ;;  %v6775_v59 = vpop.f32.mrf.mxu1  ;;  %v6080_v41 = vadd.f32 %v14043_v6, %v5947_v24  ;;  %v6242_v49 = vadd.f32 %v14025_v1, %v6163_v35 }
 0x814   : > { %v6593_v52 = vpop.f32.mrf.mxu2  ;;  %v6939_v42 = vld [vmem:[#allocation4 + $0x10] sm:$0xff]  ;;  %v6661_v16 = vpop.f32.mrf.mxu3 }
 0x815   : > { %v14208_v28 = vld [vmem:[#allocation4 + $0x12] sm:$0xff]  ;;  %6818 = vst.msk [vmem:[#allocation4 + $0x21] sm:$0xff] %vm6794_vm9, %v6768_v31  ;;  %v6594_v8 = vadd.f32 %v6593_v52, %v6538_v39  ;;  %6955 = vrot.lane.b32.xlu0 %v6939_v42, %s9904_s27  ;;  %v6343_v6 = vadd.f32 %v14115_v45, %v6242_v49  ;;  %v6168_v26 = vadd.f32 %v14033_v38, %v6080_v41 }
 0x816   : > { %v6842_v44 = vld [vmem:[#allocation4 + $0x11] sm:$0xff]  ;;  %6908 = vrot.lane.b32.xlu2 %v14208_v28, %s9905_s28  ;;  %6834 = vst.msk [vmem:[#allocation5 + $0x18] sm:$0xff] %vm6794_vm9, %v6939_v42  ;;  %v6546_v45 = vadd.f32 %v14090_v57, %v6475_v47 }
 0x817   : > { %6859 = vrot.lane.b32.xlu1 %v6842_v44, %s9901_s21  ;;  %v6656_v9 = vadd.f32 %v6655_v18, %v6594_v8  ;;  %6996 = vst.msk [vmem:[#allocation5 + $0x8] sm:$0xff] %vm6794_vm9, %v6842_v44  ;;  %v6408_v4 = vadd.f32 %v14102_v34, %v6343_v6  ;;  %v6248_v53 = vadd.f32 %v14038_v2, %v6168_v26  ;;  %v16523_v8 = vld [vmem:[#allocation36_spill] sm:$0xff]  ;;  %v7204_v6 = vld [vmem:[%s15902_s7 + $0x78] sm:$0xff] }
 0x818   : > { %v6728_v48 = vpop.f32.mrf.mxu0  ;;  %v16527_v47 = vld [vmem:[#allocation37_spill] sm:$0xff] }
 0x819   : > { %v6721_v12 = vadd.f32 %v6720_v20, %v6656_v9  ;;  %v6483_v5 = vadd.f32 %v14096_v13, %v6408_v4 }
 0x81b   : > { %v6772_v15 = vadd.f32 %v6771_v46, %v6721_v12  ;;  %v6779_v20 = vpop.f32.mrf.mxu1  ;;  %v6084_v46 = vadd.f32 %v14056_v3, %v5955_v40  ;;  %v6347_v3 = vadd.f32 %v14143_v29, %v6248_v53  ;;  %v6550_v39 = vadd.f32 %v14098_v10, %v6483_v5  ;;  %v16526_v12 = vld [vmem:[#allocation27_spill] sm:$0xff] }
 0x81c   : > { %v6598_v25 = vpop.f32.mrf.mxu2  ;;  %v14226_v43 = vld [vmem:[#allocation4 + $0x20] sm:$0xff]  ;;  %v6667_v37 = vpop.f32.mrf.mxu3  ;;  %v14317_v40 = vand.u32 4294901760, %v7204_v6 }
 0x81d   : > { %v14228_v61 = vld [vmem:[#allocation4 + $0x22] sm:$0xff]  ;;  %6819 = vst.msk [vmem:[#allocation4 + $0x31] sm:$0xff] %vm6794_vm9, %v6772_v15  ;;  %v6599_v58 = vadd.f32 %v6598_v25, %v6542_v56  ;;  %6957 = vrot.lane.b32.xlu0 %v14226_v43, %s9904_s27  ;;  %v6173_v30 = vadd.f32 %v14046_v54, %v6084_v46  ;;  %v6412_v0 = vadd.f32 %v14117_v62, %v6347_v3 }
 0x81e   : > { %v14230_v32 = vld [vmem:[#allocation4 + $0x21] sm:$0xff]  ;;  %6910 = vrot.lane.b32.xlu2 %v14228_v61, %s9905_s28  ;;  %6835 = vst.msk [vmem:[#allocation5 + $0x30] sm:$0xff] %vm6794_vm9, %v14226_v43  ;;  %7254 = vmatpush.msrb.mxu2 %v14317_v40 }
 0x81f   : > { %v6989_v17 = vld [vmem:[#allocation4 + $0x21] sm:$0xff]  ;;  %6861 = vrot.lane.b32.xlu1 %v14230_v32, %s9901_s21  ;;  %v6662_v1 = vadd.f32 %v6661_v16, %v6599_v58  ;;  %v6254_v22 = vadd.f32 %v14051_v19, %v6173_v30  ;;  %v6491_v9 = vadd.f32 %v16524_v36, %v6412_v0  ;;  %7569 = vmatpush.msra.mxu1 %v14317_v40  ;;  %v7203_v30 = vld [vmem:[%s15902_s7 + $0x70] sm:$0xff] }
 0x820   : > { %v7149_v33 = vld [vmem:[#allocation4 + $0x22] sm:$0xff]  ;;  %6997 = vst.msk [vmem:[#allocation5 + $0x20] sm:$0xff] %vm6794_vm9, %v6989_v17  ;;  %v6732_v52 = vpop.f32.mrf.mxu0 }
 0x821   : > { %7157 = vst.msk [vmem:[#allocation5 + $0x10] sm:$0xff] %vm6794_vm9, %v7149_v33  ;;  %v6725_v18 = vadd.f32 %v6724_v23, %v6662_v1  ;;  %v6351_v19 = vadd.f32 %v16523_v8, %v6254_v22  ;;  %v16525_v23 = vld [vmem:[#allocation40_spill] sm:$0xff] }
 0x823   : > { %v6776_v27 = vadd.f32 %v6775_v59, %v6725_v18  ;;  %v6783_v7 = vpop.f32.mrf.mxu1  ;;  %v6416_v24 = vadd.f32 %v16525_v23, %v6351_v19  ;;  %v6554_v59 = vadd.f32 %v16526_v12, %v6491_v9  ;;  %v7200_v12 = vld [vmem:[%s15902_s7 + $0x58] sm:$0xff] }
 0x824   : > { %v6603_v51 = vpop.f32.mrf.mxu2  ;;  %v14252_v11 = vld [vmem:[#allocation4 + $0x30] sm:$0xff]  ;;  %v6673_v55 = vpop.f32.mrf.mxu3 }
 0x825   : > { %v14254_v14 = vld [vmem:[#allocation4 + $0x32] sm:$0xff]  ;;  %6820 = vst.msk [vmem:[#allocation4 + $0x41] sm:$0xff] %vm6794_vm9, %v6776_v27  ;;  %v6604_v38 = vadd.f32 %v6603_v51, %v6546_v45  ;;  %6959 = vrot.lane.b32.xlu0 %v14252_v11, %s9904_s27 }
 0x826   : > { %v14256_v21 = vld [vmem:[#allocation4 + $0x31] sm:$0xff]  ;;  %6912 = vrot.lane.b32.xlu2 %v14254_v14, %s9905_s28  ;;  %6836 = vst.msk [vmem:[#allocation5 + $0x48] sm:$0xff] %vm6794_vm9, %v14252_v11 }
 0x827   : > { %v6990_v57 = vld [vmem:[#allocation4 + $0x31] sm:$0xff]  ;;  %6863 = vrot.lane.b32.xlu1 %v14256_v21, %s9901_s21  ;;  %v6668_v2 = vadd.f32 %v6667_v37, %v6604_v38  ;;  %v6499_v37 = vadd.f32 %v16527_v47, %v6416_v24 }
 0x828   : > { %v7150_v34 = vld [vmem:[#allocation4 + $0x32] sm:$0xff]  ;;  %6998 = vst.msk [vmem:[#allocation5 + $0x38] sm:$0xff] %vm6794_vm9, %v6990_v57  ;;  %v6736_v33 = vpop.f32.mrf.mxu0 }
 0x829   : > { %7158 = vst.msk [vmem:[#allocation5 + $0x28] sm:$0xff] %vm6794_vm9, %v7150_v34  ;;  %v6729_v63 = vadd.f32 %v6728_v48, %v6668_v2  ;;  %v14323_v48 = vsub.f32 %v7204_v6, %v14317_v40  ;;  %v16528_v27 = vld [vmem:[#allocation32_spill] sm:$0xff] }
 0x82a   : > { %v6558_v45 = vadd.f32 %v16528_v27, %v6499_v37 }
 0x82b   : > { %v6780_v31 = vadd.f32 %v6779_v20, %v6729_v63  ;;  %v6787_v26 = vpop.f32.mrf.mxu1  ;;  %v7352_v20 = vand.u32 4294901760, %v14323_v48  ;;  %7481 = vmatpush.msra.mxu0 %v14323_v48  ;;  %v7202_v63 = vld [vmem:[%s15902_s7 + $0x68] sm:$0xff] }
 0x82c   : > { %v6608_v42 = vpop.f32.mrf.mxu2  ;;  %v14276_v44 = vld [vmem:[#allocation4 + $0x40] sm:$0xff]  ;;  %v6679_v60 = vpop.f32.mrf.mxu3 }
 0x82d   : > { %v14278_v29 = vld [vmem:[#allocation4 + $0x42] sm:$0xff]  ;;  %6821 = vst.msk [vmem:[#allocation4 + $0x51] sm:$0xff] %vm6794_vm9, %v6780_v31  ;;  %v6609_v54 = vadd.f32 %v6608_v42, %v6550_v39  ;;  %6961 = vrot.lane.b32.xlu0 %v14276_v44, %s9904_s27  ;;  %v7353_v34 = vsub.f32 %v14323_v48, %v7352_v20  ;;  %v14353_v31 = vand.u32 4294901760, %v7203_v30  ;;  %v14355_v39 = vand.u32 4294901760, %v7202_v63 }
 0x82e   : > { %v14280_v13 = vld [vmem:[#allocation4 + $0x41] sm:$0xff]  ;;  %6914 = vrot.lane.b32.xlu2 %v14278_v29, %s9905_s28  ;;  %6837 = vst.msk [vmem:[#allocation5 + $0x60] sm:$0xff] %vm6794_vm9, %v14276_v44 }
 0x82f   : > { %v6991_v10 = vld [vmem:[#allocation4 + $0x41] sm:$0xff]  ;;  %6865 = vrot.lane.b32.xlu1 %v14280_v13, %s9901_s21  ;;  %v6674_v16 = vadd.f32 %v6673_v55, %v6609_v54  ;;  %v7354_v0 = vand.u32 4294901760, %v7353_v34  ;;  %7256 = vmatpush.msrb.mxu2 %v14353_v31  ;;  %v14361_v22 = vsub.f32 %v7203_v30, %v14353_v31  ;;  %v14364_v54 = vsub.f32 %v7202_v63, %v14355_v39 }
 0x830   : > { %v7151_v62 = vld [vmem:[#allocation4 + $0x42] sm:$0xff]  ;;  %6999 = vst.msk [vmem:[#allocation5 + $0x50] sm:$0xff] %vm6794_vm9, %v6991_v10  ;;  %7571 = vmatpush.msra.mxu1 %v14353_v31 }
 0x831   : > { %7159 = vst.msk [vmem:[#allocation5 + $0x40] sm:$0xff] %vm6794_vm9, %v7151_v62  ;;  %v6733_v50 = vadd.f32 %v6732_v52, %v6674_v16  ;;  %v6740_v52 = vpop.f32.mrf.mxu0  ;;  %7355 = vmatpush.msrb.mxu3 %v7354_v0  ;;  %7258 = vmatpush.msrb.mxu2 %v14355_v39  ;;  %v7364_v8 = vand.u32 4294901760, %v14364_v54  ;;  %v7197_v63 = vld [vmem:[%s15902_s7 + $0x40] sm:$0xff] }
 0x832   : > { %7484 = vmatpush.msra.mxu0 %v14361_v22  ;;  %7573 = vmatpush.msra.mxu1 %v14355_v39 }
 0x833   : > { %v6784_v35 = vadd.f32 %v6783_v7, %v6733_v50  ;;  %v6791_v10 = vpop.f32.mrf.mxu1  ;;  %v7358_v7 = vand.u32 4294901760, %v14361_v22  ;;  %v7365_v50 = vsub.f32 %v14364_v54, %v7364_v8 }
 0x834   : > { %v6613_v15 = vpop.f32.mrf.mxu2  ;;  %v14298_v56 = vld [vmem:[#allocation4 + $0x50] sm:$0xff]  ;;  %v6685_v5 = vpop.f32.mrf.mxu3  ;;  %7487 = vmatpush.msra.mxu0 %v14364_v54 }
 0x835   : > { %v14300_v25 = vld [vmem:[#allocation4 + $0x52] sm:$0xff]  ;;  %6822 = vst.msk [vmem:[#allocation4 + $0x61] sm:$0xff] %vm6794_vm9, %v6784_v35  ;;  %v6614_v49 = vadd.f32 %v6613_v15, %v6554_v59  ;;  %6963 = vrot.lane.b32.xlu0 %v14298_v56, %s9904_s27  ;;  %v7359_v9 = vsub.f32 %v14361_v22, %v7358_v7  ;;  %v7201_v35 = vld [vmem:[%s15902_s7 + $0x60] sm:$0xff] }
 0x836   : > { %v14302_v41 = vld [vmem:[#allocation4 + $0x51] sm:$0xff]  ;;  %6916 = vrot.lane.b32.xlu2 %v14300_v25, %s9905_s28  ;;  %6838 = vst.msk [vmem:[#allocation5 + $0x78] sm:$0xff] %vm6794_vm9, %v14298_v56  ;;  %v14400_v15 = vand.u32 4294901760, %v7201_v35 }
 0x837   : > { %v6992_v58 = vld [vmem:[#allocation4 + $0x51] sm:$0xff]  ;;  %6867 = vrot.lane.b32.xlu1 %v14302_v41, %s9901_s21  ;;  %v6680_v1 = vadd.f32 %v6679_v60, %v6614_v49  ;;  %v7360_v59 = vand.u32 4294901760, %v7359_v9  ;;  %v7366_v60 = vand.u32 4294901760, %v7365_v50  ;;  %v14402_v49 = vand.u32 4294901760, %v7200_v12 }
 0x838   : > { %v7152_v17 = vld [vmem:[#allocation4 + $0x52] sm:$0xff]  ;;  %7000 = vst.msk [vmem:[#allocation5 + $0x68] sm:$0xff] %vm6794_vm9, %v6992_v58  ;;  %7260 = vmatpush.msrb.mxu2 %v14400_v15  ;;  %v14408_v58 = vsub.f32 %v7201_v35, %v14400_v15  ;;  %7575 = vmatpush.msra.mxu1 %v14400_v15 }
 0x839   : > { %7160 = vst.msk [vmem:[#allocation5 + $0x58] sm:$0xff] %vm6794_vm9, %v7152_v17  ;;  %v6737_v18 = vadd.f32 %v6736_v33, %v6680_v1  ;;  %7361 = vmatpush.msrb.mxu3 %v7360_v59  ;;  %v14411_v17 = vsub.f32 %v7200_v12, %v14402_v49 }
 0x83a   : > { %v7370_v33 = vand.u32 4294901760, %v14408_v58  ;;  %7262 = vmatpush.msrb.mxu2 %v14402_v49  ;;  %7490 = vmatpush.msra.mxu0 %v14408_v58 }
 0x83b   : > { %v6788_v4 = vadd.f32 %v6787_v26, %v6737_v18  ;;  %7367 = vmatpush.msrb.mxu3 %v7366_v60  ;;  %v7376_v6 = vand.u32 4294901760, %v14411_v17  ;;  %7577 = vmatpush.msra.mxu1 %v14402_v49 }
 0x83c   : > { %v6618_v51 = vpop.f32.mrf.mxu2  ;;  %v14329_v46 = vld [vmem:[#allocation4 + $0x60] sm:$0xff]  ;;  %v7371_v37 = vsub.f32 %v14408_v58, %v7370_v33  ;;  %7493 = vmatpush.msra.mxu0 %v14411_v17 }
 0x83d   : > { %v14331_v53 = vld [vmem:[#allocation4 + $0x62] sm:$0xff]  ;;  %6823 = vst.msk [vmem:[#allocation4 + $0x71] sm:$0xff] %vm6794_vm9, %v6788_v4  ;;  %v6619_v57 = vadd.f32 %v6618_v51, %v6558_v45  ;;  %6965 = vrot.lane.b32.xlu0 %v14329_v46, %s9904_s27  ;;  %v7377_v26 = vsub.f32 %v14411_v17, %v7376_v6  ;;  %v7220_v17 = vld [vmem:[%s15902_s7 + $0xf8] sm:$0xff] }
 0x83e   : > { %v14333_v38 = vld [vmem:[#allocation4 + $0x61] sm:$0xff]  ;;  %6918 = vrot.lane.b32.xlu2 %v14331_v53, %s9905_s28  ;;  %6839 = vst.msk [vmem:[#allocation5 + $0x90] sm:$0xff] %vm6794_vm9, %v14329_v46  ;;  %v7372_v4 = vand.u32 4294901760, %v7371_v37 }
 0x83f   : > { %v6993_v3 = vld [vmem:[#allocation4 + $0x61] sm:$0xff]  ;;  %6869 = vrot.lane.b32.xlu1 %v14333_v38, %s9901_s21  ;;  %v6686_v55 = vadd.f32 %v6685_v5, %v6619_v57  ;;  %v7378_v27 = vand.u32 4294901760, %v7377_v26 }
 0x840   : > { %v7153_v2 = vld [vmem:[#allocation4 + $0x62] sm:$0xff]  ;;  %7001 = vst.msk [vmem:[#allocation5 + $0x80] sm:$0xff] %vm6794_vm9, %v6993_v3  ;;  %7373 = vmatpush.msrb.mxu3 %v7372_v4 }
 0x841   : > { %7161 = vst.msk [vmem:[#allocation5 + $0x70] sm:$0xff] %vm6794_vm9, %v7153_v2  ;;  %v6741_v42 = vadd.f32 %v6740_v52, %v6686_v55  ;;  %v7198_v51 = vld [vmem:[%s15902_s7 + $0x48] sm:$0xff]  ;;  %v14478_v55 = vand.u32 4294901760, %v7197_v63 }
 0x842   : > { %v14447_v57 = vand.u32 4294901760, %v7198_v51  ;;  %7379 = vmatpush.msrb.mxu3 %v7378_v27  ;;  %v7193_v27 = vld [vmem:[%s15902_s7 + $0x20] sm:$0xff] }
 0x843   : > { %v6792_v62 = vadd.f32 %v6791_v10, %v6741_v42 }
 0x844   : > { %v14371_v19 = vld [vmem:[#allocation4 + $0x70] sm:$0xff]  ;;  %v14454_v34 = vsub.f32 %v7198_v51, %v14447_v57 }
 0x845   : > { %v14373_v16 = vld [vmem:[#allocation4 + $0x72] sm:$0xff]  ;;  %6824 = vst.msk [vmem:[#allocation4 + $0x81] sm:$0xff] %vm6794_vm9, %v6792_v62  ;;  %6967 = vrot.lane.b32.xlu0 %v14371_v19, %s9904_s27 }
 0x846   : > { %v14375_v36 = vld [vmem:[#allocation4 + $0x71] sm:$0xff]  ;;  %6920 = vrot.lane.b32.xlu2 %v14373_v16, %s9905_s28  ;;  %6840 = vst.msk [vmem:[#allocation5 + $0xa8] sm:$0xff] %vm6794_vm9, %v14371_v19  ;;  %v7388_v2 = vand.u32 4294901760, %v14454_v34 }
 0x847   : > { %v6994_v23 = vld [vmem:[#allocation4 + $0x71] sm:$0xff]  ;;  %6871 = vrot.lane.b32.xlu1 %v14375_v36, %s9901_s21 }
 0x848   : > { %v7154_v24 = vld [vmem:[#allocation4 + $0x72] sm:$0xff]  ;;  %7002 = vst.msk [vmem:[#allocation5 + $0x98] sm:$0xff] %vm6794_vm9, %v6994_v23  ;;  %v7389_v30 = vsub.f32 %v14454_v34, %v7388_v2 }
 0x849   : > { %7162 = vst.msk [vmem:[#allocation5 + $0x88] sm:$0xff] %vm6794_vm9, %v7154_v24  ;;  %v7195_v23 = vld [vmem:[%s15902_s7 + $0x30] sm:$0xff]  ;;  %v6825_v24 = vld [vmem:[#allocation4] sm:$0xff] }
 0x84a   : > { %v7390_v0 = vand.u32 4294901760, %v7389_v30  ;;  %6833 = vst.msk [vmem:[#allocation5] sm:$0xff] %vm6794_vm9, %v6825_v24  ;;  %v7192_v30 = vld [vmem:[%s15902_s7 + $0x18] sm:$0xff] }
 0x84c   : > { %v14417_v1 = vld [vmem:[#allocation4 + $0x80] sm:$0xff] }
 0x84d   : > { %v14421_v47 = vld [vmem:[#allocation4 + $0x81] sm:$0xff]  ;;  %6969 = vrot.lane.b32.xlu0 %v14417_v1, %s9904_s27 }
 0x84e   : > { %7069 = vrot.lane.b32.xlu2 %v14226_v43, %s9905_s28  ;;  %7003 = vst.msk [vmem:[#allocation5 + $0xb0] sm:$0xff] %vm6794_vm9, %v14421_v47  ;;  %v7155_v18 = vld [vmem:[#allocation4 + $0x82] sm:$0xff]  ;;  %v7199_v43 = vld [vmem:[%s15902_s7 + $0x50] sm:$0xff] }
 0x84f   : > { %7020 = vrot.lane.b32.xlu1 %v14208_v28, %s9901_s21  ;;  %7163 = vst.msk [vmem:[#allocation5 + $0xa0] sm:$0xff] %vm6794_vm9, %v7155_v18  ;;  %v14442_v45 = vand.u32 4294901760, %v7199_v43  ;;  %v6907_v18 = vpop.permute.xlu2 %6906  ;;  %v7011_v22 = vld [vmem:[#allocation4 + $0x82] sm:$0xff] }
 0x851   : > { %7264 = vmatpush.msrb.mxu2 %v14442_v45  ;;  %v14451_v28 = vsub.f32 %v7199_v43, %v14442_v45  ;;  %7579 = vmatpush.msra.mxu1 %v14442_v45 }
 0x853   : > { %v7382_v3 = vand.u32 4294901760, %v14451_v28  ;;  %7266 = vmatpush.msrb.mxu2 %v14447_v57  ;;  %7496 = vmatpush.msra.mxu0 %v14451_v28 }
 0x854   : > { %7581 = vmatpush.msra.mxu1 %v14447_v57 }
 0x855   : > { %7117 = vrot.lane.b32.xlu0 %v14230_v32, %s9904_s27  ;;  %v7383_v5 = vsub.f32 %v14451_v28, %v7382_v3  ;;  %7499 = vmatpush.msra.mxu0 %v14454_v34  ;;  %v7196_v32 = vld [vmem:[%s15902_s7 + $0x38] sm:$0xff] }
 0x856   : > { %7071 = vrot.lane.b32.xlu2 %v14252_v11, %s9905_s28  ;;  %v14483_v52 = vand.u32 4294901760, %v7196_v32  ;;  %7268 = vmatpush.msrb.mxu2 %v14478_v55 }
 0x857   : > { %7022 = vrot.lane.b32.xlu1 %v14228_v61, %s9901_s21  ;;  %v7384_v11 = vand.u32 4294901760, %v7383_v5  ;;  %v14487_v61 = vsub.f32 %v7197_v63, %v14478_v55  ;;  %7583 = vmatpush.msra.mxu1 %v14478_v55  ;;  %v7191_v63 = vld [vmem:[%s15902_s7 + $0x10] sm:$0xff] }
 0x858   : > { %v14490_v42 = vsub.f32 %v7196_v32, %v14483_v52  ;;  %7270 = vmatpush.msrb.mxu2 %v14483_v52  ;;  %v14568_v32 = vand.u32 4294901760, %v7191_v63 }
 0x859   : > { %7385 = vmatpush.msrb.mxu3 %v7384_v11  ;;  %v7394_v10 = vand.u32 4294901760, %v14487_v61  ;;  %7502 = vmatpush.msra.mxu0 %v14487_v61  ;;  %v14566_v11 = vand.u32 4294901760, %v7192_v30 }
 0x85a   : > { %v7400_v62 = vand.u32 4294901760, %v14490_v42  ;;  %7585 = vmatpush.msra.mxu1 %v14483_v52 }
 0x85b   : > { %7391 = vmatpush.msrb.mxu3 %v7390_v0  ;;  %v7395_v9 = vsub.f32 %v14487_v61, %v7394_v10  ;;  %7505 = vmatpush.msra.mxu0 %v14490_v42 }
 0x85c   : > { %v7401_v50 = vsub.f32 %v14490_v42, %v7400_v62 }
 0x85d   : > { %7119 = vrot.lane.b32.xlu0 %v14256_v21, %s9904_s27  ;;  %v14514_v21 = vand.u32 4294901760, %v7195_v23 }
 0x85e   : > { %7073 = vrot.lane.b32.xlu2 %v14276_v44, %s9905_s28  ;;  %v7396_v44 = vand.u32 4294901760, %v7395_v9  ;;  %v7402_v35 = vand.u32 4294901760, %v7401_v50  ;;  %v6858_v5 = vpop.permute.xlu1 %6857  ;;  %v14577_v9 = vsub.f32 %v7192_v30, %v14566_v11  ;;  %v14580_v50 = vsub.f32 %v7191_v63, %v14568_v32 }
 0x85f   : > { %7024 = vrot.lane.b32.xlu1 %v14254_v14, %s9901_s21  ;;  %v7194_v14 = vld [vmem:[%s15902_s7 + $0x28] sm:$0xff]  ;;  %7272 = vmatpush.msrb.mxu2 %v14514_v21  ;;  %v14524_v59 = vsub.f32 %v7195_v23, %v14514_v21  ;;  %6882 = vst.msk [vmem:[#allocation5] sm:$0xff] %vm6881_vm11, %v6858_v5 }
 0x860   : > { %v14520_v12 = vand.u32 4294901760, %v7194_v14  ;;  %7397 = vmatpush.msrb.mxu3 %v7396_v44  ;;  %7587 = vmatpush.msra.mxu1 %v14514_v21  ;;  %6931 = vst.msk [vmem:[#allocation5] sm:$0xff] %vm6930_vm12, %v6907_v18  ;;  %v7190_v23 = vld [vmem:[%s15902_s7 + $0x8] sm:$0xff]  ;;  %v7424_v44 = vand.u32 4294901760, %v14577_v9 }
 0x861   : > { %v7406_v37 = vand.u32 4294901760, %v14524_v59  ;;  %7508 = vmatpush.msra.mxu0 %v14524_v59 }
 0x862   : > { %v14527_v60 = vsub.f32 %v7194_v14, %v14520_v12  ;;  %7403 = vmatpush.msrb.mxu3 %v7402_v35  ;;  %7274 = vmatpush.msrb.mxu2 %v14520_v12  ;;  %v7430_v14 = vand.u32 4294901760, %v14580_v50  ;;  %v7425_v18 = vsub.f32 %v14577_v9, %v7424_v44 }
 0x863   : > { %7589 = vmatpush.msra.mxu1 %v14520_v12  ;;  %v7407_v43 = vsub.f32 %v14524_v59, %v7406_v37 }
 0x864   : > { %v7412_v26 = vand.u32 4294901760, %v14527_v60  ;;  %7511 = vmatpush.msra.mxu0 %v14527_v60 }
 0x865   : > { %7121 = vrot.lane.b32.xlu0 %v14280_v13, %s9904_s27  ;;  %v7408_v13 = vand.u32 4294901760, %v7407_v43  ;;  %v7431_v43 = vsub.f32 %v14580_v50, %v7430_v14 }
 0x866   : > { %7075 = vrot.lane.b32.xlu2 %v14298_v56, %s9905_s28  ;;  %v7413_v4 = vsub.f32 %v14527_v60, %v7412_v26  ;;  %v14551_v56 = vand.u32 4294901760, %v7193_v27 }
 0x867   : > { %7026 = vrot.lane.b32.xlu1 %v14278_v29, %s9901_s21  ;;  %7409 = vmatpush.msrb.mxu3 %v7408_v13  ;;  %v7426_v13 = vand.u32 4294901760, %v7425_v18  ;;  %v7432_v5 = vand.u32 4294901760, %v7431_v43 }
 0x868   : > { %v7414_v51 = vand.u32 4294901760, %v7413_v4  ;;  %7276 = vmatpush.msrb.mxu2 %v14551_v56  ;;  %v14556_v29 = vsub.f32 %v7193_v27, %v14551_v56  ;;  %7591 = vmatpush.msra.mxu1 %v14551_v56  ;;  %v7189_v27 = vld [vmem:[%s15902_s7] sm:$0xff] }
 0x86a   : > { %7415 = vmatpush.msrb.mxu3 %v7414_v51  ;;  %v7418_v0 = vand.u32 4294901760, %v14556_v29  ;;  %7514 = vmatpush.msra.mxu0 %v14556_v29  ;;  %v14616_v51 = vand.u32 4294901760, %v7189_v27 }
 0x86b   : > { %7278 = vmatpush.msrb.mxu2 %v14566_v11  ;;  %7593 = vmatpush.msra.mxu1 %v14566_v11 }
 0x86c   : > { %7517 = vmatpush.msra.mxu0 %v14577_v9  ;;  %v14628_v63 = vsub.f32 %v7189_v27, %v14616_v51  ;;  %v7215_v27 = vld [vmem:[%s15902_s7 + $0xd0] sm:$0xff] }
 0x86d   : > { %7123 = vrot.lane.b32.xlu0 %v14302_v41, %s9904_s27  ;;  %v14591_v41 = vand.u32 4294901760, %v7190_v23  ;;  %7280 = vmatpush.msrb.mxu2 %v14568_v32 }
 0x86e   : > { %7077 = vrot.lane.b32.xlu2 %v14329_v46, %s9905_s28  ;;  %v7419_v46 = vsub.f32 %v14556_v29, %v7418_v0  ;;  %7520 = vmatpush.msra.mxu0 %v14580_v50 }
 0x86f   : > { %7028 = vrot.lane.b32.xlu1 %v14300_v25, %s9901_s21  ;;  %v14601_v25 = vsub.f32 %v7190_v23, %v14591_v41  ;;  %7595 = vmatpush.msra.mxu1 %v14568_v32 }
 0x870   : > { %v14593_v24 = vpop.permute.xlu2 %6908  ;;  %v7420_v35 = vand.u32 4294901760, %v7419_v46  ;;  %7282 = vmatpush.msrb.mxu2 %v14591_v41 }
 0x871   : > { %v7436_v4 = vand.u32 4294901760, %v14601_v25  ;;  %7523 = vmatpush.msra.mxu0 %v14601_v25  ;;  %7597 = vmatpush.msra.mxu1 %v14591_v41 }
 0x872   : > { %7421 = vmatpush.msrb.mxu3 %v7420_v35  ;;  %v7442_v35 = vand.u32 4294901760, %v14628_v63  ;;  %7284 = vmatpush.msrb.mxu2 %v14616_v51 }
 0x873   : > { %v7437_v30 = vsub.f32 %v14601_v25, %v7436_v4  ;;  %7526 = vmatpush.msra.mxu0 %v14628_v63  ;;  %7599 = vmatpush.msra.mxu1 %v14616_v51 }
 0x874   : > { %7427 = vmatpush.msrb.mxu3 %v7426_v13  ;;  %7652 = vmatpush.msra.mxu2 %v7352_v20  ;;  %v7060_v20 = vld [vmem:[#allocation4 + $0x90] sm:$0xff]  ;;  %v7214_v13 = vld [vmem:[%s15902_s7 + $0xc8] sm:$0xff] }
 0x875   : > { %7125 = vrot.lane.b32.xlu0 %v14333_v38, %s9904_s27  ;;  %v7438_v23 = vand.u32 4294901760, %v7437_v30  ;;  %v7443_v38 = vsub.f32 %v14628_v63, %v7442_v35  ;;  %v14801_v63 = vand.u32 4294901760, %v7215_v27 }
 0x876   : > { %7079 = vrot.lane.b32.xlu2 %v14371_v19, %s9905_s28  ;;  %7433 = vmatpush.msrb.mxu3 %v7432_v5 }
 0x877   : > { %7030 = vrot.lane.b32.xlu1 %v14331_v53, %s9901_s21  ;;  %v7444_v53 = vand.u32 4294901760, %v7443_v38  ;;  %7656 = vmatpush.msra.mxu2 %v7358_v7  ;;  %v7213_v38 = vld [vmem:[%s15902_s7 + $0xc0] sm:$0xff] }
 0x878   : > { %v6911_v46 = vpop.permute.xlu2 %6910  ;;  %7439 = vmatpush.msrb.mxu3 %v7438_v23 }
 0x879   : > { %7660 = vmatpush.msra.mxu2 %v7364_v8 }
 0x87a   : > { %7445 = vmatpush.msrb.mxu3 %v7444_v53 }
 0x87b   : > { %7664 = vmatpush.msra.mxu2 %v7370_v33 }
 0x87c   : > { %7747 = vmatpush.msra.mxu3 %v14317_v40 }
 0x87d   : > { %7127 = vrot.lane.b32.xlu0 %v14375_v36, %s9904_s27  ;;  %7668 = vmatpush.msra.mxu2 %v7376_v6 }
 0x87e   : > { %7081 = vrot.lane.b32.xlu2 %v14417_v1, %s9905_s28  ;;  %7749 = vmatpush.msra.mxu3 %v14353_v31  ;;  %v14707_v1 = vand.u32 4294901760, %v7220_v17 }
 0x87f   : > { %7032 = vrot.lane.b32.xlu1 %v14373_v16, %s9901_s21  ;;  %7672 = vmatpush.msra.mxu2 %v7382_v3  ;;  %v7219_v3 = vld [vmem:[%s15902_s7 + $0xf0] sm:$0xff] }
 0x880   : > { %v14652_v48 = vpop.permute.xlu2 %6912  ;;  %7751 = vmatpush.msra.mxu3 %v14355_v39  ;;  %v7108_v39 = vld [vmem:[#allocation4 + $0x91] sm:$0xff]  ;;  %v14717_v28 = vsub.f32 %v7220_v17, %v14707_v1  ;;  %7812 = vmatpush.msrb.mxu0 %v14707_v1 }
 0x881   : > { %7676 = vmatpush.msra.mxu2 %v7388_v2  ;;  %v7218_v2 = vld [vmem:[%s15902_s7 + $0xe8] sm:$0xff] }
 0x882   : > { %7753 = vmatpush.msra.mxu3 %v14400_v15  ;;  %v14734_v61 = vand.u32 4294901760, %v7218_v2 }
 0x883   : > { %7680 = vmatpush.msra.mxu2 %v7394_v10  ;;  %v7217_v10 = vld [vmem:[%s15902_s7 + $0xe0] sm:$0xff] }
 0x884   : > { %7755 = vmatpush.msra.mxu3 %v14402_v49  ;;  %v14752_v59 = vand.u32 4294901760, %v7217_v10 }
 0x885   : > { %7129 = vrot.lane.b32.xlu0 %v14421_v47, %s9904_s27  ;;  %7684 = vmatpush.msra.mxu2 %v7400_v62 }
 0x886   : > { %7083 = vrot.lane.b32.xlu2 %v7060_v20, %s9905_s28  ;;  %7757 = vmatpush.msra.mxu3 %v14442_v45  ;;  %v14765_v9 = vsub.f32 %v7217_v10, %v14752_v59  ;;  %v14816_v20 = vand.u32 4294901760, %v7213_v38  ;;  %v7211_v10 = vld [vmem:[%s15902_s7 + $0xb0] sm:$0xff] }
 0x887   : > { %7034 = vrot.lane.b32.xlu1 %v7011_v22, %s9901_s21  ;;  %v6956_v40 = vpop.permute.xlu0 %6955  ;;  %7688 = vmatpush.msra.mxu2 %v7406_v37  ;;  %v7216_v37 = vld [vmem:[%s15902_s7 + $0xd8] sm:$0xff] }
 0x888   : > { %6980 = vst.msk [vmem:[#allocation5] sm:$0xff] %vm6979_vm13, %v6956_v40  ;;  %v14675_v54 = vpop.permute.xlu2 %6914  ;;  %7759 = vmatpush.msra.mxu3 %v14447_v57  ;;  %v7928_v18 = vand.u32 4294901760, %v14765_v9 }
 0x889   : > { %v6860_v31 = vpop.permute.xlu1 %6859  ;;  %7692 = vmatpush.msra.mxu2 %v7412_v26 }
 0x88a   : > { %6883 = vst.msk [vmem:[#allocation5 + $0x18] sm:$0xff] %vm6881_vm11, %v6860_v31  ;;  %7761 = vmatpush.msra.mxu3 %v14478_v55  ;;  %v7910_v55 = vand.u32 4294901760, %v14717_v28  ;;  %v7929_v30 = vsub.f32 %v14765_v9, %v7928_v18 }
 0x88b   : > { %6932 = vst.msk [vmem:[#allocation5 + $0x18] sm:$0xff] %vm6930_vm12, %v14593_v24  ;;  %7696 = vmatpush.msra.mxu2 %v7418_v0 }
 0x88c   : > { %7763 = vmatpush.msra.mxu3 %v14483_v52  ;;  %v14732_v52 = vand.u32 4294901760, %v7219_v3  ;;  %v7911_v62 = vsub.f32 %v14717_v28, %v7910_v55  ;;  %v7930_v53 = vand.u32 4294901760, %v7929_v30 }
 0x88d   : > { %7131 = vrot.lane.b32.xlu0 %v7108_v39, %s9904_s27  ;;  %7700 = vmatpush.msra.mxu2 %v7424_v44  ;;  %v14772_v44 = vand.u32 4294901760, %v7216_v37  ;;  %v7212_v39 = vld [vmem:[%s15902_s7 + $0xb8] sm:$0xff] }
 0x88e   : > { %7765 = vmatpush.msra.mxu3 %v14514_v21  ;;  %v14746_v21 = vsub.f32 %v7219_v3, %v14732_v52  ;;  %7814 = vmatpush.msrb.mxu0 %v14732_v52 }
 0x88f   : > { %v6958_v7 = vpop.permute.xlu0 %6957  ;;  %v7165_v8 = vld [vmem:[#allocation5] sm:$0xff]  ;;  %7704 = vmatpush.msra.mxu2 %v7430_v14 }
 0x890   : > { %6981 = vst.msk [vmem:[#allocation5 + $0x18] sm:$0xff] %vm6979_vm13, %v6958_v7  ;;  %v14687_v16 = vand.u32 4294901760, %v7165_v8  ;;  %v14699_v49 = vpop.permute.xlu2 %6916  ;;  %7767 = vmatpush.msra.mxu3 %v14520_v12  ;;  %v14749_v12 = vsub.f32 %v7218_v2, %v14734_v61  ;;  %7816 = vmatpush.msrb.mxu0 %v14734_v61 }
 0x891   : > { %v6862_v19 = vpop.permute.xlu1 %6861  ;;  %7708 = vmatpush.msra.mxu2 %v7436_v4  ;;  %v14790_v4 = vsub.f32 %v7216_v37, %v14772_v44 }
 0x892   : > { %6884 = vst.msk [vmem:[#allocation5 + $0x30] sm:$0xff] %vm6881_vm11, %v6862_v19  ;;  %7447 = vmatmul.f32.vlgmr.msrb.gmra.mxu3 %v14687_v16  ;;  %v7286_v36 = vsub.f32 %v7165_v8, %v14687_v16  ;;  %v7922_v0 = vand.u32 4294901760, %v14749_v12  ;;  %7818 = vmatpush.msrb.mxu0 %v14752_v59  ;;  %v14830_v19 = vsub.f32 %v7213_v38, %v14816_v20 }
 0x893   : > { %6933 = vst.msk [vmem:[#allocation5 + $0x30] sm:$0xff] %vm6930_vm12, %v6911_v46  ;;  %7769 = vmatpush.msra.mxu3 %v14551_v56  ;;  %7712 = vmatpush.msra.mxu2 %v7442_v35  ;;  %v7934_v46 = vand.u32 4294901760, %v14790_v4  ;;  %v14806_v35 = vand.u32 4294901760, %v7214_v13 }
 0x894   : > { %7529 = vmatmul.f32.vlgmr.msra.gmra.mxu0 %v7286_v36  ;;  %v7287_v15 = vand.u32 4294901760, %v7286_v36  ;;  %v7923_v25 = vsub.f32 %v14749_v12, %v7922_v0 }
 0x895   : > { %7771 = vmatpush.msra.mxu3 %v14566_v11  ;;  %v7912_v11 = vand.u32 4294901760, %v7911_v62  ;;  %7820 = vmatpush.msrb.mxu0 %v14772_v44  ;;  %v7935_v40 = vsub.f32 %v14790_v4, %v7934_v46  ;;  %v14822_v31 = vsub.f32 %v7214_v13, %v14806_v35  ;;  %v7210_v62 = vld [vmem:[%s15902_s7 + $0xa8] sm:$0xff] }
 0x896   : > { %7603 = vmatmul.f32.vlgmr.msra.gmra.mxu1 %v7287_v15  ;;  %v7288_v58 = vsub.f32 %v7286_v36, %v7287_v15  ;;  %v7924_v5 = vand.u32 4294901760, %v7923_v25  ;;  %v14833_v36 = vand.u32 4294901760, %v7212_v39 }
 0x897   : > { %v6960_v33 = vpop.permute.xlu0 %6959  ;;  %v7168_v6 = vld [vmem:[#allocation5 + $0x18] sm:$0xff]  ;;  %7773 = vmatpush.msra.mxu3 %v14568_v32  ;;  %v7916_v32 = vand.u32 4294901760, %v14746_v21  ;;  %7913 = vmatpush.msrb.mxu1 %v7912_v11 }
 0x898   : > { %6982 = vst.msk [vmem:[#allocation5 + $0x30] sm:$0xff] %vm6979_vm13, %v6960_v33  ;;  %v7289_v45 = vand.u32 4294901760, %v7288_v58  ;;  %v14713_v57 = vand.u32 4294901760, %v7168_v6  ;;  %v14760_v26 = vpop.permute.xlu2 %6918  ;;  %7822 = vmatpush.msrb.mxu0 %v14801_v63  ;;  %v7936_v33 = vand.u32 4294901760, %v7935_v40  ;;  %v14849_v3 = vsub.f32 %v7212_v39, %v14833_v36 }
 0x899   : > { %v6864_v47 = vpop.permute.xlu1 %6863  ;;  %7775 = vmatpush.msra.mxu3 %v14591_v41  ;;  %v7917_v14 = vsub.f32 %v14746_v21, %v7916_v32 }
 0x89a   : > { %6885 = vst.msk [vmem:[#allocation5 + $0x48] sm:$0xff] %vm6881_vm11, %v6864_v47  ;;  %7290 = vmatmul.f32.vlgmr.msrb.gmra.mxu2 %v7289_v45  ;;  %7451 = vmatmul.f32.gmra.mxu3 %v14713_v57  ;;  %v7294_v34 = vsub.f32 %v7168_v6, %v14713_v57  ;;  %v7946_v6 = vand.u32 4294901760, %v14822_v31  ;;  %v7958_v37 = vand.u32 4294901760, %v14849_v3 }
 0x89b   : > { %6934 = vst.msk [vmem:[#allocation5 + $0x48] sm:$0xff] %vm6930_vm12, %v14652_v48  ;;  %7777 = vmatpush.msra.mxu3 %v14616_v51  ;;  %8039 = vmatpush.msrb.mxu2 %v14717_v28  ;;  %v7918_v51 = vand.u32 4294901760, %v7917_v14  ;;  %v14813_v48 = vsub.f32 %v7215_v27, %v14801_v63 }
 0x89c   : > { %7534 = vmatmul.f32.gmra.mxu0 %v7294_v34  ;;  %v7295_v42 = vand.u32 4294901760, %v7294_v34  ;;  %v7959_v25 = vsub.f32 %v14849_v3, %v7958_v37 }
 0x89d   : > { %8127 = vmatpush.msrb.mxu3 %v14707_v1  ;;  %8042 = vmatpush.msrb.mxu2 %v14746_v21  ;;  %v7940_v8 = vand.u32 4294901760, %v14813_v48 }
 0x89e   : > { %7609 = vmatmul.f32.gmra.mxu1 %v7295_v42  ;;  %v7296_v60 = vsub.f32 %v7294_v34, %v7295_v42  ;;  %7824 = vmatpush.msrb.mxu0 %v14806_v35  ;;  %v7952_v34 = vand.u32 4294901760, %v14830_v19  ;;  %v7947_v42 = vsub.f32 %v14822_v31, %v7946_v6  ;;  %v7960_v38 = vand.u32 4294901760, %v7959_v25 }
 0x89f   : > { %v6962_v56 = vpop.permute.xlu0 %6961  ;;  %v7171_v29 = vld [vmem:[#allocation5 + $0x30] sm:$0xff]  ;;  %8129 = vmatpush.msrb.mxu3 %v14732_v52  ;;  %7919 = vmatpush.msrb.mxu1 %v7918_v51  ;;  %v7941_v45 = vsub.f32 %v14813_v48, %v7940_v8 }
 0x8a0   : > { %6983 = vst.msk [vmem:[#allocation5 + $0x48] sm:$0xff] %vm6979_vm13, %v6962_v56  ;;  %v7297_v41 = vand.u32 4294901760, %v7296_v60  ;;  %v14770_v24 = vand.u32 4294901760, %v7171_v29  ;;  %8045 = vmatpush.msrb.mxu2 %v14749_v12  ;;  %v14841_v47 = vpop.permute.xlu2 %6920  ;;  %7826 = vmatpush.msrb.mxu0 %v14816_v20  ;;  %v14869_v56 = vand.u32 4294901760, %v7211_v10  ;;  %v7948_v11 = vand.u32 4294901760, %v7947_v42 }
 0x8a1   : > { %v6866_v50 = vpop.permute.xlu1 %6865  ;;  %7925 = vmatpush.msrb.mxu1 %v7924_v5  ;;  %8131 = vmatpush.msrb.mxu3 %v14734_v61  ;;  %v7942_v60 = vand.u32 4294901760, %v7941_v45  ;;  %v7208_v5 = vld [vmem:[%s15902_s7 + $0x98] sm:$0xff] }
 0x8a2   : > { %6886 = vst.msk [vmem:[#allocation5 + $0x60] sm:$0xff] %vm6881_vm11, %v6866_v50  ;;  %7298 = vmatmul.f32.gmra.mxu2 %v7297_v41  ;;  %7455 = vmatmul.f32.gmra.mxu3 %v14770_v24  ;;  %v7302_v43 = vsub.f32 %v7171_v29, %v14770_v24  ;;  %v14872_v50 = vand.u32 4294901760, %v7210_v62  ;;  %v7209_v41 = vld [vmem:[%s15902_s7 + $0xa0] sm:$0xff]  ;;  %v14899_v40 = vand.u32 4294901760, %v7208_v5 }
 0x8a3   : > { %6935 = vst.msk [vmem:[#allocation5 + $0x60] sm:$0xff] %vm6930_vm12, %v14675_v54  ;;  %8048 = vmatpush.msrb.mxu2 %v14765_v9  ;;  %7931 = vmatpush.msrb.mxu1 %v7930_v53  ;;  %v14885_v27 = vand.u32 4294901760, %v7209_v41 }
 0x8a4   : > { %7539 = vmatmul.f32.gmra.mxu0 %v7302_v43  ;;  %v7303_v23 = vand.u32 4294901760, %v7302_v43  ;;  %8133 = vmatpush.msrb.mxu3 %v14752_v59  ;;  %v14888_v51 = vsub.f32 %v7210_v62, %v14872_v50  ;;  %v14913_v45 = vsub.f32 %v7208_v5, %v14899_v40  ;;  %v7206_v62 = vld [vmem:[%s15902_s7 + $0x88] sm:$0xff] }
 0x8a5   : > { %7937 = vmatpush.msrb.mxu1 %v7936_v33  ;;  %7828 = vmatpush.msrb.mxu0 %v14833_v36 }
 0x8a6   : > { %7615 = vmatmul.f32.gmra.mxu1 %v7303_v23  ;;  %v7304_v22 = vsub.f32 %v7302_v43, %v7303_v23  ;;  %v14882_v43 = vsub.f32 %v7211_v10, %v14869_v56  ;;  %8051 = vmatpush.msrb.mxu2 %v14790_v4  ;;  %v7207_v10 = vld [vmem:[%s15902_s7 + $0x90] sm:$0xff] }
 0x8a7   : > { %v6964_v54 = vpop.permute.xlu0 %6963  ;;  %v7174_v7 = vld [vmem:[#allocation5 + $0x48] sm:$0xff]  ;;  %7943 = vmatpush.msrb.mxu1 %v7942_v60  ;;  %7830 = vmatpush.msrb.mxu0 %v14869_v56 }
 0x8a8   : > { %6984 = vst.msk [vmem:[#allocation5 + $0x60] sm:$0xff] %vm6979_vm13, %v6964_v54  ;;  %v7305_v58 = vand.u32 4294901760, %v7304_v22  ;;  %v14836_v17 = vand.u32 4294901760, %v7174_v7  ;;  %v7964_v53 = vand.u32 4294901760, %v14882_v43  ;;  %v14896_v22 = vsub.f32 %v7209_v41, %v14885_v27  ;;  %8135 = vmatpush.msrb.mxu3 %v14772_v44  ;;  %8054 = vmatpush.msrb.mxu2 %v14813_v48  ;;  %v14932_v60 = vpop.permute.xlu2 %7069 }
 0x8a9   : > { %v6868_v15 = vpop.permute.xlu1 %6867  ;;  %7949 = vmatpush.msrb.mxu1 %v7948_v11  ;;  %7832 = vmatpush.msrb.mxu0 %v14872_v50  ;;  %v16087_v11 = vand.u32 4294901760, %v14913_v45  ;;  %v14938_v41 = vand.u32 4294901760, %v7207_v10 }
 0x8aa   : > { %6887 = vst.msk [vmem:[#allocation5 + $0x78] sm:$0xff] %vm6881_vm11, %v6868_v15  ;;  %7306 = vmatmul.f32.gmra.mxu2 %v7305_v58  ;;  %7459 = vmatmul.f32.gmra.mxu3 %v14836_v17  ;;  %v7310_v2 = vsub.f32 %v7174_v7, %v14836_v17  ;;  %v7970_v15 = vand.u32 4294901760, %v14888_v51  ;;  %v7965_v58 = vsub.f32 %v14882_v43, %v7964_v53  ;;  %v7976_v33 = vand.u32 4294901760, %v14896_v22 }
 0x8ab   : > { %6936 = vst.msk [vmem:[#allocation5 + $0x78] sm:$0xff] %vm6930_vm12, %v14699_v49  ;;  %v7953_v49 = vsub.f32 %v14830_v19, %v7952_v34  ;;  %7834 = vmatpush.msrb.mxu0 %v14885_v27  ;;  %8137 = vmatpush.msrb.mxu3 %v14801_v63 }
 0x8ac   : > { %7544 = vmatmul.f32.gmra.mxu0 %v7310_v2  ;;  %v7311_v29 = vand.u32 4294901760, %v7310_v2  ;;  %v7971_v42 = vsub.f32 %v14888_v51, %v7970_v15  ;;  %8057 = vmatpush.msrb.mxu2 %v14822_v31 }
 0x8ad   : > { %v7954_v14 = vand.u32 4294901760, %v7953_v49  ;;  %v7966_v49 = vand.u32 4294901760, %v7965_v58  ;;  %7836 = vmatpush.msrb.mxu0 %v14899_v40  ;;  %8139 = vmatpush.msrb.mxu3 %v14806_v35 }
 0x8ae   : > { %7621 = vmatmul.f32.gmra.mxu1 %v7311_v29  ;;  %v7312_v13 = vsub.f32 %v7310_v2, %v7311_v29  ;;  %v7977_v29 = vsub.f32 %v14896_v22, %v7976_v33  ;;  %v7972_v25 = vand.u32 4294901760, %v7971_v42  ;;  %8060 = vmatpush.msrb.mxu2 %v14830_v19 }
 0x8af   : > { %v6966_v30 = vpop.permute.xlu0 %6965  ;;  %v7177_v23 = vld [vmem:[#allocation5 + $0x60] sm:$0xff]  ;;  %7955 = vmatpush.msrb.mxu1 %v7954_v14  ;;  %7838 = vmatpush.msrb.mxu0 %v14938_v41 }
 0x8b0   : > { %6985 = vst.msk [vmem:[#allocation5 + $0x78] sm:$0xff] %vm6979_vm13, %v6966_v30  ;;  %v7313_v54 = vand.u32 4294901760, %v7312_v13  ;;  %v14902_v7 = vand.u32 4294901760, %v7177_v23  ;;  %v14941_v13 = vand.u32 4294901760, %v7206_v62  ;;  %v7978_v30 = vand.u32 4294901760, %v7977_v29  ;;  %8141 = vmatpush.msrb.mxu3 %v14816_v20  ;;  %8063 = vmatpush.msrb.mxu2 %v14849_v3 }
 0x8b1   : > { %v6870_v39 = vpop.permute.xlu1 %6869  ;;  %7961 = vmatpush.msrb.mxu1 %v7960_v38  ;;  %v14950_v38 = vsub.f32 %v7207_v10, %v14938_v41 }
 0x8b2   : > { %6888 = vst.msk [vmem:[#allocation5 + $0x90] sm:$0xff] %vm6881_vm11, %v6870_v39  ;;  %7314 = vmatmul.f32.gmra.mxu2 %v7313_v54  ;;  %7463 = vmatmul.f32.gmra.mxu3 %v14902_v7  ;;  %v7318_v2 = vsub.f32 %v7177_v23, %v14902_v7  ;;  %v7983_v23 = vsub.f32 %v14913_v45, %v16087_v11 }
 0x8b3   : > { %6937 = vst.msk [vmem:[#allocation5 + $0x90] sm:$0xff] %vm6930_vm12, %v14760_v26  ;;  %v7205_v26 = vld [vmem:[%s15902_s7 + $0x80] sm:$0xff]  ;;  %7967 = vmatpush.msrb.mxu1 %v7966_v49  ;;  %v14954_v54 = vsub.f32 %v7206_v62, %v14941_v13  ;;  %v16090_v11 = vand.u32 4294901760, %v14950_v38  ;;  %7840 = vmatpush.msrb.mxu0 %v14941_v13 }
 0x8b4   : > { %7549 = vmatmul.f32.gmra.mxu0 %v7318_v2  ;;  %v7319_v14 = vand.u32 4294901760, %v7318_v2  ;;  %v14943_v5 = vand.u32 4294901760, %v7205_v26  ;;  %v7984_v29 = vand.u32 4294901760, %v7983_v23  ;;  %8143 = vmatpush.msrb.mxu3 %v14833_v36 }
 0x8b5   : > { %7973 = vmatpush.msrb.mxu1 %v7972_v25  ;;  %v16088_v62 = vand.u32 4294901760, %v14954_v54  ;;  %v7989_v25 = vsub.f32 %v14950_v38, %v16090_v11  ;;  %8066 = vmatpush.msrb.mxu2 %v14882_v43 }
 0x8b6   : > { %7627 = vmatmul.f32.gmra.mxu1 %v7319_v14  ;;  %v7320_v39 = vsub.f32 %v7318_v2, %v7319_v14  ;;  %v14957_v58 = vsub.f32 %v7205_v26, %v14943_v5  ;;  %7842 = vmatpush.msrb.mxu0 %v14943_v5 }
 0x8b7   : > { %v6968_v42 = vpop.permute.xlu0 %6967  ;;  %v7180_v49 = vld [vmem:[#allocation5 + $0x78] sm:$0xff]  ;;  %7979 = vmatpush.msrb.mxu1 %v7978_v30  ;;  %8145 = vmatpush.msrb.mxu3 %v14869_v56 }
 0x8b8   : > { %6986 = vst.msk [vmem:[#allocation5 + $0x90] sm:$0xff] %vm6979_vm13, %v6968_v42  ;;  %v7321_v2 = vand.u32 4294901760, %v7320_v39  ;;  %v14963_v14 = vand.u32 4294901760, %v7180_v49  ;;  %v16089_v26 = vand.u32 4294901760, %v14957_v58  ;;  %v7995_v39 = vsub.f32 %v14954_v54, %v16088_v62  ;;  %8210 = vmatpush.msra.mxu0 %v7910_v55  ;;  %8069 = vmatpush.msrb.mxu2 %v14888_v51 }
 0x8b9   : > { %v6872_v10 = vpop.permute.xlu1 %6871  ;;  %7985 = vmatpush.msrb.mxu1 %v7984_v29  ;;  %v7990_v42 = vand.u32 4294901760, %v7989_v25  ;;  %8147 = vmatpush.msrb.mxu3 %v14872_v50 }
 0x8ba   : > { %6889 = vst.msk [vmem:[#allocation5 + $0xa8] sm:$0xff] %vm6881_vm11, %v6872_v10  ;;  %7322 = vmatmul.f32.gmra.mxu2 %v7321_v2  ;;  %7467 = vmatmul.f32.gmra.mxu3 %v14963_v14  ;;  %v7326_v23 = vsub.f32 %v7180_v49, %v14963_v14  ;;  %v8001_v30 = vsub.f32 %v14957_v58, %v16089_v26  ;;  %v7072_v2 = vpop.permute.xlu2 %7071 }
 0x8bb   : > { %6938 = vst.msk [vmem:[#allocation5 + $0xa8] sm:$0xff] %vm6930_vm12, %v14841_v47  ;;  %v7996_v47 = vand.u32 4294901760, %v7995_v39  ;;  %7991 = vmatpush.msrb.mxu1 %v7990_v42  ;;  %8214 = vmatpush.msra.mxu0 %v7916_v32 }
 0x8bc   : > { %7554 = vmatmul.f32.gmra.mxu0 %v7326_v23  ;;  %v7327_v10 = vand.u32 4294901760, %v7326_v23  ;;  %v8002_v49 = vand.u32 4294901760, %v8001_v30  ;;  %8072 = vmatpush.msrb.mxu2 %v14896_v22 }
 0x8bd   : > { %7997 = vmatpush.msrb.mxu1 %v7996_v47  ;;  %8218 = vmatpush.msra.mxu0 %v7922_v0 }
 0x8be   : > { %7633 = vmatmul.f32.gmra.mxu1 %v7327_v10  ;;  %v7328_v62 = vsub.f32 %v7326_v23, %v7327_v10  ;;  %8149 = vmatpush.msrb.mxu3 %v14885_v27 }
 0x8bf   : > { %v6970_v26 = vpop.permute.xlu0 %6969  ;;  %v7183_v29 = vld [vmem:[#allocation5 + $0x90] sm:$0xff]  ;;  %8003 = vmatpush.msrb.mxu1 %v8002_v49  ;;  %8222 = vmatpush.msra.mxu0 %v7928_v18 }
 0x8c0   : > { %6987 = vst.msk [vmem:[#allocation5 + $0xa8] sm:$0xff] %vm6979_vm13, %v6970_v26  ;;  %v7329_v39 = vand.u32 4294901760, %v7328_v62  ;;  %v14992_v11 = vand.u32 4294901760, %v7183_v29  ;;  %8075 = vmatpush.msrb.mxu2 %v14913_v45  ;;  %8151 = vmatpush.msrb.mxu3 %v14899_v40 }
 0x8c1   : > { %v7021_v25 = vpop.permute.xlu1 %7020  ;;  %8305 = vmatpush.msra.mxu1 %v14707_v1  ;;  %8226 = vmatpush.msra.mxu0 %v7934_v46 }
 0x8c2   : > { %7044 = vst.msk [vmem:[#allocation5 + $0x8] sm:$0xff] %vm6881_vm11, %v7021_v25  ;;  %7330 = vmatmul.f32.gmra.mxu2 %v7329_v39  ;;  %7471 = vmatmul.f32.gmra.mxu3 %v14992_v11  ;;  %v7334_v28 = vsub.f32 %v7183_v29, %v14992_v11  ;;  %v7074_v12 = vpop.permute.xlu2 %7073 }
 0x8c3   : > { %7093 = vst.msk [vmem:[#allocation5 + $0x8] sm:$0xff] %vm6930_vm12, %v14932_v60  ;;  %8307 = vmatpush.msra.mxu1 %v14732_v52  ;;  %8230 = vmatpush.msra.mxu0 %v7940_v8 }
 0x8c4   : > { %7559 = vmatmul.f32.gmra.mxu0 %v7334_v28  ;;  %v7335_v55 = vand.u32 4294901760, %v7334_v28  ;;  %8153 = vmatpush.msrb.mxu3 %v14938_v41 }
 0x8c5   : > { %8309 = vmatpush.msra.mxu1 %v14734_v61  ;;  %8234 = vmatpush.msra.mxu0 %v7946_v6  ;;  %v16529_v6 = vand.u32 4294901760, %v14913_v45 }
 0x8c6   : > { %7639 = vmatmul.f32.gmra.mxu1 %v7335_v55  ;;  %v7336_v21 = vsub.f32 %v7334_v28, %v7335_v55  ;;  %8078 = vmatpush.msrb.mxu2 %v14950_v38 }
 0x8c7   : > { %v7118_v32 = vpop.permute.xlu0 %7117  ;;  %v7186_v0 = vld [vmem:[#allocation5 + $0xa8] sm:$0xff]  ;;  %8311 = vmatpush.msra.mxu1 %v14752_v59  ;;  %8238 = vmatpush.msra.mxu0 %v7952_v34 }
 0x8c8   : > { %7141 = vst.msk [vmem:[#allocation5 + $0x8] sm:$0xff] %vm6979_vm13, %v7118_v32  ;;  %v7337_v9 = vand.u32 4294901760, %v7336_v21  ;;  %v15015_v52 = vand.u32 4294901760, %v7186_v0  ;;  %8155 = vmatpush.msrb.mxu3 %v14941_v13  ;;  %8081 = vmatpush.msrb.mxu2 %v14954_v54 }
 0x8c9   : > { %v7023_v1 = vpop.permute.xlu1 %7022  ;;  %8313 = vmatpush.msra.mxu1 %v14772_v44  ;;  %8242 = vmatpush.msra.mxu0 %v7958_v37 }
 0x8ca   : > { %7045 = vst.msk [vmem:[#allocation5 + $0x20] sm:$0xff] %vm6881_vm11, %v7023_v1  ;;  %7338 = vmatmul.f32.gmra.mxu2 %v7337_v9  ;;  %7475 = vmatmul.f32.gmra.mxu3 %v15015_v52  ;;  %v7342_v61 = vsub.f32 %v7186_v0, %v15015_v52  ;;  %v7224_v1 = vld [vmem:[%s15902_s7 + $0x118] sm:$0xff] }
 0x8cb   : > { %7094 = vst.msk [vmem:[#allocation5 + $0x20] sm:$0xff] %vm6930_vm12, %v7072_v2  ;;  %8315 = vmatpush.msra.mxu1 %v14801_v63  ;;  %8246 = vmatpush.msra.mxu0 %v7964_v53  ;;  %v7076_v63 = vpop.permute.xlu2 %7075  ;;  %v16532_v53 = vand.u32 4294901760, %v14957_v58 }
 0x8cc   : > { %7564 = vmatmul.f32.gmra.mxu0 %v7342_v61  ;;  %v7343_v18 = vand.u32 4294901760, %v7342_v61  ;;  %8157 = vmatpush.msrb.mxu3 %v14943_v5 }
 0x8cd   : > { %8317 = vmatpush.msra.mxu1 %v14806_v35  ;;  %8250 = vmatpush.msra.mxu0 %v7970_v15 }
 0x8ce   : > { %7645 = vmatmul.f32.gmra.mxu1 %v7343_v18  ;;  %v7344_v59 = vsub.f32 %v7342_v61, %v7343_v18  ;;  %8084 = vmatpush.msrb.mxu2 %v14957_v58  ;;  %v15152_v61 = vand.u32 4294901760, %v7224_v1 }
 0x8cf   : > { %v7120_v4 = vpop.permute.xlu0 %7119  ;;  %v7166_v46 = vld [vmem:[#allocation5 + $0x8] sm:$0xff]  ;;  %8319 = vmatpush.msra.mxu1 %v14816_v20  ;;  %8254 = vmatpush.msra.mxu0 %v7976_v33 }
 0x8d0   : > { %7142 = vst.msk [vmem:[#allocation5 + $0x20] sm:$0xff] %vm6979_vm13, %v7120_v4  ;;  %v7345_v48 = vand.u32 4294901760, %v7344_v59  ;;  %v15037_v31 = vand.u32 4294901760, %v7166_v46  ;;  %v15160_v18 = vsub.f32 %v7224_v1, %v15152_v61 }
 0x8d1   : > { %v7025_v44 = vpop.permute.xlu1 %7024  ;;  %8321 = vmatpush.msra.mxu1 %v14833_v36  ;;  %8258 = vmatpush.msra.mxu0 %v16529_v6 }
 0x8d2   : > { %7046 = vst.msk [vmem:[#allocation5 + $0x38] sm:$0xff] %vm6881_vm11, %v7025_v44  ;;  %7346 = vmatmul.f32.gmra.mxu2 %v7345_v48  ;;  %7779 = vmatmul.f32.vlgmr.msra.gmra.mxu3 %v14687_v16  ;;  %v15048_v35 = vsub.f32 %v7166_v46, %v15037_v31  ;;  %v8468_v48 = vand.u32 4294901760, %v15160_v18 }
 0x8d3   : > { %7095 = vst.msk [vmem:[#allocation5 + $0x38] sm:$0xff] %vm6930_vm12, %v7074_v12  ;;  %8323 = vmatpush.msra.mxu1 %v14869_v56  ;;  %v16530_v56 = vand.u32 4294901760, %v14950_v38  ;;  %v7078_v43 = vpop.permute.xlu2 %7077 }
 0x8d4   : > { %v7845_v8 = vand.u32 4294901760, %v15048_v35 }
 0x8d5   : > { %8325 = vmatpush.msra.mxu1 %v14872_v50  ;;  %8262 = vmatpush.msra.mxu0 %v16530_v56 }
 0x8d6   : > { %8005 = vmatmul.f32.vlgmr.msrb.gmra.mxu1 %v15037_v31  ;;  %v7846_v20 = vsub.f32 %v15048_v35, %v7845_v8 }
 0x8d7   : > { %v7122_v19 = vpop.permute.xlu0 %7121  ;;  %v7169_v36 = vld [vmem:[#allocation5 + $0x20] sm:$0xff]  ;;  %8327 = vmatpush.msra.mxu1 %v14885_v27  ;;  %v16531_v27 = vand.u32 4294901760, %v14954_v54 }
 0x8d8   : > { %7143 = vst.msk [vmem:[#allocation5 + $0x38] sm:$0xff] %vm6979_vm13, %v7122_v19  ;;  %v7847_v3 = vand.u32 4294901760, %v7846_v20  ;;  %v15068_v37 = vand.u32 4294901760, %v7169_v36  ;;  %v8469_v20 = vsub.f32 %v15160_v18, %v8468_v48 }
 0x8d9   : > { %v7027_v34 = vpop.permute.xlu1 %7026  ;;  %8329 = vmatpush.msra.mxu1 %v14899_v40  ;;  %8266 = vmatpush.msra.mxu0 %v16531_v27 }
 0x8da   : > { %7047 = vst.msk [vmem:[#allocation5 + $0x50] sm:$0xff] %vm6881_vm11, %v7027_v34  ;;  %7714 = vmatmul.f32.vlgmr.msra.gmra.mxu2 %v14687_v16  ;;  %7783 = vmatmul.f32.gmra.mxu3 %v14713_v57  ;;  %v15078_v50 = vsub.f32 %v7169_v36, %v15068_v37  ;;  %v8470_v36 = vand.u32 4294901760, %v8469_v20 }
 0x8db   : > { %7096 = vst.msk [vmem:[#allocation5 + $0x50] sm:$0xff] %vm6930_vm12, %v7076_v63  ;;  %7848 = vmatmul.f32.vlgmr.msrb.gmra.mxu0 %v7847_v3  ;;  %8331 = vmatpush.msra.mxu1 %v14938_v41 }
 0x8dc   : > { %v7853_v51 = vand.u32 4294901760, %v15078_v50  ;;  %8270 = vmatpush.msra.mxu0 %v16532_v53  ;;  %8382 = vmatpush.msra.mxu2 %v15152_v61 }
 0x8dd   : > { %8333 = vmatpush.msra.mxu1 %v14941_v13  ;;  %v7080_v13 = vpop.permute.xlu2 %7079  ;;  %8471 = vmatpush.msra.mxu3 %v8470_v36 }
 0x8de   : > { %8009 = vmatmul.f32.gmra.mxu1 %v15068_v37  ;;  %v7854_v16 = vsub.f32 %v15078_v50, %v7853_v51  ;;  %8537 = vmatpush.msrb.mxu0 %v15160_v18 }
 0x8df   : > { %v7124_v22 = vpop.permute.xlu0 %7123  ;;  %v7172_v15 = vld [vmem:[#allocation5 + $0x38] sm:$0xff]  ;;  %8335 = vmatpush.msra.mxu1 %v14943_v5 }
 0x8e0   : > { %7144 = vst.msk [vmem:[#allocation5 + $0x50] sm:$0xff] %vm6979_vm13, %v7124_v22  ;;  %v7855_v33 = vand.u32 4294901760, %v7854_v16  ;;  %v15093_v45 = vand.u32 4294901760, %v7172_v15 }
 0x8e1   : > { %v7029_v40 = vpop.permute.xlu1 %7028  ;;  %8601 = vmatpush.msrb.mxu1 %v15152_v61 }
 0x8e2   : > { %7048 = vst.msk [vmem:[#allocation5 + $0x68] sm:$0xff] %vm6881_vm11, %v7029_v40  ;;  %7718 = vmatmul.f32.gmra.mxu2 %v14713_v57  ;;  %7787 = vmatmul.f32.gmra.mxu3 %v14770_v24  ;;  %v15101_v60 = vsub.f32 %v7172_v15, %v15093_v45 }
 0x8e3   : > { %7097 = vst.msk [vmem:[#allocation5 + $0x68] sm:$0xff] %vm6930_vm12, %v7078_v43  ;;  %7856 = vmatmul.f32.gmra.mxu0 %v7855_v33  ;;  %v7223_v43 = vld [vmem:[%s15902_s7 + $0x110] sm:$0xff] }
 0x8e4   : > { %v7861_v41 = vand.u32 4294901760, %v15101_v60  ;;  %v15192_v16 = vand.u32 4294901760, %v7223_v43 }
 0x8e5   : > { %v7082_v42 = vpop.permute.xlu2 %7081 }
 0x8e6   : > { %8013 = vmatmul.f32.gmra.mxu1 %v15093_v45  ;;  %v7862_v38 = vsub.f32 %v15101_v60, %v7861_v41  ;;  %8384 = vmatpush.msra.mxu2 %v15192_v16  ;;  %v15200_v53 = vsub.f32 %v7223_v43, %v15192_v16 }
 0x8e7   : > { %v7126_v5 = vpop.permute.xlu0 %7125  ;;  %v7175_v54 = vld [vmem:[#allocation5 + $0x50] sm:$0xff]  ;;  %8603 = vmatpush.msrb.mxu1 %v15192_v16 }
 0x8e8   : > { %7145 = vst.msk [vmem:[#allocation5 + $0x68] sm:$0xff] %vm6979_vm13, %v7126_v5  ;;  %v7863_v57 = vand.u32 4294901760, %v7862_v38  ;;  %v15109_v62 = vand.u32 4294901760, %v7175_v54  ;;  %v8474_v15 = vand.u32 4294901760, %v15200_v53  ;;  %8540 = vmatpush.msrb.mxu0 %v15200_v53 }
 0x8e9   : > { %v7031_v58 = vpop.permute.xlu1 %7030 }
 0x8ea   : > { %7049 = vst.msk [vmem:[#allocation5 + $0x80] sm:$0xff] %vm6881_vm11, %v7031_v58  ;;  %7722 = vmatmul.f32.gmra.mxu2 %v14770_v24  ;;  %7791 = vmatmul.f32.gmra.mxu3 %v14836_v17  ;;  %v15116_v26 = vsub.f32 %v7175_v54, %v15109_v62  ;;  %v8475_v33 = vsub.f32 %v15200_v53, %v8474_v15 }
 0x8eb   : > { %7098 = vst.msk [vmem:[#allocation5 + $0x80] sm:$0xff] %vm6930_vm12, %v7080_v13  ;;  %7864 = vmatmul.f32.gmra.mxu0 %v7863_v57 }
 0x8ec   : > { %v7869_v23 = vand.u32 4294901760, %v15116_v26  ;;  %v8476_v38 = vand.u32 4294901760, %v8475_v33 }
 0x8ed   : > { %v7084_v21 = vpop.permute.xlu2 %7083 }
 0x8ee   : > { %8017 = vmatmul.f32.gmra.mxu1 %v15109_v62  ;;  %v7870_v30 = vsub.f32 %v15116_v26, %v7869_v23  ;;  %8477 = vmatpush.msra.mxu3 %v8476_v38 }
 0x8ef   : > { %v7128_v10 = vpop.permute.xlu0 %7127  ;;  %v7178_v47 = vld [vmem:[#allocation5 + $0x68] sm:$0xff] }
 0x8f0   : > { %7146 = vst.msk [vmem:[#allocation5 + $0x80] sm:$0xff] %vm6979_vm13, %v7128_v10  ;;  %v7871_v24 = vand.u32 4294901760, %v7870_v30  ;;  %v15124_v49 = vand.u32 4294901760, %v7178_v47 }
 0x8f1   : > { %v7033_v2 = vpop.permute.xlu1 %7032 }
 0x8f2   : > { %7050 = vst.msk [vmem:[#allocation5 + $0x98] sm:$0xff] %vm6881_vm11, %v7033_v2  ;;  %7726 = vmatmul.f32.gmra.mxu2 %v14836_v17  ;;  %7795 = vmatmul.f32.gmra.mxu3 %v14902_v7  ;;  %v15131_v29 = vsub.f32 %v7178_v47, %v15124_v49 }
 0x8f3   : > { %7099 = vst.msk [vmem:[#allocation5 + $0x98] sm:$0xff] %vm6930_vm12, %v7082_v42  ;;  %7872 = vmatmul.f32.gmra.mxu0 %v7871_v24 }
 0x8f4   : > { %v7877_v25 = vand.u32 4294901760, %v15131_v29 }
 0x8f6   : > { %8021 = vmatmul.f32.gmra.mxu1 %v15124_v49  ;;  %v7878_v39 = vsub.f32 %v15131_v29, %v7877_v25 }
 0x8f7   : > { %v7130_v28 = vpop.permute.xlu0 %7129  ;;  %v7181_v55 = vld [vmem:[#allocation5 + $0x80] sm:$0xff] }
 0x8f8   : > { %7147 = vst.msk [vmem:[#allocation5 + $0x98] sm:$0xff] %vm6979_vm13, %v7130_v28  ;;  %v7879_v17 = vand.u32 4294901760, %v7878_v39  ;;  %v15139_v32 = vand.u32 4294901760, %v7181_v55 }
 0x8f9   : > { %v7035_v12 = vpop.permute.xlu1 %7034 }
 0x8fa   : > { %7051 = vst.msk [vmem:[#allocation5 + $0xb0] sm:$0xff] %vm6881_vm11, %v7035_v12  ;;  %7730 = vmatmul.f32.gmra.mxu2 %v14902_v7  ;;  %7799 = vmatmul.f32.gmra.mxu3 %v14963_v14  ;;  %v15146_v0 = vsub.f32 %v7181_v55, %v15139_v32 }
 0x8fb   : > { %7100 = vst.msk [vmem:[#allocation5 + $0xb0] sm:$0xff] %vm6930_vm12, %v7084_v21  ;;  %7880 = vmatmul.f32.gmra.mxu0 %v7879_v17 }
 0x8fc   : > { %v7885_v9 = vand.u32 4294901760, %v15146_v0 }
 0x8fe   : > { %8025 = vmatmul.f32.gmra.mxu1 %v15139_v32  ;;  %v7886_v7 = vsub.f32 %v15146_v0, %v7885_v9 }
 0x8ff   : > { %v7132_v59 = vpop.permute.xlu0 %7131  ;;  %v7184_v4 = vld [vmem:[#allocation5 + $0x98] sm:$0xff] }
 0x900   : > { %7148 = vst.msk [vmem:[#allocation5 + $0xb0] sm:$0xff] %vm6979_vm13, %v7132_v59  ;;  %v7887_v46 = vand.u32 4294901760, %v7886_v7  ;;  %v15164_v44 = vand.u32 4294901760, %v7184_v4 }
 0x902   : > { %7734 = vmatmul.f32.gmra.mxu2 %v14963_v14  ;;  %7803 = vmatmul.f32.gmra.mxu3 %v14992_v11  ;;  %v15171_v63 = vsub.f32 %v7184_v4, %v15164_v44 }
 0x903   : > { %7888 = vmatmul.f32.gmra.mxu0 %v7887_v46 }
 0x904   : > { %v7893_v19 = vand.u32 4294901760, %v15171_v63 }
 0x906   : > { %8029 = vmatmul.f32.gmra.mxu1 %v15164_v44  ;;  %v7894_v6 = vsub.f32 %v15171_v63, %v7893_v19 }
 0x907   : > { %v7187_v14 = vld [vmem:[#allocation5 + $0xb0] sm:$0xff] }
 0x908   : > { %v7895_v34 = vand.u32 4294901760, %v7894_v6  ;;  %v15181_v3 = vand.u32 4294901760, %v7187_v14 }
 0x90a   : > { %7738 = vmatmul.f32.gmra.mxu2 %v14992_v11  ;;  %7807 = vmatmul.f32.gmra.mxu3 %v15015_v52  ;;  %v15186_v56 = vsub.f32 %v7187_v14, %v15181_v3 }
 0x90b   : > { %7896 = vmatmul.f32.gmra.mxu0 %v7895_v34 }
 0x90c   : > { %v7901_v27 = vand.u32 4294901760, %v15186_v56 }
 0x90e   : > { %8033 = vmatmul.f32.gmra.mxu1 %v15181_v3  ;;  %v7902_v11 = vsub.f32 %v15186_v56, %v7901_v27 }
 0x910   : > { %v7903_v22 = vand.u32 4294901760, %v7902_v11 }
 0x911   : > { %v7530_v40 = vpop.f32.mrf.mxu0 }
 0x912   : > { %7742 = vmatmul.f32.gmra.mxu2 %v15015_v52  ;;  %8161 = vmatmul.f32.vlgmr.msrb.gmra.mxu3 %v7845_v8  ;;  %v15218_v52 = vld [vmem:[%s15903_s8] ss:$0 sm:$0xff]  ;;  %v7222_v8 = vld [vmem:[%s15902_s7 + $0x108] sm:$0xff] }
 0x913   : > { %7904 = vmatmul.f32.gmra.mxu0 %v7903_v22  ;;  %v7604_v13 = vpop.f32.mrf.mxu1  ;;  %v15224_v58 = vand.u32 4294901760, %v7222_v8 }
 0x915   : > { %v7448_v5 = vpop.f32.mrf.mxu3  ;;  %8386 = vmatpush.msra.mxu2 %v15224_v58  ;;  %8605 = vmatpush.msrb.mxu1 %v15224_v58 }
 0x916   : > { %8337 = vmatmul.f32.vlgmr.msra.gmra.mxu1 %v15037_v31 }
 0x919   : > { %v7535_v54 = vpop.f32.mrf.mxu0 }
 0x91a   : > { %8087 = vmatmul.f32.vlgmr.msrb.gmra.mxu2 %v15048_v35  ;;  %8167 = vmatmul.f32.gmra.mxu3 %v7853_v51  ;;  %v8479_v51 = vsub.f32 %v7222_v8, %v15224_v58 }
 0x91b   : > { %8272 = vmatmul.f32.vlgmr.msra.gmra.mxu0 %v15037_v31  ;;  %v7610_v35 = vpop.f32.mrf.mxu1 }
 0x91c   : > { %v8480_v10 = vand.u32 4294901760, %v8479_v51  ;;  %8543 = vmatpush.msrb.mxu0 %v8479_v51 }
 0x91d   : > { %v7291_v57 = vpop.f32.mrf.mxu2  ;;  %v7452_v30 = vpop.f32.mrf.mxu3 }
 0x91e   : > { %v7292_v42 = vadd.f32 %v15218_v52, %v7291_v57  ;;  %8341 = vmatmul.f32.gmra.mxu1 %v15068_v37  ;;  %v8481_v47 = vsub.f32 %v8479_v51, %v8480_v10 }
 0x920   : > { %v7449_v31 = vadd.f32 %v7448_v5, %v7292_v42  ;;  %v8482_v24 = vand.u32 4294901760, %v8481_v47 }
 0x921   : > { %v7540_v21 = vpop.f32.mrf.mxu0 }
 0x922   : > { %8092 = vmatmul.f32.gmra.mxu2 %v15078_v50  ;;  %8173 = vmatmul.f32.gmra.mxu3 %v7861_v41  ;;  %v7531_v2 = vadd.f32 %v7530_v40, %v7449_v31 }
 0x923   : > { %8276 = vmatmul.f32.gmra.mxu0 %v15068_v37  ;;  %8483 = vmatpush.msra.mxu3 %v8482_v24  ;;  %v7616_v17 = vpop.f32.mrf.mxu1  ;;  %v7221_v37 = vld [vmem:[%s15902_s7 + $0x100] sm:$0xff] }
 0x924   : > { %v15235_v39 = vadd.f32 %v7604_v13, %v7531_v2  ;;  %v8387_v1 = vand.u32 4294901760, %v7221_v37 }
 0x925   : > { %v7299_v28 = vpop.f32.mrf.mxu2  ;;  %v7456_v55 = vpop.f32.mrf.mxu3 }
 0x926   : > { %v7300_v12 = vadd.f32 %v15218_v52, %v7299_v28  ;;  %8345 = vmatmul.f32.gmra.mxu1 %v15093_v45  ;;  %8388 = vmatpush.msra.mxu2 %v8387_v1 }
 0x927   : > { %8607 = vmatpush.msrb.mxu1 %v8387_v1 }
 0x928   : > { %v7453_v50 = vadd.f32 %v7452_v30, %v7300_v12  ;;  %8672 = vmatpush.msrb.mxu2 %v8468_v48 }
 0x92a   : > { %8097 = vmatmul.f32.gmra.mxu2 %v15101_v60  ;;  %8179 = vmatmul.f32.gmra.mxu3 %v7869_v23  ;;  %v7536_v41 = vadd.f32 %v7535_v54, %v7453_v50  ;;  %v8485_v60 = vsub.f32 %v7221_v37, %v8387_v1 }
 0x92b   : > { %8280 = vmatmul.f32.gmra.mxu0 %v15093_v45  ;;  %v7545_v45 = vpop.f32.mrf.mxu0  ;;  %8676 = vmatpush.msrb.mxu2 %v8474_v15  ;;  %v7622_v36 = vpop.f32.mrf.mxu1 }
 0x92c   : > { %v15246_v7 = vadd.f32 %v7610_v35, %v7536_v41  ;;  %v8486_v20 = vand.u32 4294901760, %v8485_v60  ;;  %8546 = vmatpush.msrb.mxu0 %v8485_v60 }
 0x92d   : > { %v7307_v59 = vpop.f32.mrf.mxu2  ;;  %v7460_v4 = vpop.f32.mrf.mxu3  ;;  %8680 = vmatpush.msrb.mxu2 %v8480_v10 }
 0x92e   : > { %v7308_v46 = vadd.f32 %v15218_v52, %v7307_v59  ;;  %8349 = vmatmul.f32.gmra.mxu1 %v15109_v62  ;;  %v8487_v6 = vsub.f32 %v8485_v60, %v8486_v20 }
 0x92f   : > { %8684 = vmatpush.msrb.mxu2 %v8486_v20 }
 0x930   : > { %v7457_v23 = vadd.f32 %v7456_v55, %v7308_v46  ;;  %v8488_v18 = vand.u32 4294901760, %v8487_v6 }
 0x932   : > { %8102 = vmatmul.f32.gmra.mxu2 %v15116_v26  ;;  %8185 = vmatmul.f32.gmra.mxu3 %v7877_v25  ;;  %v7541_v14 = vadd.f32 %v7540_v21, %v7457_v23 }
 0x933   : > { %8284 = vmatmul.f32.gmra.mxu0 %v15109_v62  ;;  %8489 = vmatpush.msra.mxu3 %v8488_v18  ;;  %v7550_v25 = vpop.f32.mrf.mxu0  ;;  %v7628_v53 = vpop.f32.mrf.mxu1 }
 0x934   : > { %v15258_v48 = vadd.f32 %v7616_v17, %v7541_v14 }
 0x935   : > { %v7315_v34 = vpop.f32.mrf.mxu2  ;;  %v7464_v43 = vpop.f32.mrf.mxu3  ;;  %8731 = vmatpush.msrb.mxu3 %v15152_v61 }
 0x936   : > { %v7316_v11 = vadd.f32 %v15218_v52, %v7315_v34  ;;  %8353 = vmatmul.f32.gmra.mxu1 %v15124_v49 }
 0x937   : > { %8733 = vmatpush.msrb.mxu3 %v15192_v16 }
 0x938   : > { %v7461_v26 = vadd.f32 %v7460_v4, %v7316_v11 }
 0x939   : > { %8735 = vmatpush.msrb.mxu3 %v15224_v58 }
 0x93a   : > { %8107 = vmatmul.f32.gmra.mxu2 %v15131_v29  ;;  %8191 = vmatmul.f32.gmra.mxu3 %v7885_v9  ;;  %v7546_v62 = vadd.f32 %v7545_v45, %v7461_v26  ;;  %v7167_v29 = vld [vmem:[#allocation5 + $0x10] sm:$0xff] }
 0x93b   : > { %8288 = vmatmul.f32.gmra.mxu0 %v15124_v49  ;;  %8737 = vmatpush.msrb.mxu3 %v8387_v1  ;;  %v7555_v9 = vpop.f32.mrf.mxu0  ;;  %v7230_v5 = vsel %vm6794_vm9, %v7167_v29, 0  ;;  %v7634_v54 = vpop.f32.mrf.mxu1  ;;  %v7179_v26 = vld [vmem:[#allocation5 + $0x70] sm:$0xff] }
 0x93c   : > { %v15269_v22 = vadd.f32 %v7622_v36, %v7546_v62  ;;  %v15282_v58 = vand.u32 4294901760, %v7230_v5 }
 0x93d   : > { %v7323_v15 = vpop.f32.mrf.mxu2  ;;  %v7468_v40 = vpop.f32.mrf.mxu3 }
 0x93e   : > { %v7324_v61 = vadd.f32 %v15218_v52, %v7323_v15  ;;  %8357 = vmatmul.f32.gmra.mxu1 %v15139_v32  ;;  %v8390_v57 = vsub.f32 %v7230_v5, %v15282_v58 }
 0x940   : > { %v7465_v16 = vadd.f32 %v7464_v43, %v7324_v61  ;;  %v8391_v47 = vand.u32 4294901760, %v8390_v57 }
 0x942   : > { %8112 = vmatmul.f32.gmra.mxu2 %v15146_v0  ;;  %8197 = vmatmul.f32.gmra.mxu3 %v7893_v19  ;;  %v7551_v49 = vadd.f32 %v7550_v25, %v7465_v16  ;;  %v8392_v28 = vsub.f32 %v8390_v57, %v8391_v47 }
 0x943   : > { %8292 = vmatmul.f32.gmra.mxu0 %v15139_v32  ;;  %v7170_v32 = vld [vmem:[#allocation5 + $0x28] sm:$0xff]  ;;  %v7640_v2 = vpop.f32.mrf.mxu1 }
 0x944   : > { %v15277_v33 = vadd.f32 %v7628_v53, %v7551_v49  ;;  %v7233_v51 = vsel %vm6794_vm9, %v7170_v32, 0 }
 0x945   : > { %v7331_v13 = vpop.f32.mrf.mxu2  ;;  %v7472_v38 = vpop.f32.mrf.mxu3 }
 0x946   : > { %v7332_v8 = vadd.f32 %v15218_v52, %v7331_v13  ;;  %8361 = vmatmul.f32.gmra.mxu1 %v15164_v44  ;;  %v7182_v13 = vld [vmem:[#allocation5 + $0x88] sm:$0xff] }
 0x947   : > { %v7245_v32 = vsel %vm6794_vm9, %v7182_v13, 0 }
 0x948   : > { %v7469_v0 = vadd.f32 %v7468_v40, %v7332_v8  ;;  %v7242_v40 = vsel %vm6794_vm9, %v7179_v26, 0 }
 0x94a   : > { %8117 = vmatmul.f32.gmra.mxu2 %v15171_v63  ;;  %8203 = vmatmul.f32.gmra.mxu3 %v7901_v27  ;;  %v7556_v19 = vadd.f32 %v7555_v9, %v7469_v0  ;;  %v7560_v63 = vpop.f32.mrf.mxu0  ;;  %v15294_v27 = vand.u32 4294901760, %v7233_v51  ;;  %v15324_v9 = vand.u32 4294901760, %v7242_v40 }
 0x94b   : > { %8296 = vmatmul.f32.gmra.mxu0 %v15164_v44  ;;  %v7173_v44 = vld [vmem:[#allocation5 + $0x40] sm:$0xff]  ;;  %v7646_v60 = vpop.f32.mrf.mxu1 }
 0x94c   : > { %v15289_v30 = vadd.f32 %v7634_v54, %v7556_v19  ;;  %v8398_v55 = vsub.f32 %v7233_v51, %v15294_v27  ;;  %v7236_v50 = vsel %vm6794_vm9, %v7173_v44, 0  ;;  %v8422_v8 = vsub.f32 %v7242_v40, %v15324_v9 }
 0x94d   : > { %v7339_v35 = vpop.f32.mrf.mxu2  ;;  %v7476_v42 = vpop.f32.mrf.mxu3  ;;  %v15304_v59 = vand.u32 4294901760, %v7236_v50  ;;  %v15335_v51 = vand.u32 4294901760, %v7245_v32 }
 0x94e   : > { %v7340_v31 = vadd.f32 %v15218_v52, %v7339_v35  ;;  %8365 = vmatmul.f32.gmra.mxu1 %v15181_v3  ;;  %v8399_v1 = vand.u32 4294901760, %v8398_v55 }
 0x94f   : > { %v8406_v23 = vsub.f32 %v7236_v50, %v15304_v59 }
 0x950   : > { %v7473_v10 = vadd.f32 %v7472_v38, %v7340_v31  ;;  %v8400_v45 = vsub.f32 %v8398_v55, %v8399_v1  ;;  %v7156_v38 = vld [vmem:[#allocation4 + $0x92] sm:$0xff] }
 0x951   : > { %v8407_v43 = vand.u32 4294901760, %v8406_v23  ;;  %7164 = vst.msk [vmem:[#allocation5 + $0xb8] sm:$0xff] %vm6794_vm9, %v7156_v38 }
 0x952   : > { %8122 = vmatmul.f32.gmra.mxu2 %v15186_v56  ;;  %8491 = vmatmul.f32.vlgmr.msra.gmra.mxu3 %v15282_v58  ;;  %v7561_v24 = vadd.f32 %v7560_v63, %v7473_v10  ;;  %v8393_v56 = vand.u32 4294901760, %v8392_v28  ;;  %v7565_v4 = vpop.f32.mrf.mxu0  ;;  %v8401_v34 = vand.u32 4294901760, %v8400_v45  ;;  %v7185_v63 = vld [vmem:[#allocation5 + $0xa0] sm:$0xff] }
 0x953   : > { %8300 = vmatmul.f32.gmra.mxu0 %v15181_v3  ;;  %v7176_v3 = vld [vmem:[#allocation5 + $0x58] sm:$0xff]  ;;  %v8408_v25 = vsub.f32 %v8406_v23, %v8407_v43  ;;  %v15328_v5 = vpop.f32.mrf.mxu1 }
 0x954   : > { %v15300_v21 = vadd.f32 %v7640_v2, %v7561_v24  ;;  %v7239_v6 = vsel %vm6794_vm9, %v7176_v3, 0 }
 0x955   : > { %v7347_v12 = vpop.f32.mrf.mxu2  ;;  %v7780_v17 = vpop.f32.mrf.mxu3  ;;  %v15314_v11 = vand.u32 4294901760, %v7239_v6  ;;  %v8409_v29 = vand.u32 4294901760, %v8408_v25 }
 0x956   : > { %v7348_v41 = vadd.f32 %v15218_v52, %v7347_v12  ;;  %8611 = vmatmul.f32.vlgmr.msrb.gmra.mxu1 %v8391_v47  ;;  %v8430_v47 = vsub.f32 %v7245_v32, %v15335_v51 }
 0x957   : > { %v8414_v62 = vsub.f32 %v7239_v6, %v15314_v11 }
 0x958   : > { %v7477_v37 = vadd.f32 %v7476_v42, %v7348_v41  ;;  %v8423_v42 = vand.u32 4294901760, %v8422_v8  ;;  %v7188_v41 = vld [vmem:[#allocation5 + $0xb8] sm:$0xff] }
 0x959   : > { %v8415_v49 = vand.u32 4294901760, %v8414_v62 }
 0x95a   : > { %8394 = vmatmul.f32.vlgmr.msra.gmra.mxu2 %v8393_v56  ;;  %8495 = vmatmul.f32.gmra.mxu3 %v15294_v27  ;;  %v7566_v46 = vadd.f32 %v7565_v4, %v7477_v37  ;;  %v15320_v61 = vpop.f32.mrf.mxu0  ;;  %v8424_v10 = vsub.f32 %v8422_v8, %v8423_v42  ;;  %v7251_v37 = vsel %vm6794_vm9, %v7188_v41, 0 }
 0x95b   : > { %8549 = vmatmul.f32.vlgmr.msrb.gmra.mxu0 %v8390_v57  ;;  %v15342_v24 = vpop.f32.mrf.mxu1 }
 0x95c   : > { %v15308_v20 = vadd.f32 %v7646_v60, %v7566_v46  ;;  %v8425_v12 = vand.u32 4294901760, %v8424_v10  ;;  %v15355_v60 = vand.u32 4294901760, %v7251_v37 }
 0x95d   : > { %v7715_v52 = vpop.f32.mrf.mxu2  ;;  %v7784_v36 = vpop.f32.mrf.mxu3 }
 0x95e   : > { %v7716_v14 = vadd.f32 %v7715_v52, %v15235_v39  ;;  %8617 = vmatmul.f32.gmra.mxu1 %v8399_v1  ;;  %v8446_v6 = vsub.f32 %v7251_v37, %v15355_v60 }
 0x960   : > { %v15312_v18 = vadd.f32 %v7780_v17, %v7716_v14  ;;  %v8431_v17 = vand.u32 4294901760, %v8430_v47  ;;  %v8447_v25 = vand.u32 4294901760, %v8446_v6 }
 0x962   : > { %8402 = vmatmul.f32.gmra.mxu2 %v8401_v34  ;;  %8499 = vmatmul.f32.gmra.mxu3 %v15304_v59  ;;  %v15337_v31 = vpop.f32.mrf.mxu0  ;;  %v8432_v1 = vsub.f32 %v8430_v47, %v8431_v17  ;;  %v8448_v40 = vsub.f32 %v8446_v6, %v8447_v25 }
 0x963   : > { %8554 = vmatmul.f32.gmra.mxu0 %v8398_v55  ;;  %v15357_v45 = vpop.f32.mrf.mxu1 }
 0x964   : > { %v8433_v52 = vand.u32 4294901760, %v8432_v1  ;;  %v8449_v13 = vand.u32 4294901760, %v8448_v40 }
 0x965   : > { %v7719_v53 = vpop.f32.mrf.mxu2  ;;  %v7788_v15 = vpop.f32.mrf.mxu3 }
 0x966   : > { %v7720_v39 = vadd.f32 %v7719_v53, %v15246_v7  ;;  %8623 = vmatmul.f32.gmra.mxu1 %v8407_v43  ;;  %v8416_v7 = vsub.f32 %v8414_v62, %v8415_v49 }
 0x968   : > { %v15322_v16 = vadd.f32 %v7784_v36, %v7720_v39  ;;  %v8417_v35 = vand.u32 4294901760, %v8416_v7 }
 0x96a   : > { %8410 = vmatmul.f32.gmra.mxu2 %v8409_v29  ;;  %8503 = vmatmul.f32.gmra.mxu3 %v15314_v11  ;;  %v15351_v56 = vpop.f32.mrf.mxu0 }
 0x96b   : > { %8559 = vmatmul.f32.gmra.mxu0 %v8406_v23 }
 0x96d   : > { %v7723_v54 = vpop.f32.mrf.mxu2  ;;  %v7792_v0 = vpop.f32.mrf.mxu3 }
 0x96e   : > { %v7724_v19 = vadd.f32 %v7723_v54, %v15258_v48  ;;  %8629 = vmatmul.f32.gmra.mxu1 %v8415_v49  ;;  %v7248_v48 = vsel %vm6794_vm9, %v7185_v63, 0 }
 0x96f   : > { %v15347_v50 = vand.u32 4294901760, %v7248_v48 }
 0x970   : > { %v15333_v57 = vadd.f32 %v7788_v15, %v7724_v19  ;;  %v15368_v15 = vpop.f32.mrf.mxu1 }
 0x971   : > { %v8438_v4 = vsub.f32 %v7248_v48, %v15347_v50 }
 0x972   : > { %8418 = vmatmul.f32.gmra.mxu2 %v8417_v35  ;;  %8507 = vmatmul.f32.gmra.mxu3 %v15324_v9  ;;  %v15363_v26 = vpop.f32.mrf.mxu0 }
 0x973   : > { %8564 = vmatmul.f32.gmra.mxu0 %v8414_v62  ;;  %v8439_v36 = vand.u32 4294901760, %v8438_v4 }
 0x975   : > { %v7727_v2 = vpop.f32.mrf.mxu2  ;;  %v7796_v44 = vpop.f32.mrf.mxu3  ;;  %v8440_v14 = vsub.f32 %v8438_v4, %v8439_v36 }
 0x976   : > { %v7728_v28 = vadd.f32 %v7727_v2, %v15269_v22  ;;  %8635 = vmatmul.f32.gmra.mxu1 %v8423_v42 }
 0x977   : > { %v8441_v53 = vand.u32 4294901760, %v8440_v14 }
 0x978   : > { %v15345_v55 = vadd.f32 %v7792_v0, %v7728_v28  ;;  %v15377_v7 = vpop.f32.mrf.mxu1 }
 0x97a   : > { %8426 = vmatmul.f32.gmra.mxu2 %v8425_v12  ;;  %8511 = vmatmul.f32.gmra.mxu3 %v15335_v51  ;;  %v15372_v38 = vpop.f32.mrf.mxu0 }
 0x97b   : > { %8569 = vmatmul.f32.gmra.mxu0 %v8422_v8 }
 0x97d   : > { %v7731_v22 = vpop.f32.mrf.mxu2  ;;  %v7800_v3 = vpop.f32.mrf.mxu3 }
 0x97e   : > { %v7732_v46 = vadd.f32 %v7731_v22, %v15277_v33  ;;  %8641 = vmatmul.f32.gmra.mxu1 %v8431_v17 }
 0x980   : > { %v15359_v23 = vadd.f32 %v7796_v44, %v7732_v46  ;;  %v15392_v42 = vpop.f32.mrf.mxu1 }
 0x982   : > { %8434 = vmatmul.f32.gmra.mxu2 %v8433_v52  ;;  %8515 = vmatmul.f32.gmra.mxu3 %v15347_v50 }
 0x983   : > { %8574 = vmatmul.f32.gmra.mxu0 %v8430_v47 }
 0x985   : > { %v7735_v34 = vpop.f32.mrf.mxu2  ;;  %v7804_v43 = vpop.f32.mrf.mxu3 }
 0x986   : > { %v7736_v33 = vadd.f32 %v7735_v34, %v15289_v30  ;;  %8647 = vmatmul.f32.gmra.mxu1 %v8439_v36 }
 0x988   : > { %v15366_v62 = vadd.f32 %v7800_v3, %v7736_v33  ;;  %v15402_v47 = vpop.f32.mrf.mxu1 }
 0x989   : > { %16534 = vst [vmem:[#allocation12_spill] sm:$0xff] %v15402_v47  ;;  %v7850_v47 = vadd.f32 %v15320_v61, %v15312_v18  ;;  %v8771_v61 = vld [vmem:[%s15904_s9] sm:$0xff] }
 0x98a   : > { %8442 = vmatmul.f32.gmra.mxu2 %v8441_v53  ;;  %8519 = vmatmul.f32.gmra.mxu3 %v15355_v60 }
 0x98b   : > { %8579 = vmatmul.f32.gmra.mxu0 %v8438_v4 }
 0x98d   : > { %v7739_v39 = vpop.f32.mrf.mxu2  ;;  %v7808_v29 = vpop.f32.mrf.mxu3 }
 0x98e   : > { %v7740_v49 = vadd.f32 %v7739_v39, %v15300_v21  ;;  %8653 = vmatmul.f32.gmra.mxu1 %v8447_v25  ;;  %v15384_v21 = vpop.f32.mrf.mxu0  ;;  %v8773_v39 = vld [vmem:[%s15904_s9 + $0x10] sm:$0xff] }
 0x990   : > { %v15374_v30 = vadd.f32 %v7804_v43, %v7740_v49 }
 0x992   : > { %8450 = vmatmul.f32.gmra.mxu2 %v8449_v13  ;;  %8739 = vmatmul.f32.vlgmr.msrb.gmra.mxu3 %v15282_v58 }
 0x993   : > { %8584 = vmatmul.f32.gmra.mxu0 %v8446_v6 }
 0x995   : > { %v7743_v8 = vpop.f32.mrf.mxu2  ;;  %v15379_v54 = vpop.f32.mrf.mxu3 }
 0x996   : > { %v7744_v0 = vadd.f32 %v7743_v8, %v15308_v20  ;;  %v15396_v63 = vpop.f32.mrf.mxu0 }
 0x998   : > { %v15382_v32 = vadd.f32 %v7808_v29, %v7744_v0  ;;  %v15481_v29 = vand.u32 4294901760, %v8773_v39 }
 0x99a   : > { %16533 = vst [vmem:[#allocation41_spill] sm:$0xff] %v15382_v32  ;;  %8686 = vmatmul.f32.vlgmr.msrb.gmra.mxu2 %v15282_v58  ;;  %8743 = vmatmul.f32.gmra.mxu3 %v15294_v27  ;;  %v8907_v49 = vsub.f32 %v8773_v39, %v15481_v29 }
 0x99d   : > { %v15388_v19 = vpop.f32.mrf.mxu2  ;;  %v15390_v35 = vpop.f32.mrf.mxu3 }
 0x99e   : > { %v15410_v44 = vpop.f32.mrf.mxu0 }
 0x99f   : > { %16535 = vst [vmem:[#allocation44_spill] sm:$0xff] %v15410_v44 }
 0x9a2   : > { %8690 = vmatmul.f32.gmra.mxu2 %v15294_v27  ;;  %8747 = vmatmul.f32.gmra.mxu3 %v15304_v59  ;;  %v15412_v27 = vpop.f32.mrf.mxu1 }
 0x9a3   : > { %16536 = vst [vmem:[#allocation14_spill] sm:$0xff] %v15412_v27  ;;  %v8772_v27 = vld [vmem:[%s15904_s9 + $0x8] sm:$0xff] }
 0x9a5   : > { %v15398_v20 = vpop.f32.mrf.mxu2  ;;  %v15400_v10 = vpop.f32.mrf.mxu3 }
 0x9a6   : > { %v15420_v12 = vpop.f32.mrf.mxu0 }
 0x9aa   : > { %8694 = vmatmul.f32.gmra.mxu2 %v15304_v59  ;;  %8751 = vmatmul.f32.gmra.mxu3 %v15314_v11  ;;  %v15424_v59 = vpop.f32.mrf.mxu1 }
 0x9ad   : > { %v15406_v58 = vpop.f32.mrf.mxu2  ;;  %v15408_v2 = vpop.f32.mrf.mxu3 }
 0x9ae   : > { %v15430_v37 = vpop.f32.mrf.mxu0 }
 0x9b2   : > { %8698 = vmatmul.f32.gmra.mxu2 %v15314_v11  ;;  %8755 = vmatmul.f32.gmra.mxu3 %v15324_v9  ;;  %v15438_v4 = vpop.f32.mrf.mxu1 }
 0x9b5   : > { %v15416_v48 = vpop.f32.mrf.mxu2  ;;  %v15418_v28 = vpop.f32.mrf.mxu3 }
 0x9ba   : > { %8702 = vmatmul.f32.gmra.mxu2 %v15324_v9  ;;  %8759 = vmatmul.f32.gmra.mxu3 %v15335_v51  ;;  %v15442_v9 = vpop.f32.mrf.mxu0  ;;  %v15448_v46 = vpop.f32.mrf.mxu1 }
 0x9bd   : > { %v15426_v17 = vpop.f32.mrf.mxu2  ;;  %v15428_v41 = vpop.f32.mrf.mxu3 }
 0x9be   : > { %16537 = vst [vmem:[#allocation43_spill] sm:$0xff] %v15428_v41 }
 0x9c2   : > { %8706 = vmatmul.f32.gmra.mxu2 %v15335_v51  ;;  %8763 = vmatmul.f32.gmra.mxu3 %v15347_v50  ;;  %v8774_v51 = vld [vmem:[%s15904_s9 + $0x18] sm:$0xff]  ;;  %v15467_v34 = vpop.f32.mrf.mxu0  ;;  %v15470_v33 = vpop.f32.mrf.mxu1 }
 0x9c3   : > { %v15453_v52 = vand.u32 4294901760, %v8774_v51 }
 0x9c5   : > { %v15434_v11 = vpop.f32.mrf.mxu2  ;;  %v15436_v1 = vpop.f32.mrf.mxu3  ;;  %8816 = vmatpush.msra.mxu0 %v15453_v52  ;;  %9035 = vmatpush.msra.mxu3 %v15453_v52 }
 0x9c6   : > { %16538 = vst [vmem:[#allocation46_spill] sm:$0xff] %v15436_v1  ;;  %v8819_v1 = vand.u32 4294901760, %v8772_v27 }
 0x9c7   : > { %8818 = vmatpush.msra.mxu0 %v15481_v29  ;;  %9037 = vmatpush.msra.mxu3 %v15481_v29 }
 0x9c8   : > { %v8913_v44 = vsub.f32 %v8772_v27, %v8819_v1 }
 0x9c9   : > { %8820 = vmatpush.msra.mxu0 %v8819_v1  ;;  %9039 = vmatpush.msra.mxu3 %v8819_v1 }
 0x9ca   : > { %8710 = vmatmul.f32.gmra.mxu2 %v15347_v50  ;;  %8767 = vmatmul.f32.gmra.mxu3 %v15355_v60  ;;  %v15458_v50 = vsub.f32 %v8774_v51, %v15453_v52  ;;  %v15476_v40 = vpop.f32.mrf.mxu0  ;;  %v15486_v13 = vpop.f32.mrf.mxu1  ;;  %v8908_v51 = vand.u32 4294901760, %v8907_v49 }
 0x9cb   : > { %16542 = vst [vmem:[#allocation52_spill] sm:$0xff] %v15486_v13 }
 0x9cc   : > { %v8902_v14 = vand.u32 4294901760, %v15458_v50  ;;  %8971 = vmatpush.msra.mxu2 %v15458_v50 }
 0x9cd   : > { %v15444_v22 = vpop.f32.mrf.mxu2  ;;  %v15446_v3 = vpop.f32.mrf.mxu3 }
 0x9ce   : > { %16539 = vst [vmem:[#allocation42_spill] sm:$0xff] %v15444_v22  ;;  %v8903_v43 = vsub.f32 %v15458_v50, %v8902_v14  ;;  %8974 = vmatpush.msra.mxu2 %v8907_v49  ;;  %v8909_v50 = vsub.f32 %v8907_v49, %v8908_v51 }
 0x9cf   : > { %16540 = vst [vmem:[#allocation48_spill] sm:$0xff] %v15446_v3 }
 0x9d0   : > { %8977 = vmatpush.msra.mxu2 %v8913_v44 }
 0x9d2   : > { %8714 = vmatmul.f32.gmra.mxu2 %v15355_v60  ;;  %v8904_v60 = vand.u32 4294901760, %v8903_v43  ;;  %v8910_v43 = vand.u32 4294901760, %v8909_v50  ;;  %v15498_v39 = vpop.f32.mrf.mxu1 }
 0x9d3   : > { %16545 = vst [vmem:[#allocation53_spill] sm:$0xff] %v15498_v39 }
 0x9d4   : > { %8905 = vmatpush.msra.mxu1 %v8904_v60  ;;  %v15492_v60 = vpop.f32.mrf.mxu0 }
 0x9d5   : > { %v15461_v36 = vpop.f32.mrf.mxu2  ;;  %v15463_v6 = vpop.f32.mrf.mxu3  ;;  %16543 = vst [vmem:[#allocation50_spill] sm:$0xff] %v15492_v60 }
 0x9d6   : > { %16541 = vst [vmem:[#allocation45_spill] sm:$0xff] %v15461_v36  ;;  %8911 = vmatpush.msra.mxu1 %v8910_v43  ;;  %v8914_v43 = vand.u32 4294901760, %v8913_v44 }
 0x9d8   : > { %v8915_v60 = vsub.f32 %v8913_v44, %v8914_v43  ;;  %v7858_v44 = vadd.f32 %v15337_v31, %v15322_v16  ;;  %v7866_v31 = vadd.f32 %v15351_v56, %v15333_v57 }
 0x9da   : > { %v15509_v22 = vpop.f32.mrf.mxu1  ;;  %v8916_v39 = vand.u32 4294901760, %v8915_v60 }
 0x9dc   : > { %v15503_v32 = vpop.f32.mrf.mxu0  ;;  %8917 = vmatpush.msra.mxu1 %v8916_v39 }
 0x9dd   : > { %v15472_v25 = vpop.f32.mrf.mxu2  ;;  %v15474_v53 = vpop.f32.mrf.mxu3  ;;  %16546 = vst [vmem:[#allocation49_spill] sm:$0xff] %v15503_v32  ;;  %v8007_v32 = vadd.f32 %v15328_v5, %v7850_v47  ;;  %v8821_v47 = vand.u32 4294901760, %v8771_v61 }
 0x9df   : > { %8822 = vmatpush.msra.mxu0 %v8821_v47  ;;  %v8919_v16 = vsub.f32 %v8771_v61, %v8821_v47  ;;  %9041 = vmatpush.msra.mxu3 %v8821_v47 }
 0x9e1   : > { %9106 = vmatpush.msrb.mxu0 %v8902_v14  ;;  %8980 = vmatpush.msra.mxu2 %v8919_v16 }
 0x9e3   : > { %9110 = vmatpush.msrb.mxu0 %v8908_v51 }
 0x9e4   : > { %v15517_v41 = vpop.f32.mrf.mxu0 }
 0x9e5   : > { %v15488_v8 = vpop.f32.mrf.mxu2  ;;  %v15490_v0 = vpop.f32.mrf.mxu3  ;;  %16548 = vst [vmem:[#allocation55_spill] sm:$0xff] %v15517_v41  ;;  %v8011_v41 = vadd.f32 %v15342_v24, %v7858_v44  ;;  %9114 = vmatpush.msrb.mxu0 %v8914_v43 }
 0x9ec   : > { %v8550_v5 = vpop.f32.mrf.mxu0 }
 0x9ed   : > { %v15494_v3 = vpop.f32.mrf.mxu2  ;;  %v15496_v36 = vpop.f32.mrf.mxu3 }
 0x9ee   : > { %16544 = vst [vmem:[#allocation47_spill] sm:$0xff] %v15496_v36  ;;  %v15521_v36 = vpop.f32.mrf.mxu1 }
 0x9ef   : > { %16549 = vst [vmem:[#allocation51_spill] sm:$0xff] %v15521_v36 }
 0x9f4   : > { %v8555_v56 = vpop.f32.mrf.mxu0 }
 0x9f5   : > { %v15505_v49 = vpop.f32.mrf.mxu2  ;;  %v15507_v50 = vpop.f32.mrf.mxu3 }
 0x9f6   : > { %16547 = vst [vmem:[#allocation58_spill] sm:$0xff] %v15507_v50  ;;  %v8089_v50 = vadd.f32 %v15388_v19, %v8007_v32  ;;  %v8094_v32 = vadd.f32 %v15398_v20, %v8011_v41  ;;  %v8015_v41 = vadd.f32 %v15357_v45, %v7866_v31 }
 0x9f8   : > { %v8163_v18 = vadd.f32 %v15379_v54, %v8089_v50  ;;  %v8612_v54 = vpop.f32.mrf.mxu1  ;;  %v8920_v50 = vand.u32 4294901760, %v8919_v16  ;;  %v8169_v24 = vadd.f32 %v15390_v35, %v8094_v32  ;;  %v8099_v57 = vadd.f32 %v15406_v58, %v8015_v41 }
 0x9f9   : > { %v7874_v35 = vadd.f32 %v15363_v26, %v15345_v55 }
 0x9fa   : > { %v8274_v19 = vadd.f32 %v15420_v12, %v8163_v18  ;;  %v8921_v12 = vsub.f32 %v8919_v16, %v8920_v50  ;;  %9118 = vmatpush.msrb.mxu0 %v8920_v50  ;;  %v8278_v18 = vadd.f32 %v15430_v37, %v8169_v24 }
 0x9fb   : > { %v8019_v37 = vadd.f32 %v15368_v15, %v7874_v35  ;;  %v7898_v35 = vadd.f32 %v15396_v63, %v15374_v30 }
 0x9fc   : > { %v8339_v20 = vadd.f32 %v15424_v59, %v8274_v19  ;;  %v8922_v44 = vand.u32 4294901760, %v8921_v12  ;;  %v8343_v58 = vadd.f32 %v15438_v4, %v8278_v18 }
 0x9fd   : > { %v15513_v13 = vpop.f32.mrf.mxu2  ;;  %v15515_v27 = vpop.f32.mrf.mxu3  ;;  %v8104_v55 = vadd.f32 %v15416_v48, %v8019_v37 }
 0x9fe   : > { %v8396_v14 = vadd.f32 %v15472_v25, %v8339_v20  ;;  %8923 = vmatpush.msra.mxu1 %v8922_v44  ;;  %v8175_v25 = vadd.f32 %v15400_v10, %v8099_v57  ;;  %v8560_v10 = vpop.f32.mrf.mxu0 }
 0xa00   : > { %9165 = vmatpush.msrb.mxu1 %v15453_v52  ;;  %v8493_v59 = vadd.f32 %v15463_v6, %v8396_v14  ;;  %v8618_v43 = vpop.f32.mrf.mxu1  ;;  %v8404_v52 = vadd.f32 %v15488_v8, %v8343_v58  ;;  %v8282_v26 = vadd.f32 %v15442_v9, %v8175_v25  ;;  %v7882_v6 = vadd.f32 %v15372_v38, %v15359_v23  ;;  %v16552_v25 = vld [vmem:[#allocation43_spill] sm:$0xff]  ;;  %v16553_v58 = vld [vmem:[#allocation52_spill] sm:$0xff] }
 0xa02   : > { %9167 = vmatpush.msrb.mxu1 %v15481_v29  ;;  %v8551_v61 = vadd.f32 %v8550_v5, %v8493_v59  ;;  %v8497_v29 = vadd.f32 %v15474_v53, %v8404_v52  ;;  %v8347_v15 = vadd.f32 %v15448_v46, %v8282_v26  ;;  %v8023_v5 = vadd.f32 %v15377_v7, %v7882_v6 }
 0xa04   : > { %9169 = vmatpush.msrb.mxu1 %v8819_v1  ;;  %v8613_v32 = vadd.f32 %v8612_v54, %v8551_v61  ;;  %v8181_v1 = vadd.f32 %v15408_v2, %v8104_v55  ;;  %v8412_v48 = vadd.f32 %v15494_v3, %v8347_v15  ;;  %v8556_v9 = vadd.f32 %v8555_v56, %v8497_v29  ;;  %v16554_v55 = vld [vmem:[#allocation12_spill] sm:$0xff] }
 0xa05   : > { %v15525_v60 = vpop.f32.mrf.mxu2  ;;  %v15527_v39 = vpop.f32.mrf.mxu3  ;;  %v8109_v23 = vadd.f32 %v15426_v17, %v8023_v5  ;;  %v7890_v2 = vadd.f32 %v15384_v21, %v15366_v62  ;;  %v8031_v26 = vadd.f32 %v16554_v55, %v7898_v35  ;;  %v16566_v55 = vld [vmem:[#allocation55_spill] sm:$0xff] }
 0xa06   : > { %16550 = vst [vmem:[#allocation57_spill] sm:$0xff] %v15527_v39  ;;  %9171 = vmatpush.msrb.mxu1 %v8821_v47  ;;  %v8286_v38 = vadd.f32 %v15467_v34, %v8181_v1  ;;  %v8501_v46 = vadd.f32 %v15490_v0, %v8412_v48  ;;  %v8619_v54 = vadd.f32 %v8618_v43, %v8556_v9  ;;  %v8565_v24 = vpop.f32.mrf.mxu0  ;;  %v16557_v48 = vld [vmem:[#allocation41_spill] sm:$0xff] }
 0xa07   : > { %v8187_v17 = vadd.f32 %v15418_v28, %v8109_v23  ;;  %v8027_v41 = vadd.f32 %v15392_v42, %v7890_v2  ;;  %v16551_v42 = vld [vmem:[#allocation47_spill] sm:$0xff] }
 0xa08   : > { %v8624_v16 = vpop.f32.mrf.mxu1  ;;  %v8351_v34 = vadd.f32 %v15470_v33, %v8286_v38  ;;  %v8561_v0 = vadd.f32 %v8560_v10, %v8501_v46  ;;  %v16560_v46 = vld [vmem:[#allocation46_spill] sm:$0xff] }
 0xa09   : > { %v8114_v44 = vadd.f32 %v15434_v11, %v8027_v41  ;;  %v8290_v57 = vadd.f32 %v15476_v40, %v8187_v17 }
 0xa0a   : > { %v8420_v62 = vadd.f32 %v15505_v49, %v8351_v34  ;;  %v8625_v49 = vadd.f32 %v8624_v16, %v8561_v0  ;;  %v16559_v16 = vld [vmem:[#allocation58_spill] sm:$0xff]  ;;  %v16563_v0 = vld [vmem:[#allocation45_spill] sm:$0xff] }
 0xa0b   : > { %v8193_v40 = vadd.f32 %v16552_v25, %v8114_v44  ;;  %v8355_v43 = vadd.f32 %v16553_v58, %v8290_v57  ;;  %v16564_v57 = vld [vmem:[#allocation49_spill] sm:$0xff] }
 0xa0c   : > { %v8505_v59 = vadd.f32 %v16551_v42, %v8420_v62 }
 0xa0d   : > { %v15538_v36 = vpop.f32.mrf.mxu2  ;;  %v15540_v39 = vpop.f32.mrf.mxu3  ;;  %v8428_v63 = vadd.f32 %v15513_v13, %v8355_v43 }
 0xa0e   : > { %v8570_v30 = vpop.f32.mrf.mxu0  ;;  %v8566_v29 = vadd.f32 %v8565_v24, %v8505_v59  ;;  %v16562_v24 = vld [vmem:[#allocation14_spill] sm:$0xff] }
 0xa0f   : > { %v8509_v23 = vadd.f32 %v16559_v16, %v8428_v63 }
 0xa10   : > { %v8630_v56 = vpop.f32.mrf.mxu1 }
 0xa11   : > { %v8631_v38 = vadd.f32 %v8630_v56, %v8566_v29  ;;  %v8571_v41 = vadd.f32 %v8570_v30, %v8509_v23 }
 0xa15   : > { %v15552_v51 = vpop.f32.mrf.mxu2  ;;  %v8740_v45 = vpop.f32.mrf.mxu3 }
 0xa16   : > { %v8575_v44 = vpop.f32.mrf.mxu0 }
 0xa18   : > { %v8636_v13 = vpop.f32.mrf.mxu1 }
 0xa19   : > { %v8637_v59 = vadd.f32 %v8636_v13, %v8571_v41 }
 0xa1d   : > { %v8687_v4 = vpop.f32.mrf.mxu2  ;;  %v8744_v19 = vpop.f32.mrf.mxu3 }
 0xa1e   : > { %v8688_v8 = vadd.f32 %v8687_v4, %v8613_v32  ;;  %v16555_v32 = vld [vmem:[#allocation42_spill] sm:$0xff] }
 0xa1f   : > { %v8119_v4 = vadd.f32 %v16555_v32, %v8031_v26 }
 0xa20   : > { %v8741_v47 = vadd.f32 %v8740_v45, %v8688_v8  ;;  %v8642_v58 = vpop.f32.mrf.mxu1 }
 0xa22   : > { %v8780_v53 = vsel %vm6794_vm9, %v8741_v47, 0  ;;  %v16558_v47 = vld [vmem:[#allocation44_spill] sm:$0xff] }
 0xa23   : > { %v15571_v31 = vand.u32 4294901760, %v8780_v53  ;;  %v7906_v9 = vadd.f32 %v16558_v47, %v16557_v48 }
 0xa25   : > { %v8824_v7 = vsub.f32 %v8780_v53, %v15571_v31  ;;  %v8691_v3 = vpop.f32.mrf.mxu2  ;;  %v8748_v50 = vpop.f32.mrf.mxu3  ;;  %8925 = vmatmul.f32.vlgmr.msra.gmra.mxu1 %v15571_v31  ;;  %v8035_v34 = vadd.f32 %v16562_v24, %v7906_v9 }
 0xa26   : > { %v8692_v20 = vadd.f32 %v8691_v3, %v8619_v54  ;;  %v8199_v54 = vadd.f32 %v16560_v46, %v8119_v4 }
 0xa27   : > { %v8825_v12 = vand.u32 4294901760, %v8824_v7  ;;  %8983 = vmatmul.f32.vlgmr.msra.gmra.mxu2 %v8824_v7 }
 0xa28   : > { %v8745_v21 = vadd.f32 %v8744_v19, %v8692_v20  ;;  %v16556_v19 = vld [vmem:[#allocation50_spill] sm:$0xff]  ;;  %v8648_v23 = vpop.f32.mrf.mxu1 }
 0xa29   : > { %v8826_v14 = vsub.f32 %v8824_v7, %v8825_v12  ;;  %9045 = vmatmul.f32.vlgmr.msra.gmra.mxu3 %v8825_v12  ;;  %v8294_v1 = vadd.f32 %v16556_v19, %v8193_v40  ;;  %v16561_v7 = vld [vmem:[#allocation53_spill] sm:$0xff] }
 0xa2a   : > { %v8783_v28 = vsel %vm6794_vm9, %v8745_v21, 0 }
 0xa2b   : > { %v8827_v18 = vand.u32 4294901760, %v8826_v14  ;;  %v15585_v33 = vand.u32 4294901760, %v8783_v28  ;;  %v8359_v3 = vadd.f32 %v16561_v7, %v8294_v1  ;;  %v8124_v14 = vadd.f32 %v16563_v0, %v8035_v34  ;;  %v16568_v1 = vld [vmem:[#allocation51_spill] sm:$0xff] }
 0xa2d   : > { %v8695_v45 = vpop.f32.mrf.mxu2  ;;  %8828 = vmatmul.f32.vlgmr.msra.gmra.mxu0 %v8827_v18  ;;  %8929 = vmatmul.f32.gmra.mxu1 %v15585_v33  ;;  %v8832_v11 = vsub.f32 %v8783_v28, %v15585_v33  ;;  %v8752_v52 = vpop.f32.mrf.mxu3  ;;  %v8436_v20 = vadd.f32 %v15525_v60, %v8359_v3  ;;  %v8298_v28 = vadd.f32 %v16564_v57, %v8199_v54 }
 0xa2e   : > { %v8696_v37 = vadd.f32 %v8695_v45, %v8625_v49  ;;  %v16565_v45 = vld [vmem:[#allocation48_spill] sm:$0xff] }
 0xa2f   : > { %8988 = vmatmul.f32.gmra.mxu2 %v8832_v11  ;;  %v8833_v61 = vand.u32 4294901760, %v8832_v11  ;;  %v8513_v42 = vadd.f32 %v15515_v27, %v8436_v20  ;;  %v8363_v25 = vadd.f32 %v15509_v22, %v8298_v28  ;;  %v16567_v22 = vld [vmem:[#allocation57_spill] sm:$0xff] }
 0xa30   : > { %v8749_v6 = vadd.f32 %v8748_v50, %v8696_v37 }
 0xa31   : > { %9051 = vmatmul.f32.gmra.mxu3 %v8833_v61  ;;  %v8834_v10 = vsub.f32 %v8832_v11, %v8833_v61  ;;  %v8205_v11 = vadd.f32 %v16565_v45, %v8124_v14  ;;  %v8444_v37 = vadd.f32 %v15538_v36, %v8363_v25  ;;  %v8576_v61 = vadd.f32 %v8575_v44, %v8513_v42 }
 0xa32   : > { %v8786_v15 = vsel %vm6794_vm9, %v8749_v6, 0 }
 0xa33   : > { %v15599_v8 = vand.u32 4294901760, %v8786_v15  ;;  %v8835_v5 = vand.u32 4294901760, %v8834_v10  ;;  %v8302_v26 = vadd.f32 %v16566_v55, %v8205_v11  ;;  %v8580_v10 = vpop.f32.mrf.mxu0  ;;  %v8517_v32 = vadd.f32 %v16567_v22, %v8444_v37  ;;  %v9219_v37 = vld [vmem:[%s15906_s11 + $0x30] sm:$0xff] }
 0xa34   : > { %v8643_v4 = vadd.f32 %v8642_v58, %v8576_v61  ;;  %v15668_v55 = vand.u32 4294901760, %v9219_v37 }
 0xa35   : > { %v8699_v53 = vpop.f32.mrf.mxu2  ;;  %8836 = vmatmul.f32.gmra.mxu0 %v8835_v5  ;;  %8933 = vmatmul.f32.gmra.mxu1 %v15599_v8  ;;  %v8840_v2 = vsub.f32 %v8786_v15, %v15599_v8  ;;  %v8756_v62 = vpop.f32.mrf.mxu3  ;;  %v8367_v15 = vadd.f32 %v16568_v1, %v8302_v26  ;;  %v8581_v16 = vadd.f32 %v8580_v10, %v8517_v32  ;;  %v9217_v1 = vld [vmem:[%s15906_s11 + $0x20] sm:$0xff] }
 0xa36   : > { %v8700_v50 = vadd.f32 %v8699_v53, %v8631_v38  ;;  %v15672_v26 = vsub.f32 %v9219_v37, %v15668_v55 }
 0xa37   : > { %8993 = vmatmul.f32.gmra.mxu2 %v8840_v2  ;;  %v8841_v17 = vand.u32 4294901760, %v8840_v2  ;;  %v8452_v47 = vadd.f32 %v15552_v51, %v8367_v15  ;;  %v8649_v7 = vadd.f32 %v8648_v23, %v8581_v16 }
 0xa38   : > { %v8753_v12 = vadd.f32 %v8752_v52, %v8700_v50 }
 0xa39   : > { %9057 = vmatmul.f32.gmra.mxu3 %v8841_v17  ;;  %v8842_v21 = vsub.f32 %v8840_v2, %v8841_v17  ;;  %v8521_v46 = vadd.f32 %v15540_v39, %v8452_v47  ;;  %v15706_v47 = vand.u32 4294901760, %v9217_v1 }
 0xa3a   : > { %v8789_v56 = vsel %vm6794_vm9, %v8753_v12, 0  ;;  %v8654_v12 = vpop.f32.mrf.mxu1 }
 0xa3b   : > { %v15613_v18 = vand.u32 4294901760, %v8789_v56  ;;  %v8843_v35 = vand.u32 4294901760, %v8842_v21  ;;  %v8585_v54 = vpop.f32.mrf.mxu0 }
 0xa3c   : > { %v8586_v34 = vadd.f32 %v8585_v54, %v8521_v46 }
 0xa3d   : > { %v8703_v49 = vpop.f32.mrf.mxu2  ;;  %8844 = vmatmul.f32.gmra.mxu0 %v8843_v35  ;;  %8937 = vmatmul.f32.gmra.mxu1 %v15613_v18  ;;  %v8848_v60 = vsub.f32 %v8789_v56, %v15613_v18  ;;  %v8760_v6 = vpop.f32.mrf.mxu3 }
 0xa3e   : > { %v8704_v40 = vadd.f32 %v8703_v49, %v8637_v59  ;;  %v8655_v39 = vadd.f32 %v8654_v12, %v8586_v34 }
 0xa3f   : > { %8998 = vmatmul.f32.gmra.mxu2 %v8848_v60  ;;  %v8849_v43 = vand.u32 4294901760, %v8848_v60 }
 0xa40   : > { %v8757_v52 = vadd.f32 %v8756_v62, %v8704_v40 }
 0xa41   : > { %9063 = vmatmul.f32.gmra.mxu3 %v8849_v43  ;;  %v8850_v27 = vsub.f32 %v8848_v60, %v8849_v43 }
 0xa42   : > { %v8792_v30 = vsel %vm6794_vm9, %v8757_v52, 0 }
 0xa43   : > { %v15623_v63 = vand.u32 4294901760, %v8792_v30  ;;  %v8851_v29 = vand.u32 4294901760, %v8850_v27 }
 0xa45   : > { %v8707_v19 = vpop.f32.mrf.mxu2  ;;  %8852 = vmatmul.f32.gmra.mxu0 %v8851_v29  ;;  %8941 = vmatmul.f32.gmra.mxu1 %v15623_v63  ;;  %v8856_v36 = vsub.f32 %v8792_v30, %v15623_v63  ;;  %v8764_v3 = vpop.f32.mrf.mxu3  ;;  %v9355_v30 = vand.u32 4294901760, %v15672_v26 }
 0xa46   : > { %v8708_v5 = vadd.f32 %v8707_v19, %v8643_v4 }
 0xa47   : > { %9003 = vmatmul.f32.gmra.mxu2 %v8856_v36  ;;  %v8857_v48 = vand.u32 4294901760, %v8856_v36 }
 0xa48   : > { %v8761_v9 = vadd.f32 %v8760_v6, %v8708_v5  ;;  %v9218_v6 = vld [vmem:[%s15906_s11 + $0x28] sm:$0xff] }
 0xa49   : > { %9069 = vmatmul.f32.gmra.mxu3 %v8857_v48  ;;  %v8858_v38 = vsub.f32 %v8856_v36, %v8857_v48  ;;  %v15687_v32 = vand.u32 4294901760, %v9218_v6 }
 0xa4a   : > { %v8795_v13 = vsel %vm6794_vm9, %v8761_v9, 0  ;;  %v9366_v9 = vsub.f32 %v9217_v1, %v15706_v47  ;;  %v16569_v1 = vld [vmem:[#allocation6_spill] sm:$0xff] }
 0xa4b   : > { %v8863_v53 = vand.u32 4294901760, %v8795_v13  ;;  %v8859_v2 = vand.u32 4294901760, %v8858_v38  ;;  %v15691_v4 = vsub.f32 %v9218_v6, %v15687_v32  ;;  %v9216_v38 = vld [vmem:[%s15906_s11 + $0x18] sm:$0xff] }
 0xa4c   : > { %v9367_v16 = vand.u32 4294901760, %v9366_v9  ;;  %v15718_v46 = vand.u32 4294901760, %v9216_v38 }
 0xa4d   : > { %v8711_v50 = vpop.f32.mrf.mxu2  ;;  %8860 = vmatmul.f32.gmra.mxu0 %v8859_v2  ;;  %8945 = vmatmul.f32.gmra.mxu1 %v8863_v53  ;;  %v8864_v17 = vsub.f32 %v8795_v13, %v8863_v53  ;;  %v8768_v44 = vpop.f32.mrf.mxu3  ;;  %v9361_v19 = vand.u32 4294901760, %v15691_v4 }
 0xa4e   : > { %v8712_v24 = vadd.f32 %v8711_v50, %v8649_v7  ;;  %v9368_v23 = vsub.f32 %v9366_v9, %v9367_v16  ;;  %v9372_v54 = vsub.f32 %v9216_v38, %v15718_v46  ;;  %v9215_v50 = vld [vmem:[%s15906_s11 + $0x10] sm:$0xff] }
 0xa4f   : > { %9008 = vmatmul.f32.gmra.mxu2 %v8864_v17  ;;  %v8865_v51 = vand.u32 4294901760, %v8864_v17  ;;  %v9362_v36 = vsub.f32 %v15691_v4, %v9361_v19  ;;  %v15730_v34 = vand.u32 4294901760, %v9215_v50 }
 0xa50   : > { %v8765_v20 = vadd.f32 %v8764_v3, %v8712_v24  ;;  %v9369_v2 = vand.u32 4294901760, %v9368_v23  ;;  %v9373_v7 = vand.u32 4294901760, %v9372_v54 }
 0xa51   : > { %9075 = vmatmul.f32.gmra.mxu3 %v8865_v51  ;;  %v8866_v41 = vsub.f32 %v8864_v17, %v8865_v51  ;;  %v9363_v48 = vand.u32 4294901760, %v9362_v36 }
 0xa52   : > { %v8798_v62 = vsel %vm6794_vm9, %v8765_v20, 0  ;;  %v9374_v3 = vsub.f32 %v9372_v54, %v9373_v7  ;;  %v9378_v20 = vsub.f32 %v9215_v50, %v15730_v34 }
 0xa53   : > { %v8871_v21 = vand.u32 4294901760, %v8798_v62  ;;  %v8867_v0 = vand.u32 4294901760, %v8866_v41 }
 0xa54   : > { %v9375_v51 = vand.u32 4294901760, %v9374_v3  ;;  %v9379_v12 = vand.u32 4294901760, %v9378_v20 }
 0xa55   : > { %v8715_v14 = vpop.f32.mrf.mxu2  ;;  %8868 = vmatmul.f32.gmra.mxu0 %v8867_v0  ;;  %8949 = vmatmul.f32.gmra.mxu1 %v8871_v21  ;;  %v8872_v57 = vsub.f32 %v8798_v62, %v8871_v21 }
 0xa56   : > { %v8716_v28 = vadd.f32 %v8715_v14, %v8655_v39  ;;  %v9380_v41 = vsub.f32 %v9378_v20, %v9379_v12  ;;  %v9214_v39 = vld [vmem:[%s15906_s11 + $0x8] sm:$0xff] }
 0xa57   : > { %9013 = vmatmul.f32.gmra.mxu2 %v8872_v57  ;;  %v8873_v56 = vand.u32 4294901760, %v8872_v57 }
 0xa58   : > { %v8769_v35 = vadd.f32 %v8768_v44, %v8716_v28  ;;  %v9381_v0 = vand.u32 4294901760, %v9380_v41  ;;  %v9270_v44 = vand.u32 4294901760, %v9214_v39 }
 0xa59   : > { %9081 = vmatmul.f32.gmra.mxu3 %v8873_v56  ;;  %v8874_v42 = vsub.f32 %v8872_v57, %v8873_v56  ;;  %v9213_v57 = vld [vmem:[%s15906_s11] sm:$0xff] }
 0xa5a   : > { %v8801_v59 = vsel %vm6794_vm9, %v8769_v35, 0  ;;  %v9384_v28 = vsub.f32 %v9214_v39, %v9270_v44  ;;  %v9272_v56 = vand.u32 4294901760, %v9213_v57  ;;  %v15748_v35 = vld [vmem:[%s15905_s10] ss:$0 sm:$0xff] }
 0xa5b   : > { %v8879_v49 = vand.u32 4294901760, %v8801_v59  ;;  %v8875_v60 = vand.u32 4294901760, %v8874_v42 }
 0xa5d   : > { %8876 = vmatmul.f32.gmra.mxu0 %v8875_v60  ;;  %8953 = vmatmul.f32.gmra.mxu1 %v8879_v49  ;;  %v8880_v45 = vsub.f32 %v8801_v59, %v8879_v49  ;;  %v9385_v59 = vand.u32 4294901760, %v9384_v28 }
 0xa5f   : > { %9018 = vmatmul.f32.gmra.mxu2 %v8880_v45  ;;  %v8881_v11 = vand.u32 4294901760, %v8880_v45 }
 0xa61   : > { %9087 = vmatmul.f32.gmra.mxu3 %v8881_v11  ;;  %v8882_v25 = vsub.f32 %v8880_v45, %v8881_v11  ;;  %v9386_v11 = vsub.f32 %v9384_v28, %v9385_v59 }
 0xa63   : > { %v8883_v40 = vand.u32 4294901760, %v8882_v25 }
 0xa65   : > { %8884 = vmatmul.f32.gmra.mxu0 %v8883_v40  ;;  %9173 = vmatmul.f32.vlgmr.msrb.gmra.mxu1 %v15571_v31 }
 0xa6d   : > { %9120 = vmatmul.f32.vlgmr.msrb.gmra.mxu0 %v15571_v31  ;;  %9177 = vmatmul.f32.gmra.mxu1 %v15585_v33  ;;  %v9220_v31 = vld [vmem:[%s15906_s11 + $0x38] sm:$0xff] }
 0xa75   : > { %9124 = vmatmul.f32.gmra.mxu0 %v15585_v33  ;;  %9181 = vmatmul.f32.gmra.mxu1 %v15599_v8 }
 0xa7d   : > { %9128 = vmatmul.f32.gmra.mxu0 %v15599_v8  ;;  %9185 = vmatmul.f32.gmra.mxu1 %v15613_v18  ;;  %v15649_v8 = vand.u32 4294901760, %v9220_v31 }
 0xa7f   : > { %9259 = vmatpush.msrb.mxu2 %v15649_v8  ;;  %9510 = vmatpush.msra.mxu1 %v15649_v8 }
 0xa81   : > { %9261 = vmatpush.msrb.mxu2 %v15668_v55  ;;  %9512 = vmatpush.msra.mxu1 %v15668_v55 }
 0xa83   : > { %9263 = vmatpush.msrb.mxu2 %v15687_v32  ;;  %9514 = vmatpush.msra.mxu1 %v15687_v32 }
 0xa85   : > { %9132 = vmatmul.f32.gmra.mxu0 %v15613_v18  ;;  %9189 = vmatmul.f32.gmra.mxu1 %v15623_v63  ;;  %v15653_v18 = vsub.f32 %v9220_v31, %v15649_v8  ;;  %v9387_v31 = vand.u32 4294901760, %v9386_v11  ;;  %v16571_v11 = vld [vmem:[#allocation8_spill] sm:$0xff] }
 0xa86   : > { %9265 = vmatpush.msrb.mxu2 %v15706_v47  ;;  %9516 = vmatpush.msra.mxu1 %v15706_v47 }
 0xa87   : > { %v9349_v58 = vand.u32 4294901760, %v15653_v18  ;;  %9438 = vmatpush.msra.mxu0 %v15653_v18 }
 0xa88   : > { %9267 = vmatpush.msrb.mxu2 %v15718_v46  ;;  %9518 = vmatpush.msra.mxu1 %v15718_v46 }
 0xa89   : > { %v9350_v43 = vsub.f32 %v15653_v18, %v9349_v58  ;;  %9441 = vmatpush.msra.mxu0 %v15672_v26 }
 0xa8a   : > { %9269 = vmatpush.msrb.mxu2 %v15730_v34  ;;  %9520 = vmatpush.msra.mxu1 %v15730_v34 }
 0xa8b   : > { %v9351_v27 = vand.u32 4294901760, %v9350_v43  ;;  %9444 = vmatpush.msra.mxu0 %v15691_v4 }
 0xa8c   : > { %9271 = vmatpush.msrb.mxu2 %v9270_v44  ;;  %9522 = vmatpush.msra.mxu1 %v9270_v44 }
 0xa8d   : > { %9136 = vmatmul.f32.gmra.mxu0 %v15623_v63  ;;  %9193 = vmatmul.f32.gmra.mxu1 %v8863_v53  ;;  %v9356_v63 = vsub.f32 %v15672_v26, %v9355_v30 }
 0xa8e   : > { %9352 = vmatpush.msrb.mxu3 %v9351_v27  ;;  %9447 = vmatpush.msra.mxu0 %v9366_v9 }
 0xa8f   : > { %v9357_v22 = vand.u32 4294901760, %v9356_v63  ;;  %9273 = vmatpush.msrb.mxu2 %v9272_v56  ;;  %9524 = vmatpush.msra.mxu1 %v9272_v56 }
 0xa90   : > { %9450 = vmatpush.msra.mxu0 %v9372_v54 }
 0xa91   : > { %9358 = vmatpush.msrb.mxu3 %v9357_v22  ;;  %9585 = vmatpush.msra.mxu2 %v9349_v58 }
 0xa92   : > { %9453 = vmatpush.msra.mxu0 %v9378_v20 }
 0xa93   : > { %9364 = vmatpush.msrb.mxu3 %v9363_v48  ;;  %9589 = vmatpush.msra.mxu2 %v9355_v30 }
 0xa94   : > { %9456 = vmatpush.msra.mxu0 %v9384_v28 }
 0xa95   : > { %9140 = vmatmul.f32.gmra.mxu0 %v8863_v53  ;;  %9197 = vmatmul.f32.gmra.mxu1 %v8871_v21 }
 0xa96   : > { %9370 = vmatpush.msrb.mxu3 %v9369_v2  ;;  %9593 = vmatpush.msra.mxu2 %v9361_v19 }
 0xa98   : > { %9376 = vmatpush.msrb.mxu3 %v9375_v51  ;;  %9597 = vmatpush.msra.mxu2 %v9367_v16 }
 0xa9a   : > { %9382 = vmatpush.msrb.mxu3 %v9381_v0  ;;  %9601 = vmatpush.msra.mxu2 %v9373_v7 }
 0xa9c   : > { %9388 = vmatpush.msrb.mxu3 %v9387_v31  ;;  %9605 = vmatpush.msra.mxu2 %v9379_v12 }
 0xa9d   : > { %9144 = vmatmul.f32.gmra.mxu0 %v8871_v21  ;;  %9201 = vmatmul.f32.gmra.mxu1 %v8879_v49 }
 0xa9e   : > { %9609 = vmatpush.msra.mxu2 %v9385_v59 }
 0xaa2   : > { %v15647_v33 = vpop.f32.mrf.mxu1 }
 0xaa5   : > { %9148 = vmatmul.f32.gmra.mxu0 %v8879_v49  ;;  %v9390_v49 = vsub.f32 %v9213_v57, %v9272_v56 }
 0xaa7   : > { %v9391_v25 = vand.u32 4294901760, %v9390_v49  ;;  %9459 = vmatpush.msra.mxu0 %v9390_v49 }
 0xaa9   : > { %v9392_v43 = vsub.f32 %v9390_v49, %v9391_v25  ;;  %9613 = vmatpush.msra.mxu2 %v9391_v25 }
 0xaaa   : > { %v15664_v52 = vpop.f32.mrf.mxu0  ;;  %v15666_v61 = vpop.f32.mrf.mxu1 }
 0xaab   : > { %v8984_v14 = vpop.f32.mrf.mxu2  ;;  %v8830_v40 = vadd.f32 %v15748_v35, %v15664_v52  ;;  %v9393_v27 = vand.u32 4294901760, %v9392_v43 }
 0xaac   : > { %v9046_v42 = vpop.f32.mrf.mxu3 }
 0xaad   : > { %v8927_v18 = vadd.f32 %v15647_v33, %v8830_v40  ;;  %9394 = vmatpush.msrb.mxu3 %v9393_v27 }
 0xaaf   : > { %9656 = vmatpush.msra.mxu3 %v15649_v8  ;;  %v8985_v52 = vadd.f32 %v8984_v14, %v8927_v18 }
 0xab1   : > { %9658 = vmatpush.msra.mxu3 %v15668_v55  ;;  %v9047_v33 = vadd.f32 %v9046_v42, %v8985_v52 }
 0xab2   : > { %v15683_v29 = vpop.f32.mrf.mxu0  ;;  %v15685_v10 = vpop.f32.mrf.mxu1 }
 0xab3   : > { %v8989_v37 = vpop.f32.mrf.mxu2  ;;  %v8838_v30 = vadd.f32 %v15748_v35, %v15683_v29  ;;  %9660 = vmatpush.msra.mxu3 %v15687_v32 }
 0xab4   : > { %v9052_v26 = vpop.f32.mrf.mxu3 }
 0xab5   : > { %9662 = vmatpush.msra.mxu3 %v15706_v47  ;;  %v8931_v6 = vadd.f32 %v15666_v61, %v8838_v30 }
 0xab7   : > { %9664 = vmatpush.msra.mxu3 %v15718_v46  ;;  %v8990_v19 = vadd.f32 %v8989_v37, %v8931_v6 }
 0xab9   : > { %9666 = vmatpush.msra.mxu3 %v15730_v34  ;;  %v9053_v61 = vadd.f32 %v9052_v26, %v8990_v19 }
 0xaba   : > { %v15702_v15 = vpop.f32.mrf.mxu0  ;;  %v15704_v5 = vpop.f32.mrf.mxu1 }
 0xabb   : > { %v8994_v22 = vpop.f32.mrf.mxu2  ;;  %v8846_v29 = vadd.f32 %v15748_v35, %v15702_v15  ;;  %9668 = vmatpush.msra.mxu3 %v9270_v44 }
 0xabc   : > { %v9058_v36 = vpop.f32.mrf.mxu3 }
 0xabd   : > { %9670 = vmatpush.msra.mxu3 %v9272_v56  ;;  %v8935_v47 = vadd.f32 %v15685_v10, %v8846_v29  ;;  %v16570_v10 = vld [vmem:[#allocation7_spill] sm:$0xff] }
 0xabf   : > { %v8995_v54 = vadd.f32 %v8994_v22, %v8935_v47 }
 0xac1   : > { %v9059_v12 = vadd.f32 %v9058_v36, %v8995_v54 }
 0xac2   : > { %v15714_v13 = vpop.f32.mrf.mxu0  ;;  %v15716_v53 = vpop.f32.mrf.mxu1 }
 0xac3   : > { %v8999_v46 = vpop.f32.mrf.mxu2  ;;  %v8854_v7 = vadd.f32 %v15748_v35, %v15714_v13 }
 0xac4   : > { %v9064_v34 = vpop.f32.mrf.mxu3 }
 0xac5   : > { %v8939_v41 = vadd.f32 %v15704_v5, %v8854_v7 }
 0xac7   : > { %v9000_v56 = vadd.f32 %v8999_v46, %v8939_v41  ;;  %v16573_v46 = vld [vmem:[#allocation10_spill] sm:$0xff] }
 0xac9   : > { %v9065_v31 = vadd.f32 %v9064_v34, %v9000_v56 }
 0xaca   : > { %v15726_v17 = vpop.f32.mrf.mxu0  ;;  %v15728_v24 = vpop.f32.mrf.mxu1 }
 0xacb   : > { %v8862_v42 = vadd.f32 %v15748_v35, %v15726_v17  ;;  %v9004_v49 = vpop.f32.mrf.mxu2 }
 0xacc   : > { %v9070_v27 = vpop.f32.mrf.mxu3 }
 0xacd   : > { %v8943_v43 = vadd.f32 %v15716_v53, %v8862_v42 }
 0xacf   : > { %v9005_v30 = vadd.f32 %v9004_v49, %v8943_v43 }
 0xad1   : > { %v9071_v29 = vadd.f32 %v9070_v27, %v9005_v30 }
 0xad2   : > { %v15735_v62 = vpop.f32.mrf.mxu0  ;;  %v15737_v21 = vpop.f32.mrf.mxu1 }
 0xada   : > { %v15750_v60 = vpop.f32.mrf.mxu0  ;;  %v15752_v45 = vpop.f32.mrf.mxu1 }
 0xae2   : > { %v15763_v58 = vpop.f32.mrf.mxu0  ;;  %v9174_v63 = vpop.f32.mrf.mxu1 }
 0xaea   : > { %v9121_v8 = vpop.f32.mrf.mxu0  ;;  %v9178_v4 = vpop.f32.mrf.mxu1 }
 0xaeb   : > { %v9122_v55 = vadd.f32 %v9121_v8, %v9047_v33  ;;  %v8870_v33 = vadd.f32 %v15748_v35, %v15735_v62  ;;  %v16572_v8 = vld [vmem:[#allocation9_spill] sm:$0xff]  ;;  %v9076_v62 = vpop.f32.mrf.mxu3 }
 0xaed   : > { %v9175_v32 = vadd.f32 %v9174_v63, %v9122_v55  ;;  %v9009_v55 = vpop.f32.mrf.mxu2 }
 0xaef   : > { %v9205_v48 = vadd.f32 %v9175_v32, %v16569_v1  ;;  %v8947_v32 = vadd.f32 %v15728_v24, %v8870_v33 }
 0xaf1   : > { %v9227_v9 = vsel %vm9225_vm14, %v9205_v48, 0 }
 0xaf2   : > { %v15779_v16 = vand.u32 4294901760, %v9227_v9  ;;  %v9125_v23 = vpop.f32.mrf.mxu0  ;;  %v9182_v38 = vpop.f32.mrf.mxu1 }
 0xaf3   : > { %v9126_v2 = vadd.f32 %v9125_v23, %v9053_v61  ;;  %v9010_v23 = vadd.f32 %v9009_v55, %v8947_v32 }
 0xaf4   : > { %v9275_v15 = vsub.f32 %v9227_v9, %v15779_v16  ;;  %9396 = vmatmul.f32.vlgmr.msrb.gmra.mxu3 %v15779_v16 }
 0xaf5   : > { %v9179_v3 = vadd.f32 %v9178_v4, %v9126_v2 }
 0xaf6   : > { %v9276_v50 = vand.u32 4294901760, %v9275_v15  ;;  %9462 = vmatmul.f32.vlgmr.msra.gmra.mxu0 %v9275_v15 }
 0xaf7   : > { %v9206_v51 = vadd.f32 %v9179_v3, %v16570_v10  ;;  %v9077_v3 = vadd.f32 %v9076_v62, %v9010_v23 }
 0xaf8   : > { %v9277_v20 = vsub.f32 %v9275_v15, %v9276_v50  ;;  %9528 = vmatmul.f32.vlgmr.msra.gmra.mxu1 %v9276_v50 }
 0xaf9   : > { %v9230_v0 = vsel %vm9225_vm14, %v9206_v51, 0  ;;  %v9014_v51 = vpop.f32.mrf.mxu2 }
 0xafa   : > { %v9129_v39 = vpop.f32.mrf.mxu0  ;;  %v9278_v14 = vand.u32 4294901760, %v9277_v20  ;;  %v15788_v44 = vand.u32 4294901760, %v9230_v0  ;;  %v9186_v28 = vpop.f32.mrf.mxu1 }
 0xafb   : > { %v9130_v57 = vadd.f32 %v9129_v39, %v9059_v12  ;;  %v8886_v39 = vadd.f32 %v15748_v35, %v15763_v58 }
 0xafc   : > { %9279 = vmatmul.f32.vlgmr.msrb.gmra.mxu2 %v9278_v14  ;;  %9400 = vmatmul.f32.gmra.mxu3 %v15788_v44  ;;  %v9283_v13 = vsub.f32 %v9230_v0, %v15788_v44 }
 0xafd   : > { %v9183_v59 = vadd.f32 %v9182_v38, %v9130_v57  ;;  %v8878_v38 = vadd.f32 %v15748_v35, %v15750_v60  ;;  %v9082_v57 = vpop.f32.mrf.mxu3 }
 0xafe   : > { %9467 = vmatmul.f32.gmra.mxu0 %v9283_v13  ;;  %v9284_v5 = vand.u32 4294901760, %v9283_v13 }
 0xaff   : > { %v9207_v25 = vadd.f32 %v9183_v59, %v16571_v11  ;;  %v8951_v50 = vadd.f32 %v15737_v21, %v8878_v38  ;;  %v8955_v59 = vadd.f32 %v15752_v45, %v8886_v39 }
 0xb00   : > { %9534 = vmatmul.f32.gmra.mxu1 %v9284_v5  ;;  %v9285_v40 = vsub.f32 %v9283_v13, %v9284_v5 }
 0xb01   : > { %v9233_v37 = vsel %vm9225_vm14, %v9207_v25, 0  ;;  %v9015_v0 = vadd.f32 %v9014_v51, %v8951_v50  ;;  %v9019_v43 = vpop.f32.mrf.mxu2 }
 0xb02   : > { %v9133_v18 = vpop.f32.mrf.mxu0  ;;  %v9286_v63 = vand.u32 4294901760, %v9285_v40  ;;  %v15797_v26 = vand.u32 4294901760, %v9233_v37  ;;  %v9190_v22 = vpop.f32.mrf.mxu1  ;;  %v9020_v58 = vadd.f32 %v9019_v43, %v8955_v59 }
 0xb03   : > { %v9134_v52 = vadd.f32 %v9133_v18, %v9065_v31  ;;  %v9083_v42 = vadd.f32 %v9082_v57, %v9015_v0  ;;  %v16575_v18 = vld [vmem:[#allocation13_spill] sm:$0xff] }
 0xb04   : > { %9287 = vmatmul.f32.gmra.mxu2 %v9286_v63  ;;  %9404 = vmatmul.f32.gmra.mxu3 %v15797_v26  ;;  %v9291_v17 = vsub.f32 %v9233_v37, %v15797_v26 }
 0xb05   : > { %v9187_v6 = vadd.f32 %v9186_v28, %v9134_v52  ;;  %v16574_v28 = vld [vmem:[#allocation11_spill] sm:$0xff]  ;;  %v9088_v52 = vpop.f32.mrf.mxu3 }
 0xb06   : > { %9472 = vmatmul.f32.gmra.mxu0 %v9291_v17  ;;  %v9292_v53 = vand.u32 4294901760, %v9291_v17 }
 0xb07   : > { %v9208_v4 = vadd.f32 %v9187_v6, %v16572_v8 }
 0xb08   : > { %9540 = vmatmul.f32.gmra.mxu1 %v9292_v53  ;;  %v9293_v19 = vsub.f32 %v9291_v17, %v9292_v53  ;;  %v9089_v17 = vadd.f32 %v9088_v52, %v9020_v58 }
 0xb09   : > { %v9236_v36 = vsel %vm9225_vm14, %v9208_v4, 0 }
 0xb0a   : > { %v9137_v1 = vpop.f32.mrf.mxu0  ;;  %v9294_v48 = vand.u32 4294901760, %v9293_v19  ;;  %v15806_v61 = vand.u32 4294901760, %v9236_v36  ;;  %v9194_v54 = vpop.f32.mrf.mxu1 }
 0xb0b   : > { %v9138_v47 = vadd.f32 %v9137_v1, %v9071_v29  ;;  %v16576_v29 = vld [vmem:[#allocation15_spill] sm:$0xff] }
 0xb0c   : > { %9295 = vmatmul.f32.gmra.mxu2 %v9294_v48  ;;  %9408 = vmatmul.f32.gmra.mxu3 %v15806_v61  ;;  %v9299_v9 = vsub.f32 %v9236_v36, %v15806_v61 }
 0xb0d   : > { %v9191_v2 = vadd.f32 %v9190_v22, %v9138_v47 }
 0xb0e   : > { %9477 = vmatmul.f32.gmra.mxu0 %v9299_v9  ;;  %v9300_v24 = vand.u32 4294901760, %v9299_v9 }
 0xb0f   : > { %v9209_v15 = vadd.f32 %v9191_v2, %v16573_v46 }
 0xb10   : > { %9546 = vmatmul.f32.gmra.mxu1 %v9300_v24  ;;  %v9301_v7 = vsub.f32 %v9299_v9, %v9300_v24 }
 0xb11   : > { %v9239_v10 = vsel %vm9225_vm14, %v9209_v15, 0 }
 0xb12   : > { %v9141_v34 = vpop.f32.mrf.mxu0  ;;  %v9302_v20 = vand.u32 4294901760, %v9301_v7  ;;  %v15815_v12 = vand.u32 4294901760, %v9239_v10  ;;  %v9198_v5 = vpop.f32.mrf.mxu1 }
 0xb13   : > { %v9142_v41 = vadd.f32 %v9141_v34, %v9077_v3 }
 0xb14   : > { %9303 = vmatmul.f32.gmra.mxu2 %v9302_v20  ;;  %9412 = vmatmul.f32.gmra.mxu3 %v15815_v12  ;;  %v9307_v60 = vsub.f32 %v9239_v10, %v15815_v12  ;;  %v15847_v20 = vld [vmem:[%s15907_s12] ss:$0 sm:$0xff] }
 0xb15   : > { %v9195_v14 = vadd.f32 %v9194_v54, %v9142_v41 }
 0xb16   : > { %9482 = vmatmul.f32.gmra.mxu0 %v9307_v60  ;;  %v9308_v21 = vand.u32 4294901760, %v9307_v60 }
 0xb17   : > { %v9210_v13 = vadd.f32 %v9195_v14, %v16574_v28 }
 0xb18   : > { %9552 = vmatmul.f32.gmra.mxu1 %v9308_v21  ;;  %v9309_v56 = vsub.f32 %v9307_v60, %v9308_v21 }
 0xb19   : > { %v9242_v49 = vsel %vm9225_vm14, %v9210_v13, 0 }
 0xb1a   : > { %v9145_v11 = vpop.f32.mrf.mxu0  ;;  %v9310_v25 = vand.u32 4294901760, %v9309_v56  ;;  %v9314_v40 = vand.u32 4294901760, %v9242_v49  ;;  %v9202_v8 = vpop.f32.mrf.mxu1 }
 0xb1b   : > { %v9146_v31 = vadd.f32 %v9145_v11, %v9083_v42 }
 0xb1c   : > { %9311 = vmatmul.f32.gmra.mxu2 %v9310_v25  ;;  %9416 = vmatmul.f32.gmra.mxu3 %v9314_v40  ;;  %v9315_v35 = vsub.f32 %v9242_v49, %v9314_v40 }
 0xb1d   : > { %v9199_v37 = vadd.f32 %v9198_v5, %v9146_v31 }
 0xb1e   : > { %9487 = vmatmul.f32.gmra.mxu0 %v9315_v35  ;;  %v9316_v27 = vand.u32 4294901760, %v9315_v35 }
 0xb1f   : > { %v9211_v63 = vadd.f32 %v9199_v37, %v16575_v18 }
 0xb20   : > { %9558 = vmatmul.f32.gmra.mxu1 %v9316_v27  ;;  %v9317_v45 = vsub.f32 %v9315_v35, %v9316_v27 }
 0xb21   : > { %v9245_v30 = vsel %vm9225_vm14, %v9211_v63, 0 }
 0xb22   : > { %v9149_v33 = vpop.f32.mrf.mxu0  ;;  %v9318_v6 = vand.u32 4294901760, %v9317_v45  ;;  %v9322_v22 = vand.u32 4294901760, %v9245_v30 }
 0xb23   : > { %v9150_v53 = vadd.f32 %v9149_v33, %v9089_v17 }
 0xb24   : > { %9319 = vmatmul.f32.gmra.mxu2 %v9318_v6  ;;  %9420 = vmatmul.f32.gmra.mxu3 %v9322_v22  ;;  %v9323_v4 = vsub.f32 %v9245_v30, %v9322_v22 }
 0xb25   : > { %v9203_v55 = vadd.f32 %v9202_v8, %v9150_v53 }
 0xb26   : > { %9492 = vmatmul.f32.gmra.mxu0 %v9323_v4  ;;  %v9324_v19 = vand.u32 4294901760, %v9323_v4 }
 0xb27   : > { %v9212_v32 = vadd.f32 %v9203_v55, %v16576_v29 }
 0xb28   : > { %9564 = vmatmul.f32.gmra.mxu1 %v9324_v19  ;;  %v9325_v36 = vsub.f32 %v9323_v4, %v9324_v19 }
 0xb29   : > { %v9248_v1 = vsel %vm9225_vm14, %v9212_v32, 0 }
 0xb2a   : > { %v9326_v48 = vand.u32 4294901760, %v9325_v36  ;;  %v9330_v47 = vand.u32 4294901760, %v9248_v1 }
 0xb2c   : > { %9327 = vmatmul.f32.gmra.mxu2 %v9326_v48  ;;  %9424 = vmatmul.f32.gmra.mxu3 %v9330_v47  ;;  %v9331_v62 = vsub.f32 %v9248_v1, %v9330_v47 }
 0xb2e   : > { %9497 = vmatmul.f32.gmra.mxu0 %v9331_v62  ;;  %v9332_v9 = vand.u32 4294901760, %v9331_v62 }
 0xb30   : > { %9570 = vmatmul.f32.gmra.mxu1 %v9332_v9  ;;  %v9333_v23 = vsub.f32 %v9331_v62, %v9332_v9 }
 0xb32   : > { %v9334_v38 = vand.u32 4294901760, %v9333_v23 }
 0xb34   : > { %9335 = vmatmul.f32.gmra.mxu2 %v9334_v38  ;;  %9672 = vmatmul.f32.vlgmr.msra.gmra.mxu3 %v15779_v16 }
 0xb3c   : > { %9615 = vmatmul.f32.vlgmr.msra.gmra.mxu2 %v15779_v16  ;;  %9676 = vmatmul.f32.gmra.mxu3 %v15788_v44 }
 0xb44   : > { %9619 = vmatmul.f32.gmra.mxu2 %v15788_v44  ;;  %9680 = vmatmul.f32.gmra.mxu3 %v15797_v26 }
 0xb4c   : > { %9623 = vmatmul.f32.gmra.mxu2 %v15797_v26  ;;  %9684 = vmatmul.f32.gmra.mxu3 %v15806_v61 }
 0xb54   : > { %9627 = vmatmul.f32.gmra.mxu2 %v15806_v61  ;;  %9688 = vmatmul.f32.gmra.mxu3 %v15815_v12 }
 0xb5c   : > { %9631 = vmatmul.f32.gmra.mxu2 %v15815_v12  ;;  %9692 = vmatmul.f32.gmra.mxu3 %v9314_v40 }
 0xb64   : > { %9635 = vmatmul.f32.gmra.mxu2 %v9314_v40  ;;  %9696 = vmatmul.f32.gmra.mxu3 %v9322_v22 }
 0xb6c   : > { %9639 = vmatmul.f32.gmra.mxu2 %v9322_v22  ;;  %9700 = vmatmul.f32.gmra.mxu3 %v9330_v47 }
 0xb73   : > { %v9463_v51 = vpop.f32.mrf.mxu0 }
 0xb74   : > { %9643 = vmatmul.f32.gmra.mxu2 %v9330_v47 }
 0xb75   : > { %v9529_v34 = vpop.f32.mrf.mxu1 }
 0xb77   : > { %v9397_v16 = vpop.f32.mrf.mxu3 }
 0xb7b   : > { %v9468_v0 = vpop.f32.mrf.mxu0 }
 0xb7d   : > { %v9535_v21 = vpop.f32.mrf.mxu1 }
 0xb7f   : > { %v9280_v44 = vpop.f32.mrf.mxu2  ;;  %v9401_v2 = vpop.f32.mrf.mxu3 }
 0xb80   : > { %v9281_v60 = vadd.f32 %v15847_v20, %v9280_v44 }
 0xb82   : > { %v9398_v39 = vadd.f32 %v9397_v16, %v9281_v60 }
 0xb83   : > { %v9473_v56 = vpop.f32.mrf.mxu0 }
 0xb84   : > { %v9464_v13 = vadd.f32 %v9463_v51, %v9398_v39 }
 0xb85   : > { %v9541_v43 = vpop.f32.mrf.mxu1 }
 0xb86   : > { %v9530_v59 = vadd.f32 %v9529_v34, %v9464_v13 }
 0xb87   : > { %v9288_v24 = vpop.f32.mrf.mxu2  ;;  %v9405_v46 = vpop.f32.mrf.mxu3 }
 0xb88   : > { %v9289_v28 = vadd.f32 %v15847_v20, %v9288_v24 }
 0xb8a   : > { %v9402_v42 = vadd.f32 %v9401_v2, %v9289_v28 }
 0xb8b   : > { %v9478_v45 = vpop.f32.mrf.mxu0 }
 0xb8c   : > { %v9469_v31 = vadd.f32 %v9468_v0, %v9402_v42 }
 0xb8d   : > { %v9547_v22 = vpop.f32.mrf.mxu1 }
 0xb8e   : > { %v9536_v27 = vadd.f32 %v9535_v21, %v9469_v31 }
 0xb8f   : > { %v9296_v26 = vpop.f32.mrf.mxu2  ;;  %v9409_v15 = vpop.f32.mrf.mxu3 }
 0xb90   : > { %v9297_v25 = vadd.f32 %v15847_v20, %v9296_v26 }
 0xb92   : > { %v9406_v58 = vadd.f32 %v9405_v46, %v9297_v25 }
 0xb93   : > { %v9483_v62 = vpop.f32.mrf.mxu0 }
 0xb94   : > { %v9474_v33 = vadd.f32 %v9473_v56, %v9406_v58 }
 0xb95   : > { %v9553_v24 = vpop.f32.mrf.mxu1 }
 0xb96   : > { %v9542_v55 = vadd.f32 %v9541_v43, %v9474_v33 }
 0xb97   : > { %v9304_v54 = vpop.f32.mrf.mxu2  ;;  %v9413_v7 = vpop.f32.mrf.mxu3 }
 0xb98   : > { %v9305_v17 = vadd.f32 %v15847_v20, %v9304_v54 }
 0xb9a   : > { %v9410_v8 = vadd.f32 %v9409_v15, %v9305_v17  ;;  %v9883_v15 = vld [vmem:[%s10122_s23] sm:$0xff]  ;;  %v9885_v17 = vld [vmem:[%s10122_s23 + $0x10] sm:$0xff] }
 0xb9b   : > { %v9488_v39 = vpop.f32.mrf.mxu0 }
 0xb9c   : > { %v9479_v47 = vadd.f32 %v9478_v45, %v9410_v8 }
 0xb9e   : > { %v9548_v44 = vadd.f32 %v9547_v22, %v9479_v47 }
 0xb9f   : > { %v9312_v61 = vpop.f32.mrf.mxu2  ;;  %v15838_v3 = vpop.f32.mrf.mxu3 }
 0xba0   : > { %v9313_v1 = vadd.f32 %v15847_v20, %v9312_v61 }
 0xba2   : > { %v9414_v38 = vadd.f32 %v9413_v7, %v9313_v1 }
 0xba4   : > { %v9484_v34 = vadd.f32 %v9483_v62, %v9414_v38 }
 0xba6   : > { %v9554_v13 = vadd.f32 %v9553_v24, %v9484_v34 }
 0xba7   : > { %v15840_v50 = vpop.f32.mrf.mxu2  ;;  %v15842_v10 = vpop.f32.mrf.mxu3 }
 0xba8   : > { %v9321_v7 = vadd.f32 %v15847_v20, %v15840_v50  ;;  %v9559_v50 = vpop.f32.mrf.mxu1 }
 0xbaa   : > { %v9418_v21 = vadd.f32 %v15838_v3, %v9321_v7 }
 0xbac   : > { %v9489_v31 = vadd.f32 %v9488_v39, %v9418_v21 }
 0xbaf   : > { %v15849_v12 = vpop.f32.mrf.mxu2  ;;  %v15851_v41 = vpop.f32.mrf.mxu3 }
 0xbb0   : > { %v9329_v25 = vadd.f32 %v15847_v20, %v15849_v12 }
 0xbb2   : > { %v9422_v58 = vadd.f32 %v15842_v10, %v9329_v25 }
 0xbb7   : > { %v15854_v14 = vpop.f32.mrf.mxu2  ;;  %v9673_v57 = vpop.f32.mrf.mxu3 }
 0xbb8   : > { %v9337_v12 = vadd.f32 %v15847_v20, %v15854_v14 }
 0xbbf   : > { %v9616_v49 = vpop.f32.mrf.mxu2  ;;  %v9677_v5 = vpop.f32.mrf.mxu3 }
 0xbc0   : > { %v9617_v11 = vadd.f32 %v9616_v49, %v9530_v59  ;;  %v9884_v49 = vld [vmem:[%s10122_s23 + $0x8] sm:$0xff] }
 0xbc2   : > { %v9674_v40 = vadd.f32 %v9673_v57, %v9617_v11 }
 0xbc4   : > { %v9704_v35 = vsub.f32 0.0, %v9674_v40 }
 0xbc6   : > { %v9712_v37 = vmul.f32 1.442695, %v9704_v35 }
 0xbc7   : > { %v9620_v18 = vpop.f32.mrf.mxu2  ;;  %v9681_v63 = vpop.f32.mrf.mxu3 }
 0xbc8   : > { %9850 = vpow2.f32 %v9712_v37  ;;  %v9621_v52 = vadd.f32 %v9620_v18, %v9536_v27  ;;  %v9560_v27 = vadd.f32 %v9559_v50, %v9489_v31 }
 0xbca   : > { %v9678_v30 = vadd.f32 %v9677_v5, %v9621_v52 }
 0xbcc   : > { %v9705_v6 = vsub.f32 0.0, %v9678_v30 }
 0xbce   : > { %v9851_v53 = vpop.eup %9850  ;;  %v9714_v4 = vmul.f32 1.442695, %v9705_v6 }
 0xbcf   : > { %v9728_v19 = vadd.f32 1.0, %v9851_v53  ;;  %v9624_v29 = vpop.f32.mrf.mxu2  ;;  %v9685_v36 = vpop.f32.mrf.mxu3 }
 0xbd0   : > { %9852 = vpow2.f32 %v9714_v4  ;;  %v9625_v32 = vadd.f32 %v9624_v29, %v9542_v55  ;;  %v9565_v53 = vpop.f32.mrf.mxu1  ;;  %v9426_v4 = vadd.f32 %v15851_v41, %v9337_v12 }
 0xbd1   : > { %9854 = vrcp.f32 %v9728_v19 }
 0xbd2   : > { %v9682_v48 = vadd.f32 %v9681_v63, %v9625_v32  ;;  %v9493_v63 = vpop.f32.mrf.mxu0 }
 0xbd3   : > { %v9494_v22 = vadd.f32 %v9493_v63, %v9422_v58 }
 0xbd4   : > { %v9706_v9 = vsub.f32 0.0, %v9682_v48  ;;  %v9886_v48 = vld [vmem:[%s10122_s23 + $0x18] sm:$0xff] }
 0xbd5   : > { %v9566_v19 = vadd.f32 %v9565_v53, %v9494_v22 }
 0xbd6   : > { %v9853_v23 = vpop.eup %9852  ;;  %v9716_v16 = vmul.f32 1.442695, %v9706_v9 }
 0xbd7   : > { %v9855_v2 = vpop.eup %9854  ;;  %v9729_v46 = vadd.f32 1.0, %v9853_v23  ;;  %v9628_v26 = vpop.f32.mrf.mxu2 }
 0xbd8   : > { %v9744_v54 = vadd.f32 %v9883_v15, %v9855_v2  ;;  %9856 = vpow2.f32 %v9716_v16  ;;  %v9629_v61 = vadd.f32 %v9628_v26, %v9548_v44  ;;  %v9689_v60 = vpop.f32.mrf.mxu3  ;;  %v9571_v38 = vpop.f32.mrf.mxu1  ;;  %v9887_v26 = vld [vmem:[%s10122_s23 + $0x20] sm:$0xff] }
 0xbd9   : > { %9858 = vrcp.f32 %v9729_v46 }
 0xbda   : > { %9752 = vst [vmem:[%s15865_s17] sm:$0xff] %v9744_v54  ;;  %v9686_v51 = vadd.f32 %v9685_v36, %v9629_v61  ;;  %v9498_v14 = vpop.f32.mrf.mxu0 }
 0xbdb   : > { %v9499_v9 = vadd.f32 %v9498_v14, %v9426_v4 }
 0xbdc   : > { %v9707_v0 = vsub.f32 0.0, %v9686_v51 }
 0xbdd   : > { %v9572_v44 = vadd.f32 %v9571_v38, %v9499_v9 }
 0xbde   : > { %v9857_v57 = vpop.eup %9856  ;;  %v9718_v28 = vmul.f32 1.442695, %v9707_v0 }
 0xbdf   : > { %v9859_v56 = vpop.eup %9858  ;;  %v9730_v42 = vadd.f32 1.0, %v9857_v57  ;;  %v9632_v59 = vpop.f32.mrf.mxu2  ;;  %v9888_v57 = vld [vmem:[%s10122_s23 + $0x28] sm:$0xff] }
 0xbe0   : > { %v9745_v5 = vadd.f32 %v9884_v49, %v9859_v56  ;;  %9860 = vpow2.f32 %v9718_v28  ;;  %v9633_v11 = vadd.f32 %v9632_v59, %v9554_v13  ;;  %v9693_v3 = vpop.f32.mrf.mxu3 }
 0xbe1   : > { %9862 = vrcp.f32 %v9730_v42  ;;  %v9889_v42 = vld [vmem:[%s10122_s23 + $0x30] sm:$0xff] }
 0xbe2   : > { %9753 = vst [vmem:[%s15865_s17 + $0x8] sm:$0xff] %v9745_v5  ;;  %v9690_v40 = vadd.f32 %v9689_v60, %v9633_v11  ;;  %v9890_v5 = vld [vmem:[%s10122_s23 + $0x38] sm:$0xff] }
 0xbe4   : > { %v9708_v43 = vsub.f32 0.0, %v9690_v40 }
 0xbe6   : > { %v9861_v35 = vpop.eup %9860  ;;  %v9720_v37 = vmul.f32 1.442695, %v9708_v43 }
 0xbe7   : > { %v9863_v18 = vpop.eup %9862  ;;  %v9731_v52 = vadd.f32 1.0, %v9861_v35  ;;  %v9636_v45 = vpop.f32.mrf.mxu2 }
 0xbe8   : > { %v9746_v30 = vadd.f32 %v9885_v17, %v9863_v18  ;;  %9864 = vpow2.f32 %v9720_v37  ;;  %v9637_v33 = vadd.f32 %v9636_v45, %v9560_v27  ;;  %v9697_v36 = vpop.f32.mrf.mxu3 }
 0xbe9   : > { %9866 = vrcp.f32 %v9731_v52 }
 0xbea   : > { %9754 = vst [vmem:[%s15865_s17 + $0x10] sm:$0xff] %v9746_v30  ;;  %v9694_v6 = vadd.f32 %v9693_v3, %v9637_v33 }
 0xbec   : > { %v9709_v10 = vsub.f32 0.0, %v9694_v6 }
 0xbee   : > { %v9865_v8 = vpop.eup %9864  ;;  %v9722_v55 = vmul.f32 1.442695, %v9709_v10 }
 0xbef   : > { %v9867_v29 = vpop.eup %9866  ;;  %v9732_v32 = vadd.f32 1.0, %v9865_v8  ;;  %v9640_v1 = vpop.f32.mrf.mxu2 }
 0xbf0   : > { %v9747_v47 = vadd.f32 %v9886_v48, %v9867_v29  ;;  %9868 = vpow2.f32 %v9722_v55  ;;  %v9641_v20 = vadd.f32 %v9640_v1, %v9566_v19  ;;  %v9701_v61 = vpop.f32.mrf.mxu3 }
 0xbf1   : > { %9870 = vrcp.f32 %v9732_v32 }
 0xbf2   : > { %9755 = vst [vmem:[%s15865_s17 + $0x18] sm:$0xff] %v9747_v47  ;;  %v9698_v62 = vadd.f32 %v9697_v36, %v9641_v20 }
 0xbf4   : > { %v9710_v23 = vsub.f32 0.0, %v9698_v62 }
 0xbf6   : > { %v9869_v41 = vpop.eup %9868  ;;  %v9724_v16 = vmul.f32 1.442695, %v9710_v23 }
 0xbf7   : > { %v9871_v2 = vpop.eup %9870  ;;  %v9733_v24 = vadd.f32 1.0, %v9869_v41  ;;  %v9644_v46 = vpop.f32.mrf.mxu2 }
 0xbf8   : > { %v9748_v15 = vadd.f32 %v9887_v26, %v9871_v2  ;;  %9872 = vpow2.f32 %v9724_v16  ;;  %v9645_v54 = vadd.f32 %v9644_v46, %v9572_v44 }
 0xbf9   : > { %9874 = vrcp.f32 %v9733_v24 }
 0xbfa   : > { %9756 = vst [vmem:[%s15865_s17 + $0x20] sm:$0xff] %v9748_v15  ;;  %v9702_v7 = vadd.f32 %v9701_v61, %v9645_v54 }
 0xbfc   : > { %v9711_v51 = vsub.f32 0.0, %v9702_v7 }
 0xbfe   : > { %v9873_v34 = vpop.eup %9872  ;;  %v9726_v60 = vmul.f32 1.442695, %v9711_v51 }
 0xbff   : > { %v9875_v0 = vpop.eup %9874  ;;  %v9734_v39 = vadd.f32 1.0, %v9873_v34 }
 0xc00   : > { %v9749_v21 = vadd.f32 %v9888_v57, %v9875_v0  ;;  %9876 = vpow2.f32 %v9726_v60 }
 0xc01   : > { %9878 = vrcp.f32 %v9734_v39 }
 0xc02   : > { %9757 = vst [vmem:[%s15865_s17 + $0x28] sm:$0xff] %v9749_v21 }
 0xc06   : > { %v9877_v28 = vpop.eup %9876 }
 0xc07   : > { %v9879_v13 = vpop.eup %9878  ;;  %v9735_v56 = vadd.f32 1.0, %v9877_v28 }
 0xc08   : > { %v9750_v59 = vadd.f32 %v9889_v42, %v9879_v13 }
 0xc09   : > { %9880 = vrcp.f32 %v9735_v56 }
 0xc0a   : > { %9758 = vst [vmem:[%s15865_s17 + $0x30] sm:$0xff] %v9750_v59 }
 0xc0f   : > { %v9881_v49 = vpop.eup %9880 }
 0xc10   : > { %v9751_v11 = vadd.f32 %v9890_v5, %v9881_v49 }
 0xc12   : > { %9759 = vst [vmem:[%s15865_s17 + $0x38] sm:$0xff] %v9751_v11 }
 0xc13 PF: > { %s23_s25 = sadd.s32 1, %s9897_s25  }
 0xc14   : > { %p20_p4 = scmp.ge.s32.totalorder %s23_s25, 4  }
 0xc16   :  { %22 = sbr.rel (!%p20_p4) target bundleno = 1 (0x1), region = 118 }

</bundles_post_ra>
